<compile_context>
chip_gen: v6e
topology: v6e:2x2x1
jax: 0.10.0
libtpu: 0.0.40
codegen_flags: <defaults>
</compile_context>

<pallas_src>
import functools

import jax
import jax.numpy as jnp
from jax.experimental import pallas as pl
from jax.experimental.pallas import tpu as pltpu

BN_EPS = 1e-3
CP = 128       # every activation channel axis is zero-padded to 128 lanes (lane-dense)
SEP = 128      # squeeze-excite hidden width, padded to 128 lanes
CIN_PH = 8     # stem: channel slots per space-to-depth phase (3 real channels, zero padded)


def _same_pad(n, k, s):
    """TF-'SAME' padding (left, right) for size n, kernel k, stride s."""
    out = -(-n // s)
    pad = max((out - 1) * s + k - n, 0)
    return pad // 2, pad - pad // 2


# ----------------------------------------------------------------------------
# stem kernel: 3x3 stride-2 conv + folded BN + swish, as a 2x2/s1 conv over a
# space-to-depth input -> 4 contiguous reads + 4 whole-image MXU matmuls.
# ----------------------------------------------------------------------------
def _make_stem_kernel(Ho, Wo):
    def kernel(x_ref, w_ref, b_ref, o_ref):
        # x_ref: (1, Ho+1, Wo+1, 4*CIN_PH) bf16   space-to-depth, TF-SAME padded
        # w_ref: (4, 4*CIN_PH, CP) bf16           BN scale folded into the columns
        # b_ref: (1, CP) f32                      folded BN bias
        # o_ref: (1, Ho*Wo, CP) bf16
        acc = None
        for oi in range(2):
            for oj in range(2):
                slab = x_ref[0, oi:oi + Ho, oj:oj + Wo, :].reshape(Ho * Wo, 4 * CIN_PH)
                term = jnp.dot(slab, w_ref[oi * 2 + oj],
                               preferred_element_type=jnp.float32)
                acc = term if acc is None else acc + term
        y = acc + b_ref[...]
        y = y * jax.nn.sigmoid(y)                       # swish
        o_ref[0] = y.astype(o_ref.dtype)
    return kernel


def stem_forward(x_nhwc, w_off, b):
    N, H, W, C = x_nhwc.shape
    assert H % 2 == 0 and W % 2 == 0 and C <= CIN_PH
    Ho, Wo = H // 2, W // 2
    ph0, _ = _same_pad(H, 3, 2)
    pw0, _ = _same_pad(W, 3, 2)
    # zero-pad spatially (covers TF-SAME pad) to an even extent, then space-to-depth:
    #   s2d[n, i, j, (pi*2+pj)*CIN_PH + c] = x_pad[n, 2i+pi, 2j+pj, c]
    Hp2, Wp2 = 2 * (Ho + 1), 2 * (Wo + 1)
    xp = jnp.zeros((N, Hp2, Wp2, C), jnp.float32)
    xp = xp.at[:, ph0:ph0 + H, pw0:pw0 + W, :].set(x_nhwc.astype(jnp.float32))
    s2d = jnp.zeros((N, Ho + 1, Wo + 1, 4 * CIN_PH), jnp.float32)
    for pi in range(2):
        for pj in range(2):
            base = (pi * 2 + pj) * CIN_PH
            s2d = s2d.at[:, :, :, base:base + C].set(xp[:, pi::2, pj::2, :])
    s2d = s2d.astype(jnp.bfloat16)

    out = pl.pallas_call(
        _make_stem_kernel(Ho, Wo),
        out_shape=jax.ShapeDtypeStruct((N, Ho * Wo, CP), jnp.bfloat16),
        grid=(N,),
        in_specs=[
            pl.BlockSpec((1, Ho + 1, Wo + 1, 4 * CIN_PH), lambda n: (n, 0, 0, 0)),
            pl.BlockSpec(w_off.shape, lambda n: (0, 0, 0)),
            pl.BlockSpec(b.shape, lambda n: (0, 0)),
        ],
        out_specs=pl.BlockSpec((1, Ho * Wo, CP), lambda n: (n, 0, 0)),
        compiler_params=pltpu.CompilerParams(
            dimension_semantics=("parallel",)),
    )(s2d, w_off, b)
    return out, Ho, Wo


# ----------------------------------------------------------------------------
# fully-fused MBConv block kernel (per image):
#   expand(1x1)+BN+swish -> dw 3x3+BN+swish -> SE -> project(1x1)+BN (+skip)
# ----------------------------------------------------------------------------
def _make_block_kernel(H, W, Ho, Wo, s, has_expand, has_skip):
    inv_hw = 1.0 / float(Ho * Wo)

    def kernel(*refs):
        if has_expand:
            (x_ref, w_exp_ref, b_exp_ref, w_dw_ref, b_dw_ref,
             se_w1_ref, se_b1_ref, se_w2_ref, se_b2_ref,
             w_pr_ref, b_pr_ref, o_ref, *scratch) = refs
        else:
            (x_ref, w_dw_ref, b_dw_ref,
             se_w1_ref, se_b1_ref, se_w2_ref, se_b2_ref,
             w_pr_ref, b_pr_ref, o_ref, *scratch) = refs

        xin = x_ref[0]                                  # (H*W, CP) bf16

        # ---- 1x1 expand conv + folded BN + swish (MXU, bf16 in / f32 acc) ----
        if has_expand:
            e = jnp.dot(xin, w_exp_ref[...], preferred_element_type=jnp.float32)
            e = e + b_exp_ref[...]
            e = e * jax.nn.sigmoid(e)
        else:
            e = xin.astype(jnp.float32)

        w_dw = w_dw_ref[...]                            # (9, CP) f32 (BN scale folded)

        # ---- depthwise 3x3: 9 whole-image per-tap multiply-accumulates ----
        if s == 1:
            (pad_vmem,) = scratch                       # (H+2, W+2, CP) f32
            # Zero only the 1-wide padding border; done every grid step so this is
            # correct when the "parallel" batch axis is split across TensorCores
            # (each core's scratch is uninitialized).  Interior is bulk-overwritten.
            pad_vmem[0:1, :, :] = jnp.zeros((1, W + 2, CP), jnp.float32)
            pad_vmem[H + 1:H + 2, :, :] = jnp.zeros((1, W + 2, CP), jnp.float32)
            pad_vmem[1:H + 1, 0:1, :] = jnp.zeros((H, 1, CP), jnp.float32)
            pad_vmem[1:H + 1, W + 1:W + 2, :] = jnp.zeros((H, 1, CP), jnp.float32)
            pad_vmem[1:H + 1, 1:W + 1, :] = e.reshape(H, W, CP)   # single bulk store

            acc = None
            for di in range(3):
                for dj in range(3):
                    tap = pad_vmem[di:di + H, dj:dj + W, :]       # contiguous window
                    term = tap * w_dw[di * 3 + dj]
                    acc = term if acc is None else acc + term
        else:
            # stride 2 (TF-SAME pad = (0,1) for even H, W): deinterleave the expanded
            # image into even/odd-column copies once, so the 9 tap reads are contiguous
            # on the sublane (W) axis; only the outer H axis is strided.
            flat_vmem, even_vmem, odd_vmem = scratch
            # flat_vmem: (H*W, CP); even_vmem: (H+1, Wo+1, CP); odd_vmem: (H+1, Wo, CP)
            flat_vmem[...] = e
            even = flat_vmem[pl.ds(0, H * Wo, stride=2), :]       # cols 0,2,4,...
            odd = flat_vmem[pl.ds(1, H * Wo, stride=2), :]        # cols 1,3,5,...
            even_vmem[H:H + 1, :, :] = jnp.zeros((1, Wo + 1, CP), jnp.float32)
            odd_vmem[H:H + 1, :, :] = jnp.zeros((1, Wo, CP), jnp.float32)
            even_vmem[0:H, Wo:Wo + 1, :] = jnp.zeros((H, 1, CP), jnp.float32)
            even_vmem[0:H, 0:Wo, :] = even.reshape(H, Wo, CP)
            odd_vmem[0:H, 0:Wo, :] = odd.reshape(H, Wo, CP)

            acc = None
            for di in range(3):
                for dj in range(3):
                    if dj == 1:
                        tap = odd_vmem[pl.ds(di, Ho, stride=2), 0:Wo, :]
                    else:
                        c0 = dj // 2
                        tap = even_vmem[pl.ds(di, Ho, stride=2), c0:c0 + Wo, :]
                    term = tap * w_dw[di * 3 + dj]
                    acc = term if acc is None else acc + term

        dw = acc.reshape(Ho * Wo, CP) + b_dw_ref[...]
        dw = dw * jax.nn.sigmoid(dw)                    # swish

        # ---- squeeze & excite (VMEM/register resident, no HBM round trip) ----
        pooled = jnp.sum(dw, axis=0, keepdims=True) * inv_hw
        s1 = jnp.dot(pooled.astype(jnp.bfloat16), se_w1_ref[...],
                     preferred_element_type=jnp.float32) + se_b1_ref[...]
        s1 = s1 * jax.nn.sigmoid(s1)                    # swish
        g = jnp.dot(s1.astype(jnp.bfloat16), se_w2_ref[...],
                    preferred_element_type=jnp.float32) + se_b2_ref[...]
        g = jax.nn.sigmoid(g)                           # (1, CP) gate

        # ---- 1x1 project conv + folded BN (+ identity skip) ----
        xg = (dw * g).astype(jnp.bfloat16)
        out = jnp.dot(xg, w_pr_ref[...], preferred_element_type=jnp.float32)
        out = out + b_pr_ref[...]
        if has_skip:
            out = out + xin.astype(jnp.float32)
        o_ref[0] = out.astype(o_ref.dtype)

    return kernel


def mbconv_block(x_flat, p, cfg, H, W):
    """x_flat: (N, H*W, CP) bf16.  Returns ((N, Ho*Wo, CP) bf16, Ho, Wo)."""
    N = x_flat.shape[0]
    k, s = cfg["k"], cfg["s"]
    assert k == 3, "only 3x3 depthwise kernels implemented"
    if s == 2:
        assert H % 2 == 0 and W % 2 == 0
    Ho, Wo = -(-H // s), -(-W // s)
    has_expand = cfg["expand"] != 1
    has_skip = (s == 1 and cfg["cin"] == cfg["cout"])

    args = [x_flat]
    in_specs = [pl.BlockSpec((1, H * W, CP), lambda n: (n, 0, 0))]

    def _add(a):
        args.append(a)
        in_specs.append(pl.BlockSpec(a.shape, lambda n, nd=a.ndim: (0,) * nd))

    if has_expand:
        _add(p["w_exp"]); _add(p["b_exp"])
    _add(p["w_dw"]); _add(p["b_dw"])
    _add(p["se_w1"]); _add(p["se_b1"]); _add(p["se_w2"]); _add(p["se_b2"])
    _add(p["w_proj"]); _add(p["b_proj"])

    if s == 1:
        scratch = [pltpu.VMEM((H + 2, W + 2, CP), jnp.float32)]
    else:
        scratch = [pltpu.VMEM((H * W, CP), jnp.float32),
                   pltpu.VMEM((H + 1, Wo + 1, CP), jnp.float32),
                   pltpu.VMEM((H + 1, Wo, CP), jnp.float32)]

    out = pl.pallas_call(
        _make_block_kernel(H, W, Ho, Wo, s, has_expand, has_skip),
        out_shape=jax.ShapeDtypeStruct((N, Ho * Wo, CP), jnp.bfloat16),
        grid=(N,),
        in_specs=in_specs,
        out_specs=pl.BlockSpec((1, Ho * Wo, CP), lambda n: (n, 0, 0)),
        scratch_shapes=scratch,
        compiler_params=pltpu.CompilerParams(
            dimension_semantics=("parallel",)),
    )(*args)
    return out, Ho, Wo


# ----------------------------------------------------------------------------
# full forward (matches the PyTorch module's feature-map collection rule)
# ----------------------------------------------------------------------------
def efficientnet_forward(x_nchw, params, cfgs):
    x_nhwc = jnp.transpose(x_nchw, (0, 2, 3, 1)).astype(jnp.float32)
    N = x_nhwc.shape[0]

    x, H, W = stem_forward(x_nhwc, params["stem_w"], params["stem_b"])

    feature_maps = []
    last = None
    n_blocks = len(cfgs)
    for idx, (cfg, bp) in enumerate(zip(cfgs, params["blocks"])):
        # TODO(synk): drop_connect_rate scaling is training-only (identity at eval).
        x_new, Ho, Wo = mbconv_block(x, bp, cfg, H, W)
        if cfg["s"] == 2:
            feature_maps.append(last)
        elif idx == n_blocks - 1:
            feature_maps.append((x_new, Ho, Wo, cfg["cout"]))
        last = (x_new, Ho, Wo, cfg["cout"])
        x, H, W = x_new, Ho, Wo

    outs = []
    for f, fh, fw, fc in feature_maps[1:]:
        nhwc = f.reshape(N, fh, fw, CP)[:, :, :, :fc].astype(jnp.float32)
        outs.append(jnp.transpose(nhwc, (0, 3, 1, 2)))      # back to NCHW
    return outs


# ----------------------------------------------------------------------------
# deterministic parameter construction (synthetic, small config)
# BN folded: scale -> weight columns, only bias kept; channels zero-padded to CP.
# ----------------------------------------------------------------------------
def make_bn(key, c, eps=BN_EPS):
    k1, k2, k3, k4 = jax.random.split(key, 4)
    gamma = 1.0 + 0.1 * jax.random.normal(k1, (c,), jnp.float32)
    beta = 0.1 * jax.random.normal(k2, (c,), jnp.float32)
    mean = 0.1 * jax.random.normal(k3, (c,), jnp.float32)
    var = 1.0 + 0.1 * jax.random.uniform(k4, (c,), jnp.float32)
    scale = gamma / jnp.sqrt(var + eps)
    bias = beta - mean * scale
    return scale, bias


def _pad2(w, rp, cp):
    r, c = w.shape
    return jnp.zeros((rp, cp), w.dtype).at[:r, :c].set(w)


def _pad1(v, n):
    return jnp.zeros((n,), v.dtype).at[:v.shape[0]].set(v)


def build_block_configs():
    block_args = [
        dict(cin=8,  cout=8,  expand=1, k=3, s=1, se=0.25, repeat=1),
        dict(cin=8,  cout=16, expand=4, k=3, s=2, se=0.25, repeat=2),
        dict(cin=16, cout=24, expand=4, k=3, s=2, se=0.25, repeat=1),
        dict(cin=24, cout=32, expand=4, k=3, s=1, se=0.25, repeat=1),
    ]
    cfgs = []
    for a in block_args:
        cfgs.append(dict(cin=a["cin"], cout=a["cout"], expand=a["expand"],
                         k=a["k"], s=a["s"], se=a["se"]))
        for _ in range(a["repeat"] - 1):
            cfgs.append(dict(cin=a["cout"], cout=a["cout"], expand=a["expand"],
                             k=a["k"], s=1, se=a["se"]))
    return cfgs


def make_block_params(key, cfg):
    cin, cout, exp, k = cfg["cin"], cfg["cout"], cfg["expand"], cfg["k"]
    cexp = cin * exp
    sec = max(1, int(cin * cfg["se"]))
    keys = jax.random.split(key, 10)
    p = {}
    if exp != 1:
        w = 0.1 * jax.random.normal(keys[0], (cin, cexp), jnp.float32)
        sc, bi = make_bn(keys[1], cexp)
        p["w_exp"] = _pad2(w * sc[None, :], CP, CP).astype(jnp.bfloat16)
        p["b_exp"] = _pad1(bi, CP).reshape(1, CP)
    wdw = 0.1 * jax.random.normal(keys[2], (k * k, cexp), jnp.float32)
    sc1, bi1 = make_bn(keys[3], cexp)
    p["w_dw"] = _pad2(wdw * sc1[None, :], k * k, CP)            # f32 (VPU path)
    p["b_dw"] = _pad1(bi1, CP).reshape(1, CP)
    p["se_w1"] = _pad2(0.1 * jax.random.normal(keys[4], (cexp, sec), jnp.float32),
                       CP, SEP).astype(jnp.bfloat16)
    p["se_b1"] = _pad1(0.1 * jax.random.normal(keys[5], (sec,), jnp.float32),
                       SEP).reshape(1, SEP)
    p["se_w2"] = _pad2(0.1 * jax.random.normal(keys[6], (sec, cexp), jnp.float32),
                       SEP, CP).astype(jnp.bfloat16)
    p["se_b2"] = _pad1(0.1 * jax.random.normal(keys[7], (cexp,), jnp.float32),
                       CP).reshape(1, CP)
    wpr = 0.1 * jax.random.normal(keys[8], (cexp, cout), jnp.float32)
    sc2, bi2 = make_bn(keys[9], cout)
    p["w_proj"] = _pad2(wpr * sc2[None, :], CP, CP).astype(jnp.bfloat16)
    p["b_proj"] = _pad1(bi2, CP).reshape(1, CP)
    return p


def init_params(key, cfgs, stem_out=8):
    keys = jax.random.split(key, 2 + len(cfgs))
    w9 = 0.1 * jax.random.normal(keys[0], (3, 3, 3, stem_out), jnp.float32)
    sc, bi = make_bn(keys[1], stem_out)
    w9 = w9 * sc[None, None, None, :]
    # pack the 3x3/s2 conv as 4 offset weights of a 2x2/s1 conv on the space-to-depth input
    w_off = jnp.zeros((4, 4 * CIN_PH, CP), jnp.float32)
    for oi in range(2):
        for oj in range(2):
            for pi in range(2):
                for pj in range(2):
                    di, dj = 2 * oi + pi, 2 * oj + pj
                    if di <= 2 and dj <= 2:
                        base = (pi * 2 + pj) * CIN_PH
                        w_off = w_off.at[oi * 2 + oj, base:base + 3,
                                         :stem_out].set(w9[di, dj])
    return {
        "stem_w": w_off.astype(jnp.bfloat16),
        "stem_b": _pad1(bi, CP).reshape(1, CP),
        "blocks": [make_block_params(keys[2 + i], c) for i, c in enumerate(cfgs)],
    }


# ----------------------------------------------------------------------------
# main
# ----------------------------------------------------------------------------
if __name__ == "__main__":
    key = jax.random.PRNGKey(0)
    kx, kp = jax.random.split(key)

    # PyTorch-convention NCHW input: batch=2, 3 channels, 32x32 spatial
    x = jax.random.normal(kx, (2, 3, 32, 32), jnp.float32)

    cfgs = build_block_configs()
    params = init_params(kp, cfgs)

    fwd = jax.jit(functools.partial(efficientnet_forward, cfgs=cfgs))
    feats = fwd(x, params)
    feats = jax.block_until_ready(feats)

    # sanity: two feature maps (after the 1st one is dropped), NCHW
    assert len(feats) == 2
    assert feats[0].shape == (2, 16, 8, 8)
    assert feats[1].shape == (2, 32, 4, 4)
    assert all(bool(jnp.all(jnp.isfinite(f))) for f in feats)

    print("KERNEL_OK")
</pallas_src>

<mosaic_0001>
module attributes {stable_mosaic.version = 11 : i64} {
  func.func @kernel(%arg0: i32, %arg1: memref<1x17x17x32xbf16, #tpu.memory_space<vmem>>, %arg2: memref<4x32x128xbf16, #tpu.memory_space<vmem>>, %arg3: memref<1x128xf32, #tpu.memory_space<vmem>>, %arg4: memref<1x256x128xbf16, #tpu.memory_space<vmem>>) attributes {dimension_semantics = [#tpu.dimension_semantics<parallel>], iteration_bounds = array<i64: 2>, scalar_prefetch = 0 : i64, scratch_operands = 0 : i64, tpu.core_type = #tpu.core_type<tc>, window_params = [{transform_indices = @transform_0, window_bounds = array<i64: 1, 17, 17, 32>}, {pipeline_mode = #tpu.pipeline_mode<synchronous>, transform_indices = @transform_1, window_bounds = array<i64: 4, 32, 128>}, {pipeline_mode = #tpu.pipeline_mode<synchronous>, transform_indices = @transform_2, window_bounds = array<i64: 1, 128>}, {transform_indices = @transform_3, window_bounds = array<i64: 1, 256, 128>}]} {
    %c0 = arith.constant 0 : index
    %c0_0 = arith.constant 0 : index
    %c0_1 = arith.constant 0 : index
    %c0_2 = arith.constant 0 : index
    %0 = vector.load %arg1[%c0, %c0_0, %c0_1, %c0_2] : memref<1x17x17x32xbf16, #tpu.memory_space<vmem>>, vector<1x16x16x32xbf16>
    %1 = vector.shape_cast %0 : vector<1x16x16x32xbf16> to vector<16x16x32xbf16>
    %2 = vector.shape_cast %1 : vector<16x16x32xbf16> to vector<256x32xbf16>
    %c0_3 = arith.constant 0 : index
    %c0_4 = arith.constant 0 : index
    %c0_5 = arith.constant 0 : index
    %3 = vector.load %arg2[%c0_3, %c0_4, %c0_5] : memref<4x32x128xbf16, #tpu.memory_space<vmem>>, vector<1x32x128xbf16>
    %4 = vector.shape_cast %3 : vector<1x32x128xbf16> to vector<32x128xbf16>
    %cst = arith.constant dense<0.000000e+00> : vector<256x128xf32>
    %5 = tpu.matmul %2, %4, %cst {dimension_numbers = #tpu.dot_dimension_numbers<[1], [0], [0], [1], [0, 0, 1, 1], [], []>} : vector<256x32xbf16>, vector<32x128xbf16>, vector<256x128xf32> -> vector<256x128xf32>
    %c0_6 = arith.constant 0 : index
    %c0_7 = arith.constant 0 : index
    %c1 = arith.constant 1 : index
    %c0_8 = arith.constant 0 : index
    %6 = vector.load %arg1[%c0_6, %c0_7, %c1, %c0_8] : memref<1x17x17x32xbf16, #tpu.memory_space<vmem>>, vector<1x16x16x32xbf16>
    %7 = vector.shape_cast %6 : vector<1x16x16x32xbf16> to vector<16x16x32xbf16>
    %8 = vector.shape_cast %7 : vector<16x16x32xbf16> to vector<256x32xbf16>
    %c1_9 = arith.constant 1 : index
    %c0_10 = arith.constant 0 : index
    %c0_11 = arith.constant 0 : index
    %9 = vector.load %arg2[%c1_9, %c0_10, %c0_11] : memref<4x32x128xbf16, #tpu.memory_space<vmem>>, vector<1x32x128xbf16>
    %10 = vector.shape_cast %9 : vector<1x32x128xbf16> to vector<32x128xbf16>
    %cst_12 = arith.constant dense<0.000000e+00> : vector<256x128xf32>
    %11 = tpu.matmul %8, %10, %cst_12 {dimension_numbers = #tpu.dot_dimension_numbers<[1], [0], [0], [1], [0, 0, 1, 1], [], []>} : vector<256x32xbf16>, vector<32x128xbf16>, vector<256x128xf32> -> vector<256x128xf32>
    %12 = arith.addf %5, %11 : vector<256x128xf32>
    %c0_13 = arith.constant 0 : index
    %c1_14 = arith.constant 1 : index
    %c0_15 = arith.constant 0 : index
    %c0_16 = arith.constant 0 : index
    %13 = vector.load %arg1[%c0_13, %c1_14, %c0_15, %c0_16] : memref<1x17x17x32xbf16, #tpu.memory_space<vmem>>, vector<1x16x16x32xbf16>
    %14 = vector.shape_cast %13 : vector<1x16x16x32xbf16> to vector<16x16x32xbf16>
    %15 = vector.shape_cast %14 : vector<16x16x32xbf16> to vector<256x32xbf16>
    %c2 = arith.constant 2 : index
    %c0_17 = arith.constant 0 : index
    %c0_18 = arith.constant 0 : index
    %16 = vector.load %arg2[%c2, %c0_17, %c0_18] : memref<4x32x128xbf16, #tpu.memory_space<vmem>>, vector<1x32x128xbf16>
    %17 = vector.shape_cast %16 : vector<1x32x128xbf16> to vector<32x128xbf16>
    %cst_19 = arith.constant dense<0.000000e+00> : vector<256x128xf32>
    %18 = tpu.matmul %15, %17, %cst_19 {dimension_numbers = #tpu.dot_dimension_numbers<[1], [0], [0], [1], [0, 0, 1, 1], [], []>} : vector<256x32xbf16>, vector<32x128xbf16>, vector<256x128xf32> -> vector<256x128xf32>
    %19 = arith.addf %12, %18 : vector<256x128xf32>
    %c0_20 = arith.constant 0 : index
    %c1_21 = arith.constant 1 : index
    %c1_22 = arith.constant 1 : index
    %c0_23 = arith.constant 0 : index
    %20 = vector.load %arg1[%c0_20, %c1_21, %c1_22, %c0_23] : memref<1x17x17x32xbf16, #tpu.memory_space<vmem>>, vector<1x16x16x32xbf16>
    %21 = vector.shape_cast %20 : vector<1x16x16x32xbf16> to vector<16x16x32xbf16>
    %22 = vector.shape_cast %21 : vector<16x16x32xbf16> to vector<256x32xbf16>
    %c3 = arith.constant 3 : index
    %c0_24 = arith.constant 0 : index
    %c0_25 = arith.constant 0 : index
    %23 = vector.load %arg2[%c3, %c0_24, %c0_25] : memref<4x32x128xbf16, #tpu.memory_space<vmem>>, vector<1x32x128xbf16>
    %24 = vector.shape_cast %23 : vector<1x32x128xbf16> to vector<32x128xbf16>
    %cst_26 = arith.constant dense<0.000000e+00> : vector<256x128xf32>
    %25 = tpu.matmul %22, %24, %cst_26 {dimension_numbers = #tpu.dot_dimension_numbers<[1], [0], [0], [1], [0, 0, 1, 1], [], []>} : vector<256x32xbf16>, vector<32x128xbf16>, vector<256x128xf32> -> vector<256x128xf32>
    %26 = arith.addf %19, %25 : vector<256x128xf32>
    %c0_27 = arith.constant 0 : index
    %c0_28 = arith.constant 0 : index
    %27 = vector.load %arg3[%c0_27, %c0_28] : memref<1x128xf32, #tpu.memory_space<vmem>>, vector<1x128xf32>
    %28 = vector.broadcast %27 : vector<1x128xf32> to vector<256x128xf32>
    %29 = arith.addf %26, %28 : vector<256x128xf32>
    %30 = arith.negf %29 : vector<256x128xf32>
    %31 = math.exp %30 : vector<256x128xf32>
    %cst_29 = arith.constant 1.000000e+00 : f32
    %32 = vector.broadcast %cst_29 : f32 to vector<256x128xf32>
    %33 = arith.addf %32, %31 : vector<256x128xf32>
    %34 = arith.divf %32, %33 : vector<256x128xf32>
    %35 = arith.mulf %29, %34 : vector<256x128xf32>
    %36 = arith.truncf %35 : vector<256x128xf32> to vector<256x128xbf16>
    %c0_30 = arith.constant 0 : index
    %c0_31 = arith.constant 0 : index
    %c0_32 = arith.constant 0 : index
    %37 = vector.load %arg4[%c0_30, %c0_31, %c0_32] : memref<1x256x128xbf16, #tpu.memory_space<vmem>>, vector<1x256x128xbf16>
    %38 = vector.shape_cast %37 : vector<1x256x128xbf16> to vector<256x128xbf16>
    %39 = vector.shape_cast %36 : vector<256x128xbf16> to vector<1x256x128xbf16>
    tpu.vector_store %arg4[%c0_30, %c0_31, %c0_32], %39 {strides = array<i32>} : memref<1x256x128xbf16, #tpu.memory_space<vmem>>, vector<1x256x128xbf16>,
    return
  }
  func.func @transform_0(%arg0: i32) -> (i32, i32, i32, i32) {
    %c0_i32 = arith.constant 0 : i32
    %c0_i32_0 = arith.constant 0 : i32
    %c0_i32_1 = arith.constant 0 : i32
    %c0_i32_2 = arith.constant 0 : i32
    return %arg0, %c0_i32, %c0_i32_0, %c0_i32_1 : i32, i32, i32, i32
  }
  func.func @transform_1(%arg0: i32) -> (i32, i32, i32) {
    %c0_i32 = arith.constant 0 : i32
    %c0_i32_0 = arith.constant 0 : i32
    %c0_i32_1 = arith.constant 0 : i32
    %c0_i32_2 = arith.constant 0 : i32
    return %c0_i32, %c0_i32_0, %c0_i32_1 : i32, i32, i32
  }
  func.func @transform_2(%arg0: i32) -> (i32, i32) {
    %c0_i32 = arith.constant 0 : i32
    %c0_i32_0 = arith.constant 0 : i32
    %c0_i32_1 = arith.constant 0 : i32
    return %c0_i32, %c0_i32_0 : i32, i32
  }
  func.func @transform_3(%arg0: i32) -> (i32, i32, i32) {
    %c0_i32 = arith.constant 0 : i32
    %c0_i32_0 = arith.constant 0 : i32
    %c0_i32_1 = arith.constant 0 : i32
    return %arg0, %c0_i32, %c0_i32_0 : i32, i32, i32
  }
}

module attributes {stable_mosaic.version = 11 : i64} {
  func.func @kernel(%arg0: i32, %arg1: memref<1x256x128xbf16, #tpu.memory_space<vmem>>, %arg2: memref<9x128xf32, #tpu.memory_space<vmem>>, %arg3: memref<1x128xf32, #tpu.memory_space<vmem>>, %arg4: memref<128x128xbf16, #tpu.memory_space<vmem>>, %arg5: memref<1x128xf32, #tpu.memory_space<vmem>>, %arg6: memref<128x128xbf16, #tpu.memory_space<vmem>>, %arg7: memref<1x128xf32, #tpu.memory_space<vmem>>, %arg8: memref<128x128xbf16, #tpu.memory_space<vmem>>, %arg9: memref<1x128xf32, #tpu.memory_space<vmem>>, %arg10: memref<1x256x128xbf16, #tpu.memory_space<vmem>>, %arg11: memref<18x18x128xf32, #tpu.memory_space<vmem>>) attributes {dimension_semantics = [#tpu.dimension_semantics<parallel>], iteration_bounds = array<i64: 2>, scalar_prefetch = 0 : i64, scratch_operands = 1 : i64, tpu.core_type = #tpu.core_type<tc>, window_params = [{transform_indices = @transform_0, window_bounds = array<i64: 1, 256, 128>}, {pipeline_mode = #tpu.pipeline_mode<synchronous>, transform_indices = @transform_1, window_bounds = array<i64: 9, 128>}, {pipeline_mode = #tpu.pipeline_mode<synchronous>, transform_indices = @transform_2, window_bounds = array<i64: 1, 128>}, {pipeline_mode = #tpu.pipeline_mode<synchronous>, transform_indices = @transform_3, window_bounds = array<i64: 128, 128>}, {pipeline_mode = #tpu.pipeline_mode<synchronous>, transform_indices = @transform_4, window_bounds = array<i64: 1, 128>}, {pipeline_mode = #tpu.pipeline_mode<synchronous>, transform_indices = @transform_5, window_bounds = array<i64: 128, 128>}, {pipeline_mode = #tpu.pipeline_mode<synchronous>, transform_indices = @transform_6, window_bounds = array<i64: 1, 128>}, {pipeline_mode = #tpu.pipeline_mode<synchronous>, transform_indices = @transform_7, window_bounds = array<i64: 128, 128>}, {pipeline_mode = #tpu.pipeline_mode<synchronous>, transform_indices = @transform_8, window_bounds = array<i64: 1, 128>}, {transform_indices = @transform_9, window_bounds = array<i64: 1, 256, 128>}]} {
    %c0 = arith.constant 0 : index
    %c0_0 = arith.constant 0 : index
    %c0_1 = arith.constant 0 : index
    %0 = vector.load %arg1[%c0, %c0_0, %c0_1] : memref<1x256x128xbf16, #tpu.memory_space<vmem>>, vector<1x256x128xbf16>
    %1 = vector.shape_cast %0 : vector<1x256x128xbf16> to vector<256x128xbf16>
    %2 = arith.extf %1 : vector<256x128xbf16> to vector<256x128xf32>
    %c0_2 = arith.constant 0 : index
    %c0_3 = arith.constant 0 : index
    %3 = vector.load %arg2[%c0_2, %c0_3] : memref<9x128xf32, #tpu.memory_space<vmem>>, vector<9x128xf32>
    %cst = arith.constant 0.000000e+00 : f32
    %4 = vector.broadcast %cst : f32 to vector<1x18x128xf32>
    %c0_4 = arith.constant 0 : index
    %c0_5 = arith.constant 0 : index
    %c0_6 = arith.constant 0 : index
    %5 = vector.load %arg11[%c0_4, %c0_5, %c0_6] : memref<18x18x128xf32, #tpu.memory_space<vmem>>, vector<1x18x128xf32>
    tpu.vector_store %arg11[%c0_4, %c0_5, %c0_6], %4 {strides = array<i32>} : memref<18x18x128xf32, #tpu.memory_space<vmem>>, vector<1x18x128xf32>,
    %cst_7 = arith.constant 0.000000e+00 : f32
    %6 = vector.broadcast %cst_7 : f32 to vector<1x18x128xf32>
    %c17 = arith.constant 17 : index
    %c0_8 = arith.constant 0 : index
    %c0_9 = arith.constant 0 : index
    %7 = vector.load %arg11[%c17, %c0_8, %c0_9] : memref<18x18x128xf32, #tpu.memory_space<vmem>>, vector<1x18x128xf32>
    tpu.vector_store %arg11[%c17, %c0_8, %c0_9], %6 {strides = array<i32>} : memref<18x18x128xf32, #tpu.memory_space<vmem>>, vector<1x18x128xf32>,
    %cst_10 = arith.constant 0.000000e+00 : f32
    %8 = vector.broadcast %cst_10 : f32 to vector<16x1x128xf32>
    %c1 = arith.constant 1 : index
    %c0_11 = arith.constant 0 : index
    %c0_12 = arith.constant 0 : index
    %9 = vector.load %arg11[%c1, %c0_11, %c0_12] : memref<18x18x128xf32, #tpu.memory_space<vmem>>, vector<16x1x128xf32>
    tpu.vector_store %arg11[%c1, %c0_11, %c0_12], %8 {strides = array<i32>} : memref<18x18x128xf32, #tpu.memory_space<vmem>>, vector<16x1x128xf32>,
    %cst_13 = arith.constant 0.000000e+00 : f32
    %10 = vector.broadcast %cst_13 : f32 to vector<16x1x128xf32>
    %c1_14 = arith.constant 1 : index
    %c17_15 = arith.constant 17 : index
    %c0_16 = arith.constant 0 : index
    %11 = vector.load %arg11[%c1_14, %c17_15, %c0_16] : memref<18x18x128xf32, #tpu.memory_space<vmem>>, vector<16x1x128xf32>
    tpu.vector_store %arg11[%c1_14, %c17_15, %c0_16], %10 {strides = array<i32>} : memref<18x18x128xf32, #tpu.memory_space<vmem>>, vector<16x1x128xf32>,
    %12 = vector.shape_cast %2 : vector<256x128xf32> to vector<16x16x128xf32>
    %c1_17 = arith.constant 1 : index
    %c1_18 = arith.constant 1 : index
    %c0_19 = arith.constant 0 : index
    %13 = vector.load %arg11[%c1_17, %c1_18, %c0_19] : memref<18x18x128xf32, #tpu.memory_space<vmem>>, vector<16x16x128xf32>
    tpu.vector_store %arg11[%c1_17, %c1_18, %c0_19], %12 {strides = array<i32>} : memref<18x18x128xf32, #tpu.memory_space<vmem>>, vector<16x16x128xf32>,
    %c0_20 = arith.constant 0 : index
    %c0_21 = arith.constant 0 : index
    %c0_22 = arith.constant 0 : index
    %14 = vector.load %arg11[%c0_20, %c0_21, %c0_22] : memref<18x18x128xf32, #tpu.memory_space<vmem>>, vector<16x16x128xf32>
    %15 = vector.extract_strided_slice %3 {offsets = [0, 0], sizes = [1, 128], strides = [1, 1]} : vector<9x128xf32> to vector<1x128xf32>
    %16 = vector.shape_cast %15 : vector<1x128xf32> to vector<128xf32>
    %17 = vector.shape_cast %16 : vector<128xf32> to vector<1x1x128xf32>
    %18 = vector.broadcast %17 : vector<1x1x128xf32> to vector<16x16x128xf32>
    %19 = arith.mulf %14, %18 : vector<16x16x128xf32>
    %c0_23 = arith.constant 0 : index
    %c1_24 = arith.constant 1 : index
    %c0_25 = arith.constant 0 : index
    %20 = vector.load %arg11[%c0_23, %c1_24, %c0_25] : memref<18x18x128xf32, #tpu.memory_space<vmem>>, vector<16x16x128xf32>
    %21 = vector.extract_strided_slice %3 {offsets = [1, 0], sizes = [1, 128], strides = [1, 1]} : vector<9x128xf32> to vector<1x128xf32>
    %22 = vector.shape_cast %21 : vector<1x128xf32> to vector<128xf32>
    %23 = vector.shape_cast %22 : vector<128xf32> to vector<1x1x128xf32>
    %24 = vector.broadcast %23 : vector<1x1x128xf32> to vector<16x16x128xf32>
    %25 = arith.mulf %20, %24 : vector<16x16x128xf32>
    %26 = arith.addf %19, %25 : vector<16x16x128xf32>
    %c0_26 = arith.constant 0 : index
    %c2 = arith.constant 2 : index
    %c0_27 = arith.constant 0 : index
    %27 = vector.load %arg11[%c0_26, %c2, %c0_27] : memref<18x18x128xf32, #tpu.memory_space<vmem>>, vector<16x16x128xf32>
    %28 = vector.extract_strided_slice %3 {offsets = [2, 0], sizes = [1, 128], strides = [1, 1]} : vector<9x128xf32> to vector<1x128xf32>
    %29 = vector.shape_cast %28 : vector<1x128xf32> to vector<128xf32>
    %30 = vector.shape_cast %29 : vector<128xf32> to vector<1x1x128xf32>
    %31 = vector.broadcast %30 : vector<1x1x128xf32> to vector<16x16x128xf32>
    %32 = arith.mulf %27, %31 : vector<16x16x128xf32>
    %33 = arith.addf %26, %32 : vector<16x16x128xf32>
    %c1_28 = arith.constant 1 : index
    %c0_29 = arith.constant 0 : index
    %c0_30 = arith.constant 0 : index
    %34 = vector.load %arg11[%c1_28, %c0_29, %c0_30] : memref<18x18x128xf32, #tpu.memory_space<vmem>>, vector<16x16x128xf32>
    %35 = vector.extract_strided_slice %3 {offsets = [3, 0], sizes = [1, 128], strides = [1, 1]} : vector<9x128xf32> to vector<1x128xf32>
    %36 = vector.shape_cast %35 : vector<1x128xf32> to vector<128xf32>
    %37 = vector.shape_cast %36 : vector<128xf32> to vector<1x1x128xf32>
    %38 = vector.broadcast %37 : vector<1x1x128xf32> to vector<16x16x128xf32>
    %39 = arith.mulf %34, %38 : vector<16x16x128xf32>
    %40 = arith.addf %33, %39 : vector<16x16x128xf32>
    %c1_31 = arith.constant 1 : index
    %c1_32 = arith.constant 1 : index
    %c0_33 = arith.constant 0 : index
    %41 = vector.load %arg11[%c1_31, %c1_32, %c0_33] : memref<18x18x128xf32, #tpu.memory_space<vmem>>, vector<16x16x128xf32>
    %42 = vector.extract_strided_slice %3 {offsets = [4, 0], sizes = [1, 128], strides = [1, 1]} : vector<9x128xf32> to vector<1x128xf32>
    %43 = vector.shape_cast %42 : vector<1x128xf32> to vector<128xf32>
    %44 = vector.shape_cast %43 : vector<128xf32> to vector<1x1x128xf32>
    %45 = vector.broadcast %44 : vector<1x1x128xf32> to vector<16x16x128xf32>
    %46 = arith.mulf %41, %45 : vector<16x16x128xf32>
    %47 = arith.addf %40, %46 : vector<16x16x128xf32>
    %c1_34 = arith.constant 1 : index
    %c2_35 = arith.constant 2 : index
    %c0_36 = arith.constant 0 : index
    %48 = vector.load %arg11[%c1_34, %c2_35, %c0_36] : memref<18x18x128xf32, #tpu.memory_space<vmem>>, vector<16x16x128xf32>
    %49 = vector.extract_strided_slice %3 {offsets = [5, 0], sizes = [1, 128], strides = [1, 1]} : vector<9x128xf32> to vector<1x128xf32>
    %50 = vector.shape_cast %49 : vector<1x128xf32> to vector<128xf32>
    %51 = vector.shape_cast %50 : vector<128xf32> to vector<1x1x128xf32>
    %52 = vector.broadcast %51 : vector<1x1x128xf32> to vector<16x16x128xf32>
    %53 = arith.mulf %48, %52 : vector<16x16x128xf32>
    %54 = arith.addf %47, %53 : vector<16x16x128xf32>
    %c2_37 = arith.constant 2 : index
    %c0_38 = arith.constant 0 : index
    %c0_39 = arith.constant 0 : index
    %55 = vector.load %arg11[%c2_37, %c0_38, %c0_39] : memref<18x18x128xf32, #tpu.memory_space<vmem>>, vector<16x16x128xf32>
    %56 = vector.extract_strided_slice %3 {offsets = [6, 0], sizes = [1, 128], strides = [1, 1]} : vector<9x128xf32> to vector<1x128xf32>
    %57 = vector.shape_cast %56 : vector<1x128xf32> to vector<128xf32>
    %58 = vector.shape_cast %57 : vector<128xf32> to vector<1x1x128xf32>
    %59 = vector.broadcast %58 : vector<1x1x128xf32> to vector<16x16x128xf32>
    %60 = arith.mulf %55, %59 : vector<16x16x128xf32>
    %61 = arith.addf %54, %60 : vector<16x16x128xf32>
    %c2_40 = arith.constant 2 : index
    %c1_41 = arith.constant 1 : index
    %c0_42 = arith.constant 0 : index
    %62 = vector.load %arg11[%c2_40, %c1_41, %c0_42] : memref<18x18x128xf32, #tpu.memory_space<vmem>>, vector<16x16x128xf32>
    %63 = vector.extract_strided_slice %3 {offsets = [7, 0], sizes = [1, 128], strides = [1, 1]} : vector<9x128xf32> to vector<1x128xf32>
    %64 = vector.shape_cast %63 : vector<1x128xf32> to vector<128xf32>
    %65 = vector.shape_cast %64 : vector<128xf32> to vector<1x1x128xf32>
    %66 = vector.broadcast %65 : vector<1x1x128xf32> to vector<16x16x128xf32>
    %67 = arith.mulf %62, %66 : vector<16x16x128xf32>
    %68 = arith.addf %61, %67 : vector<16x16x128xf32>
    %c2_43 = arith.constant 2 : index
    %c2_44 = arith.constant 2 : index
    %c0_45 = arith.constant 0 : index
    %69 = vector.load %arg11[%c2_43, %c2_44, %c0_45] : memref<18x18x128xf32, #tpu.memory_space<vmem>>, vector<16x16x128xf32>
    %70 = vector.extract_strided_slice %3 {offsets = [8, 0], sizes = [1, 128], strides = [1, 1]} : vector<9x128xf32> to vector<1x128xf32>
    %71 = vector.shape_cast %70 : vector<1x128xf32> to vector<128xf32>
    %72 = vector.shape_cast %71 : vector<128xf32> to vector<1x1x128xf32>
    %73 = vector.broadcast %72 : vector<1x1x128xf32> to vector<16x16x128xf32>
    %74 = arith.mulf %69, %73 : vector<16x16x128xf32>
    %75 = arith.addf %68, %74 : vector<16x16x128xf32>
    %76 = vector.shape_cast %75 : vector<16x16x128xf32> to vector<256x128xf32>
    %c0_46 = arith.constant 0 : index
    %c0_47 = arith.constant 0 : index
    %77 = vector.load %arg3[%c0_46, %c0_47] : memref<1x128xf32, #tpu.memory_space<vmem>>, vector<1x128xf32>
    %78 = vector.broadcast %77 : vector<1x128xf32> to vector<256x128xf32>
    %79 = arith.addf %76, %78 : vector<256x128xf32>
    %80 = arith.negf %79 : vector<256x128xf32>
    %81 = math.exp %80 : vector<256x128xf32>
    %cst_48 = arith.constant 1.000000e+00 : f32
    %82 = vector.broadcast %cst_48 : f32 to vector<256x128xf32>
    %83 = arith.addf %82, %81 : vector<256x128xf32>
    %84 = arith.divf %82, %83 : vector<256x128xf32>
    %85 = arith.mulf %79, %84 : vector<256x128xf32>
    %cst_49 = arith.constant dense<0.000000e+00> : vector<128xf32>
    %86 = vector.multi_reduction <add>, %85, %cst_49 [0] : vector<256x128xf32> to vector<128xf32>
    %87 = vector.shape_cast %86 : vector<128xf32> to vector<1x128xf32>
    %cst_50 = arith.constant 3.906250e-03 : f32
    %88 = vector.broadcast %cst_50 : f32 to vector<1x128xf32>
    %89 = arith.mulf %87, %88 : vector<1x128xf32>
    %90 = arith.truncf %89 : vector<1x128xf32> to vector<1x128xbf16>
    %c0_51 = arith.constant 0 : index
    %c0_52 = arith.constant 0 : index
    %91 = vector.load %arg4[%c0_51, %c0_52] : memref<128x128xbf16, #tpu.memory_space<vmem>>, vector<128x128xbf16>
    %cst_53 = arith.constant dense<0.000000e+00> : vector<1x128xf32>
    %92 = tpu.matmul %90, %91, %cst_53 {dimension_numbers = #tpu.dot_dimension_numbers<[1], [0], [0], [1], [0, 0, 1, 1], [], []>} : vector<1x128xbf16>, vector<128x128xbf16>, vector<1x128xf32> -> vector<1x128xf32>
    %c0_54 = arith.constant 0 : index
    %c0_55 = arith.constant 0 : index
    %93 = vector.load %arg5[%c0_54, %c0_55] : memref<1x128xf32, #tpu.memory_space<vmem>>, vector<1x128xf32>
    %94 = arith.addf %92, %93 : vector<1x128xf32>
    %95 = arith.negf %94 : vector<1x128xf32>
    %96 = math.exp %95 : vector<1x128xf32>
    %cst_56 = arith.constant 1.000000e+00 : f32
    %97 = vector.broadcast %cst_56 : f32 to vector<1x128xf32>
    %98 = arith.addf %97, %96 : vector<1x128xf32>
    %99 = arith.divf %97, %98 : vector<1x128xf32>
    %100 = arith.mulf %94, %99 : vector<1x128xf32>
    %101 = arith.truncf %100 : vector<1x128xf32> to vector<1x128xbf16>
    %c0_57 = arith.constant 0 : index
    %c0_58 = arith.constant 0 : index
    %102 = vector.load %arg6[%c0_57, %c0_58] : memref<128x128xbf16, #tpu.memory_space<vmem>>, vector<128x128xbf16>
    %cst_59 = arith.constant dense<0.000000e+00> : vector<1x128xf32>
    %103 = tpu.matmul %101, %102, %cst_59 {dimension_numbers = #tpu.dot_dimension_numbers<[1], [0], [0], [1], [0, 0, 1, 1], [], []>} : vector<1x128xbf16>, vector<128x128xbf16>, vector<1x128xf32> -> vector<1x128xf32>
    %c0_60 = arith.constant 0 : index
    %c0_61 = arith.constant 0 : index
    %104 = vector.load %arg7[%c0_60, %c0_61] : memref<1x128xf32, #tpu.memory_space<vmem>>, vector<1x128xf32>
    %105 = arith.addf %103, %104 : vector<1x128xf32>
    %106 = arith.negf %105 : vector<1x128xf32>
    %107 = math.exp %106 : vector<1x128xf32>
    %cst_62 = arith.constant 1.000000e+00 : f32
    %108 = vector.broadcast %cst_62 : f32 to vector<1x128xf32>
    %109 = arith.addf %108, %107 : vector<1x128xf32>
    %110 = arith.divf %108, %109 : vector<1x128xf32>
    %111 = vector.broadcast %110 : vector<1x128xf32> to vector<256x128xf32>
    %112 = arith.mulf %85, %111 : vector<256x128xf32>
    %113 = arith.truncf %112 : vector<256x128xf32> to vector<256x128xbf16>
    %c0_63 = arith.constant 0 : index
    %c0_64 = arith.constant 0 : index
    %114 = vector.load %arg8[%c0_63, %c0_64] : memref<128x128xbf16, #tpu.memory_space<vmem>>, vector<128x128xbf16>
    %cst_65 = arith.constant dense<0.000000e+00> : vector<256x128xf32>
    %115 = tpu.matmul %113, %114, %cst_65 {dimension_numbers = #tpu.dot_dimension_numbers<[1], [0], [0], [1], [0, 0, 1, 1], [], []>} : vector<256x128xbf16>, vector<128x128xbf16>, vector<256x128xf32> -> vector<256x128xf32>
    %c0_66 = arith.constant 0 : index
    %c0_67 = arith.constant 0 : index
    %116 = vector.load %arg9[%c0_66, %c0_67] : memref<1x128xf32, #tpu.memory_space<vmem>>, vector<1x128xf32>
    %117 = vector.broadcast %116 : vector<1x128xf32> to vector<256x128xf32>
    %118 = arith.addf %115, %117 : vector<256x128xf32>
    %119 = arith.extf %1 : vector<256x128xbf16> to vector<256x128xf32>
    %120 = arith.addf %118, %119 : vector<256x128xf32>
    %121 = arith.truncf %120 : vector<256x128xf32> to vector<256x128xbf16>
    %c0_68 = arith.constant 0 : index
    %c0_69 = arith.constant 0 : index
    %c0_70 = arith.constant 0 : index
    %122 = vector.load %arg10[%c0_68, %c0_69, %c0_70] : memref<1x256x128xbf16, #tpu.memory_space<vmem>>, vector<1x256x128xbf16>
    %123 = vector.shape_cast %122 : vector<1x256x128xbf16> to vector<256x128xbf16>
    %124 = vector.shape_cast %121 : vector<256x128xbf16> to vector<1x256x128xbf16>
    tpu.vector_store %arg10[%c0_68, %c0_69, %c0_70], %124 {strides = array<i32>} : memref<1x256x128xbf16, #tpu.memory_space<vmem>>, vector<1x256x128xbf16>,
    return
  }
  func.func @transform_0(%arg0: i32) -> (i32, i32, i32) {
    %c0_i32 = arith.constant 0 : i32
    %c0_i32_0 = arith.constant 0 : i32
    %c0_i32_1 = arith.constant 0 : i32
    return %arg0, %c0_i32, %c0_i32_0 : i32, i32, i32
  }
  func.func @transform_1(%arg0: i32) -> (i32, i32) {
    %c0_i32 = arith.constant 0 : i32
    %c0_i32_0 = arith.constant 0 : i32
    %c0_i32_1 = arith.constant 0 : i32
    return %c0_i32, %c0_i32_0 : i32, i32
  }
  func.func @transform_2(%arg0: i32) -> (i32, i32) {
    %c0_i32 = arith.constant 0 : i32
    %c0_i32_0 = arith.constant 0 : i32
    %c0_i32_1 = arith.constant 0 : i32
    return %c0_i32, %c0_i32_0 : i32, i32
  }
  func.func @transform_3(%arg0: i32) -> (i32, i32) {
    %c0_i32 = arith.constant 0 : i32
    %c0_i32_0 = arith.constant 0 : i32
    %c0_i32_1 = arith.constant 0 : i32
    return %c0_i32, %c0_i32_0 : i32, i32
  }
  func.func @transform_4(%arg0: i32) -> (i32, i32) {
    %c0_i32 = arith.constant 0 : i32
    %c0_i32_0 = arith.constant 0 : i32
    %c0_i32_1 = arith.constant 0 : i32
    return %c0_i32, %c0_i32_0 : i32, i32
  }
  func.func @transform_5(%arg0: i32) -> (i32, i32) {
    %c0_i32 = arith.constant 0 : i32
    %c0_i32_0 = arith.constant 0 : i32
    %c0_i32_1 = arith.constant 0 : i32
    return %c0_i32, %c0_i32_0 : i32, i32
  }
  func.func @transform_6(%arg0: i32) -> (i32, i32) {
    %c0_i32 = arith.constant 0 : i32
    %c0_i32_0 = arith.constant 0 : i32
    %c0_i32_1 = arith.constant 0 : i32
    return %c0_i32, %c0_i32_0 : i32, i32
  }
  func.func @transform_7(%arg0: i32) -> (i32, i32) {
    %c0_i32 = arith.constant 0 : i32
    %c0_i32_0 = arith.constant 0 : i32
    %c0_i32_1 = arith.constant 0 : i32
    return %c0_i32, %c0_i32_0 : i32, i32
  }
  func.func @transform_8(%arg0: i32) -> (i32, i32) {
    %c0_i32 = arith.constant 0 : i32
    %c0_i32_0 = arith.constant 0 : i32
    %c0_i32_1 = arith.constant 0 : i32
    return %c0_i32, %c0_i32_0 : i32, i32
  }
  func.func @transform_9(%arg0: i32) -> (i32, i32, i32) {
    %c0_i32 = arith.constant 0 : i32
    %c0_i32_0 = arith.constant 0 : i32
    %c0_i32_1 = arith.constant 0 : i32
    return %arg0, %c0_i32, %c0_i32_0 : i32, i32, i32
  }
}

module attributes {stable_mosaic.version = 11 : i64} {
  func.func @kernel(%arg0: i32, %arg1: memref<1x256x128xbf16, #tpu.memory_space<vmem>>, %arg2: memref<128x128xbf16, #tpu.memory_space<vmem>>, %arg3: memref<1x128xf32, #tpu.memory_space<vmem>>, %arg4: memref<9x128xf32, #tpu.memory_space<vmem>>, %arg5: memref<1x128xf32, #tpu.memory_space<vmem>>, %arg6: memref<128x128xbf16, #tpu.memory_space<vmem>>, %arg7: memref<1x128xf32, #tpu.memory_space<vmem>>, %arg8: memref<128x128xbf16, #tpu.memory_space<vmem>>, %arg9: memref<1x128xf32, #tpu.memory_space<vmem>>, %arg10: memref<128x128xbf16, #tpu.memory_space<vmem>>, %arg11: memref<1x128xf32, #tpu.memory_space<vmem>>, %arg12: memref<1x64x128xbf16, #tpu.memory_space<vmem>>, %arg13: memref<256x128xf32, #tpu.memory_space<vmem>>, %arg14: memref<17x9x128xf32, #tpu.memory_space<vmem>>, %arg15: memref<17x8x128xf32, #tpu.memory_space<vmem>>) attributes {dimension_semantics = [#tpu.dimension_semantics<parallel>], iteration_bounds = array<i64: 2>, scalar_prefetch = 0 : i64, scratch_operands = 3 : i64, tpu.core_type = #tpu.core_type<tc>, window_params = [{transform_indices = @transform_0, window_bounds = array<i64: 1, 256, 128>}, {pipeline_mode = #tpu.pipeline_mode<synchronous>, transform_indices = @transform_1, window_bounds = array<i64: 128, 128>}, {pipeline_mode = #tpu.pipeline_mode<synchronous>, transform_indices = @transform_2, window_bounds = array<i64: 1, 128>}, {pipeline_mode = #tpu.pipeline_mode<synchronous>, transform_indices = @transform_3, window_bounds = array<i64: 9, 128>}, {pipeline_mode = #tpu.pipeline_mode<synchronous>, transform_indices = @transform_4, window_bounds = array<i64: 1, 128>}, {pipeline_mode = #tpu.pipeline_mode<synchronous>, transform_indices = @transform_5, window_bounds = array<i64: 128, 128>}, {pipeline_mode = #tpu.pipeline_mode<synchronous>, transform_indices = @transform_6, window_bounds = array<i64: 1, 128>}, {pipeline_mode = #tpu.pipeline_mode<synchronous>, transform_indices = @transform_7, window_bounds = array<i64: 128, 128>}, {pipeline_mode = #tpu.pipeline_mode<synchronous>, transform_indices = @transform_8, window_bounds = array<i64: 1, 128>}, {pipeline_mode = #tpu.pipeline_mode<synchronous>, transform_indices = @transform_9, window_bounds = array<i64: 128, 128>}, {pipeline_mode = #tpu.pipeline_mode<synchronous>, transform_indices = @transform_10, window_bounds = array<i64: 1, 128>}, {transform_indices = @transform_11, window_bounds = array<i64: 1, 64, 128>}]} {
    %c0 = arith.constant 0 : index
    %c0_0 = arith.constant 0 : index
    %c0_1 = arith.constant 0 : index
    %0 = vector.load %arg1[%c0, %c0_0, %c0_1] : memref<1x256x128xbf16, #tpu.memory_space<vmem>>, vector<1x256x128xbf16>
    %1 = vector.shape_cast %0 : vector<1x256x128xbf16> to vector<256x128xbf16>
    %c0_2 = arith.constant 0 : index
    %c0_3 = arith.constant 0 : index
    %2 = vector.load %arg2[%c0_2, %c0_3] : memref<128x128xbf16, #tpu.memory_space<vmem>>, vector<128x128xbf16>
    %cst = arith.constant dense<0.000000e+00> : vector<256x128xf32>
    %3 = tpu.matmul %1, %2, %cst {dimension_numbers = #tpu.dot_dimension_numbers<[1], [0], [0], [1], [0, 0, 1, 1], [], []>} : vector<256x128xbf16>, vector<128x128xbf16>, vector<256x128xf32> -> vector<256x128xf32>
    %c0_4 = arith.constant 0 : index
    %c0_5 = arith.constant 0 : index
    %4 = vector.load %arg3[%c0_4, %c0_5] : memref<1x128xf32, #tpu.memory_space<vmem>>, vector<1x128xf32>
    %5 = vector.broadcast %4 : vector<1x128xf32> to vector<256x128xf32>
    %6 = arith.addf %3, %5 : vector<256x128xf32>
    %7 = arith.negf %6 : vector<256x128xf32>
    %8 = math.exp %7 : vector<256x128xf32>
    %cst_6 = arith.constant 1.000000e+00 : f32
    %9 = vector.broadcast %cst_6 : f32 to vector<256x128xf32>
    %10 = arith.addf %9, %8 : vector<256x128xf32>
    %11 = arith.divf %9, %10 : vector<256x128xf32>
    %12 = arith.mulf %6, %11 : vector<256x128xf32>
    %c0_7 = arith.constant 0 : index
    %c0_8 = arith.constant 0 : index
    %13 = vector.load %arg4[%c0_7, %c0_8] : memref<9x128xf32, #tpu.memory_space<vmem>>, vector<9x128xf32>
    %c0_9 = arith.constant 0 : index
    %c0_10 = arith.constant 0 : index
    %14 = vector.load %arg13[%c0_9, %c0_10] : memref<256x128xf32, #tpu.memory_space<vmem>>, vector<256x128xf32>
    tpu.vector_store %arg13[%c0_9, %c0_10], %12 {strides = array<i32>} : memref<256x128xf32, #tpu.memory_space<vmem>>, vector<256x128xf32>,
    %c0_11 = arith.constant 0 : index
    %c0_12 = arith.constant 0 : index
    %15 = tpu.strided_load %arg13[%c0_11, %c0_12] {strides = array<i32: 2, 1>} : memref<256x128xf32, #tpu.memory_space<vmem>>, vector<128x128xf32>
    %c1 = arith.constant 1 : index
    %c0_13 = arith.constant 0 : index
    %16 = tpu.strided_load %arg13[%c1, %c0_13] {strides = array<i32: 2, 1>} : memref<256x128xf32, #tpu.memory_space<vmem>>, vector<128x128xf32>
    %cst_14 = arith.constant 0.000000e+00 : f32
    %17 = vector.broadcast %cst_14 : f32 to vector<1x9x128xf32>
    %c16 = arith.constant 16 : index
    %c0_15 = arith.constant 0 : index
    %c0_16 = arith.constant 0 : index
    %18 = vector.load %arg14[%c16, %c0_15, %c0_16] : memref<17x9x128xf32, #tpu.memory_space<vmem>>, vector<1x9x128xf32>
    tpu.vector_store %arg14[%c16, %c0_15, %c0_16], %17 {strides = array<i32>} : memref<17x9x128xf32, #tpu.memory_space<vmem>>, vector<1x9x128xf32>,
    %cst_17 = arith.constant 0.000000e+00 : f32
    %19 = vector.broadcast %cst_17 : f32 to vector<1x8x128xf32>
    %c16_18 = arith.constant 16 : index
    %c0_19 = arith.constant 0 : index
    %c0_20 = arith.constant 0 : index
    %20 = vector.load %arg15[%c16_18, %c0_19, %c0_20] : memref<17x8x128xf32, #tpu.memory_space<vmem>>, vector<1x8x128xf32>
    tpu.vector_store %arg15[%c16_18, %c0_19, %c0_20], %19 {strides = array<i32>} : memref<17x8x128xf32, #tpu.memory_space<vmem>>, vector<1x8x128xf32>,
    %cst_21 = arith.constant 0.000000e+00 : f32
    %21 = vector.broadcast %cst_21 : f32 to vector<16x1x128xf32>
    %c0_22 = arith.constant 0 : index
    %c8 = arith.constant 8 : index
    %c0_23 = arith.constant 0 : index
    %22 = vector.load %arg14[%c0_22, %c8, %c0_23] : memref<17x9x128xf32, #tpu.memory_space<vmem>>, vector<16x1x128xf32>
    tpu.vector_store %arg14[%c0_22, %c8, %c0_23], %21 {strides = array<i32>} : memref<17x9x128xf32, #tpu.memory_space<vmem>>, vector<16x1x128xf32>,
    %23 = vector.shape_cast %15 : vector<128x128xf32> to vector<16x8x128xf32>
    %c0_24 = arith.constant 0 : index
    %c0_25 = arith.constant 0 : index
    %c0_26 = arith.constant 0 : index
    %24 = vector.load %arg14[%c0_24, %c0_25, %c0_26] : memref<17x9x128xf32, #tpu.memory_space<vmem>>, vector<16x8x128xf32>
    tpu.vector_store %arg14[%c0_24, %c0_25, %c0_26], %23 {strides = array<i32>} : memref<17x9x128xf32, #tpu.memory_space<vmem>>, vector<16x8x128xf32>,
    %25 = vector.shape_cast %16 : vector<128x128xf32> to vector<16x8x128xf32>
    %c0_27 = arith.constant 0 : index
    %c0_28 = arith.constant 0 : index
    %c0_29 = arith.constant 0 : index
    %26 = vector.load %arg15[%c0_27, %c0_28, %c0_29] : memref<17x8x128xf32, #tpu.memory_space<vmem>>, vector<16x8x128xf32>
    tpu.vector_store %arg15[%c0_27, %c0_28, %c0_29], %25 {strides = array<i32>} : memref<17x8x128xf32, #tpu.memory_space<vmem>>, vector<16x8x128xf32>,
    %c0_30 = arith.constant 0 : index
    %c0_31 = arith.constant 0 : index
    %c0_32 = arith.constant 0 : index
    %27 = tpu.strided_load %arg14[%c0_30, %c0_31, %c0_32] {strides = array<i32: 2, 1, 1>} : memref<17x9x128xf32, #tpu.memory_space<vmem>>, vector<8x8x128xf32>
    %28 = vector.extract_strided_slice %13 {offsets = [0, 0], sizes = [1, 128], strides = [1, 1]} : vector<9x128xf32> to vector<1x128xf32>
    %29 = vector.shape_cast %28 : vector<1x128xf32> to vector<128xf32>
    %30 = vector.shape_cast %29 : vector<128xf32> to vector<1x1x128xf32>
    %31 = vector.broadcast %30 : vector<1x1x128xf32> to vector<8x8x128xf32>
    %32 = arith.mulf %27, %31 : vector<8x8x128xf32>
    %c0_33 = arith.constant 0 : index
    %c0_34 = arith.constant 0 : index
    %c0_35 = arith.constant 0 : index
    %33 = tpu.strided_load %arg15[%c0_33, %c0_34, %c0_35] {strides = array<i32: 2, 1, 1>} : memref<17x8x128xf32, #tpu.memory_space<vmem>>, vector<8x8x128xf32>
    %34 = vector.extract_strided_slice %13 {offsets = [1, 0], sizes = [1, 128], strides = [1, 1]} : vector<9x128xf32> to vector<1x128xf32>
    %35 = vector.shape_cast %34 : vector<1x128xf32> to vector<128xf32>
    %36 = vector.shape_cast %35 : vector<128xf32> to vector<1x1x128xf32>
    %37 = vector.broadcast %36 : vector<1x1x128xf32> to vector<8x8x128xf32>
    %38 = arith.mulf %33, %37 : vector<8x8x128xf32>
    %39 = arith.addf %32, %38 : vector<8x8x128xf32>
    %c0_36 = arith.constant 0 : index
    %c1_37 = arith.constant 1 : index
    %c0_38 = arith.constant 0 : index
    %40 = tpu.strided_load %arg14[%c0_36, %c1_37, %c0_38] {strides = array<i32: 2, 1, 1>} : memref<17x9x128xf32, #tpu.memory_space<vmem>>, vector<8x8x128xf32>
    %41 = vector.extract_strided_slice %13 {offsets = [2, 0], sizes = [1, 128], strides = [1, 1]} : vector<9x128xf32> to vector<1x128xf32>
    %42 = vector.shape_cast %41 : vector<1x128xf32> to vector<128xf32>
    %43 = vector.shape_cast %42 : vector<128xf32> to vector<1x1x128xf32>
    %44 = vector.broadcast %43 : vector<1x1x128xf32> to vector<8x8x128xf32>
    %45 = arith.mulf %40, %44 : vector<8x8x128xf32>
    %46 = arith.addf %39, %45 : vector<8x8x128xf32>
    %c1_39 = arith.constant 1 : index
    %c0_40 = arith.constant 0 : index
    %c0_41 = arith.constant 0 : index
    %47 = tpu.strided_load %arg14[%c1_39, %c0_40, %c0_41] {strides = array<i32: 2, 1, 1>} : memref<17x9x128xf32, #tpu.memory_space<vmem>>, vector<8x8x128xf32>
    %48 = vector.extract_strided_slice %13 {offsets = [3, 0], sizes = [1, 128], strides = [1, 1]} : vector<9x128xf32> to vector<1x128xf32>
    %49 = vector.shape_cast %48 : vector<1x128xf32> to vector<128xf32>
    %50 = vector.shape_cast %49 : vector<128xf32> to vector<1x1x128xf32>
    %51 = vector.broadcast %50 : vector<1x1x128xf32> to vector<8x8x128xf32>
    %52 = arith.mulf %47, %51 : vector<8x8x128xf32>
    %53 = arith.addf %46, %52 : vector<8x8x128xf32>
    %c1_42 = arith.constant 1 : index
    %c0_43 = arith.constant 0 : index
    %c0_44 = arith.constant 0 : index
    %54 = tpu.strided_load %arg15[%c1_42, %c0_43, %c0_44] {strides = array<i32: 2, 1, 1>} : memref<17x8x128xf32, #tpu.memory_space<vmem>>, vector<8x8x128xf32>
    %55 = vector.extract_strided_slice %13 {offsets = [4, 0], sizes = [1, 128], strides = [1, 1]} : vector<9x128xf32> to vector<1x128xf32>
    %56 = vector.shape_cast %55 : vector<1x128xf32> to vector<128xf32>
    %57 = vector.shape_cast %56 : vector<128xf32> to vector<1x1x128xf32>
    %58 = vector.broadcast %57 : vector<1x1x128xf32> to vector<8x8x128xf32>
    %59 = arith.mulf %54, %58 : vector<8x8x128xf32>
    %60 = arith.addf %53, %59 : vector<8x8x128xf32>
    %c1_45 = arith.constant 1 : index
    %c1_46 = arith.constant 1 : index
    %c0_47 = arith.constant 0 : index
    %61 = tpu.strided_load %arg14[%c1_45, %c1_46, %c0_47] {strides = array<i32: 2, 1, 1>} : memref<17x9x128xf32, #tpu.memory_space<vmem>>, vector<8x8x128xf32>
    %62 = vector.extract_strided_slice %13 {offsets = [5, 0], sizes = [1, 128], strides = [1, 1]} : vector<9x128xf32> to vector<1x128xf32>
    %63 = vector.shape_cast %62 : vector<1x128xf32> to vector<128xf32>
    %64 = vector.shape_cast %63 : vector<128xf32> to vector<1x1x128xf32>
    %65 = vector.broadcast %64 : vector<1x1x128xf32> to vector<8x8x128xf32>
    %66 = arith.mulf %61, %65 : vector<8x8x128xf32>
    %67 = arith.addf %60, %66 : vector<8x8x128xf32>
    %c2 = arith.constant 2 : index
    %c0_48 = arith.constant 0 : index
    %c0_49 = arith.constant 0 : index
    %68 = tpu.strided_load %arg14[%c2, %c0_48, %c0_49] {strides = array<i32: 2, 1, 1>} : memref<17x9x128xf32, #tpu.memory_space<vmem>>, vector<8x8x128xf32>
    %69 = vector.extract_strided_slice %13 {offsets = [6, 0], sizes = [1, 128], strides = [1, 1]} : vector<9x128xf32> to vector<1x128xf32>
    %70 = vector.shape_cast %69 : vector<1x128xf32> to vector<128xf32>
    %71 = vector.shape_cast %70 : vector<128xf32> to vector<1x1x128xf32>
    %72 = vector.broadcast %71 : vector<1x1x128xf32> to vector<8x8x128xf32>
    %73 = arith.mulf %68, %72 : vector<8x8x128xf32>
    %74 = arith.addf %67, %73 : vector<8x8x128xf32>
    %c2_50 = arith.constant 2 : index
    %c0_51 = arith.constant 0 : index
    %c0_52 = arith.constant 0 : index
    %75 = tpu.strided_load %arg15[%c2_50, %c0_51, %c0_52] {strides = array<i32: 2, 1, 1>} : memref<17x8x128xf32, #tpu.memory_space<vmem>>, vector<8x8x128xf32>
    %76 = vector.extract_strided_slice %13 {offsets = [7, 0], sizes = [1, 128], strides = [1, 1]} : vector<9x128xf32> to vector<1x128xf32>
    %77 = vector.shape_cast %76 : vector<1x128xf32> to vector<128xf32>
    %78 = vector.shape_cast %77 : vector<128xf32> to vector<1x1x128xf32>
    %79 = vector.broadcast %78 : vector<1x1x128xf32> to vector<8x8x128xf32>
    %80 = arith.mulf %75, %79 : vector<8x8x128xf32>
    %81 = arith.addf %74, %80 : vector<8x8x128xf32>
    %c2_53 = arith.constant 2 : index
    %c1_54 = arith.constant 1 : index
    %c0_55 = arith.constant 0 : index
    %82 = tpu.strided_load %arg14[%c2_53, %c1_54, %c0_55] {strides = array<i32: 2, 1, 1>} : memref<17x9x128xf32, #tpu.memory_space<vmem>>, vector<8x8x128xf32>
    %83 = vector.extract_strided_slice %13 {offsets = [8, 0], sizes = [1, 128], strides = [1, 1]} : vector<9x128xf32> to vector<1x128xf32>
    %84 = vector.shape_cast %83 : vector<1x128xf32> to vector<128xf32>
    %85 = vector.shape_cast %84 : vector<128xf32> to vector<1x1x128xf32>
    %86 = vector.broadcast %85 : vector<1x1x128xf32> to vector<8x8x128xf32>
    %87 = arith.mulf %82, %86 : vector<8x8x128xf32>
    %88 = arith.addf %81, %87 : vector<8x8x128xf32>
    %89 = vector.shape_cast %88 : vector<8x8x128xf32> to vector<64x128xf32>
    %c0_56 = arith.constant 0 : index
    %c0_57 = arith.constant 0 : index
    %90 = vector.load %arg5[%c0_56, %c0_57] : memref<1x128xf32, #tpu.memory_space<vmem>>, vector<1x128xf32>
    %91 = vector.broadcast %90 : vector<1x128xf32> to vector<64x128xf32>
    %92 = arith.addf %89, %91 : vector<64x128xf32>
    %93 = arith.negf %92 : vector<64x128xf32>
    %94 = math.exp %93 : vector<64x128xf32>
    %cst_58 = arith.constant 1.000000e+00 : f32
    %95 = vector.broadcast %cst_58 : f32 to vector<64x128xf32>
    %96 = arith.addf %95, %94 : vector<64x128xf32>
    %97 = arith.divf %95, %96 : vector<64x128xf32>
    %98 = arith.mulf %92, %97 : vector<64x128xf32>
    %cst_59 = arith.constant dense<0.000000e+00> : vector<128xf32>
    %99 = vector.multi_reduction <add>, %98, %cst_59 [0] : vector<64x128xf32> to vector<128xf32>
    %100 = vector.shape_cast %99 : vector<128xf32> to vector<1x128xf32>
    %cst_60 = arith.constant 1.562500e-02 : f32
    %101 = vector.broadcast %cst_60 : f32 to vector<1x128xf32>
    %102 = arith.mulf %100, %101 : vector<1x128xf32>
    %103 = arith.truncf %102 : vector<1x128xf32> to vector<1x128xbf16>
    %c0_61 = arith.constant 0 : index
    %c0_62 = arith.constant 0 : index
    %104 = vector.load %arg6[%c0_61, %c0_62] : memref<128x128xbf16, #tpu.memory_space<vmem>>, vector<128x128xbf16>
    %cst_63 = arith.constant dense<0.000000e+00> : vector<1x128xf32>
    %105 = tpu.matmul %103, %104, %cst_63 {dimension_numbers = #tpu.dot_dimension_numbers<[1], [0], [0], [1], [0, 0, 1, 1], [], []>} : vector<1x128xbf16>, vector<128x128xbf16>, vector<1x128xf32> -> vector<1x128xf32>
    %c0_64 = arith.constant 0 : index
    %c0_65 = arith.constant 0 : index
    %106 = vector.load %arg7[%c0_64, %c0_65] : memref<1x128xf32, #tpu.memory_space<vmem>>, vector<1x128xf32>
    %107 = arith.addf %105, %106 : vector<1x128xf32>
    %108 = arith.negf %107 : vector<1x128xf32>
    %109 = math.exp %108 : vector<1x128xf32>
    %cst_66 = arith.constant 1.000000e+00 : f32
    %110 = vector.broadcast %cst_66 : f32 to vector<1x128xf32>
    %111 = arith.addf %110, %109 : vector<1x128xf32>
    %112 = arith.divf %110, %111 : vector<1x128xf32>
    %113 = arith.mulf %107, %112 : vector<1x128xf32>
    %114 = arith.truncf %113 : vector<1x128xf32> to vector<1x128xbf16>
    %c0_67 = arith.constant 0 : index
    %c0_68 = arith.constant 0 : index
    %115 = vector.load %arg8[%c0_67, %c0_68] : memref<128x128xbf16, #tpu.memory_space<vmem>>, vector<128x128xbf16>
    %cst_69 = arith.constant dense<0.000000e+00> : vector<1x128xf32>
    %116 = tpu.matmul %114, %115, %cst_69 {dimension_numbers = #tpu.dot_dimension_numbers<[1], [0], [0], [1], [0, 0, 1, 1], [], []>} : vector<1x128xbf16>, vector<128x128xbf16>, vector<1x128xf32> -> vector<1x128xf32>
    %c0_70 = arith.constant 0 : index
    %c0_71 = arith.constant 0 : index
    %117 = vector.load %arg9[%c0_70, %c0_71] : memref<1x128xf32, #tpu.memory_space<vmem>>, vector<1x128xf32>
    %118 = arith.addf %116, %117 : vector<1x128xf32>
    %119 = arith.negf %118 : vector<1x128xf32>
    %120 = math.exp %119 : vector<1x128xf32>
    %cst_72 = arith.constant 1.000000e+00 : f32
    %121 = vector.broadcast %cst_72 : f32 to vector<1x128xf32>
    %122 = arith.addf %121, %120 : vector<1x128xf32>
    %123 = arith.divf %121, %122 : vector<1x128xf32>
    %124 = vector.broadcast %123 : vector<1x128xf32> to vector<64x128xf32>
    %125 = arith.mulf %98, %124 : vector<64x128xf32>
    %126 = arith.truncf %125 : vector<64x128xf32> to vector<64x128xbf16>
    %c0_73 = arith.constant 0 : index
    %c0_74 = arith.constant 0 : index
    %127 = vector.load %arg10[%c0_73, %c0_74] : memref<128x128xbf16, #tpu.memory_space<vmem>>, vector<128x128xbf16>
    %cst_75 = arith.constant dense<0.000000e+00> : vector<64x128xf32>
    %128 = tpu.matmul %126, %127, %cst_75 {dimension_numbers = #tpu.dot_dimension_numbers<[1], [0], [0], [1], [0, 0, 1, 1], [], []>} : vector<64x128xbf16>, vector<128x128xbf16>, vector<64x128xf32> -> vector<64x128xf32>
    %c0_76 = arith.constant 0 : index
    %c0_77 = arith.constant 0 : index
    %129 = vector.load %arg11[%c0_76, %c0_77] : memref<1x128xf32, #tpu.memory_space<vmem>>, vector<1x128xf32>
    %130 = vector.broadcast %129 : vector<1x128xf32> to vector<64x128xf32>
    %131 = arith.addf %128, %130 : vector<64x128xf32>
    %132 = arith.truncf %131 : vector<64x128xf32> to vector<64x128xbf16>
    %c0_78 = arith.constant 0 : index
    %c0_79 = arith.constant 0 : index
    %c0_80 = arith.constant 0 : index
    %133 = vector.load %arg12[%c0_78, %c0_79, %c0_80] : memref<1x64x128xbf16, #tpu.memory_space<vmem>>, vector<1x64x128xbf16>
    %134 = vector.shape_cast %133 : vector<1x64x128xbf16> to vector<64x128xbf16>
    %135 = vector.shape_cast %132 : vector<64x128xbf16> to vector<1x64x128xbf16>
    tpu.vector_store %arg12[%c0_78, %c0_79, %c0_80], %135 {strides = array<i32>} : memref<1x64x128xbf16, #tpu.memory_space<vmem>>, vector<1x64x128xbf16>,
    return
  }
  func.func @transform_0(%arg0: i32) -> (i32, i32, i32) {
    %c0_i32 = arith.constant 0 : i32
    %c0_i32_0 = arith.constant 0 : i32
    %c0_i32_1 = arith.constant 0 : i32
    return %arg0, %c0_i32, %c0_i32_0 : i32, i32, i32
  }
  func.func @transform_1(%arg0: i32) -> (i32, i32) {
    %c0_i32 = arith.constant 0 : i32
    %c0_i32_0 = arith.constant 0 : i32
    %c0_i32_1 = arith.constant 0 : i32
    return %c0_i32, %c0_i32_0 : i32, i32
  }
  func.func @transform_2(%arg0: i32) -> (i32, i32) {
    %c0_i32 = arith.constant 0 : i32
    %c0_i32_0 = arith.constant 0 : i32
    %c0_i32_1 = arith.constant 0 : i32
    return %c0_i32, %c0_i32_0 : i32, i32
  }
  func.func @transform_3(%arg0: i32) -> (i32, i32) {
    %c0_i32 = arith.constant 0 : i32
    %c0_i32_0 = arith.constant 0 : i32
    %c0_i32_1 = arith.constant 0 : i32
    return %c0_i32, %c0_i32_0 : i32, i32
  }
  func.func @transform_4(%arg0: i32) -> (i32, i32) {
    %c0_i32 = arith.constant 0 : i32
    %c0_i32_0 = arith.constant 0 : i32
    %c0_i32_1 = arith.constant 0 : i32
    return %c0_i32, %c0_i32_0 : i32, i32
  }
  func.func @transform_5(%arg0: i32) -> (i32, i32) {
    %c0_i32 = arith.constant 0 : i32
    %c0_i32_0 = arith.constant 0 : i32
    %c0_i32_1 = arith.constant 0 : i32
    return %c0_i32, %c0_i32_0 : i32, i32
  }
  func.func @transform_6(%arg0: i32) -> (i32, i32) {
    %c0_i32 = arith.constant 0 : i32
    %c0_i32_0 = arith.constant 0 : i32
    %c0_i32_1 = arith.constant 0 : i32
    return %c0_i32, %c0_i32_0 : i32, i32
  }
  func.func @transform_7(%arg0: i32) -> (i32, i32) {
    %c0_i32 = arith.constant 0 : i32
    %c0_i32_0 = arith.constant 0 : i32
    %c0_i32_1 = arith.constant 0 : i32
    return %c0_i32, %c0_i32_0 : i32, i32
  }
  func.func @transform_8(%arg0: i32) -> (i32, i32) {
    %c0_i32 = arith.constant 0 : i32
    %c0_i32_0 = arith.constant 0 : i32
    %c0_i32_1 = arith.constant 0 : i32
    return %c0_i32, %c0_i32_0 : i32, i32
  }
  func.func @transform_9(%arg0: i32) -> (i32, i32) {
    %c0_i32 = arith.constant 0 : i32
    %c0_i32_0 = arith.constant 0 : i32
    %c0_i32_1 = arith.constant 0 : i32
    return %c0_i32, %c0_i32_0 : i32, i32
  }
  func.func @transform_10(%arg0: i32) -> (i32, i32) {
    %c0_i32 = arith.constant 0 : i32
    %c0_i32_0 = arith.constant 0 : i32
    %c0_i32_1 = arith.constant 0 : i32
    return %c0_i32, %c0_i32_0 : i32, i32
  }
  func.func @transform_11(%arg0: i32) -> (i32, i32, i32) {
    %c0_i32 = arith.constant 0 : i32
    %c0_i32_0 = arith.constant 0 : i32
    %c0_i32_1 = arith.constant 0 : i32
    return %arg0, %c0_i32, %c0_i32_0 : i32, i32, i32
  }
}

module attributes {stable_mosaic.version = 11 : i64} {
  func.func @kernel(%arg0: i32, %arg1: memref<1x64x128xbf16, #tpu.memory_space<vmem>>, %arg2: memref<128x128xbf16, #tpu.memory_space<vmem>>, %arg3: memref<1x128xf32, #tpu.memory_space<vmem>>, %arg4: memref<9x128xf32, #tpu.memory_space<vmem>>, %arg5: memref<1x128xf32, #tpu.memory_space<vmem>>, %arg6: memref<128x128xbf16, #tpu.memory_space<vmem>>, %arg7: memref<1x128xf32, #tpu.memory_space<vmem>>, %arg8: memref<128x128xbf16, #tpu.memory_space<vmem>>, %arg9: memref<1x128xf32, #tpu.memory_space<vmem>>, %arg10: memref<128x128xbf16, #tpu.memory_space<vmem>>, %arg11: memref<1x128xf32, #tpu.memory_space<vmem>>, %arg12: memref<1x64x128xbf16, #tpu.memory_space<vmem>>, %arg13: memref<10x10x128xf32, #tpu.memory_space<vmem>>) attributes {dimension_semantics = [#tpu.dimension_semantics<parallel>], iteration_bounds = array<i64: 2>, scalar_prefetch = 0 : i64, scratch_operands = 1 : i64, tpu.core_type = #tpu.core_type<tc>, window_params = [{transform_indices = @transform_0, window_bounds = array<i64: 1, 64, 128>}, {pipeline_mode = #tpu.pipeline_mode<synchronous>, transform_indices = @transform_1, window_bounds = array<i64: 128, 128>}, {pipeline_mode = #tpu.pipeline_mode<synchronous>, transform_indices = @transform_2, window_bounds = array<i64: 1, 128>}, {pipeline_mode = #tpu.pipeline_mode<synchronous>, transform_indices = @transform_3, window_bounds = array<i64: 9, 128>}, {pipeline_mode = #tpu.pipeline_mode<synchronous>, transform_indices = @transform_4, window_bounds = array<i64: 1, 128>}, {pipeline_mode = #tpu.pipeline_mode<synchronous>, transform_indices = @transform_5, window_bounds = array<i64: 128, 128>}, {pipeline_mode = #tpu.pipeline_mode<synchronous>, transform_indices = @transform_6, window_bounds = array<i64: 1, 128>}, {pipeline_mode = #tpu.pipeline_mode<synchronous>, transform_indices = @transform_7, window_bounds = array<i64: 128, 128>}, {pipeline_mode = #tpu.pipeline_mode<synchronous>, transform_indices = @transform_8, window_bounds = array<i64: 1, 128>}, {pipeline_mode = #tpu.pipeline_mode<synchronous>, transform_indices = @transform_9, window_bounds = array<i64: 128, 128>}, {pipeline_mode = #tpu.pipeline_mode<synchronous>, transform_indices = @transform_10, window_bounds = array<i64: 1, 128>}, {transform_indices = @transform_11, window_bounds = array<i64: 1, 64, 128>}]} {
    %c0 = arith.constant 0 : index
    %c0_0 = arith.constant 0 : index
    %c0_1 = arith.constant 0 : index
    %0 = vector.load %arg1[%c0, %c0_0, %c0_1] : memref<1x64x128xbf16, #tpu.memory_space<vmem>>, vector<1x64x128xbf16>
    %1 = vector.shape_cast %0 : vector<1x64x128xbf16> to vector<64x128xbf16>
    %c0_2 = arith.constant 0 : index
    %c0_3 = arith.constant 0 : index
    %2 = vector.load %arg2[%c0_2, %c0_3] : memref<128x128xbf16, #tpu.memory_space<vmem>>, vector<128x128xbf16>
    %cst = arith.constant dense<0.000000e+00> : vector<64x128xf32>
    %3 = tpu.matmul %1, %2, %cst {dimension_numbers = #tpu.dot_dimension_numbers<[1], [0], [0], [1], [0, 0, 1, 1], [], []>} : vector<64x128xbf16>, vector<128x128xbf16>, vector<64x128xf32> -> vector<64x128xf32>
    %c0_4 = arith.constant 0 : index
    %c0_5 = arith.constant 0 : index
    %4 = vector.load %arg3[%c0_4, %c0_5] : memref<1x128xf32, #tpu.memory_space<vmem>>, vector<1x128xf32>
    %5 = vector.broadcast %4 : vector<1x128xf32> to vector<64x128xf32>
    %6 = arith.addf %3, %5 : vector<64x128xf32>
    %7 = arith.negf %6 : vector<64x128xf32>
    %8 = math.exp %7 : vector<64x128xf32>
    %cst_6 = arith.constant 1.000000e+00 : f32
    %9 = vector.broadcast %cst_6 : f32 to vector<64x128xf32>
    %10 = arith.addf %9, %8 : vector<64x128xf32>
    %11 = arith.divf %9, %10 : vector<64x128xf32>
    %12 = arith.mulf %6, %11 : vector<64x128xf32>
    %c0_7 = arith.constant 0 : index
    %c0_8 = arith.constant 0 : index
    %13 = vector.load %arg4[%c0_7, %c0_8] : memref<9x128xf32, #tpu.memory_space<vmem>>, vector<9x128xf32>
    %cst_9 = arith.constant 0.000000e+00 : f32
    %14 = vector.broadcast %cst_9 : f32 to vector<1x10x128xf32>
    %c0_10 = arith.constant 0 : index
    %c0_11 = arith.constant 0 : index
    %c0_12 = arith.constant 0 : index
    %15 = vector.load %arg13[%c0_10, %c0_11, %c0_12] : memref<10x10x128xf32, #tpu.memory_space<vmem>>, vector<1x10x128xf32>
    tpu.vector_store %arg13[%c0_10, %c0_11, %c0_12], %14 {strides = array<i32>} : memref<10x10x128xf32, #tpu.memory_space<vmem>>, vector<1x10x128xf32>,
    %cst_13 = arith.constant 0.000000e+00 : f32
    %16 = vector.broadcast %cst_13 : f32 to vector<1x10x128xf32>
    %c9 = arith.constant 9 : index
    %c0_14 = arith.constant 0 : index
    %c0_15 = arith.constant 0 : index
    %17 = vector.load %arg13[%c9, %c0_14, %c0_15] : memref<10x10x128xf32, #tpu.memory_space<vmem>>, vector<1x10x128xf32>
    tpu.vector_store %arg13[%c9, %c0_14, %c0_15], %16 {strides = array<i32>} : memref<10x10x128xf32, #tpu.memory_space<vmem>>, vector<1x10x128xf32>,
    %cst_16 = arith.constant 0.000000e+00 : f32
    %18 = vector.broadcast %cst_16 : f32 to vector<8x1x128xf32>
    %c1 = arith.constant 1 : index
    %c0_17 = arith.constant 0 : index
    %c0_18 = arith.constant 0 : index
    %19 = vector.load %arg13[%c1, %c0_17, %c0_18] : memref<10x10x128xf32, #tpu.memory_space<vmem>>, vector<8x1x128xf32>
    tpu.vector_store %arg13[%c1, %c0_17, %c0_18], %18 {strides = array<i32>} : memref<10x10x128xf32, #tpu.memory_space<vmem>>, vector<8x1x128xf32>,
    %cst_19 = arith.constant 0.000000e+00 : f32
    %20 = vector.broadcast %cst_19 : f32 to vector<8x1x128xf32>
    %c1_20 = arith.constant 1 : index
    %c9_21 = arith.constant 9 : index
    %c0_22 = arith.constant 0 : index
    %21 = vector.load %arg13[%c1_20, %c9_21, %c0_22] : memref<10x10x128xf32, #tpu.memory_space<vmem>>, vector<8x1x128xf32>
    tpu.vector_store %arg13[%c1_20, %c9_21, %c0_22], %20 {strides = array<i32>} : memref<10x10x128xf32, #tpu.memory_space<vmem>>, vector<8x1x128xf32>,
    %22 = vector.shape_cast %12 : vector<64x128xf32> to vector<8x8x128xf32>
    %c1_23 = arith.constant 1 : index
    %c1_24 = arith.constant 1 : index
    %c0_25 = arith.constant 0 : index
    %23 = vector.load %arg13[%c1_23, %c1_24, %c0_25] : memref<10x10x128xf32, #tpu.memory_space<vmem>>, vector<8x8x128xf32>
    tpu.vector_store %arg13[%c1_23, %c1_24, %c0_25], %22 {strides = array<i32>} : memref<10x10x128xf32, #tpu.memory_space<vmem>>, vector<8x8x128xf32>,
    %c0_26 = arith.constant 0 : index
    %c0_27 = arith.constant 0 : index
    %c0_28 = arith.constant 0 : index
    %24 = vector.load %arg13[%c0_26, %c0_27, %c0_28] : memref<10x10x128xf32, #tpu.memory_space<vmem>>, vector<8x8x128xf32>
    %25 = vector.extract_strided_slice %13 {offsets = [0, 0], sizes = [1, 128], strides = [1, 1]} : vector<9x128xf32> to vector<1x128xf32>
    %26 = vector.shape_cast %25 : vector<1x128xf32> to vector<128xf32>
    %27 = vector.shape_cast %26 : vector<128xf32> to vector<1x1x128xf32>
    %28 = vector.broadcast %27 : vector<1x1x128xf32> to vector<8x8x128xf32>
    %29 = arith.mulf %24, %28 : vector<8x8x128xf32>
    %c0_29 = arith.constant 0 : index
    %c1_30 = arith.constant 1 : index
    %c0_31 = arith.constant 0 : index
    %30 = vector.load %arg13[%c0_29, %c1_30, %c0_31] : memref<10x10x128xf32, #tpu.memory_space<vmem>>, vector<8x8x128xf32>
    %31 = vector.extract_strided_slice %13 {offsets = [1, 0], sizes = [1, 128], strides = [1, 1]} : vector<9x128xf32> to vector<1x128xf32>
    %32 = vector.shape_cast %31 : vector<1x128xf32> to vector<128xf32>
    %33 = vector.shape_cast %32 : vector<128xf32> to vector<1x1x128xf32>
    %34 = vector.broadcast %33 : vector<1x1x128xf32> to vector<8x8x128xf32>
    %35 = arith.mulf %30, %34 : vector<8x8x128xf32>
    %36 = arith.addf %29, %35 : vector<8x8x128xf32>
    %c0_32 = arith.constant 0 : index
    %c2 = arith.constant 2 : index
    %c0_33 = arith.constant 0 : index
    %37 = vector.load %arg13[%c0_32, %c2, %c0_33] : memref<10x10x128xf32, #tpu.memory_space<vmem>>, vector<8x8x128xf32>
    %38 = vector.extract_strided_slice %13 {offsets = [2, 0], sizes = [1, 128], strides = [1, 1]} : vector<9x128xf32> to vector<1x128xf32>
    %39 = vector.shape_cast %38 : vector<1x128xf32> to vector<128xf32>
    %40 = vector.shape_cast %39 : vector<128xf32> to vector<1x1x128xf32>
    %41 = vector.broadcast %40 : vector<1x1x128xf32> to vector<8x8x128xf32>
    %42 = arith.mulf %37, %41 : vector<8x8x128xf32>
    %43 = arith.addf %36, %42 : vector<8x8x128xf32>
    %c1_34 = arith.constant 1 : index
    %c0_35 = arith.constant 0 : index
    %c0_36 = arith.constant 0 : index
    %44 = vector.load %arg13[%c1_34, %c0_35, %c0_36] : memref<10x10x128xf32, #tpu.memory_space<vmem>>, vector<8x8x128xf32>
    %45 = vector.extract_strided_slice %13 {offsets = [3, 0], sizes = [1, 128], strides = [1, 1]} : vector<9x128xf32> to vector<1x128xf32>
    %46 = vector.shape_cast %45 : vector<1x128xf32> to vector<128xf32>
    %47 = vector.shape_cast %46 : vector<128xf32> to vector<1x1x128xf32>
    %48 = vector.broadcast %47 : vector<1x1x128xf32> to vector<8x8x128xf32>
    %49 = arith.mulf %44, %48 : vector<8x8x128xf32>
    %50 = arith.addf %43, %49 : vector<8x8x128xf32>
    %c1_37 = arith.constant 1 : index
    %c1_38 = arith.constant 1 : index
    %c0_39 = arith.constant 0 : index
    %51 = vector.load %arg13[%c1_37, %c1_38, %c0_39] : memref<10x10x128xf32, #tpu.memory_space<vmem>>, vector<8x8x128xf32>
    %52 = vector.extract_strided_slice %13 {offsets = [4, 0], sizes = [1, 128], strides = [1, 1]} : vector<9x128xf32> to vector<1x128xf32>
    %53 = vector.shape_cast %52 : vector<1x128xf32> to vector<128xf32>
    %54 = vector.shape_cast %53 : vector<128xf32> to vector<1x1x128xf32>
    %55 = vector.broadcast %54 : vector<1x1x128xf32> to vector<8x8x128xf32>
    %56 = arith.mulf %51, %55 : vector<8x8x128xf32>
    %57 = arith.addf %50, %56 : vector<8x8x128xf32>
    %c1_40 = arith.constant 1 : index
    %c2_41 = arith.constant 2 : index
    %c0_42 = arith.constant 0 : index
    %58 = vector.load %arg13[%c1_40, %c2_41, %c0_42] : memref<10x10x128xf32, #tpu.memory_space<vmem>>, vector<8x8x128xf32>
    %59 = vector.extract_strided_slice %13 {offsets = [5, 0], sizes = [1, 128], strides = [1, 1]} : vector<9x128xf32> to vector<1x128xf32>
    %60 = vector.shape_cast %59 : vector<1x128xf32> to vector<128xf32>
    %61 = vector.shape_cast %60 : vector<128xf32> to vector<1x1x128xf32>
    %62 = vector.broadcast %61 : vector<1x1x128xf32> to vector<8x8x128xf32>
    %63 = arith.mulf %58, %62 : vector<8x8x128xf32>
    %64 = arith.addf %57, %63 : vector<8x8x128xf32>
    %c2_43 = arith.constant 2 : index
    %c0_44 = arith.constant 0 : index
    %c0_45 = arith.constant 0 : index
    %65 = vector.load %arg13[%c2_43, %c0_44, %c0_45] : memref<10x10x128xf32, #tpu.memory_space<vmem>>, vector<8x8x128xf32>
    %66 = vector.extract_strided_slice %13 {offsets = [6, 0], sizes = [1, 128], strides = [1, 1]} : vector<9x128xf32> to vector<1x128xf32>
    %67 = vector.shape_cast %66 : vector<1x128xf32> to vector<128xf32>
    %68 = vector.shape_cast %67 : vector<128xf32> to vector<1x1x128xf32>
    %69 = vector.broadcast %68 : vector<1x1x128xf32> to vector<8x8x128xf32>
    %70 = arith.mulf %65, %69 : vector<8x8x128xf32>
    %71 = arith.addf %64, %70 : vector<8x8x128xf32>
    %c2_46 = arith.constant 2 : index
    %c1_47 = arith.constant 1 : index
    %c0_48 = arith.constant 0 : index
    %72 = vector.load %arg13[%c2_46, %c1_47, %c0_48] : memref<10x10x128xf32, #tpu.memory_space<vmem>>, vector<8x8x128xf32>
    %73 = vector.extract_strided_slice %13 {offsets = [7, 0], sizes = [1, 128], strides = [1, 1]} : vector<9x128xf32> to vector<1x128xf32>
    %74 = vector.shape_cast %73 : vector<1x128xf32> to vector<128xf32>
    %75 = vector.shape_cast %74 : vector<128xf32> to vector<1x1x128xf32>
    %76 = vector.broadcast %75 : vector<1x1x128xf32> to vector<8x8x128xf32>
    %77 = arith.mulf %72, %76 : vector<8x8x128xf32>
    %78 = arith.addf %71, %77 : vector<8x8x128xf32>
    %c2_49 = arith.constant 2 : index
    %c2_50 = arith.constant 2 : index
    %c0_51 = arith.constant 0 : index
    %79 = vector.load %arg13[%c2_49, %c2_50, %c0_51] : memref<10x10x128xf32, #tpu.memory_space<vmem>>, vector<8x8x128xf32>
    %80 = vector.extract_strided_slice %13 {offsets = [8, 0], sizes = [1, 128], strides = [1, 1]} : vector<9x128xf32> to vector<1x128xf32>
    %81 = vector.shape_cast %80 : vector<1x128xf32> to vector<128xf32>
    %82 = vector.shape_cast %81 : vector<128xf32> to vector<1x1x128xf32>
    %83 = vector.broadcast %82 : vector<1x1x128xf32> to vector<8x8x128xf32>
    %84 = arith.mulf %79, %83 : vector<8x8x128xf32>
    %85 = arith.addf %78, %84 : vector<8x8x128xf32>
    %86 = vector.shape_cast %85 : vector<8x8x128xf32> to vector<64x128xf32>
    %c0_52 = arith.constant 0 : index
    %c0_53 = arith.constant 0 : index
    %87 = vector.load %arg5[%c0_52, %c0_53] : memref<1x128xf32, #tpu.memory_space<vmem>>, vector<1x128xf32>
    %88 = vector.broadcast %87 : vector<1x128xf32> to vector<64x128xf32>
    %89 = arith.addf %86, %88 : vector<64x128xf32>
    %90 = arith.negf %89 : vector<64x128xf32>
    %91 = math.exp %90 : vector<64x128xf32>
    %cst_54 = arith.constant 1.000000e+00 : f32
    %92 = vector.broadcast %cst_54 : f32 to vector<64x128xf32>
    %93 = arith.addf %92, %91 : vector<64x128xf32>
    %94 = arith.divf %92, %93 : vector<64x128xf32>
    %95 = arith.mulf %89, %94 : vector<64x128xf32>
    %cst_55 = arith.constant dense<0.000000e+00> : vector<128xf32>
    %96 = vector.multi_reduction <add>, %95, %cst_55 [0] : vector<64x128xf32> to vector<128xf32>
    %97 = vector.shape_cast %96 : vector<128xf32> to vector<1x128xf32>
    %cst_56 = arith.constant 1.562500e-02 : f32
    %98 = vector.broadcast %cst_56 : f32 to vector<1x128xf32>
    %99 = arith.mulf %97, %98 : vector<1x128xf32>
    %100 = arith.truncf %99 : vector<1x128xf32> to vector<1x128xbf16>
    %c0_57 = arith.constant 0 : index
    %c0_58 = arith.constant 0 : index
    %101 = vector.load %arg6[%c0_57, %c0_58] : memref<128x128xbf16, #tpu.memory_space<vmem>>, vector<128x128xbf16>
    %cst_59 = arith.constant dense<0.000000e+00> : vector<1x128xf32>
    %102 = tpu.matmul %100, %101, %cst_59 {dimension_numbers = #tpu.dot_dimension_numbers<[1], [0], [0], [1], [0, 0, 1, 1], [], []>} : vector<1x128xbf16>, vector<128x128xbf16>, vector<1x128xf32> -> vector<1x128xf32>
    %c0_60 = arith.constant 0 : index
    %c0_61 = arith.constant 0 : index
    %103 = vector.load %arg7[%c0_60, %c0_61] : memref<1x128xf32, #tpu.memory_space<vmem>>, vector<1x128xf32>
    %104 = arith.addf %102, %103 : vector<1x128xf32>
    %105 = arith.negf %104 : vector<1x128xf32>
    %106 = math.exp %105 : vector<1x128xf32>
    %cst_62 = arith.constant 1.000000e+00 : f32
    %107 = vector.broadcast %cst_62 : f32 to vector<1x128xf32>
    %108 = arith.addf %107, %106 : vector<1x128xf32>
    %109 = arith.divf %107, %108 : vector<1x128xf32>
    %110 = arith.mulf %104, %109 : vector<1x128xf32>
    %111 = arith.truncf %110 : vector<1x128xf32> to vector<1x128xbf16>
    %c0_63 = arith.constant 0 : index
    %c0_64 = arith.constant 0 : index
    %112 = vector.load %arg8[%c0_63, %c0_64] : memref<128x128xbf16, #tpu.memory_space<vmem>>, vector<128x128xbf16>
    %cst_65 = arith.constant dense<0.000000e+00> : vector<1x128xf32>
    %113 = tpu.matmul %111, %112, %cst_65 {dimension_numbers = #tpu.dot_dimension_numbers<[1], [0], [0], [1], [0, 0, 1, 1], [], []>} : vector<1x128xbf16>, vector<128x128xbf16>, vector<1x128xf32> -> vector<1x128xf32>
    %c0_66 = arith.constant 0 : index
    %c0_67 = arith.constant 0 : index
    %114 = vector.load %arg9[%c0_66, %c0_67] : memref<1x128xf32, #tpu.memory_space<vmem>>, vector<1x128xf32>
    %115 = arith.addf %113, %114 : vector<1x128xf32>
    %116 = arith.negf %115 : vector<1x128xf32>
    %117 = math.exp %116 : vector<1x128xf32>
    %cst_68 = arith.constant 1.000000e+00 : f32
    %118 = vector.broadcast %cst_68 : f32 to vector<1x128xf32>
    %119 = arith.addf %118, %117 : vector<1x128xf32>
    %120 = arith.divf %118, %119 : vector<1x128xf32>
    %121 = vector.broadcast %120 : vector<1x128xf32> to vector<64x128xf32>
    %122 = arith.mulf %95, %121 : vector<64x128xf32>
    %123 = arith.truncf %122 : vector<64x128xf32> to vector<64x128xbf16>
    %c0_69 = arith.constant 0 : index
    %c0_70 = arith.constant 0 : index
    %124 = vector.load %arg10[%c0_69, %c0_70] : memref<128x128xbf16, #tpu.memory_space<vmem>>, vector<128x128xbf16>
    %cst_71 = arith.constant dense<0.000000e+00> : vector<64x128xf32>
    %125 = tpu.matmul %123, %124, %cst_71 {dimension_numbers = #tpu.dot_dimension_numbers<[1], [0], [0], [1], [0, 0, 1, 1], [], []>} : vector<64x128xbf16>, vector<128x128xbf16>, vector<64x128xf32> -> vector<64x128xf32>
    %c0_72 = arith.constant 0 : index
    %c0_73 = arith.constant 0 : index
    %126 = vector.load %arg11[%c0_72, %c0_73] : memref<1x128xf32, #tpu.memory_space<vmem>>, vector<1x128xf32>
    %127 = vector.broadcast %126 : vector<1x128xf32> to vector<64x128xf32>
    %128 = arith.addf %125, %127 : vector<64x128xf32>
    %129 = arith.extf %1 : vector<64x128xbf16> to vector<64x128xf32>
    %130 = arith.addf %128, %129 : vector<64x128xf32>
    %131 = arith.truncf %130 : vector<64x128xf32> to vector<64x128xbf16>
    %c0_74 = arith.constant 0 : index
    %c0_75 = arith.constant 0 : index
    %c0_76 = arith.constant 0 : index
    %132 = vector.load %arg12[%c0_74, %c0_75, %c0_76] : memref<1x64x128xbf16, #tpu.memory_space<vmem>>, vector<1x64x128xbf16>
    %133 = vector.shape_cast %132 : vector<1x64x128xbf16> to vector<64x128xbf16>
    %134 = vector.shape_cast %131 : vector<64x128xbf16> to vector<1x64x128xbf16>
    tpu.vector_store %arg12[%c0_74, %c0_75, %c0_76], %134 {strides = array<i32>} : memref<1x64x128xbf16, #tpu.memory_space<vmem>>, vector<1x64x128xbf16>,
    return
  }
  func.func @transform_0(%arg0: i32) -> (i32, i32, i32) {
    %c0_i32 = arith.constant 0 : i32
    %c0_i32_0 = arith.constant 0 : i32
    %c0_i32_1 = arith.constant 0 : i32
    return %arg0, %c0_i32, %c0_i32_0 : i32, i32, i32
  }
  func.func @transform_1(%arg0: i32) -> (i32, i32) {
    %c0_i32 = arith.constant 0 : i32
    %c0_i32_0 = arith.constant 0 : i32
    %c0_i32_1 = arith.constant 0 : i32
    return %c0_i32, %c0_i32_0 : i32, i32
  }
  func.func @transform_2(%arg0: i32) -> (i32, i32) {
    %c0_i32 = arith.constant 0 : i32
    %c0_i32_0 = arith.constant 0 : i32
    %c0_i32_1 = arith.constant 0 : i32
    return %c0_i32, %c0_i32_0 : i32, i32
  }
  func.func @transform_3(%arg0: i32) -> (i32, i32) {
    %c0_i32 = arith.constant 0 : i32
    %c0_i32_0 = arith.constant 0 : i32
    %c0_i32_1 = arith.constant 0 : i32
    return %c0_i32, %c0_i32_0 : i32, i32
  }
  func.func @transform_4(%arg0: i32) -> (i32, i32) {
    %c0_i32 = arith.constant 0 : i32
    %c0_i32_0 = arith.constant 0 : i32
    %c0_i32_1 = arith.constant 0 : i32
    return %c0_i32, %c0_i32_0 : i32, i32
  }
  func.func @transform_5(%arg0: i32) -> (i32, i32) {
    %c0_i32 = arith.constant 0 : i32
    %c0_i32_0 = arith.constant 0 : i32
    %c0_i32_1 = arith.constant 0 : i32
    return %c0_i32, %c0_i32_0 : i32, i32
  }
  func.func @transform_6(%arg0: i32) -> (i32, i32) {
    %c0_i32 = arith.constant 0 : i32
    %c0_i32_0 = arith.constant 0 : i32
    %c0_i32_1 = arith.constant 0 : i32
    return %c0_i32, %c0_i32_0 : i32, i32
  }
  func.func @transform_7(%arg0: i32) -> (i32, i32) {
    %c0_i32 = arith.constant 0 : i32
    %c0_i32_0 = arith.constant 0 : i32
    %c0_i32_1 = arith.constant 0 : i32
    return %c0_i32, %c0_i32_0 : i32, i32
  }
  func.func @transform_8(%arg0: i32) -> (i32, i32) {
    %c0_i32 = arith.constant 0 : i32
    %c0_i32_0 = arith.constant 0 : i32
    %c0_i32_1 = arith.constant 0 : i32
    return %c0_i32, %c0_i32_0 : i32, i32
  }
  func.func @transform_9(%arg0: i32) -> (i32, i32) {
    %c0_i32 = arith.constant 0 : i32
    %c0_i32_0 = arith.constant 0 : i32
    %c0_i32_1 = arith.constant 0 : i32
    return %c0_i32, %c0_i32_0 : i32, i32
  }
  func.func @transform_10(%arg0: i32) -> (i32, i32) {
    %c0_i32 = arith.constant 0 : i32
    %c0_i32_0 = arith.constant 0 : i32
    %c0_i32_1 = arith.constant 0 : i32
    return %c0_i32, %c0_i32_0 : i32, i32
  }
  func.func @transform_11(%arg0: i32) -> (i32, i32, i32) {
    %c0_i32 = arith.constant 0 : i32
    %c0_i32_0 = arith.constant 0 : i32
    %c0_i32_1 = arith.constant 0 : i32
    return %arg0, %c0_i32, %c0_i32_0 : i32, i32, i32
  }
}

module attributes {stable_mosaic.version = 11 : i64} {
  func.func @kernel(%arg0: i32, %arg1: memref<1x64x128xbf16, #tpu.memory_space<vmem>>, %arg2: memref<128x128xbf16, #tpu.memory_space<vmem>>, %arg3: memref<1x128xf32, #tpu.memory_space<vmem>>, %arg4: memref<9x128xf32, #tpu.memory_space<vmem>>, %arg5: memref<1x128xf32, #tpu.memory_space<vmem>>, %arg6: memref<128x128xbf16, #tpu.memory_space<vmem>>, %arg7: memref<1x128xf32, #tpu.memory_space<vmem>>, %arg8: memref<128x128xbf16, #tpu.memory_space<vmem>>, %arg9: memref<1x128xf32, #tpu.memory_space<vmem>>, %arg10: memref<128x128xbf16, #tpu.memory_space<vmem>>, %arg11: memref<1x128xf32, #tpu.memory_space<vmem>>, %arg12: memref<1x16x128xbf16, #tpu.memory_space<vmem>>, %arg13: memref<64x128xf32, #tpu.memory_space<vmem>>, %arg14: memref<9x5x128xf32, #tpu.memory_space<vmem>>, %arg15: memref<9x4x128xf32, #tpu.memory_space<vmem>>) attributes {dimension_semantics = [#tpu.dimension_semantics<parallel>], iteration_bounds = array<i64: 2>, scalar_prefetch = 0 : i64, scratch_operands = 3 : i64, tpu.core_type = #tpu.core_type<tc>, window_params = [{transform_indices = @transform_0, window_bounds = array<i64: 1, 64, 128>}, {pipeline_mode = #tpu.pipeline_mode<synchronous>, transform_indices = @transform_1, window_bounds = array<i64: 128, 128>}, {pipeline_mode = #tpu.pipeline_mode<synchronous>, transform_indices = @transform_2, window_bounds = array<i64: 1, 128>}, {pipeline_mode = #tpu.pipeline_mode<synchronous>, transform_indices = @transform_3, window_bounds = array<i64: 9, 128>}, {pipeline_mode = #tpu.pipeline_mode<synchronous>, transform_indices = @transform_4, window_bounds = array<i64: 1, 128>}, {pipeline_mode = #tpu.pipeline_mode<synchronous>, transform_indices = @transform_5, window_bounds = array<i64: 128, 128>}, {pipeline_mode = #tpu.pipeline_mode<synchronous>, transform_indices = @transform_6, window_bounds = array<i64: 1, 128>}, {pipeline_mode = #tpu.pipeline_mode<synchronous>, transform_indices = @transform_7, window_bounds = array<i64: 128, 128>}, {pipeline_mode = #tpu.pipeline_mode<synchronous>, transform_indices = @transform_8, window_bounds = array<i64: 1, 128>}, {pipeline_mode = #tpu.pipeline_mode<synchronous>, transform_indices = @transform_9, window_bounds = array<i64: 128, 128>}, {pipeline_mode = #tpu.pipeline_mode<synchronous>, transform_indices = @transform_10, window_bounds = array<i64: 1, 128>}, {transform_indices = @transform_11, window_bounds = array<i64: 1, 16, 128>}]} {
    %c0 = arith.constant 0 : index
    %c0_0 = arith.constant 0 : index
    %c0_1 = arith.constant 0 : index
    %0 = vector.load %arg1[%c0, %c0_0, %c0_1] : memref<1x64x128xbf16, #tpu.memory_space<vmem>>, vector<1x64x128xbf16>
    %1 = vector.shape_cast %0 : vector<1x64x128xbf16> to vector<64x128xbf16>
    %c0_2 = arith.constant 0 : index
    %c0_3 = arith.constant 0 : index
    %2 = vector.load %arg2[%c0_2, %c0_3] : memref<128x128xbf16, #tpu.memory_space<vmem>>, vector<128x128xbf16>
    %cst = arith.constant dense<0.000000e+00> : vector<64x128xf32>
    %3 = tpu.matmul %1, %2, %cst {dimension_numbers = #tpu.dot_dimension_numbers<[1], [0], [0], [1], [0, 0, 1, 1], [], []>} : vector<64x128xbf16>, vector<128x128xbf16>, vector<64x128xf32> -> vector<64x128xf32>
    %c0_4 = arith.constant 0 : index
    %c0_5 = arith.constant 0 : index
    %4 = vector.load %arg3[%c0_4, %c0_5] : memref<1x128xf32, #tpu.memory_space<vmem>>, vector<1x128xf32>
    %5 = vector.broadcast %4 : vector<1x128xf32> to vector<64x128xf32>
    %6 = arith.addf %3, %5 : vector<64x128xf32>
    %7 = arith.negf %6 : vector<64x128xf32>
    %8 = math.exp %7 : vector<64x128xf32>
    %cst_6 = arith.constant 1.000000e+00 : f32
    %9 = vector.broadcast %cst_6 : f32 to vector<64x128xf32>
    %10 = arith.addf %9, %8 : vector<64x128xf32>
    %11 = arith.divf %9, %10 : vector<64x128xf32>
    %12 = arith.mulf %6, %11 : vector<64x128xf32>
    %c0_7 = arith.constant 0 : index
    %c0_8 = arith.constant 0 : index
    %13 = vector.load %arg4[%c0_7, %c0_8] : memref<9x128xf32, #tpu.memory_space<vmem>>, vector<9x128xf32>
    %c0_9 = arith.constant 0 : index
    %c0_10 = arith.constant 0 : index
    %14 = vector.load %arg13[%c0_9, %c0_10] : memref<64x128xf32, #tpu.memory_space<vmem>>, vector<64x128xf32>
    tpu.vector_store %arg13[%c0_9, %c0_10], %12 {strides = array<i32>} : memref<64x128xf32, #tpu.memory_space<vmem>>, vector<64x128xf32>,
    %c0_11 = arith.constant 0 : index
    %c0_12 = arith.constant 0 : index
    %15 = tpu.strided_load %arg13[%c0_11, %c0_12] {strides = array<i32: 2, 1>} : memref<64x128xf32, #tpu.memory_space<vmem>>, vector<32x128xf32>
    %c1 = arith.constant 1 : index
    %c0_13 = arith.constant 0 : index
    %16 = tpu.strided_load %arg13[%c1, %c0_13] {strides = array<i32: 2, 1>} : memref<64x128xf32, #tpu.memory_space<vmem>>, vector<32x128xf32>
    %cst_14 = arith.constant 0.000000e+00 : f32
    %17 = vector.broadcast %cst_14 : f32 to vector<1x5x128xf32>
    %c8 = arith.constant 8 : index
    %c0_15 = arith.constant 0 : index
    %c0_16 = arith.constant 0 : index
    %18 = vector.load %arg14[%c8, %c0_15, %c0_16] : memref<9x5x128xf32, #tpu.memory_space<vmem>>, vector<1x5x128xf32>
    tpu.vector_store %arg14[%c8, %c0_15, %c0_16], %17 {strides = array<i32>} : memref<9x5x128xf32, #tpu.memory_space<vmem>>, vector<1x5x128xf32>,
    %cst_17 = arith.constant 0.000000e+00 : f32
    %19 = vector.broadcast %cst_17 : f32 to vector<1x4x128xf32>
    %c8_18 = arith.constant 8 : index
    %c0_19 = arith.constant 0 : index
    %c0_20 = arith.constant 0 : index
    %20 = vector.load %arg15[%c8_18, %c0_19, %c0_20] : memref<9x4x128xf32, #tpu.memory_space<vmem>>, vector<1x4x128xf32>
    tpu.vector_store %arg15[%c8_18, %c0_19, %c0_20], %19 {strides = array<i32>} : memref<9x4x128xf32, #tpu.memory_space<vmem>>, vector<1x4x128xf32>,
    %cst_21 = arith.constant 0.000000e+00 : f32
    %21 = vector.broadcast %cst_21 : f32 to vector<8x1x128xf32>
    %c0_22 = arith.constant 0 : index
    %c4 = arith.constant 4 : index
    %c0_23 = arith.constant 0 : index
    %22 = vector.load %arg14[%c0_22, %c4, %c0_23] : memref<9x5x128xf32, #tpu.memory_space<vmem>>, vector<8x1x128xf32>
    tpu.vector_store %arg14[%c0_22, %c4, %c0_23], %21 {strides = array<i32>} : memref<9x5x128xf32, #tpu.memory_space<vmem>>, vector<8x1x128xf32>,
    %23 = vector.shape_cast %15 : vector<32x128xf32> to vector<8x4x128xf32>
    %c0_24 = arith.constant 0 : index
    %c0_25 = arith.constant 0 : index
    %c0_26 = arith.constant 0 : index
    %24 = vector.load %arg14[%c0_24, %c0_25, %c0_26] : memref<9x5x128xf32, #tpu.memory_space<vmem>>, vector<8x4x128xf32>
    tpu.vector_store %arg14[%c0_24, %c0_25, %c0_26], %23 {strides = array<i32>} : memref<9x5x128xf32, #tpu.memory_space<vmem>>, vector<8x4x128xf32>,
    %25 = vector.shape_cast %16 : vector<32x128xf32> to vector<8x4x128xf32>
    %c0_27 = arith.constant 0 : index
    %c0_28 = arith.constant 0 : index
    %c0_29 = arith.constant 0 : index
    %26 = vector.load %arg15[%c0_27, %c0_28, %c0_29] : memref<9x4x128xf32, #tpu.memory_space<vmem>>, vector<8x4x128xf32>
    tpu.vector_store %arg15[%c0_27, %c0_28, %c0_29], %25 {strides = array<i32>} : memref<9x4x128xf32, #tpu.memory_space<vmem>>, vector<8x4x128xf32>,
    %c0_30 = arith.constant 0 : index
    %c0_31 = arith.constant 0 : index
    %c0_32 = arith.constant 0 : index
    %27 = tpu.strided_load %arg14[%c0_30, %c0_31, %c0_32] {strides = array<i32: 2, 1, 1>} : memref<9x5x128xf32, #tpu.memory_space<vmem>>, vector<4x4x128xf32>
    %28 = vector.extract_strided_slice %13 {offsets = [0, 0], sizes = [1, 128], strides = [1, 1]} : vector<9x128xf32> to vector<1x128xf32>
    %29 = vector.shape_cast %28 : vector<1x128xf32> to vector<128xf32>
    %30 = vector.shape_cast %29 : vector<128xf32> to vector<1x1x128xf32>
    %31 = vector.broadcast %30 : vector<1x1x128xf32> to vector<4x4x128xf32>
    %32 = arith.mulf %27, %31 : vector<4x4x128xf32>
    %c0_33 = arith.constant 0 : index
    %c0_34 = arith.constant 0 : index
    %c0_35 = arith.constant 0 : index
    %33 = tpu.strided_load %arg15[%c0_33, %c0_34, %c0_35] {strides = array<i32: 2, 1, 1>} : memref<9x4x128xf32, #tpu.memory_space<vmem>>, vector<4x4x128xf32>
    %34 = vector.extract_strided_slice %13 {offsets = [1, 0], sizes = [1, 128], strides = [1, 1]} : vector<9x128xf32> to vector<1x128xf32>
    %35 = vector.shape_cast %34 : vector<1x128xf32> to vector<128xf32>
    %36 = vector.shape_cast %35 : vector<128xf32> to vector<1x1x128xf32>
    %37 = vector.broadcast %36 : vector<1x1x128xf32> to vector<4x4x128xf32>
    %38 = arith.mulf %33, %37 : vector<4x4x128xf32>
    %39 = arith.addf %32, %38 : vector<4x4x128xf32>
    %c0_36 = arith.constant 0 : index
    %c1_37 = arith.constant 1 : index
    %c0_38 = arith.constant 0 : index
    %40 = tpu.strided_load %arg14[%c0_36, %c1_37, %c0_38] {strides = array<i32: 2, 1, 1>} : memref<9x5x128xf32, #tpu.memory_space<vmem>>, vector<4x4x128xf32>
    %41 = vector.extract_strided_slice %13 {offsets = [2, 0], sizes = [1, 128], strides = [1, 1]} : vector<9x128xf32> to vector<1x128xf32>
    %42 = vector.shape_cast %41 : vector<1x128xf32> to vector<128xf32>
    %43 = vector.shape_cast %42 : vector<128xf32> to vector<1x1x128xf32>
    %44 = vector.broadcast %43 : vector<1x1x128xf32> to vector<4x4x128xf32>
    %45 = arith.mulf %40, %44 : vector<4x4x128xf32>
    %46 = arith.addf %39, %45 : vector<4x4x128xf32>
    %c1_39 = arith.constant 1 : index
    %c0_40 = arith.constant 0 : index
    %c0_41 = arith.constant 0 : index
    %47 = tpu.strided_load %arg14[%c1_39, %c0_40, %c0_41] {strides = array<i32: 2, 1, 1>} : memref<9x5x128xf32, #tpu.memory_space<vmem>>, vector<4x4x128xf32>
    %48 = vector.extract_strided_slice %13 {offsets = [3, 0], sizes = [1, 128], strides = [1, 1]} : vector<9x128xf32> to vector<1x128xf32>
    %49 = vector.shape_cast %48 : vector<1x128xf32> to vector<128xf32>
    %50 = vector.shape_cast %49 : vector<128xf32> to vector<1x1x128xf32>
    %51 = vector.broadcast %50 : vector<1x1x128xf32> to vector<4x4x128xf32>
    %52 = arith.mulf %47, %51 : vector<4x4x128xf32>
    %53 = arith.addf %46, %52 : vector<4x4x128xf32>
    %c1_42 = arith.constant 1 : index
    %c0_43 = arith.constant 0 : index
    %c0_44 = arith.constant 0 : index
    %54 = tpu.strided_load %arg15[%c1_42, %c0_43, %c0_44] {strides = array<i32: 2, 1, 1>} : memref<9x4x128xf32, #tpu.memory_space<vmem>>, vector<4x4x128xf32>
    %55 = vector.extract_strided_slice %13 {offsets = [4, 0], sizes = [1, 128], strides = [1, 1]} : vector<9x128xf32> to vector<1x128xf32>
    %56 = vector.shape_cast %55 : vector<1x128xf32> to vector<128xf32>
    %57 = vector.shape_cast %56 : vector<128xf32> to vector<1x1x128xf32>
    %58 = vector.broadcast %57 : vector<1x1x128xf32> to vector<4x4x128xf32>
    %59 = arith.mulf %54, %58 : vector<4x4x128xf32>
    %60 = arith.addf %53, %59 : vector<4x4x128xf32>
    %c1_45 = arith.constant 1 : index
    %c1_46 = arith.constant 1 : index
    %c0_47 = arith.constant 0 : index
    %61 = tpu.strided_load %arg14[%c1_45, %c1_46, %c0_47] {strides = array<i32: 2, 1, 1>} : memref<9x5x128xf32, #tpu.memory_space<vmem>>, vector<4x4x128xf32>
    %62 = vector.extract_strided_slice %13 {offsets = [5, 0], sizes = [1, 128], strides = [1, 1]} : vector<9x128xf32> to vector<1x128xf32>
    %63 = vector.shape_cast %62 : vector<1x128xf32> to vector<128xf32>
    %64 = vector.shape_cast %63 : vector<128xf32> to vector<1x1x128xf32>
    %65 = vector.broadcast %64 : vector<1x1x128xf32> to vector<4x4x128xf32>
    %66 = arith.mulf %61, %65 : vector<4x4x128xf32>
    %67 = arith.addf %60, %66 : vector<4x4x128xf32>
    %c2 = arith.constant 2 : index
    %c0_48 = arith.constant 0 : index
    %c0_49 = arith.constant 0 : index
    %68 = tpu.strided_load %arg14[%c2, %c0_48, %c0_49] {strides = array<i32: 2, 1, 1>} : memref<9x5x128xf32, #tpu.memory_space<vmem>>, vector<4x4x128xf32>
    %69 = vector.extract_strided_slice %13 {offsets = [6, 0], sizes = [1, 128], strides = [1, 1]} : vector<9x128xf32> to vector<1x128xf32>
    %70 = vector.shape_cast %69 : vector<1x128xf32> to vector<128xf32>
    %71 = vector.shape_cast %70 : vector<128xf32> to vector<1x1x128xf32>
    %72 = vector.broadcast %71 : vector<1x1x128xf32> to vector<4x4x128xf32>
    %73 = arith.mulf %68, %72 : vector<4x4x128xf32>
    %74 = arith.addf %67, %73 : vector<4x4x128xf32>
    %c2_50 = arith.constant 2 : index
    %c0_51 = arith.constant 0 : index
    %c0_52 = arith.constant 0 : index
    %75 = tpu.strided_load %arg15[%c2_50, %c0_51, %c0_52] {strides = array<i32: 2, 1, 1>} : memref<9x4x128xf32, #tpu.memory_space<vmem>>, vector<4x4x128xf32>
    %76 = vector.extract_strided_slice %13 {offsets = [7, 0], sizes = [1, 128], strides = [1, 1]} : vector<9x128xf32> to vector<1x128xf32>
    %77 = vector.shape_cast %76 : vector<1x128xf32> to vector<128xf32>
    %78 = vector.shape_cast %77 : vector<128xf32> to vector<1x1x128xf32>
    %79 = vector.broadcast %78 : vector<1x1x128xf32> to vector<4x4x128xf32>
    %80 = arith.mulf %75, %79 : vector<4x4x128xf32>
    %81 = arith.addf %74, %80 : vector<4x4x128xf32>
    %c2_53 = arith.constant 2 : index
    %c1_54 = arith.constant 1 : index
    %c0_55 = arith.constant 0 : index
    %82 = tpu.strided_load %arg14[%c2_53, %c1_54, %c0_55] {strides = array<i32: 2, 1, 1>} : memref<9x5x128xf32, #tpu.memory_space<vmem>>, vector<4x4x128xf32>
    %83 = vector.extract_strided_slice %13 {offsets = [8, 0], sizes = [1, 128], strides = [1, 1]} : vector<9x128xf32> to vector<1x128xf32>
    %84 = vector.shape_cast %83 : vector<1x128xf32> to vector<128xf32>
    %85 = vector.shape_cast %84 : vector<128xf32> to vector<1x1x128xf32>
    %86 = vector.broadcast %85 : vector<1x1x128xf32> to vector<4x4x128xf32>
    %87 = arith.mulf %82, %86 : vector<4x4x128xf32>
    %88 = arith.addf %81, %87 : vector<4x4x128xf32>
    %89 = vector.shape_cast %88 : vector<4x4x128xf32> to vector<16x128xf32>
    %c0_56 = arith.constant 0 : index
    %c0_57 = arith.constant 0 : index
    %90 = vector.load %arg5[%c0_56, %c0_57] : memref<1x128xf32, #tpu.memory_space<vmem>>, vector<1x128xf32>
    %91 = vector.broadcast %90 : vector<1x128xf32> to vector<16x128xf32>
    %92 = arith.addf %89, %91 : vector<16x128xf32>
    %93 = arith.negf %92 : vector<16x128xf32>
    %94 = math.exp %93 : vector<16x128xf32>
    %cst_58 = arith.constant 1.000000e+00 : f32
    %95 = vector.broadcast %cst_58 : f32 to vector<16x128xf32>
    %96 = arith.addf %95, %94 : vector<16x128xf32>
    %97 = arith.divf %95, %96 : vector<16x128xf32>
    %98 = arith.mulf %92, %97 : vector<16x128xf32>
    %cst_59 = arith.constant dense<0.000000e+00> : vector<128xf32>
    %99 = vector.multi_reduction <add>, %98, %cst_59 [0] : vector<16x128xf32> to vector<128xf32>
    %100 = vector.shape_cast %99 : vector<128xf32> to vector<1x128xf32>
    %cst_60 = arith.constant 6.250000e-02 : f32
    %101 = vector.broadcast %cst_60 : f32 to vector<1x128xf32>
    %102 = arith.mulf %100, %101 : vector<1x128xf32>
    %103 = arith.truncf %102 : vector<1x128xf32> to vector<1x128xbf16>
    %c0_61 = arith.constant 0 : index
    %c0_62 = arith.constant 0 : index
    %104 = vector.load %arg6[%c0_61, %c0_62] : memref<128x128xbf16, #tpu.memory_space<vmem>>, vector<128x128xbf16>
    %cst_63 = arith.constant dense<0.000000e+00> : vector<1x128xf32>
    %105 = tpu.matmul %103, %104, %cst_63 {dimension_numbers = #tpu.dot_dimension_numbers<[1], [0], [0], [1], [0, 0, 1, 1], [], []>} : vector<1x128xbf16>, vector<128x128xbf16>, vector<1x128xf32> -> vector<1x128xf32>
    %c0_64 = arith.constant 0 : index
    %c0_65 = arith.constant 0 : index
    %106 = vector.load %arg7[%c0_64, %c0_65] : memref<1x128xf32, #tpu.memory_space<vmem>>, vector<1x128xf32>
    %107 = arith.addf %105, %106 : vector<1x128xf32>
    %108 = arith.negf %107 : vector<1x128xf32>
    %109 = math.exp %108 : vector<1x128xf32>
    %cst_66 = arith.constant 1.000000e+00 : f32
    %110 = vector.broadcast %cst_66 : f32 to vector<1x128xf32>
    %111 = arith.addf %110, %109 : vector<1x128xf32>
    %112 = arith.divf %110, %111 : vector<1x128xf32>
    %113 = arith.mulf %107, %112 : vector<1x128xf32>
    %114 = arith.truncf %113 : vector<1x128xf32> to vector<1x128xbf16>
    %c0_67 = arith.constant 0 : index
    %c0_68 = arith.constant 0 : index
    %115 = vector.load %arg8[%c0_67, %c0_68] : memref<128x128xbf16, #tpu.memory_space<vmem>>, vector<128x128xbf16>
    %cst_69 = arith.constant dense<0.000000e+00> : vector<1x128xf32>
    %116 = tpu.matmul %114, %115, %cst_69 {dimension_numbers = #tpu.dot_dimension_numbers<[1], [0], [0], [1], [0, 0, 1, 1], [], []>} : vector<1x128xbf16>, vector<128x128xbf16>, vector<1x128xf32> -> vector<1x128xf32>
    %c0_70 = arith.constant 0 : index
    %c0_71 = arith.constant 0 : index
    %117 = vector.load %arg9[%c0_70, %c0_71] : memref<1x128xf32, #tpu.memory_space<vmem>>, vector<1x128xf32>
    %118 = arith.addf %116, %117 : vector<1x128xf32>
    %119 = arith.negf %118 : vector<1x128xf32>
    %120 = math.exp %119 : vector<1x128xf32>
    %cst_72 = arith.constant 1.000000e+00 : f32
    %121 = vector.broadcast %cst_72 : f32 to vector<1x128xf32>
    %122 = arith.addf %121, %120 : vector<1x128xf32>
    %123 = arith.divf %121, %122 : vector<1x128xf32>
    %124 = vector.broadcast %123 : vector<1x128xf32> to vector<16x128xf32>
    %125 = arith.mulf %98, %124 : vector<16x128xf32>
    %126 = arith.truncf %125 : vector<16x128xf32> to vector<16x128xbf16>
    %c0_73 = arith.constant 0 : index
    %c0_74 = arith.constant 0 : index
    %127 = vector.load %arg10[%c0_73, %c0_74] : memref<128x128xbf16, #tpu.memory_space<vmem>>, vector<128x128xbf16>
    %cst_75 = arith.constant dense<0.000000e+00> : vector<16x128xf32>
    %128 = tpu.matmul %126, %127, %cst_75 {dimension_numbers = #tpu.dot_dimension_numbers<[1], [0], [0], [1], [0, 0, 1, 1], [], []>} : vector<16x128xbf16>, vector<128x128xbf16>, vector<16x128xf32> -> vector<16x128xf32>
    %c0_76 = arith.constant 0 : index
    %c0_77 = arith.constant 0 : index
    %129 = vector.load %arg11[%c0_76, %c0_77] : memref<1x128xf32, #tpu.memory_space<vmem>>, vector<1x128xf32>
    %130 = vector.broadcast %129 : vector<1x128xf32> to vector<16x128xf32>
    %131 = arith.addf %128, %130 : vector<16x128xf32>
    %132 = arith.truncf %131 : vector<16x128xf32> to vector<16x128xbf16>
    %c0_78 = arith.constant 0 : index
    %c0_79 = arith.constant 0 : index
    %c0_80 = arith.constant 0 : index
    %133 = vector.load %arg12[%c0_78, %c0_79, %c0_80] : memref<1x16x128xbf16, #tpu.memory_space<vmem>>, vector<1x16x128xbf16>
    %134 = vector.shape_cast %133 : vector<1x16x128xbf16> to vector<16x128xbf16>
    %135 = vector.shape_cast %132 : vector<16x128xbf16> to vector<1x16x128xbf16>
    tpu.vector_store %arg12[%c0_78, %c0_79, %c0_80], %135 {strides = array<i32>} : memref<1x16x128xbf16, #tpu.memory_space<vmem>>, vector<1x16x128xbf16>,
    return
  }
  func.func @transform_0(%arg0: i32) -> (i32, i32, i32) {
    %c0_i32 = arith.constant 0 : i32
    %c0_i32_0 = arith.constant 0 : i32
    %c0_i32_1 = arith.constant 0 : i32
    return %arg0, %c0_i32, %c0_i32_0 : i32, i32, i32
  }
  func.func @transform_1(%arg0: i32) -> (i32, i32) {
    %c0_i32 = arith.constant 0 : i32
    %c0_i32_0 = arith.constant 0 : i32
    %c0_i32_1 = arith.constant 0 : i32
    return %c0_i32, %c0_i32_0 : i32, i32
  }
  func.func @transform_2(%arg0: i32) -> (i32, i32) {
    %c0_i32 = arith.constant 0 : i32
    %c0_i32_0 = arith.constant 0 : i32
    %c0_i32_1 = arith.constant 0 : i32
    return %c0_i32, %c0_i32_0 : i32, i32
  }
  func.func @transform_3(%arg0: i32) -> (i32, i32) {
    %c0_i32 = arith.constant 0 : i32
    %c0_i32_0 = arith.constant 0 : i32
    %c0_i32_1 = arith.constant 0 : i32
    return %c0_i32, %c0_i32_0 : i32, i32
  }
  func.func @transform_4(%arg0: i32) -> (i32, i32) {
    %c0_i32 = arith.constant 0 : i32
    %c0_i32_0 = arith.constant 0 : i32
    %c0_i32_1 = arith.constant 0 : i32
    return %c0_i32, %c0_i32_0 : i32, i32
  }
  func.func @transform_5(%arg0: i32) -> (i32, i32) {
    %c0_i32 = arith.constant 0 : i32
    %c0_i32_0 = arith.constant 0 : i32
    %c0_i32_1 = arith.constant 0 : i32
    return %c0_i32, %c0_i32_0 : i32, i32
  }
  func.func @transform_6(%arg0: i32) -> (i32, i32) {
    %c0_i32 = arith.constant 0 : i32
    %c0_i32_0 = arith.constant 0 : i32
    %c0_i32_1 = arith.constant 0 : i32
    return %c0_i32, %c0_i32_0 : i32, i32
  }
  func.func @transform_7(%arg0: i32) -> (i32, i32) {
    %c0_i32 = arith.constant 0 : i32
    %c0_i32_0 = arith.constant 0 : i32
    %c0_i32_1 = arith.constant 0 : i32
    return %c0_i32, %c0_i32_0 : i32, i32
  }
  func.func @transform_8(%arg0: i32) -> (i32, i32) {
    %c0_i32 = arith.constant 0 : i32
    %c0_i32_0 = arith.constant 0 : i32
    %c0_i32_1 = arith.constant 0 : i32
    return %c0_i32, %c0_i32_0 : i32, i32
  }
  func.func @transform_9(%arg0: i32) -> (i32, i32) {
    %c0_i32 = arith.constant 0 : i32
    %c0_i32_0 = arith.constant 0 : i32
    %c0_i32_1 = arith.constant 0 : i32
    return %c0_i32, %c0_i32_0 : i32, i32
  }
  func.func @transform_10(%arg0: i32) -> (i32, i32) {
    %c0_i32 = arith.constant 0 : i32
    %c0_i32_0 = arith.constant 0 : i32
    %c0_i32_1 = arith.constant 0 : i32
    return %c0_i32, %c0_i32_0 : i32, i32
  }
  func.func @transform_11(%arg0: i32) -> (i32, i32, i32) {
    %c0_i32 = arith.constant 0 : i32
    %c0_i32_0 = arith.constant 0 : i32
    %c0_i32_1 = arith.constant 0 : i32
    return %arg0, %c0_i32, %c0_i32_0 : i32, i32, i32
  }
}

module attributes {stable_mosaic.version = 11 : i64} {
  func.func @kernel(%arg0: i32, %arg1: memref<1x16x128xbf16, #tpu.memory_space<vmem>>, %arg2: memref<128x128xbf16, #tpu.memory_space<vmem>>, %arg3: memref<1x128xf32, #tpu.memory_space<vmem>>, %arg4: memref<9x128xf32, #tpu.memory_space<vmem>>, %arg5: memref<1x128xf32, #tpu.memory_space<vmem>>, %arg6: memref<128x128xbf16, #tpu.memory_space<vmem>>, %arg7: memref<1x128xf32, #tpu.memory_space<vmem>>, %arg8: memref<128x128xbf16, #tpu.memory_space<vmem>>, %arg9: memref<1x128xf32, #tpu.memory_space<vmem>>, %arg10: memref<128x128xbf16, #tpu.memory_space<vmem>>, %arg11: memref<1x128xf32, #tpu.memory_space<vmem>>, %arg12: memref<1x16x128xbf16, #tpu.memory_space<vmem>>, %arg13: memref<6x6x128xf32, #tpu.memory_space<vmem>>) attributes {dimension_semantics = [#tpu.dimension_semantics<parallel>], iteration_bounds = array<i64: 2>, scalar_prefetch = 0 : i64, scratch_operands = 1 : i64, tpu.core_type = #tpu.core_type<tc>, window_params = [{transform_indices = @transform_0, window_bounds = array<i64: 1, 16, 128>}, {pipeline_mode = #tpu.pipeline_mode<synchronous>, transform_indices = @transform_1, window_bounds = array<i64: 128, 128>}, {pipeline_mode = #tpu.pipeline_mode<synchronous>, transform_indices = @transform_2, window_bounds = array<i64: 1, 128>}, {pipeline_mode = #tpu.pipeline_mode<synchronous>, transform_indices = @transform_3, window_bounds = array<i64: 9, 128>}, {pipeline_mode = #tpu.pipeline_mode<synchronous>, transform_indices = @transform_4, window_bounds = array<i64: 1, 128>}, {pipeline_mode = #tpu.pipeline_mode<synchronous>, transform_indices = @transform_5, window_bounds = array<i64: 128, 128>}, {pipeline_mode = #tpu.pipeline_mode<synchronous>, transform_indices = @transform_6, window_bounds = array<i64: 1, 128>}, {pipeline_mode = #tpu.pipeline_mode<synchronous>, transform_indices = @transform_7, window_bounds = array<i64: 128, 128>}, {pipeline_mode = #tpu.pipeline_mode<synchronous>, transform_indices = @transform_8, window_bounds = array<i64: 1, 128>}, {pipeline_mode = #tpu.pipeline_mode<synchronous>, transform_indices = @transform_9, window_bounds = array<i64: 128, 128>}, {pipeline_mode = #tpu.pipeline_mode<synchronous>, transform_indices = @transform_10, window_bounds = array<i64: 1, 128>}, {transform_indices = @transform_11, window_bounds = array<i64: 1, 16, 128>}]} {
    %c0 = arith.constant 0 : index
    %c0_0 = arith.constant 0 : index
    %c0_1 = arith.constant 0 : index
    %0 = vector.load %arg1[%c0, %c0_0, %c0_1] : memref<1x16x128xbf16, #tpu.memory_space<vmem>>, vector<1x16x128xbf16>
    %1 = vector.shape_cast %0 : vector<1x16x128xbf16> to vector<16x128xbf16>
    %c0_2 = arith.constant 0 : index
    %c0_3 = arith.constant 0 : index
    %2 = vector.load %arg2[%c0_2, %c0_3] : memref<128x128xbf16, #tpu.memory_space<vmem>>, vector<128x128xbf16>
    %cst = arith.constant dense<0.000000e+00> : vector<16x128xf32>
    %3 = tpu.matmul %1, %2, %cst {dimension_numbers = #tpu.dot_dimension_numbers<[1], [0], [0], [1], [0, 0, 1, 1], [], []>} : vector<16x128xbf16>, vector<128x128xbf16>, vector<16x128xf32> -> vector<16x128xf32>
    %c0_4 = arith.constant 0 : index
    %c0_5 = arith.constant 0 : index
    %4 = vector.load %arg3[%c0_4, %c0_5] : memref<1x128xf32, #tpu.memory_space<vmem>>, vector<1x128xf32>
    %5 = vector.broadcast %4 : vector<1x128xf32> to vector<16x128xf32>
    %6 = arith.addf %3, %5 : vector<16x128xf32>
    %7 = arith.negf %6 : vector<16x128xf32>
    %8 = math.exp %7 : vector<16x128xf32>
    %cst_6 = arith.constant 1.000000e+00 : f32
    %9 = vector.broadcast %cst_6 : f32 to vector<16x128xf32>
    %10 = arith.addf %9, %8 : vector<16x128xf32>
    %11 = arith.divf %9, %10 : vector<16x128xf32>
    %12 = arith.mulf %6, %11 : vector<16x128xf32>
    %c0_7 = arith.constant 0 : index
    %c0_8 = arith.constant 0 : index
    %13 = vector.load %arg4[%c0_7, %c0_8] : memref<9x128xf32, #tpu.memory_space<vmem>>, vector<9x128xf32>
    %cst_9 = arith.constant 0.000000e+00 : f32
    %14 = vector.broadcast %cst_9 : f32 to vector<1x6x128xf32>
    %c0_10 = arith.constant 0 : index
    %c0_11 = arith.constant 0 : index
    %c0_12 = arith.constant 0 : index
    %15 = vector.load %arg13[%c0_10, %c0_11, %c0_12] : memref<6x6x128xf32, #tpu.memory_space<vmem>>, vector<1x6x128xf32>
    tpu.vector_store %arg13[%c0_10, %c0_11, %c0_12], %14 {strides = array<i32>} : memref<6x6x128xf32, #tpu.memory_space<vmem>>, vector<1x6x128xf32>,
    %cst_13 = arith.constant 0.000000e+00 : f32
    %16 = vector.broadcast %cst_13 : f32 to vector<1x6x128xf32>
    %c5 = arith.constant 5 : index
    %c0_14 = arith.constant 0 : index
    %c0_15 = arith.constant 0 : index
    %17 = vector.load %arg13[%c5, %c0_14, %c0_15] : memref<6x6x128xf32, #tpu.memory_space<vmem>>, vector<1x6x128xf32>
    tpu.vector_store %arg13[%c5, %c0_14, %c0_15], %16 {strides = array<i32>} : memref<6x6x128xf32, #tpu.memory_space<vmem>>, vector<1x6x128xf32>,
    %cst_16 = arith.constant 0.000000e+00 : f32
    %18 = vector.broadcast %cst_16 : f32 to vector<4x1x128xf32>
    %c1 = arith.constant 1 : index
    %c0_17 = arith.constant 0 : index
    %c0_18 = arith.constant 0 : index
    %19 = vector.load %arg13[%c1, %c0_17, %c0_18] : memref<6x6x128xf32, #tpu.memory_space<vmem>>, vector<4x1x128xf32>
    tpu.vector_store %arg13[%c1, %c0_17, %c0_18], %18 {strides = array<i32>} : memref<6x6x128xf32, #tpu.memory_space<vmem>>, vector<4x1x128xf32>,
    %cst_19 = arith.constant 0.000000e+00 : f32
    %20 = vector.broadcast %cst_19 : f32 to vector<4x1x128xf32>
    %c1_20 = arith.constant 1 : index
    %c5_21 = arith.constant 5 : index
    %c0_22 = arith.constant 0 : index
    %21 = vector.load %arg13[%c1_20, %c5_21, %c0_22] : memref<6x6x128xf32, #tpu.memory_space<vmem>>, vector<4x1x128xf32>
    tpu.vector_store %arg13[%c1_20, %c5_21, %c0_22], %20 {strides = array<i32>} : memref<6x6x128xf32, #tpu.memory_space<vmem>>, vector<4x1x128xf32>,
    %22 = vector.shape_cast %12 : vector<16x128xf32> to vector<4x4x128xf32>
    %c1_23 = arith.constant 1 : index
    %c1_24 = arith.constant 1 : index
    %c0_25 = arith.constant 0 : index
    %23 = vector.load %arg13[%c1_23, %c1_24, %c0_25] : memref<6x6x128xf32, #tpu.memory_space<vmem>>, vector<4x4x128xf32>
    tpu.vector_store %arg13[%c1_23, %c1_24, %c0_25], %22 {strides = array<i32>} : memref<6x6x128xf32, #tpu.memory_space<vmem>>, vector<4x4x128xf32>,
    %c0_26 = arith.constant 0 : index
    %c0_27 = arith.constant 0 : index
    %c0_28 = arith.constant 0 : index
    %24 = vector.load %arg13[%c0_26, %c0_27, %c0_28] : memref<6x6x128xf32, #tpu.memory_space<vmem>>, vector<4x4x128xf32>
    %25 = vector.extract_strided_slice %13 {offsets = [0, 0], sizes = [1, 128], strides = [1, 1]} : vector<9x128xf32> to vector<1x128xf32>
    %26 = vector.shape_cast %25 : vector<1x128xf32> to vector<128xf32>
    %27 = vector.shape_cast %26 : vector<128xf32> to vector<1x1x128xf32>
    %28 = vector.broadcast %27 : vector<1x1x128xf32> to vector<4x4x128xf32>
    %29 = arith.mulf %24, %28 : vector<4x4x128xf32>
    %c0_29 = arith.constant 0 : index
    %c1_30 = arith.constant 1 : index
    %c0_31 = arith.constant 0 : index
    %30 = vector.load %arg13[%c0_29, %c1_30, %c0_31] : memref<6x6x128xf32, #tpu.memory_space<vmem>>, vector<4x4x128xf32>
    %31 = vector.extract_strided_slice %13 {offsets = [1, 0], sizes = [1, 128], strides = [1, 1]} : vector<9x128xf32> to vector<1x128xf32>
    %32 = vector.shape_cast %31 : vector<1x128xf32> to vector<128xf32>
    %33 = vector.shape_cast %32 : vector<128xf32> to vector<1x1x128xf32>
    %34 = vector.broadcast %33 : vector<1x1x128xf32> to vector<4x4x128xf32>
    %35 = arith.mulf %30, %34 : vector<4x4x128xf32>
    %36 = arith.addf %29, %35 : vector<4x4x128xf32>
    %c0_32 = arith.constant 0 : index
    %c2 = arith.constant 2 : index
    %c0_33 = arith.constant 0 : index
    %37 = vector.load %arg13[%c0_32, %c2, %c0_33] : memref<6x6x128xf32, #tpu.memory_space<vmem>>, vector<4x4x128xf32>
    %38 = vector.extract_strided_slice %13 {offsets = [2, 0], sizes = [1, 128], strides = [1, 1]} : vector<9x128xf32> to vector<1x128xf32>
    %39 = vector.shape_cast %38 : vector<1x128xf32> to vector<128xf32>
    %40 = vector.shape_cast %39 : vector<128xf32> to vector<1x1x128xf32>
    %41 = vector.broadcast %40 : vector<1x1x128xf32> to vector<4x4x128xf32>
    %42 = arith.mulf %37, %41 : vector<4x4x128xf32>
    %43 = arith.addf %36, %42 : vector<4x4x128xf32>
    %c1_34 = arith.constant 1 : index
    %c0_35 = arith.constant 0 : index
    %c0_36 = arith.constant 0 : index
    %44 = vector.load %arg13[%c1_34, %c0_35, %c0_36] : memref<6x6x128xf32, #tpu.memory_space<vmem>>, vector<4x4x128xf32>
    %45 = vector.extract_strided_slice %13 {offsets = [3, 0], sizes = [1, 128], strides = [1, 1]} : vector<9x128xf32> to vector<1x128xf32>
    %46 = vector.shape_cast %45 : vector<1x128xf32> to vector<128xf32>
    %47 = vector.shape_cast %46 : vector<128xf32> to vector<1x1x128xf32>
    %48 = vector.broadcast %47 : vector<1x1x128xf32> to vector<4x4x128xf32>
    %49 = arith.mulf %44, %48 : vector<4x4x128xf32>
    %50 = arith.addf %43, %49 : vector<4x4x128xf32>
    %c1_37 = arith.constant 1 : index
    %c1_38 = arith.constant 1 : index
    %c0_39 = arith.constant 0 : index
    %51 = vector.load %arg13[%c1_37, %c1_38, %c0_39] : memref<6x6x128xf32, #tpu.memory_space<vmem>>, vector<4x4x128xf32>
    %52 = vector.extract_strided_slice %13 {offsets = [4, 0], sizes = [1, 128], strides = [1, 1]} : vector<9x128xf32> to vector<1x128xf32>
    %53 = vector.shape_cast %52 : vector<1x128xf32> to vector<128xf32>
    %54 = vector.shape_cast %53 : vector<128xf32> to vector<1x1x128xf32>
    %55 = vector.broadcast %54 : vector<1x1x128xf32> to vector<4x4x128xf32>
    %56 = arith.mulf %51, %55 : vector<4x4x128xf32>
    %57 = arith.addf %50, %56 : vector<4x4x128xf32>
    %c1_40 = arith.constant 1 : index
    %c2_41 = arith.constant 2 : index
    %c0_42 = arith.constant 0 : index
    %58 = vector.load %arg13[%c1_40, %c2_41, %c0_42] : memref<6x6x128xf32, #tpu.memory_space<vmem>>, vector<4x4x128xf32>
    %59 = vector.extract_strided_slice %13 {offsets = [5, 0], sizes = [1, 128], strides = [1, 1]} : vector<9x128xf32> to vector<1x128xf32>
    %60 = vector.shape_cast %59 : vector<1x128xf32> to vector<128xf32>
    %61 = vector.shape_cast %60 : vector<128xf32> to vector<1x1x128xf32>
    %62 = vector.broadcast %61 : vector<1x1x128xf32> to vector<4x4x128xf32>
    %63 = arith.mulf %58, %62 : vector<4x4x128xf32>
    %64 = arith.addf %57, %63 : vector<4x4x128xf32>
    %c2_43 = arith.constant 2 : index
    %c0_44 = arith.constant 0 : index
    %c0_45 = arith.constant 0 : index
    %65 = vector.load %arg13[%c2_43, %c0_44, %c0_45] : memref<6x6x128xf32, #tpu.memory_space<vmem>>, vector<4x4x128xf32>
    %66 = vector.extract_strided_slice %13 {offsets = [6, 0], sizes = [1, 128], strides = [1, 1]} : vector<9x128xf32> to vector<1x128xf32>
    %67 = vector.shape_cast %66 : vector<1x128xf32> to vector<128xf32>
    %68 = vector.shape_cast %67 : vector<128xf32> to vector<1x1x128xf32>
    %69 = vector.broadcast %68 : vector<1x1x128xf32> to vector<4x4x128xf32>
    %70 = arith.mulf %65, %69 : vector<4x4x128xf32>
    %71 = arith.addf %64, %70 : vector<4x4x128xf32>
    %c2_46 = arith.constant 2 : index
    %c1_47 = arith.constant 1 : index
    %c0_48 = arith.constant 0 : index
    %72 = vector.load %arg13[%c2_46, %c1_47, %c0_48] : memref<6x6x128xf32, #tpu.memory_space<vmem>>, vector<4x4x128xf32>
    %73 = vector.extract_strided_slice %13 {offsets = [7, 0], sizes = [1, 128], strides = [1, 1]} : vector<9x128xf32> to vector<1x128xf32>
    %74 = vector.shape_cast %73 : vector<1x128xf32> to vector<128xf32>
    %75 = vector.shape_cast %74 : vector<128xf32> to vector<1x1x128xf32>
    %76 = vector.broadcast %75 : vector<1x1x128xf32> to vector<4x4x128xf32>
    %77 = arith.mulf %72, %76 : vector<4x4x128xf32>
    %78 = arith.addf %71, %77 : vector<4x4x128xf32>
    %c2_49 = arith.constant 2 : index
    %c2_50 = arith.constant 2 : index
    %c0_51 = arith.constant 0 : index
    %79 = vector.load %arg13[%c2_49, %c2_50, %c0_51] : memref<6x6x128xf32, #tpu.memory_space<vmem>>, vector<4x4x128xf32>
    %80 = vector.extract_strided_slice %13 {offsets = [8, 0], sizes = [1, 128], strides = [1, 1]} : vector<9x128xf32> to vector<1x128xf32>
    %81 = vector.shape_cast %80 : vector<1x128xf32> to vector<128xf32>
    %82 = vector.shape_cast %81 : vector<128xf32> to vector<1x1x128xf32>
    %83 = vector.broadcast %82 : vector<1x1x128xf32> to vector<4x4x128xf32>
    %84 = arith.mulf %79, %83 : vector<4x4x128xf32>
    %85 = arith.addf %78, %84 : vector<4x4x128xf32>
    %86 = vector.shape_cast %85 : vector<4x4x128xf32> to vector<16x128xf32>
    %c0_52 = arith.constant 0 : index
    %c0_53 = arith.constant 0 : index
    %87 = vector.load %arg5[%c0_52, %c0_53] : memref<1x128xf32, #tpu.memory_space<vmem>>, vector<1x128xf32>
    %88 = vector.broadcast %87 : vector<1x128xf32> to vector<16x128xf32>
    %89 = arith.addf %86, %88 : vector<16x128xf32>
    %90 = arith.negf %89 : vector<16x128xf32>
    %91 = math.exp %90 : vector<16x128xf32>
    %cst_54 = arith.constant 1.000000e+00 : f32
    %92 = vector.broadcast %cst_54 : f32 to vector<16x128xf32>
    %93 = arith.addf %92, %91 : vector<16x128xf32>
    %94 = arith.divf %92, %93 : vector<16x128xf32>
    %95 = arith.mulf %89, %94 : vector<16x128xf32>
    %cst_55 = arith.constant dense<0.000000e+00> : vector<128xf32>
    %96 = vector.multi_reduction <add>, %95, %cst_55 [0] : vector<16x128xf32> to vector<128xf32>
    %97 = vector.shape_cast %96 : vector<128xf32> to vector<1x128xf32>
    %cst_56 = arith.constant 6.250000e-02 : f32
    %98 = vector.broadcast %cst_56 : f32 to vector<1x128xf32>
    %99 = arith.mulf %97, %98 : vector<1x128xf32>
    %100 = arith.truncf %99 : vector<1x128xf32> to vector<1x128xbf16>
    %c0_57 = arith.constant 0 : index
    %c0_58 = arith.constant 0 : index
    %101 = vector.load %arg6[%c0_57, %c0_58] : memref<128x128xbf16, #tpu.memory_space<vmem>>, vector<128x128xbf16>
    %cst_59 = arith.constant dense<0.000000e+00> : vector<1x128xf32>
    %102 = tpu.matmul %100, %101, %cst_59 {dimension_numbers = #tpu.dot_dimension_numbers<[1], [0], [0], [1], [0, 0, 1, 1], [], []>} : vector<1x128xbf16>, vector<128x128xbf16>, vector<1x128xf32> -> vector<1x128xf32>
    %c0_60 = arith.constant 0 : index
    %c0_61 = arith.constant 0 : index
    %103 = vector.load %arg7[%c0_60, %c0_61] : memref<1x128xf32, #tpu.memory_space<vmem>>, vector<1x128xf32>
    %104 = arith.addf %102, %103 : vector<1x128xf32>
    %105 = arith.negf %104 : vector<1x128xf32>
    %106 = math.exp %105 : vector<1x128xf32>
    %cst_62 = arith.constant 1.000000e+00 : f32
    %107 = vector.broadcast %cst_62 : f32 to vector<1x128xf32>
    %108 = arith.addf %107, %106 : vector<1x128xf32>
    %109 = arith.divf %107, %108 : vector<1x128xf32>
    %110 = arith.mulf %104, %109 : vector<1x128xf32>
    %111 = arith.truncf %110 : vector<1x128xf32> to vector<1x128xbf16>
    %c0_63 = arith.constant 0 : index
    %c0_64 = arith.constant 0 : index
    %112 = vector.load %arg8[%c0_63, %c0_64] : memref<128x128xbf16, #tpu.memory_space<vmem>>, vector<128x128xbf16>
    %cst_65 = arith.constant dense<0.000000e+00> : vector<1x128xf32>
    %113 = tpu.matmul %111, %112, %cst_65 {dimension_numbers = #tpu.dot_dimension_numbers<[1], [0], [0], [1], [0, 0, 1, 1], [], []>} : vector<1x128xbf16>, vector<128x128xbf16>, vector<1x128xf32> -> vector<1x128xf32>
    %c0_66 = arith.constant 0 : index
    %c0_67 = arith.constant 0 : index
    %114 = vector.load %arg9[%c0_66, %c0_67] : memref<1x128xf32, #tpu.memory_space<vmem>>, vector<1x128xf32>
    %115 = arith.addf %113, %114 : vector<1x128xf32>
    %116 = arith.negf %115 : vector<1x128xf32>
    %117 = math.exp %116 : vector<1x128xf32>
    %cst_68 = arith.constant 1.000000e+00 : f32
    %118 = vector.broadcast %cst_68 : f32 to vector<1x128xf32>
    %119 = arith.addf %118, %117 : vector<1x128xf32>
    %120 = arith.divf %118, %119 : vector<1x128xf32>
    %121 = vector.broadcast %120 : vector<1x128xf32> to vector<16x128xf32>
    %122 = arith.mulf %95, %121 : vector<16x128xf32>
    %123 = arith.truncf %122 : vector<16x128xf32> to vector<16x128xbf16>
    %c0_69 = arith.constant 0 : index
    %c0_70 = arith.constant 0 : index
    %124 = vector.load %arg10[%c0_69, %c0_70] : memref<128x128xbf16, #tpu.memory_space<vmem>>, vector<128x128xbf16>
    %cst_71 = arith.constant dense<0.000000e+00> : vector<16x128xf32>
    %125 = tpu.matmul %123, %124, %cst_71 {dimension_numbers = #tpu.dot_dimension_numbers<[1], [0], [0], [1], [0, 0, 1, 1], [], []>} : vector<16x128xbf16>, vector<128x128xbf16>, vector<16x128xf32> -> vector<16x128xf32>
    %c0_72 = arith.constant 0 : index
    %c0_73 = arith.constant 0 : index
    %126 = vector.load %arg11[%c0_72, %c0_73] : memref<1x128xf32, #tpu.memory_space<vmem>>, vector<1x128xf32>
    %127 = vector.broadcast %126 : vector<1x128xf32> to vector<16x128xf32>
    %128 = arith.addf %125, %127 : vector<16x128xf32>
    %129 = arith.truncf %128 : vector<16x128xf32> to vector<16x128xbf16>
    %c0_74 = arith.constant 0 : index
    %c0_75 = arith.constant 0 : index
    %c0_76 = arith.constant 0 : index
    %130 = vector.load %arg12[%c0_74, %c0_75, %c0_76] : memref<1x16x128xbf16, #tpu.memory_space<vmem>>, vector<1x16x128xbf16>
    %131 = vector.shape_cast %130 : vector<1x16x128xbf16> to vector<16x128xbf16>
    %132 = vector.shape_cast %129 : vector<16x128xbf16> to vector<1x16x128xbf16>
    tpu.vector_store %arg12[%c0_74, %c0_75, %c0_76], %132 {strides = array<i32>} : memref<1x16x128xbf16, #tpu.memory_space<vmem>>, vector<1x16x128xbf16>,
    return
  }
  func.func @transform_0(%arg0: i32) -> (i32, i32, i32) {
    %c0_i32 = arith.constant 0 : i32
    %c0_i32_0 = arith.constant 0 : i32
    %c0_i32_1 = arith.constant 0 : i32
    return %arg0, %c0_i32, %c0_i32_0 : i32, i32, i32
  }
  func.func @transform_1(%arg0: i32) -> (i32, i32) {
    %c0_i32 = arith.constant 0 : i32
    %c0_i32_0 = arith.constant 0 : i32
    %c0_i32_1 = arith.constant 0 : i32
    return %c0_i32, %c0_i32_0 : i32, i32
  }
  func.func @transform_2(%arg0: i32) -> (i32, i32) {
    %c0_i32 = arith.constant 0 : i32
    %c0_i32_0 = arith.constant 0 : i32
    %c0_i32_1 = arith.constant 0 : i32
    return %c0_i32, %c0_i32_0 : i32, i32
  }
  func.func @transform_3(%arg0: i32) -> (i32, i32) {
    %c0_i32 = arith.constant 0 : i32
    %c0_i32_0 = arith.constant 0 : i32
    %c0_i32_1 = arith.constant 0 : i32
    return %c0_i32, %c0_i32_0 : i32, i32
  }
  func.func @transform_4(%arg0: i32) -> (i32, i32) {
    %c0_i32 = arith.constant 0 : i32
    %c0_i32_0 = arith.constant 0 : i32
    %c0_i32_1 = arith.constant 0 : i32
    return %c0_i32, %c0_i32_0 : i32, i32
  }
  func.func @transform_5(%arg0: i32) -> (i32, i32) {
    %c0_i32 = arith.constant 0 : i32
    %c0_i32_0 = arith.constant 0 : i32
    %c0_i32_1 = arith.constant 0 : i32
    return %c0_i32, %c0_i32_0 : i32, i32
  }
  func.func @transform_6(%arg0: i32) -> (i32, i32) {
    %c0_i32 = arith.constant 0 : i32
    %c0_i32_0 = arith.constant 0 : i32
    %c0_i32_1 = arith.constant 0 : i32
    return %c0_i32, %c0_i32_0 : i32, i32
  }
  func.func @transform_7(%arg0: i32) -> (i32, i32) {
    %c0_i32 = arith.constant 0 : i32
    %c0_i32_0 = arith.constant 0 : i32
    %c0_i32_1 = arith.constant 0 : i32
    return %c0_i32, %c0_i32_0 : i32, i32
  }
  func.func @transform_8(%arg0: i32) -> (i32, i32) {
    %c0_i32 = arith.constant 0 : i32
    %c0_i32_0 = arith.constant 0 : i32
    %c0_i32_1 = arith.constant 0 : i32
    return %c0_i32, %c0_i32_0 : i32, i32
  }
  func.func @transform_9(%arg0: i32) -> (i32, i32) {
    %c0_i32 = arith.constant 0 : i32
    %c0_i32_0 = arith.constant 0 : i32
    %c0_i32_1 = arith.constant 0 : i32
    return %c0_i32, %c0_i32_0 : i32, i32
  }
  func.func @transform_10(%arg0: i32) -> (i32, i32) {
    %c0_i32 = arith.constant 0 : i32
    %c0_i32_0 = arith.constant 0 : i32
    %c0_i32_1 = arith.constant 0 : i32
    return %c0_i32, %c0_i32_0 : i32, i32
  }
  func.func @transform_11(%arg0: i32) -> (i32, i32, i32) {
    %c0_i32 = arith.constant 0 : i32
    %c0_i32_0 = arith.constant 0 : i32
    %c0_i32_1 = arith.constant 0 : i32
    return %arg0, %c0_i32, %c0_i32_0 : i32, i32, i32
  }
}

</mosaic_0001>

<bundles_post_ra>
// kernel: efficientnet_forward.6
= control target key start
LH: loop header
LB: loop body
LE: loop exit
PB: predicated region body
PF: predicated region fallthrough
CT: control target
= control target key end

     0   :  { %s3626_s12 = smov 0   ;;  %s4290_s0 = inlined_call_operand.vmem [shape: bf16[2,17,17,32], index: 0, kind: input, shape index: {}]   ;;  %s4291_s1 = inlined_call_operand.vmem [shape: bf16[4,32,128], index: 1, kind: input, shape index: {}]   ;;  %s4292_s2 = inlined_call_operand.vmem [shape: f32[1,128], index: 2, kind: input, shape index: {}]   ;;  %s4293_s3 = inlined_call_operand.vmem [shape: bf16[2,256,128], index: 3, kind: output, shape index: {}]  }
   0x1 LB: > { %s2774_s13 = sadd.s32 4294967295, %s3604_s12   ;;  %p2778_p0 = scmp.ge.s32.totalorder %s3604_s12, 1  ;;  %s3604_s12 = sphi %s3626_s12, %s13_s12  }
   0x2   : > { %p137_p1 = scmp.lt.s32.totalorder %s3604_s12, 3 }
   0x4   : > { %p138_p2 = pnand %p2778_p0, %p137_p1 }
   0x5   : > { %p161_p3 = scmp.lt.s32.totalorder (!%p138_p2), %s2774_s13, 1 }
   0x6   : > { %141 = sbr.rel (%p138_p2) target bundleno = 404 (0x194), region = 32 }
   0xb   : > { %v3430_v0 = vld [vmem:[%s4291_s1 + $0x8] sm:$0xff]   ;;  %v3431_v1 = vld [vmem:[%s4291_s1 + $0x18] sm:$0xff]   ;;  %v3432_v2 = vld [vmem:[%s4291_s1] sm:$0xff]   ;;  %s4297_s13 = smov (!%p161_p3, %s2774_s13), 1  ;;  %vm224_vm0 = vsmask.f32 3328 }
   0xc   : > { %3313 = vmatprep.subr.bf16.mxu1 %v3430_v0  ;;  %3277 = vmatprep.subr.bf16.mxu0 %v3431_v1  ;;  %v3433_v3 = vld [vmem:[%s4291_s1 + $0x10] sm:$0xff]   ;;  %s3421_s22 = smul.u32 204, %s4297_s13  ;;  %vm225_vm1 = vsmask.f32 7440  ;;  %v3652_v4 = vld [vmem:[%s4291_s1 + $0x28] sm:$0xff]   ;;  %vm676_vm2 = vcmask 261120  }
   0xd   : > { %3314 = vmatpush3.bf16.msra.mxu1 %v3430_v0  ;;  %3278 = vmatpush3.bf16.msra.mxu0 %v3431_v1  ;;  %v3437_v5 = vld [vmem:[%s4291_s1 + $0x38] sm:$0xff]   ;;  %v3447_v33 = vld [vmem:[%s4291_s1 + $0x30] sm:$0xff]   ;;  %vm3676_vm3 = vmor %vm224_vm0, %vm225_vm1  ;;  %s3077_s9 = sshll.u32 %s4297_s13, 7 }
   0xe   : > { %3315 = vmatprep.subr.bf16.mxu1 %v3432_v2  ;;  %3279 = vmatprep.subr.bf16.mxu0 %v3433_v3  ;;  %s3657_s27 = scalar_lea.vmem %s4290_s0, %s3421_s22  ;;  %s4175_s13 = scalar_lea.vmem %s4293_s3, %s3077_s9 }
   0xf   : > { %v172_v6 = vld [vmem:[%s3657_s27] sm:$0xf]  ;;  %v173_v7 = vld [vmem:[%s3657_s27 + $0x4] sm:$0xf]  ;;  %v174_v8 = vld [vmem:[%s3657_s27 + $0xc] sm:$0xf] }
  0x10   : > { %v228_v9 = vshrl.u32 %v172_v6, 16  ;;  %v231_v10 = vshll.u32 %v172_v6, 16  ;;  %v237_v11 = vshll.u32 %v173_v7, 16  ;;  %v241_v12 = vshrl.u32 %v173_v7, 16  ;;  %v175_v13 = vld [vmem:[%s3657_s27 + $0x10] sm:$0xf] }
  0x11   : > { %3316 = vmatpush3.bf16.msra.mxu1 %v3432_v2  ;;  %3280 = vmatpush3.bf16.msra.mxu0 %v3433_v3  ;;  %v2820_v14 = vcombine.low %v172_v6, %v173_v7  ;;  %v252_v15 = vshrl.u32 %v174_v8, 16  ;;  %v255_v16 = vshll.u32 %v174_v8, 16  ;;  %v261_v17 = vshll.u32 %v175_v13, 16  ;;  %v208_v18 = vld [vmem:[%s3657_s27 + $0x8] sm:$0x1] }
  0x12   : > { %3385 = vmatprep.subr.bf16.mxu1 %v3437_v5  ;;  %3349 = vmatprep.subr.bf16.mxu0 %v3652_v4  ;;  %v230_v19 = vrot.slane %v228_v9, 4  ;;  %v233_v20 = vrot.slane %v231_v10, 5  ;;  %v239_v21 = vrot.slane %v237_v11, 5  ;;  %v243_v22 = vrot.slane %v241_v12, 4  ;;  %v209_v23 = vld [vmem:[%s3657_s27 + $0x14] sm:$0x1] }
  0x13   : > { %3317 = vmatprep.mubr.msk.bf16.mxu1 %vm676_vm2, %v2820_v14  ;;  %v254_v24 = vrot.slane %v252_v15, 4  ;;  %v257_v25 = vrot.slane %v255_v16, 5  ;;  %v263_v26 = vrot.slane %v261_v17, 5  ;;  %v265_v27 = vshrl.u32 %v175_v13, 16  ;;  %v176_v28 = vld [vmem:[%s3657_s27 + $0x18] sm:$0xf] }
  0x14   : > { %v2821_v29 = vcombine.low %v174_v8, %v175_v13  ;;  %v234_v30 = vor.u32 %v233_v20, %v230_v19  ;;  %v244_v31 = vor.u32 %v243_v22, %v239_v21  ;;  %v247_v32 = vshll.u32 %v208_v18, 16  ;;  %v177_v38 = vld [vmem:[%s3657_s27 + $0x1c] sm:$0xf]  ;;  %v178_v48 = vld [vmem:[%s3657_s27 + $0x24] sm:$0xf] }
  0x15   : > { %v267_v34 = vrot.slane %v265_v27, 4  ;;  %v258_v36 = vor.u32 %v257_v25, %v254_v24  ;;  %v271_v37 = vshll.u32 %v209_v23, 16  ;;  %v276_v39 = vshrl.u32 %v176_v28, 16  ;;  %v179_v53 = vld [vmem:[%s3657_s27 + $0x28] sm:$0xf]  ;;  %v3446_v10 = vld [vmem:[%s4291_s1 + $0x20] sm:$0xff]  }
  0x16   : > { %3318 = vmatmul.mubr.msk.bf16.vlgmr.msra.gmra.mxu1 %vm676_vm2, %v2821_v29  ;;  %v235_v40 = vrot.slane %v234_v30, 4  ;;  %v245_v41 = vrot.slane %v244_v31, 4  ;;  %v249_v42 = vrot.slane %v247_v32, 5  ;;  %v279_v43 = vshll.u32 %v176_v28, 16  ;;  %v210_v58 = vld [vmem:[%s3657_s27 + $0x20] sm:$0x1] }
  0x17   : > { %v259_v44 = vrot.slane %v258_v36, 4  ;;  %v268_v45 = vor.u32 %v267_v34, %v263_v26  ;;  %v273_v46 = vrot.slane %v271_v37, 5  ;;  %3386 = vmatpush3.bf16.msra.mxu1 %v3437_v5  ;;  %v278_v47 = vrot.slane %v276_v39, 4  ;;  %v211_v63 = vld [vmem:[%s3657_s27 + $0x2c] sm:$0x1] }
  0x18   : > { %v240_v49 = vsel %vm3676_vm3, %v235_v40, %v239_v21  ;;  %v250_v50 = vsel %vm3676_vm3, %v245_v41, %v249_v42  ;;  %v281_v51 = vrot.slane %v279_v43, 5  ;;  %v285_v52 = vshll.u32 %v177_v38, 16  ;;  %3387 = vmatprep.subr.bf16.mxu1 %v3447_v33  ;;  %v180_v5 = vld [vmem:[%s3657_s27 + $0x30] sm:$0xf]  ;;  %v181_v18 = vld [vmem:[%s3657_s27 + $0x34] sm:$0xf] }
  0x19   : > { %v2786_v54 = vcombine.low %v240_v49, %v250_v50  ;;  %v264_v55 = vsel %vm3676_vm3, %v259_v44, %v263_v26  ;;  %v269_v56 = vrot.slane %v268_v45, 4  ;;  %v289_v57 = vshrl.u32 %v177_v38, 16  ;;  %v213_v39 = vld [vmem:[%s3657_s27 + $0x44] sm:$0x1]  ;;  %v184_v44 = vld [vmem:[%s3657_s27 + $0x48] sm:$0xf] }
  0x1a   : > { %v287_v59 = vrot.slane %v285_v52, 5  ;;  %v2822_v60 = vcombine.low %v176_v28, %v177_v38  ;;  %v300_v61 = vshrl.u32 %v178_v48, 16  ;;  %v303_v62 = vshll.u32 %v178_v48, 16  ;;  %v182_v28 = vld [vmem:[%s3657_s27 + $0x3c] sm:$0xf] }
  0x1b   : > { %3281 = vmatprep.mubr.msk.bf16.mxu0 %vm676_vm2, %v2786_v54  ;;  %v274_v0 = vsel %vm3676_vm3, %v269_v56, %v273_v46  ;;  %v291_v1 = vrot.slane %v289_v57, 4  ;;  %v309_v2 = vshll.u32 %v179_v53, 16  ;;  %v313_v3 = vshrl.u32 %v179_v53, 16  ;;  %3388 = vmatpush3.bf16.msra.mxu1 %v3447_v33  ;;  %v212_v38 = vld [vmem:[%s3657_s27 + $0x38] sm:$0x1] }
  0x1c   : > { %v2787_v6 = vcombine.low %v264_v55, %v274_v0  ;;  %3321 = vmatprep.mubr.msk.bf16.mxu1 %vm676_vm2, %v2822_v60  ;;  %v302_v7 = vrot.slane %v300_v61, 4  ;;  %v305_v8 = vrot.slane %v303_v62, 5  ;;  %v2823_v9 = vcombine.low %v178_v48, %v179_v53  ;;  %v185_v60 = vld [vmem:[%s3657_s27 + $0x4c] sm:$0xf] }
  0x1d   : > { %v311_v11 = vrot.slane %v309_v2, 5  ;;  %v315_v12 = vrot.slane %v313_v3, 4  ;;  %v282_v13 = vor.u32 %v281_v51, %v278_v47  ;;  %v292_v14 = vor.u32 %v291_v1, %v287_v59 }
  0x1e   : > { %3282 = vmatmul.mubr.msk.bf16.vlgmr.msra.gmra.mxu0 %vm676_vm2, %v2787_v6  ;;  %3322 = vmatmul.mubr.msk.bf16.gmra.mxu1 %vm676_vm2, %v2823_v9  ;;  %v295_v15 = vshll.u32 %v210_v58, 16  ;;  %v306_v16 = vor.u32 %v305_v8, %v302_v7  ;;  %v319_v17 = vshll.u32 %v211_v63, 16  ;;  %v324_v19 = vshrl.u32 %v180_v5, 16  ;;  %v186_v7 = vld [vmem:[%s3657_s27 + $0x54] sm:$0xf] }
  0x1f   : > { %3350 = vmatpush3.bf16.msra.mxu0 %v3652_v4  ;;  %v283_v20 = vrot.slane %v282_v13, 4  ;;  %v293_v21 = vrot.slane %v292_v14, 4  ;;  %v316_v22 = vor.u32 %v315_v12, %v311_v11  ;;  %v327_v23 = vshll.u32 %v180_v5, 16  ;;  %v183_v4 = vld [vmem:[%s3657_s27 + $0x40] sm:$0xf] }
  0x20   : > { %v297_v24 = vrot.slane %v295_v15, 5  ;;  %v307_v25 = vrot.slane %v306_v16, 4  ;;  %v321_v26 = vrot.slane %v319_v17, 5  ;;  %v326_v27 = vrot.slane %v324_v19, 4  ;;  %3351 = vmatprep.subr.bf16.mxu0 %v3446_v10  ;;  %v187_v12 = vld [vmem:[%s3657_s27 + $0x58] sm:$0xf] }
  0x21   : > { %v288_v29 = vsel %vm3676_vm3, %v283_v20, %v287_v59  ;;  %v317_v30 = vrot.slane %v316_v22, 4  ;;  %v329_v31 = vrot.slane %v327_v23, 5  ;;  %v333_v32 = vshll.u32 %v181_v18, 16  ;;  %v214_v17 = vld [vmem:[%s3657_s27 + $0x50] sm:$0x1] }
  0x22   : > { %v298_v33 = vsel %vm3676_vm3, %v293_v21, %v297_v24  ;;  %v312_v34 = vsel %vm3676_vm3, %v307_v25, %v311_v11  ;;  %v337_v36 = vshrl.u32 %v181_v18, 16  ;;  %v2824_v37 = vcombine.low %v180_v5, %v181_v18  ;;  %v215_v22 = vld [vmem:[%s3657_s27 + $0x5c] sm:$0x1] }
  0x23   : > { %v2788_v40 = vcombine.low %v288_v29, %v298_v33  ;;  %v322_v41 = vsel %vm3676_vm3, %v317_v30, %v321_v26  ;;  %v335_v42 = vrot.slane %v333_v32, 5  ;;  %v348_v43 = vshrl.u32 %v182_v28, 16  ;;  %3352 = vmatpush3.bf16.msra.mxu0 %v3446_v10 }
  0x24   : > { %v2789_v45 = vcombine.low %v312_v34, %v322_v41  ;;  %v339_v46 = vrot.slane %v337_v36, 4  ;;  %3325 = vmatprep.mubr.msk.bf16.mxu1 %vm676_vm2, %v2824_v37  ;;  %v351_v47 = vshll.u32 %v182_v28, 16  ;;  %v357_v48 = vshll.u32 %v183_v4, 16 }
  0x25   : > { %3285 = vmatprep.mubr.msk.bf16.mxu0 %vm676_vm2, %v2788_v40  ;;  %v350_v49 = vrot.slane %v348_v43, 4  ;;  %v361_v50 = vshrl.u32 %v183_v4, 16  ;;  %v2825_v51 = vcombine.low %v182_v28, %v183_v4  ;;  %v330_v52 = vor.u32 %v329_v31, %v326_v27  ;;  %v188_v27 = vld [vmem:[%s3657_s27 + $0x60] sm:$0xf] }
  0x26   : > { %3286 = vmatmul.mubr.msk.bf16.gmra.mxu0 %vm676_vm2, %v2789_v45  ;;  %v353_v53 = vrot.slane %v351_v47, 5  ;;  %v359_v54 = vrot.slane %v357_v48, 5  ;;  %v340_v55 = vor.u32 %v339_v46, %v335_v42  ;;  %v343_v56 = vshll.u32 %v212_v38, 16 }
  0x27   : > { %v363_v57 = vrot.slane %v361_v50, 4  ;;  %3326 = vmatmul.mubr.msk.bf16.gmra.mxu1 %vm676_vm2, %v2825_v51  ;;  %v331_v58 = vrot.slane %v330_v52, 4  ;;  %v367_v59 = vshll.u32 %v213_v39, 16  ;;  %v372_v61 = vshrl.u32 %v184_v44, 16  ;;  %v189_v39 = vld [vmem:[%s3657_s27 + $0x64] sm:$0xf] }
  0x28   : > { %v341_v62 = vrot.slane %v340_v55, 4  ;;  %v345_v63 = vrot.slane %v343_v56, 5  ;;  %v354_v0 = vor.u32 %v353_v53, %v350_v49  ;;  %v375_v1 = vshll.u32 %v184_v44, 16  ;;  %v190_v49 = vld [vmem:[%s3657_s27 + $0x6c] sm:$0xf] }
  0x29   : > { %v336_v2 = vsel %vm3676_vm3, %v331_v58, %v335_v42  ;;  %v364_v3 = vor.u32 %v363_v57, %v359_v54  ;;  %v369_v5 = vrot.slane %v367_v59, 5  ;;  %v374_v6 = vrot.slane %v372_v61, 4 }
  0x2a   : > { %v346_v8 = vsel %vm3676_vm3, %v341_v62, %v345_v63  ;;  %v355_v9 = vrot.slane %v354_v0, 4  ;;  %v377_v10 = vrot.slane %v375_v1, 5  ;;  %v381_v11 = vshll.u32 %v185_v60, 16  ;;  %v216_v63 = vld [vmem:[%s3657_s27 + $0x68] sm:$0x1] }
  0x2b   : > { %v2790_v13 = vcombine.low %v336_v2, %v346_v8  ;;  %v365_v14 = vrot.slane %v364_v3, 4  ;;  %v385_v15 = vshrl.u32 %v185_v60, 16  ;;  %v2826_v16 = vcombine.low %v184_v44, %v185_v60  ;;  %v217_v0 = vld [vmem:[%s3657_s27 + $0x74] sm:$0x1] }
  0x2c   : > { %v360_v18 = vsel %vm3676_vm3, %v355_v9, %v359_v54  ;;  %v383_v19 = vrot.slane %v381_v11, 5  ;;  %v396_v20 = vshrl.u32 %v186_v7, 16  ;;  %v399_v21 = vshll.u32 %v186_v7, 16  ;;  %v191_v54 = vld [vmem:[%s3657_s27 + $0x70] sm:$0xf] }
  0x2d   : > { %3289 = vmatprep.mubr.msk.bf16.mxu0 %vm676_vm2, %v2790_v13  ;;  %v370_v23 = vsel %vm3676_vm3, %v365_v14, %v369_v5  ;;  %v387_v24 = vrot.slane %v385_v15, 4  ;;  %3329 = vmatprep.mubr.msk.bf16.mxu1 %vm676_vm2, %v2826_v16  ;;  %v405_v25 = vshll.u32 %v187_v12, 16  ;;  %v409_v26 = vshrl.u32 %v187_v12, 16  ;;  %v193_v11 = vld [vmem:[%s3657_s27 + $0x7c] sm:$0xf] }
  0x2e   : > { %v2791_v28 = vcombine.low %v360_v18, %v370_v23  ;;  %v398_v29 = vrot.slane %v396_v20, 4  ;;  %v401_v30 = vrot.slane %v399_v21, 5  ;;  %v2827_v31 = vcombine.low %v186_v7, %v187_v12 }
  0x2f   : > { %v407_v32 = vrot.slane %v405_v25, 5  ;;  %v411_v4 = vrot.slane %v409_v26, 4  ;;  %v378_v33 = vor.u32 %v377_v10, %v374_v6  ;;  %v388_v34 = vor.u32 %v387_v24, %v383_v19  ;;  %v192_v6 = vld [vmem:[%s3657_s27 + $0x78] sm:$0xf] }
  0x30   : > { %3290 = vmatmul.mubr.msk.bf16.gmra.mxu0 %vm676_vm2, %v2791_v28  ;;  %3330 = vmatmul.mubr.msk.bf16.gmra.mxu1 %vm676_vm2, %v2827_v31  ;;  %v391_v36 = vshll.u32 %v214_v17, 16  ;;  %v402_v37 = vor.u32 %v401_v30, %v398_v29  ;;  %v415_v38 = vshll.u32 %v215_v22, 16  ;;  %v420_v40 = vshrl.u32 %v188_v27, 16  ;;  %v194_v28 = vld [vmem:[%s3657_s27 + $0x84] sm:$0xf] }
  0x31   : > { %v379_v41 = vrot.slane %v378_v33, 4  ;;  %v389_v42 = vrot.slane %v388_v34, 4  ;;  %v412_v43 = vor.u32 %v411_v4, %v407_v32  ;;  %v423_v44 = vshll.u32 %v188_v27, 16  ;;  %v195_v4 = vld [vmem:[%s3657_s27 + $0x88] sm:$0xf] }
  0x32   : > { %v393_v45 = vrot.slane %v391_v36, 5  ;;  %v403_v46 = vrot.slane %v402_v37, 4  ;;  %v417_v47 = vrot.slane %v415_v38, 5  ;;  %v422_v48 = vrot.slane %v420_v40, 4  ;;  %v218_v38 = vld [vmem:[%s3657_s27 + $0x80] sm:$0x1] }
  0x33   : > { %v384_v50 = vsel %vm3676_vm3, %v379_v41, %v383_v19  ;;  %v413_v51 = vrot.slane %v412_v43, 4  ;;  %v425_v52 = vrot.slane %v423_v44, 5  ;;  %v429_v53 = vshll.u32 %v189_v39, 16  ;;  %v219_v43 = vld [vmem:[%s3657_s27 + $0x8c] sm:$0x1] }
  0x34   : > { %v394_v55 = vsel %vm3676_vm3, %v389_v42, %v393_v45  ;;  %v408_v56 = vsel %vm3676_vm3, %v403_v46, %v407_v32  ;;  %v433_v57 = vshrl.u32 %v189_v39, 16  ;;  %v2828_v58 = vcombine.low %v188_v27, %v189_v39 }
  0x35   : > { %v2792_v59 = vcombine.low %v384_v50, %v394_v55  ;;  %v418_v60 = vsel %vm3676_vm3, %v413_v51, %v417_v47  ;;  %v431_v61 = vrot.slane %v429_v53, 5  ;;  %v444_v62 = vshrl.u32 %v190_v49, 16 }
  0x36   : > { %v2793_v1 = vcombine.low %v408_v56, %v418_v60  ;;  %v435_v2 = vrot.slane %v433_v57, 4  ;;  %3333 = vmatprep.mubr.msk.bf16.mxu1 %vm676_vm2, %v2828_v58  ;;  %v447_v3 = vshll.u32 %v190_v49, 16  ;;  %v453_v5 = vshll.u32 %v191_v54, 16  ;;  %v197_v60 = vld [vmem:[%s3657_s27 + $0x94] sm:$0xf] }
  0x37   : > { %3293 = vmatprep.mubr.msk.bf16.mxu0 %vm676_vm2, %v2792_v59  ;;  %v446_v7 = vrot.slane %v444_v62, 4  ;;  %v457_v8 = vshrl.u32 %v191_v54, 16  ;;  %v2829_v9 = vcombine.low %v190_v49, %v191_v54  ;;  %v426_v10 = vor.u32 %v425_v52, %v422_v48  ;;  %v196_v48 = vld [vmem:[%s3657_s27 + $0x90] sm:$0xf] }
  0x38   : > { %3294 = vmatmul.mubr.msk.bf16.gmra.mxu0 %vm676_vm2, %v2793_v1  ;;  %v449_v12 = vrot.slane %v447_v3, 5  ;;  %v455_v13 = vrot.slane %v453_v5, 5  ;;  %v436_v14 = vor.u32 %v435_v2, %v431_v61  ;;  %v439_v15 = vshll.u32 %v216_v63, 16  ;;  %v198_v2 = vld [vmem:[%s3657_s27 + $0x9c] sm:$0xf] }
  0x39   : > { %v459_v16 = vrot.slane %v457_v8, 4  ;;  %3334 = vmatmul.mubr.msk.bf16.gmra.mxu1 %vm676_vm2, %v2829_v9  ;;  %v427_v17 = vrot.slane %v426_v10, 4  ;;  %v463_v18 = vshll.u32 %v217_v0, 16  ;;  %v468_v19 = vshrl.u32 %v192_v6, 16  ;;  %v199_v8 = vld [vmem:[%s3657_s27 + $0xa0] sm:$0xf] }
  0x3a   : > { %v437_v20 = vrot.slane %v436_v14, 4  ;;  %v441_v21 = vrot.slane %v439_v15, 5  ;;  %v450_v22 = vor.u32 %v449_v12, %v446_v7  ;;  %v471_v23 = vshll.u32 %v192_v6, 16 }
  0x3b   : > { %v432_v24 = vsel %vm3676_vm3, %v427_v17, %v431_v61  ;;  %v460_v25 = vor.u32 %v459_v16, %v455_v13  ;;  %v465_v26 = vrot.slane %v463_v18, 5  ;;  %v470_v27 = vrot.slane %v468_v19, 4  ;;  %v221_v18 = vld [vmem:[%s3657_s27 + $0xa4] sm:$0x1]  ;;  %v200_v19 = vld [vmem:[%s3657_s27 + $0xa8] sm:$0xf] }
  0x3c   : > { %v442_v29 = vsel %vm3676_vm3, %v437_v20, %v441_v21  ;;  %v451_v30 = vrot.slane %v450_v22, 4  ;;  %v473_v31 = vrot.slane %v471_v23, 5  ;;  %v477_v32 = vshll.u32 %v193_v11, 16 }
  0x3d   : > { %v2794_v33 = vcombine.low %v432_v24, %v442_v29  ;;  %v461_v34 = vrot.slane %v460_v25, 4  ;;  %v481_v36 = vshrl.u32 %v193_v11, 16  ;;  %v2830_v37 = vcombine.low %v192_v6, %v193_v11 }
  0x3e   : > { %v456_v39 = vsel %vm3676_vm3, %v451_v30, %v455_v13  ;;  %v479_v40 = vrot.slane %v477_v32, 5  ;;  %v492_v41 = vshrl.u32 %v194_v28, 16  ;;  %v495_v42 = vshll.u32 %v194_v28, 16  ;;  %v220_v13 = vld [vmem:[%s3657_s27 + $0x98] sm:$0x1] }
  0x3f   : > { %3297 = vmatprep.mubr.msk.bf16.mxu0 %vm676_vm2, %v2794_v33  ;;  %v466_v44 = vsel %vm3676_vm3, %v461_v34, %v465_v26  ;;  %v483_v45 = vrot.slane %v481_v36, 4  ;;  %3337 = vmatprep.mubr.msk.bf16.mxu1 %vm676_vm2, %v2830_v37  ;;  %v501_v46 = vshll.u32 %v195_v4, 16  ;;  %v505_v47 = vshrl.u32 %v195_v4, 16 }
  0x40   : > { %v2795_v49 = vcombine.low %v456_v39, %v466_v44  ;;  %v494_v50 = vrot.slane %v492_v41, 4  ;;  %v497_v51 = vrot.slane %v495_v42, 5  ;;  %v2831_v52 = vcombine.low %v194_v28, %v195_v4  ;;  %v201_v39 = vld [vmem:[%s3657_s27 + $0xac] sm:$0xf] }
  0x41   : > { %v503_v53 = vrot.slane %v501_v46, 5  ;;  %v507_v54 = vrot.slane %v505_v47, 4  ;;  %v474_v55 = vor.u32 %v473_v31, %v470_v27  ;;  %v484_v56 = vor.u32 %v483_v45, %v479_v40 }
  0x42   : > { %3298 = vmatmul.mubr.msk.bf16.gmra.mxu0 %vm676_vm2, %v2795_v49  ;;  %3338 = vmatmul.mubr.msk.bf16.gmra.mxu1 %vm676_vm2, %v2831_v52  ;;  %v487_v57 = vshll.u32 %v218_v38, 16  ;;  %v498_v58 = vor.u32 %v497_v51, %v494_v50  ;;  %v511_v59 = vshll.u32 %v219_v43, 16  ;;  %v516_v61 = vshrl.u32 %v196_v48, 16  ;;  %v202_v49 = vld [vmem:[%s3657_s27 + $0xb4] sm:$0xf] }
  0x43   : > { %v475_v62 = vrot.slane %v474_v55, 4  ;;  %v485_v63 = vrot.slane %v484_v56, 4  ;;  %v508_v0 = vor.u32 %v507_v54, %v503_v53  ;;  %v519_v1 = vshll.u32 %v196_v48, 16  ;;  %v203_v50 = vld [vmem:[%s3657_s27 + $0xb8] sm:$0xf] }
  0x44   : > { %v489_v3 = vrot.slane %v487_v57, 5  ;;  %v499_v5 = vrot.slane %v498_v58, 4  ;;  %v513_v6 = vrot.slane %v511_v59, 5  ;;  %v518_v7 = vrot.slane %v516_v61, 4  ;;  %v222_v59 = vld [vmem:[%s3657_s27 + $0xb0] sm:$0x1] }
  0x45   : > { %v480_v9 = vsel %vm3676_vm3, %v475_v62, %v479_v40  ;;  %v509_v10 = vrot.slane %v508_v0, 4  ;;  %v521_v11 = vrot.slane %v519_v1, 5  ;;  %v525_v12 = vshll.u32 %v197_v60, 16 }
  0x46   : > { %v490_v14 = vsel %vm3676_vm3, %v485_v63, %v489_v3  ;;  %v504_v15 = vsel %vm3676_vm3, %v499_v5, %v503_v53  ;;  %v529_v16 = vshrl.u32 %v197_v60, 16  ;;  %v2832_v17 = vcombine.low %v196_v48, %v197_v60  ;;  %v223_v60 = vld [vmem:[%s3657_s27 + $0xbc] sm:$0x1] }
  0x47   : > { %v2796_v20 = vcombine.low %v480_v9, %v490_v14  ;;  %v514_v21 = vsel %vm3676_vm3, %v509_v10, %v513_v6  ;;  %v527_v22 = vrot.slane %v525_v12, 5  ;;  %v540_v23 = vshrl.u32 %v198_v2, 16  ;;  %v2924_v6 = vld [vmem:[%s3657_s27 + $0xc] sm:$0xf] }
  0x48   : > { %v2797_v24 = vcombine.low %v504_v15, %v514_v21  ;;  %v531_v25 = vrot.slane %v529_v16, 4  ;;  %3341 = vmatprep.mubr.msk.bf16.mxu1 %vm676_vm2, %v2832_v17  ;;  %v543_v26 = vshll.u32 %v198_v2, 16  ;;  %v549_v27 = vshll.u32 %v199_v8, 16  ;;  %v2925_v15 = vld [vmem:[%s3657_s27 + $0x10] sm:$0xf] }
  0x49   : > { %3301 = vmatprep.mubr.msk.bf16.mxu0 %vm676_vm2, %v2796_v20  ;;  %v542_v28 = vrot.slane %v540_v23, 4  ;;  %v553_v29 = vshrl.u32 %v199_v8, 16  ;;  %v2833_v30 = vcombine.low %v198_v2, %v199_v8  ;;  %v522_v31 = vor.u32 %v521_v11, %v518_v7 }
  0x4a   : > { %3302 = vmatmul.mubr.msk.bf16.gmra.mxu0 %vm676_vm2, %v2797_v24  ;;  %v545_v32 = vrot.slane %v543_v26, 5  ;;  %v551_v4 = vrot.slane %v549_v27, 5  ;;  %v532_v33 = vor.u32 %v531_v25, %v527_v22  ;;  %v535_v34 = vshll.u32 %v220_v13, 16  ;;  %v2927_v25 = vld [vmem:[%s3657_s27 + $0x18] sm:$0xf] }
  0x4b   : > { %v555_v36 = vrot.slane %v553_v29, 4  ;;  %3342 = vmatmul.mubr.msk.bf16.gmra.mxu1 %vm676_vm2, %v2833_v30  ;;  %v523_v37 = vrot.slane %v522_v31, 4  ;;  %v559_v38 = vshll.u32 %v221_v18, 16  ;;  %v564_v40 = vshrl.u32 %v200_v19, 16 }
  0x4c   : > { %v533_v41 = vrot.slane %v532_v33, 4  ;;  %v537_v42 = vrot.slane %v535_v34, 5  ;;  %v546_v43 = vor.u32 %v545_v32, %v542_v28  ;;  %v567_v44 = vshll.u32 %v200_v19, 16 }
  0x4d   : > { %v528_v45 = vsel %vm3676_vm3, %v523_v37, %v527_v22  ;;  %v556_v46 = vor.u32 %v555_v36, %v551_v4  ;;  %v561_v47 = vrot.slane %v559_v38, 5  ;;  %v566_v48 = vrot.slane %v564_v40, 4  ;;  %v2928_v38 = vld [vmem:[%s3657_s27 + $0x1c] sm:$0xf] }
  0x4e   : > { %v538_v51 = vsel %vm3676_vm3, %v533_v41, %v537_v42  ;;  %v547_v52 = vrot.slane %v546_v43, 4  ;;  %v569_v53 = vrot.slane %v567_v44, 5  ;;  %v573_v54 = vshll.u32 %v201_v39, 16  ;;  %v2929_v43 = vld [vmem:[%s3657_s27 + $0x20] sm:$0x1]  ;;  %v3454_v44 = vld [vmem:[%s3657_s27 + $0xc] sm:$0xff]  }
  0x4f   : > { %v2798_v55 = vcombine.low %v528_v45, %v538_v51  ;;  %v557_v56 = vrot.slane %v556_v46, 4  ;;  %v577_v57 = vshrl.u32 %v201_v39, 16  ;;  %v2834_v58 = vcombine.low %v200_v19, %v201_v39  ;;  %v2926_v19 = vld [vmem:[%s3657_s27 + $0x14] sm:$0x1]  ;;  %v2930_v45 = vld [vmem:[%s3657_s27 + $0x24] sm:$0xf] }
  0x50   : > { %v552_v61 = vsel %vm3676_vm3, %v547_v52, %v551_v4  ;;  %v575_v62 = vrot.slane %v573_v54, 5  ;;  %v588_v63 = vshrl.u32 %v202_v49, 16  ;;  %v591_v0 = vshll.u32 %v202_v49, 16 }
  0x51   : > { %3305 = vmatprep.mubr.msk.bf16.mxu0 %vm676_vm2, %v2798_v55  ;;  %v562_v1 = vsel %vm3676_vm3, %v557_v56, %v561_v47  ;;  %v579_v2 = vrot.slane %v577_v57, 4  ;;  %3345 = vmatprep.mubr.msk.bf16.mxu1 %vm676_vm2, %v2834_v58  ;;  %v597_v3 = vshll.u32 %v203_v50, 16  ;;  %v601_v5 = vshrl.u32 %v203_v50, 16  ;;  %v2932_v55 = vld [vmem:[%s3657_s27 + $0x2c] sm:$0x1] }
  0x52   : > { %v2799_v7 = vcombine.low %v552_v61, %v562_v1  ;;  %v590_v8 = vrot.slane %v588_v63, 4  ;;  %v593_v9 = vrot.slane %v591_v0, 5  ;;  %v2835_v10 = vcombine.low %v202_v49, %v203_v50  ;;  %v2931_v50 = vld [vmem:[%s3657_s27 + $0x28] sm:$0xf] }
  0x53   : > { %v599_v11 = vrot.slane %v597_v3, 5  ;;  %v603_v12 = vrot.slane %v601_v5, 4  ;;  %v570_v13 = vor.u32 %v569_v53, %v566_v48  ;;  %v580_v14 = vor.u32 %v579_v2, %v575_v62 }
  0x54   : > { %3306 = vmatmul.mubr.msk.bf16.gmra.mxu0 %vm676_vm2, %v2799_v7  ;;  %3346 = vmatmul.mubr.msk.bf16.gmra.mxu1 %vm676_vm2, %v2835_v10  ;;  %v583_v16 = vshll.u32 %v222_v59, 16  ;;  %v594_v17 = vor.u32 %v593_v9, %v590_v8  ;;  %v607_v18 = vshll.u32 %v223_v60, 16  ;;  %v1607_v20 = vshrl.u32 %v2924_v6, 16  ;;  %v2933_v60 = vld [vmem:[%s3657_s27 + $0x30] sm:$0xf] }
  0x55   : > { %v571_v21 = vrot.slane %v570_v13, 4  ;;  %v581_v22 = vrot.slane %v580_v14, 4  ;;  %v604_v23 = vor.u32 %v603_v12, %v599_v11  ;;  %v1610_v24 = vshll.u32 %v2924_v6, 16  ;;  %v2934_v14 = vld [vmem:[%s3657_s27 + $0x34] sm:$0xf] }
  0x56   : > { %v585_v26 = vrot.slane %v583_v16, 5  ;;  %v595_v27 = vrot.slane %v594_v17, 4  ;;  %v609_v28 = vrot.slane %v607_v18, 5  ;;  %v1609_v29 = vrot.slane %v1607_v20, 4  ;;  %v2935_v20 = vld [vmem:[%s3657_s27 + $0x38] sm:$0x1] }
  0x57   : > { %v576_v30 = vsel %vm3676_vm3, %v571_v21, %v575_v62  ;;  %v605_v31 = vrot.slane %v604_v23, 4  ;;  %v1612_v32 = vrot.slane %v1610_v24, 5  ;;  %v1616_v4 = vshll.u32 %v2925_v15, 16  ;;  %v3456_v21 = vld [vmem:[%s3657_s27 + $0x24] sm:$0xff]  }
  0x58   : > { %v586_v33 = vsel %vm3676_vm3, %v581_v22, %v585_v26  ;;  %v600_v34 = vsel %vm3676_vm3, %v595_v27, %v599_v11  ;;  %v1620_v36 = vshrl.u32 %v2925_v15, 16  ;;  %v1626_v37 = vshll.u32 %v2926_v19, 16  ;;  %v3455_v11 = vld [vmem:[%s3657_s27 + $0x18] sm:$0xff]  }
  0x59   : > { %v2800_v39 = vcombine.low %v576_v30, %v586_v33  ;;  %v610_v40 = vsel %vm3676_vm3, %v605_v31, %v609_v28  ;;  %v1613_v41 = vor.u32 %v1612_v32, %v1609_v29  ;;  %v1618_v42 = vrot.slane %v1616_v4, 5  ;;  %v2936_v26 = vld [vmem:[%s3657_s27 + $0x3c] sm:$0xf]  ;;  %v2937_v31 = vld [vmem:[%s3657_s27 + $0x40] sm:$0xf] }
  0x5a   : > { %v2801_v46 = vcombine.low %v600_v34, %v610_v40  ;;  %v1622_v47 = vrot.slane %v1620_v36, 4  ;;  %v1628_v48 = vrot.slane %v1626_v37, 5  ;;  %v1631_v49 = vshrl.u32 %v2927_v25, 16  ;;  %v2938_v36 = vld [vmem:[%s3657_s27 + $0x44] sm:$0x1] }
  0x5b   : > { %3309 = vmatprep.mubr.msk.bf16.mxu0 %vm676_vm2, %v2800_v39  ;;  %v1614_v51 = vrot.slane %v1613_v41, 4  ;;  %v1634_v52 = vshll.u32 %v2927_v25, 16  ;;  %v1640_v53 = vshll.u32 %v2928_v38, 16  ;;  %v1644_v54 = vshrl.u32 %v2928_v38, 16  ;;  %v2939_v41 = vld [vmem:[%s3657_s27 + $0x48] sm:$0xf] }
  0x5c   : > { %3310 = vmatmul.mubr.msk.bf16.gmra.mxu0 %vm676_vm2, %v2801_v46  ;;  %v1623_v56 = vor.u32 %v1622_v47, %v1618_v42  ;;  %v1633_v57 = vrot.slane %v1631_v49, 4  ;;  %v1650_v58 = vshll.u32 %v2929_v43, 16  ;;  %v1655_v59 = vshrl.u32 %v2930_v45, 16 }
  0x5d   : > { %v1619_v61 = vsel %vm3676_vm3, %v1614_v51, %v1618_v42  ;;  %v1636_v62 = vrot.slane %v1634_v52, 5  ;;  %v1642_v63 = vrot.slane %v1640_v53, 5  ;;  %v1646_v0 = vrot.slane %v1644_v54, 4  ;;  %3353 = vmatprep.mubr.msk.bf16.mxu0 %vm676_vm2, %v3454_v44  ;;  %v3457_v52 = vld [vmem:[%s3657_s27 + $0x30] sm:$0xff]  }
  0x5e   : > { %v1624_v1 = vrot.slane %v1623_v56, 4  ;;  %v1652_v2 = vrot.slane %v1650_v58, 5  ;;  %v1657_v3 = vrot.slane %v1655_v59, 4  ;;  %v1658_v5 = vshll.u32 %v2930_v45, 16 }
  0x5f   : > { %v1637_v6 = vor.u32 %v1636_v62, %v1633_v57  ;;  %v1647_v7 = vor.u32 %v1646_v0, %v1642_v63  ;;  %v1664_v8 = vshll.u32 %v2931_v50, 16  ;;  %v1668_v9 = vshrl.u32 %v2931_v50, 16  ;;  %v2941_v0 = vld [vmem:[%s3657_s27 + $0x50] sm:$0x1] }
  0x60   : > { %v1629_v10 = vsel %vm3676_vm3, %v1624_v1, %v1628_v48  ;;  %v1660_v12 = vrot.slane %v1658_v5, 5  ;;  %v1674_v13 = vshll.u32 %v2932_v55, 16  ;;  %v1679_v15 = vshrl.u32 %v2933_v60, 16  ;;  %v2940_v55 = vld [vmem:[%s3657_s27 + $0x4c] sm:$0xf] }
  0x61   : > { %v2976_v16 = vcombine.low %v1619_v61, %v1629_v10  ;;  %v1638_v17 = vrot.slane %v1637_v6, 4  ;;  %v1648_v18 = vrot.slane %v1647_v7, 4  ;;  %v1666_v19 = vrot.slane %v1664_v8, 5  ;;  %v2942_v7 = vld [vmem:[%s3657_s27 + $0x54] sm:$0xf] }
  0x62   : > { %v1661_v22 = vor.u32 %v1660_v12, %v1657_v3  ;;  %v1670_v23 = vrot.slane %v1668_v9, 4  ;;  %v1676_v24 = vrot.slane %v1674_v13, 5  ;;  %v1681_v25 = vrot.slane %v1679_v15, 4  ;;  %v2943_v12 = vld [vmem:[%s3657_s27 + $0x58] sm:$0xf] }
  0x63   : > { %3389 = vmatprep.mubr.msk.bf16.mxu1 %vm676_vm2, %v2976_v16  ;;  %v1643_v27 = vsel %vm3676_vm3, %v1638_v17, %v1642_v63  ;;  %v1653_v28 = vsel %vm3676_vm3, %v1648_v18, %v1652_v2  ;;  %v1682_v29 = vshll.u32 %v2933_v60, 16  ;;  %v1688_v30 = vshll.u32 %v2934_v14, 16  ;;  %v3458_v60 = vld [vmem:[%s3657_s27 + $0x3c] sm:$0xff]  }
  0x64   : > { %v2977_v32 = vcombine.low %v1643_v27, %v1653_v28  ;;  %3354 = vmatmul.mubr.msk.bf16.vlgmr.msra.gmra.mxu0 %vm676_vm2, %v3455_v11  ;;  %v1662_v4 = vrot.slane %v1661_v22, 4  ;;  %v1671_v33 = vor.u32 %v1670_v23, %v1666_v19  ;;  %v1692_v34 = vshrl.u32 %v2934_v14, 16  ;;  %v2944_v17 = vld [vmem:[%s3657_s27 + $0x5c] sm:$0x1]  ;;  %v2945_v18 = vld [vmem:[%s3657_s27 + $0x60] sm:$0xf] }
  0x65   : > { %v1684_v37 = vrot.slane %v1682_v29, 5  ;;  %v1690_v38 = vrot.slane %v1688_v30, 5  ;;  %v1698_v39 = vshll.u32 %v2935_v20, 16  ;;  %3357 = vmatprep.mubr.msk.bf16.mxu0 %vm676_vm2, %v3456_v21  ;;  %v1703_v40 = vshrl.u32 %v2936_v26, 16  ;;  %v3459_v29 = vld [vmem:[%s3657_s27 + $0x48] sm:$0xff]  }
  0x66   : > { %3390 = vmatmul.mubr.msk.bf16.vlgmr.msra.gmra.mxu1 %vm676_vm2, %v2977_v32  ;;  %v1667_v42 = vsel %vm3676_vm3, %v1662_v4, %v1666_v19  ;;  %v1672_v43 = vrot.slane %v1671_v33, 4  ;;  %v1694_v44 = vrot.slane %v1692_v34, 4  ;;  %v1706_v45 = vshll.u32 %v2936_v26, 16 }
  0x67   : > { %v1685_v46 = vor.u32 %v1684_v37, %v1681_v25  ;;  %v1700_v47 = vrot.slane %v1698_v39, 5  ;;  %v1705_v48 = vrot.slane %v1703_v40, 4  ;;  %v1712_v49 = vshll.u32 %v2937_v31, 16  ;;  %v3460_v37 = vld [vmem:[%s3657_s27 + $0x54] sm:$0xff]  }
  0x68   : > { %v1677_v50 = vsel %vm3676_vm3, %v1672_v43, %v1676_v24  ;;  %v1695_v51 = vor.u32 %v1694_v44, %v1690_v38  ;;  %v1708_v53 = vrot.slane %v1706_v45, 5  ;;  %v1716_v54 = vshrl.u32 %v2937_v31, 16  ;;  %v2947_v45 = vld [vmem:[%s3657_s27 + $0x68] sm:$0x1] }
  0x69   : > { %v2978_v56 = vcombine.low %v1667_v42, %v1677_v50  ;;  %v1686_v57 = vrot.slane %v1685_v46, 4  ;;  %v1714_v58 = vrot.slane %v1712_v49, 5  ;;  %v1722_v59 = vshll.u32 %v2938_v36, 16  ;;  %v2946_v36 = vld [vmem:[%s3657_s27 + $0x64] sm:$0xf] }
  0x6a   : > { %v1696_v61 = vrot.slane %v1695_v51, 4  ;;  %v1709_v62 = vor.u32 %v1708_v53, %v1705_v48  ;;  %v1718_v63 = vrot.slane %v1716_v54, 4  ;;  %v1727_v1 = vshrl.u32 %v2939_v41, 16  ;;  %v2948_v51 = vld [vmem:[%s3657_s27 + $0x6c] sm:$0xf] }
  0x6b   : > { %3393 = vmatprep.mubr.msk.bf16.mxu1 %vm676_vm2, %v2978_v56  ;;  %v1691_v2 = vsel %vm3676_vm3, %v1686_v57, %v1690_v38  ;;  %v1724_v3 = vrot.slane %v1722_v59, 5  ;;  %v1730_v5 = vshll.u32 %v2939_v41, 16  ;;  %v1736_v6 = vshll.u32 %v2940_v55, 16  ;;  %v2949_v56 = vld [vmem:[%s3657_s27 + $0x70] sm:$0xf] }
  0x6c   : > { %v1701_v8 = vsel %vm3676_vm3, %v1696_v61, %v1700_v47  ;;  %3358 = vmatmul.mubr.msk.bf16.gmra.mxu0 %vm676_vm2, %v3457_v52  ;;  %v1710_v9 = vrot.slane %v1709_v62, 4  ;;  %v1719_v10 = vor.u32 %v1718_v63, %v1714_v58  ;;  %v1729_v11 = vrot.slane %v1727_v1, 4 }
  0x6d   : > { %v2979_v13 = vcombine.low %v1691_v2, %v1701_v8  ;;  %v1732_v14 = vrot.slane %v1730_v5, 5  ;;  %v1738_v15 = vrot.slane %v1736_v6, 5  ;;  %v1740_v16 = vshrl.u32 %v2940_v55, 16  ;;  %3361 = vmatprep.mubr.msk.bf16.mxu0 %vm676_vm2, %v3458_v60  ;;  %v3461_v5 = vld [vmem:[%s3657_s27 + $0x60] sm:$0xff]   ;;  %v2951_v8 = vld [vmem:[%s3657_s27 + $0x78] sm:$0xf] }
  0x6e   : > { %v1715_v19 = vsel %vm3676_vm3, %v1710_v9, %v1714_v58  ;;  %v1720_v20 = vrot.slane %v1719_v10, 4  ;;  %v1746_v21 = vshll.u32 %v2941_v0, 16  ;;  %v1751_v22 = vshrl.u32 %v2942_v7, 16  ;;  %v2950_v0 = vld [vmem:[%s3657_s27 + $0x74] sm:$0x1] }
  0x6f   : > { %3394 = vmatmul.mubr.msk.bf16.gmra.mxu1 %vm676_vm2, %v2979_v13  ;;  %v1733_v23 = vor.u32 %v1732_v14, %v1729_v11  ;;  %v1742_v24 = vrot.slane %v1740_v16, 4  ;;  %v1754_v25 = vshll.u32 %v2942_v7, 16  ;;  %v1760_v26 = vshll.u32 %v2943_v12, 16  ;;  %v2952_v13 = vld [vmem:[%s3657_s27 + $0x7c] sm:$0xf]  ;;  %v3462_v14 = vld [vmem:[%s3657_s27 + $0x6c] sm:$0xff]  }
  0x70   : > { %v1725_v27 = vsel %vm3676_vm3, %v1720_v20, %v1724_v3  ;;  %v1748_v28 = vrot.slane %v1746_v21, 5  ;;  %v1753_v30 = vrot.slane %v1751_v22, 4  ;;  %v1764_v31 = vshrl.u32 %v2943_v12, 16  ;;  %v2953_v21 = vld [vmem:[%s3657_s27 + $0x80] sm:$0x1] }
  0x71   : > { %v2980_v32 = vcombine.low %v1715_v19, %v1725_v27  ;;  %v1734_v4 = vrot.slane %v1733_v23, 4  ;;  %v1743_v33 = vor.u32 %v1742_v24, %v1738_v15  ;;  %v1756_v34 = vrot.slane %v1754_v25, 5 }
  0x72   : > { %v1762_v38 = vrot.slane %v1760_v26, 5  ;;  %v1766_v39 = vrot.slane %v1764_v31, 4  ;;  %v1770_v40 = vshll.u32 %v2944_v17, 16  ;;  %v1775_v41 = vshrl.u32 %v2945_v18, 16 }
  0x73   : > { %3397 = vmatprep.mubr.msk.bf16.mxu1 %vm676_vm2, %v2980_v32  ;;  %v1739_v42 = vsel %vm3676_vm3, %v1734_v4, %v1738_v15  ;;  %v1744_v43 = vrot.slane %v1743_v33, 4  ;;  %v1757_v44 = vor.u32 %v1756_v34, %v1753_v30  ;;  %v1778_v46 = vshll.u32 %v2945_v18, 16  ;;  %v2955_v4 = vld [vmem:[%s3657_s27 + $0x88] sm:$0xf] }
  0x74   : > { %3362 = vmatmul.mubr.msk.bf16.gmra.mxu0 %vm676_vm2, %v3459_v29  ;;  %v1767_v47 = vor.u32 %v1766_v39, %v1762_v38  ;;  %v1772_v48 = vrot.slane %v1770_v40, 5  ;;  %v1777_v49 = vrot.slane %v1775_v41, 4  ;;  %v1784_v50 = vshll.u32 %v2946_v36, 16 }
  0x75   : > { %v1749_v52 = vsel %vm3676_vm3, %v1744_v43, %v1748_v28  ;;  %v1758_v53 = vrot.slane %v1757_v44, 4  ;;  %v1780_v54 = vrot.slane %v1778_v46, 5  ;;  %v1788_v55 = vshrl.u32 %v2946_v36, 16  ;;  %3365 = vmatprep.mubr.msk.bf16.mxu0 %vm676_vm2, %v3460_v37  ;;  %v2954_v28 = vld [vmem:[%s3657_s27 + $0x84] sm:$0xf]  ;;  %v3463_v44 = vld [vmem:[%s3657_s27 + $0x78] sm:$0xff]  }
  0x76   : > { %v2981_v57 = vcombine.low %v1739_v42, %v1749_v52  ;;  %v1768_v58 = vrot.slane %v1767_v47, 4  ;;  %v1786_v59 = vrot.slane %v1784_v50, 5  ;;  %v1794_v60 = vshll.u32 %v2947_v45, 16  ;;  %v2956_v45 = vld [vmem:[%s3657_s27 + $0x8c] sm:$0x1] }
  0x77   : > { %v1763_v61 = vsel %vm3676_vm3, %v1758_v53, %v1762_v38  ;;  %v1781_v62 = vor.u32 %v1780_v54, %v1777_v49  ;;  %v1790_v63 = vrot.slane %v1788_v55, 4  ;;  %v1799_v1 = vshrl.u32 %v2948_v51, 16  ;;  %v2957_v52 = vld [vmem:[%s3657_s27 + $0x90] sm:$0xf]  ;;  %v3464_v53 = vld [vmem:[%s3657_s27 + $0x84] sm:$0xff]  }
  0x78   : > { %3398 = vmatmul.mubr.msk.bf16.gmra.mxu1 %vm676_vm2, %v2981_v57  ;;  %v1773_v2 = vsel %vm3676_vm3, %v1768_v58, %v1772_v48  ;;  %v1796_v3 = vrot.slane %v1794_v60, 5  ;;  %v1802_v6 = vshll.u32 %v2948_v51, 16  ;;  %v1808_v7 = vshll.u32 %v2949_v56, 16  ;;  %v2958_v58 = vld [vmem:[%s3657_s27 + $0x94] sm:$0xf] }
  0x79   : > { %v2982_v9 = vcombine.low %v1763_v61, %v1773_v2  ;;  %v1782_v10 = vrot.slane %v1781_v62, 4  ;;  %v1791_v11 = vor.u32 %v1790_v63, %v1786_v59  ;;  %v1801_v12 = vrot.slane %v1799_v1, 4  ;;  %v2959_v1 = vld [vmem:[%s3657_s27 + $0x98] sm:$0x1] }
  0x7a   : > { %v1804_v15 = vrot.slane %v1802_v6, 5  ;;  %v1810_v16 = vrot.slane %v1808_v7, 5  ;;  %v1812_v17 = vshrl.u32 %v2949_v56, 16  ;;  %v1818_v18 = vshll.u32 %v2950_v0, 16 }
  0x7b   : > { %3401 = vmatprep.mubr.msk.bf16.mxu1 %vm676_vm2, %v2982_v9  ;;  %v1787_v19 = vsel %vm3676_vm3, %v1782_v10, %v1786_v59  ;;  %v1792_v20 = vrot.slane %v1791_v11, 4  ;;  %v1823_v22 = vshrl.u32 %v2951_v8, 16  ;;  %v1826_v23 = vshll.u32 %v2951_v8, 16  ;;  %v2960_v9 = vld [vmem:[%s3657_s27 + $0x9c] sm:$0xf] }
  0x7c   : > { %3366 = vmatmul.mubr.msk.bf16.gmra.mxu0 %vm676_vm2, %v3461_v5  ;;  %v1805_v24 = vor.u32 %v1804_v15, %v1801_v12  ;;  %v1814_v25 = vrot.slane %v1812_v17, 4  ;;  %v1820_v26 = vrot.slane %v1818_v18, 5  ;;  %v1832_v27 = vshll.u32 %v2952_v13, 16 }
  0x7d   : > { %v1797_v29 = vsel %vm3676_vm3, %v1792_v20, %v1796_v3  ;;  %v1825_v30 = vrot.slane %v1823_v22, 4  ;;  %v1828_v31 = vrot.slane %v1826_v23, 5  ;;  %v1836_v32 = vshrl.u32 %v2952_v13, 16  ;;  %3369 = vmatprep.mubr.msk.bf16.mxu0 %vm676_vm2, %v3462_v14  ;;  %v2961_v14 = vld [vmem:[%s3657_s27 + $0xa0] sm:$0xf] }
  0x7e   : > { %v2983_v33 = vcombine.low %v1787_v19, %v1797_v29  ;;  %v1806_v34 = vrot.slane %v1805_v24, 4  ;;  %v1815_v36 = vor.u32 %v1814_v25, %v1810_v16  ;;  %v1834_v37 = vrot.slane %v1832_v27, 5  ;;  %v3466_v24 = vld [vmem:[%s3657_s27 + $0x9c] sm:$0xff]  }
  0x7f   : > { %v1829_v38 = vor.u32 %v1828_v31, %v1825_v30  ;;  %v1838_v39 = vrot.slane %v1836_v32, 4  ;;  %v1842_v40 = vshll.u32 %v2953_v21, 16  ;;  %v1847_v41 = vshrl.u32 %v2954_v28, 16  ;;  %v3465_v21 = vld [vmem:[%s3657_s27 + $0x90] sm:$0xff]   ;;  %v2963_v30 = vld [vmem:[%s3657_s27 + $0xa8] sm:$0xf] }
  0x80   : > { %3402 = vmatmul.mubr.msk.bf16.gmra.mxu1 %vm676_vm2, %v2983_v33  ;;  %v1811_v42 = vsel %vm3676_vm3, %v1806_v34, %v1810_v16  ;;  %v1816_v43 = vrot.slane %v1815_v36, 4  ;;  %v1850_v46 = vshll.u32 %v2954_v28, 16  ;;  %v1856_v47 = vshll.u32 %v2955_v4, 16  ;;  %v2962_v28 = vld [vmem:[%s3657_s27 + $0xa4] sm:$0x1] }
  0x81   : > { %v1830_v48 = vrot.slane %v1829_v38, 4  ;;  %v1839_v49 = vor.u32 %v1838_v39, %v1834_v37  ;;  %v1844_v50 = vrot.slane %v1842_v40, 5  ;;  %v1849_v51 = vrot.slane %v1847_v41, 4  ;;  %v2964_v34 = vld [vmem:[%s3657_s27 + $0xac] sm:$0xf] }
  0x82   : > { %v1821_v54 = vsel %vm3676_vm3, %v1816_v43, %v1820_v26  ;;  %v1852_v55 = vrot.slane %v1850_v46, 5  ;;  %v1858_v56 = vrot.slane %v1856_v47, 5  ;;  %v1860_v57 = vshrl.u32 %v2955_v4, 16  ;;  %v2965_v46 = vld [vmem:[%s3657_s27 + $0xb0] sm:$0x1] }
  0x83   : > { %v2984_v59 = vcombine.low %v1811_v42, %v1821_v54  ;;  %v1835_v60 = vsel %vm3676_vm3, %v1830_v48, %v1834_v37  ;;  %v1840_v61 = vrot.slane %v1839_v49, 4  ;;  %v1866_v62 = vshll.u32 %v2956_v45, 16  ;;  %v2966_v49 = vld [vmem:[%s3657_s27 + $0xb4] sm:$0xf]  ;;  %v2967_v54 = vld [vmem:[%s3657_s27 + $0xb8] sm:$0xf] }
  0x84   : > { %3370 = vmatmul.mubr.msk.bf16.gmra.mxu0 %vm676_vm2, %v3463_v44  ;;  %v1853_v63 = vor.u32 %v1852_v55, %v1849_v51  ;;  %v1862_v0 = vrot.slane %v1860_v57, 4  ;;  %v1871_v2 = vshrl.u32 %v2957_v52, 16  ;;  %v1874_v3 = vshll.u32 %v2957_v52, 16 }
  0x85   : > { %3405 = vmatprep.mubr.msk.bf16.mxu1 %vm676_vm2, %v2984_v59  ;;  %v1845_v5 = vsel %vm3676_vm3, %v1840_v61, %v1844_v50  ;;  %v1868_v6 = vrot.slane %v1866_v62, 5  ;;  %v1880_v7 = vshll.u32 %v2958_v58, 16  ;;  %v1884_v8 = vshrl.u32 %v2958_v58, 16  ;;  %3373 = vmatprep.mubr.msk.bf16.mxu0 %vm676_vm2, %v3464_v53  ;;  %v3467_v62 = vld [vmem:[%s3657_s27 + $0xa8] sm:$0xff]  }
  0x86   : > { %v2985_v10 = vcombine.low %v1835_v60, %v1845_v5  ;;  %v1854_v11 = vrot.slane %v1853_v63, 4  ;;  %v1863_v12 = vor.u32 %v1862_v0, %v1858_v56  ;;  %v1873_v13 = vrot.slane %v1871_v2, 4  ;;  %v2968_v63 = vld [vmem:[%s3657_s27 + $0xbc] sm:$0x1] }
  0x87   : > { %v1876_v15 = vrot.slane %v1874_v3, 5  ;;  %v1882_v16 = vrot.slane %v1880_v7, 5  ;;  %v1886_v17 = vrot.slane %v1884_v8, 4  ;;  %v1890_v18 = vshll.u32 %v2959_v1, 16  ;;  %v3468_v7 = vld [vmem:[%s3657_s27 + $0xb4] sm:$0xff]  }
  0x88   : > { %3406 = vmatmul.mubr.msk.bf16.gmra.mxu1 %vm676_vm2, %v2985_v10  ;;  %v1859_v19 = vsel %vm3676_vm3, %v1854_v11, %v1858_v56  ;;  %v1864_v20 = vrot.slane %v1863_v12, 4  ;;  %v1895_v22 = vshrl.u32 %v2960_v9, 16  ;;  %v1898_v23 = vshll.u32 %v2960_v9, 16 }
  0x89   : > { %v1877_v25 = vor.u32 %v1876_v15, %v1873_v13  ;;  %v1887_v26 = vor.u32 %v1886_v17, %v1882_v16  ;;  %v1892_v27 = vrot.slane %v1890_v18, 5  ;;  %v1904_v29 = vshll.u32 %v2961_v14, 16 }
  0x8a   : > { %v1869_v31 = vsel %vm3676_vm3, %v1864_v20, %v1868_v6  ;;  %v1897_v32 = vrot.slane %v1895_v22, 4  ;;  %v1900_v4 = vrot.slane %v1898_v23, 5  ;;  %v1908_v33 = vshrl.u32 %v2961_v14, 16  ;;  %v2969_v6 = vld [vmem:[%s3657_s27 + $0xc0] sm:$0xf] }
  0x8b   : > { %v2986_v36 = vcombine.low %v1859_v19, %v1869_v31  ;;  %v1878_v37 = vrot.slane %v1877_v25, 4  ;;  %v1888_v38 = vrot.slane %v1887_v26, 4  ;;  %v1906_v39 = vrot.slane %v1904_v29, 5 }
  0x8c   : > { %3374 = vmatmul.mubr.msk.bf16.gmra.mxu0 %vm676_vm2, %v3465_v21  ;;  %v1901_v40 = vor.u32 %v1900_v4, %v1897_v32  ;;  %v1910_v41 = vrot.slane %v1908_v33, 4  ;;  %v1914_v42 = vshll.u32 %v2962_v28, 16  ;;  %v1919_v43 = vshrl.u32 %v2963_v30, 16 }
  0x8d   : > { %3409 = vmatprep.mubr.msk.bf16.mxu1 %vm676_vm2, %v2986_v36  ;;  %v1883_v44 = vsel %vm3676_vm3, %v1878_v37, %v1882_v16  ;;  %v1893_v45 = vsel %vm3676_vm3, %v1888_v38, %v1892_v27  ;;  %v1922_v47 = vshll.u32 %v2963_v30, 16  ;;  %v1928_v48 = vshll.u32 %v2964_v34, 16  ;;  %3377 = vmatprep.mubr.msk.bf16.mxu0 %vm676_vm2, %v3466_v24  ;;  %v2970_v16 = vld [vmem:[%s3657_s27 + $0xc4] sm:$0xf]  ;;  %v2971_v24 = vld [vmem:[%s3657_s27 + $0xc8] sm:$0x1] }
  0x8e   : > { %v2987_v50 = vcombine.low %v1883_v44, %v1893_v45  ;;  %v1902_v51 = vrot.slane %v1901_v40, 4  ;;  %v1911_v52 = vor.u32 %v1910_v41, %v1906_v39  ;;  %v1916_v53 = vrot.slane %v1914_v42, 5  ;;  %v3469_v38 = vld [vmem:[%s3657_s27 + $0xc0] sm:$0xff]  }
  0x8f   : > { %v1921_v55 = vrot.slane %v1919_v43, 4  ;;  %v1924_v56 = vrot.slane %v1922_v47, 5  ;;  %v1930_v57 = vrot.slane %v1928_v48, 5  ;;  %v1932_v58 = vshrl.u32 %v2964_v34, 16 }
  0x90   : > { %3410 = vmatmul.mubr.msk.bf16.gmra.mxu1 %vm676_vm2, %v2987_v50  ;;  %v1907_v59 = vsel %vm3676_vm3, %v1902_v51, %v1906_v39  ;;  %v1912_v60 = vrot.slane %v1911_v52, 4  ;;  %v1938_v61 = vshll.u32 %v2965_v46, 16  ;;  %v1943_v0 = vshrl.u32 %v2966_v49, 16 }
  0x91   : > { %v1925_v1 = vor.u32 %v1924_v56, %v1921_v55  ;;  %v1934_v2 = vrot.slane %v1932_v58, 4  ;;  %v1946_v3 = vshll.u32 %v2966_v49, 16  ;;  %v1952_v5 = vshll.u32 %v2967_v54, 16 }
  0x92   : > { %v1917_v8 = vsel %vm3676_vm3, %v1912_v60, %v1916_v53  ;;  %v1940_v9 = vrot.slane %v1938_v61, 5  ;;  %v1945_v10 = vrot.slane %v1943_v0, 4  ;;  %v1956_v11 = vshrl.u32 %v2967_v54, 16 }
  0x93   : > { %v2988_v12 = vcombine.low %v1907_v59, %v1917_v8  ;;  %v1926_v13 = vrot.slane %v1925_v1, 4  ;;  %v1935_v14 = vor.u32 %v1934_v2, %v1930_v57  ;;  %v1948_v15 = vrot.slane %v1946_v3, 5 }
  0x94   : > { %3378 = vmatmul.mubr.msk.bf16.gmra.mxu0 %vm676_vm2, %v3467_v62  ;;  %v1954_v17 = vrot.slane %v1952_v5, 5  ;;  %v1958_v18 = vrot.slane %v1956_v11, 4  ;;  %v1962_v19 = vshll.u32 %v2968_v63, 16  ;;  %v1967_v20 = vshrl.u32 %v2969_v6, 16 }
  0x95   : > { %3413 = vmatprep.mubr.msk.bf16.mxu1 %vm676_vm2, %v2988_v12  ;;  %v1931_v21 = vsel %vm3676_vm3, %v1926_v13, %v1930_v57  ;;  %v1936_v22 = vrot.slane %v1935_v14, 4  ;;  %v1949_v23 = vor.u32 %v1948_v15, %v1945_v10  ;;  %v1970_v25 = vshll.u32 %v2969_v6, 16  ;;  %3381 = vmatprep.mubr.msk.bf16.mxu0 %vm676_vm2, %v3468_v7 }
  0x96   : > { %v1959_v26 = vor.u32 %v1958_v18, %v1954_v17  ;;  %v1964_v27 = vrot.slane %v1962_v19, 5  ;;  %v1969_v28 = vrot.slane %v1967_v20, 4  ;;  %v1976_v29 = vshll.u32 %v2970_v16, 16 }
  0x97   : > { %v1941_v30 = vsel %vm3676_vm3, %v1936_v22, %v1940_v9  ;;  %v1950_v31 = vrot.slane %v1949_v23, 4  ;;  %v1972_v32 = vrot.slane %v1970_v25, 5  ;;  %v1980_v4 = vshrl.u32 %v2970_v16, 16 }
  0x98   : > { %v2989_v33 = vcombine.low %v1931_v21, %v1941_v30  ;;  %v1960_v34 = vrot.slane %v1959_v26, 4  ;;  %v1978_v36 = vrot.slane %v1976_v29, 5  ;;  %v1986_v37 = vshll.u32 %v2971_v24, 16 }
  0x99   : > { %v1955_v39 = vsel %vm3676_vm3, %v1950_v31, %v1954_v17  ;;  %v1973_v40 = vor.u32 %v1972_v32, %v1969_v28  ;;  %v1982_v41 = vrot.slane %v1980_v4, 4 }
  0x9a   : > { %3414 = vmatmul.mubr.msk.bf16.gmra.mxu1 %vm676_vm2, %v2989_v33  ;;  %v1965_v42 = vsel %vm3676_vm3, %v1960_v34, %v1964_v27  ;;  %v1988_v46 = vrot.slane %v1986_v37, 5 }
  0x9b   : > { %v2990_v43 = vcombine.low %v1955_v39, %v1965_v42  ;;  %v1974_v44 = vrot.slane %v1973_v40, 4  ;;  %v1983_v45 = vor.u32 %v1982_v41, %v1978_v36 }
  0x9c   : > { %3382 = vmatmul.mubr.msk.bf16.gmra.mxu0 %vm676_vm2, %v3469_v38 }
  0x9d   : > { %3417 = vmatprep.mubr.msk.bf16.mxu1 %vm676_vm2, %v2990_v43  ;;  %v1979_v47 = vsel %vm3676_vm3, %v1974_v44, %v1978_v36  ;;  %v1984_v48 = vrot.slane %v1983_v45, 4 }
  0x9f   : > { %v1989_v49 = vsel %vm3676_vm3, %v1984_v48, %v1988_v46 }
  0xa0   : > { %v2991_v50 = vcombine.low %v1979_v47, %v1989_v49 }
  0xa2   : > { %3418 = vmatmul.mubr.msk.bf16.gmra.mxu1 %vm676_vm2, %v2991_v50 }
  0xd6   : > { %v3319_v51 = vpop.f32.mrf.mxu1 }
  0xd8   : > { %v1060_v52 = vpop.f32.mrf.mxu1 }
  0xda   : > { %v3980_v53 = vpop.f32.mrf.mxu1 }
  0xdc   : > { %v3982_v54 = vpop.f32.mrf.mxu1 }
  0xde   : > { %v3283_v55 = vpop.f32.mrf.mxu0  ;;  %v3323_v56 = vpop.f32.mrf.mxu1 }
  0xdf   : > { %v3984_v57 = vadd.f32 %v3319_v51, %v3283_v55 }
  0xe0   : > { %v759_v58 = vpop.f32.mrf.mxu0  ;;  %v1076_v59 = vpop.f32.mrf.mxu1 }
  0xe1   : > { %v3986_v60 = vadd.f32 %v1060_v52, %v759_v58 }
  0xe2   : > { %v3988_v61 = vpop.f32.mrf.mxu0  ;;  %v3990_v35 = vpop.f32.mrf.mxu1 }
  0xe4   : > { %v3992_v62 = vpop.f32.mrf.mxu0  ;;  %v3994_v63 = vpop.f32.mrf.mxu1 }
  0xe6   : > { %v3287_v0 = vpop.f32.mrf.mxu0 }
  0xe7   : > { %v3996_v1 = vadd.f32 %v3323_v56, %v3287_v0  ;;  %v3327_v2 = vpop.f32.mrf.mxu1 }
  0xe8   : > { %v775_v3 = vpop.f32.mrf.mxu0 }
  0xe9   : > { %v3998_v5 = vadd.f32 %v1076_v59, %v775_v3  ;;  %v1092_v6 = vpop.f32.mrf.mxu1 }
  0xea   : > { %v4000_v7 = vpop.f32.mrf.mxu0 }
  0xeb   : > { %v4002_v8 = vpop.f32.mrf.mxu1 }
  0xec   : > { %v4004_v9 = vpop.f32.mrf.mxu0 }
  0xed   : > { %v4006_v10 = vpop.f32.mrf.mxu1 }
  0xf0   : > { %v3291_v11 = vpop.f32.mrf.mxu0  ;;  %v3331_v12 = vpop.f32.mrf.mxu1 }
  0xf1   : > { %v4008_v13 = vadd.f32 %v3327_v2, %v3291_v11 }
  0xf2   : > { %v791_v14 = vpop.f32.mrf.mxu0  ;;  %v1108_v15 = vpop.f32.mrf.mxu1 }
  0xf3   : > { %v4010_v16 = vadd.f32 %v1092_v6, %v791_v14 }
  0xf4   : > { %v4012_v17 = vpop.f32.mrf.mxu0  ;;  %v4014_v18 = vpop.f32.mrf.mxu1 }
  0xf6   : > { %v4016_v19 = vpop.f32.mrf.mxu0  ;;  %v4018_v20 = vpop.f32.mrf.mxu1 }
  0xf8   : > { %v3295_v21 = vpop.f32.mrf.mxu0 }
  0xf9   : > { %v4020_v22 = vadd.f32 %v3331_v12, %v3295_v21  ;;  %v3335_v23 = vpop.f32.mrf.mxu1 }
  0xfa   : > { %v807_v24 = vpop.f32.mrf.mxu0 }
  0xfb   : > { %v4022_v25 = vadd.f32 %v1108_v15, %v807_v24  ;;  %v1124_v26 = vpop.f32.mrf.mxu1 }
  0xfc   : > { %v4024_v27 = vpop.f32.mrf.mxu0 }
  0xfd   : > { %v3336_v28 = vpop.f32.mrf.mxu1 }
  0xfe   : > { %v4026_v29 = vpop.f32.mrf.mxu0 }
  0xff   : > { %v1127_v30 = vpop.f32.mrf.mxu1 }
 0x102   : > { %v3299_v31 = vpop.f32.mrf.mxu0  ;;  %v3339_v32 = vpop.f32.mrf.mxu1 }
 0x103   : > { %v4028_v4 = vadd.f32 %v3335_v23, %v3299_v31 }
 0x104   : > { %v823_v33 = vpop.f32.mrf.mxu0  ;;  %v1140_v34 = vpop.f32.mrf.mxu1 }
 0x105   : > { %v4030_v36 = vadd.f32 %v1124_v26, %v823_v33 }
 0x106   : > { %v3300_v37 = vpop.f32.mrf.mxu0  ;;  %v3340_v38 = vpop.f32.mrf.mxu1 }
 0x107   : > { %v4032_v39 = vadd.f32 %v3336_v28, %v3300_v37 }
 0x108   : > { %v826_v40 = vpop.f32.mrf.mxu0  ;;  %v1143_v41 = vpop.f32.mrf.mxu1 }
 0x109   : > { %v4034_v42 = vadd.f32 %v1127_v30, %v826_v40 }
 0x10a   : > { %v3303_v43 = vpop.f32.mrf.mxu0 }
 0x10b   : > { %v4036_v44 = vadd.f32 %v3339_v32, %v3303_v43  ;;  %v3343_v45 = vpop.f32.mrf.mxu1 }
 0x10c   : > { %v839_v46 = vpop.f32.mrf.mxu0 }
 0x10d   : > { %v4038_v47 = vadd.f32 %v1140_v34, %v839_v46  ;;  %v1156_v48 = vpop.f32.mrf.mxu1 }
 0x10e   : > { %v3304_v49 = vpop.f32.mrf.mxu0 }
 0x10f   : > { %v4040_v50 = vadd.f32 %v3340_v38, %v3304_v49  ;;  %v3344_v51 = vpop.f32.mrf.mxu1 }
 0x110   : > { %v842_v52 = vpop.f32.mrf.mxu0 }
 0x111   : > { %v4042_v55 = vadd.f32 %v1143_v41, %v842_v52  ;;  %v1159_v56 = vpop.f32.mrf.mxu1  ;;  %v4064_v41 = vld [vmem:[%s4292_s2] ss:$0 sm:$0xff]  ;;  %v1064_v52 = vadd.f32 %v3982_v54, %v3992_v62 }
 0x114   : > { %v3307_v58 = vpop.f32.mrf.mxu0  ;;  %v3347_v2 = vpop.f32.mrf.mxu1 }
 0x115   : > { %v4044_v59 = vadd.f32 %v3343_v45, %v3307_v58  ;;  %v1072_v45 = vadd.f32 %v3980_v53, %v3988_v61 }
 0x116   : > { %v855_v0 = vpop.f32.mrf.mxu0  ;;  %v1172_v14 = vpop.f32.mrf.mxu1 }
 0x117   : > { %v4046_v3 = vadd.f32 %v1156_v48, %v855_v0 }
 0x118   : > { %v3308_v6 = vpop.f32.mrf.mxu0  ;;  %v3348_v24 = vpop.f32.mrf.mxu1 }
 0x119   : > { %v4048_v11 = vadd.f32 %v3344_v51, %v3308_v6 }
 0x11a   : > { %v858_v12 = vpop.f32.mrf.mxu0  ;;  %v1175_v32 = vpop.f32.mrf.mxu1 }
 0x11b   : > { %v4050_v15 = vadd.f32 %v1159_v56, %v858_v12 }
 0x11c   : > { %v3311_v21 = vpop.f32.mrf.mxu0 }
 0x11d   : > { %v4052_v23 = vadd.f32 %v3347_v2, %v3311_v21 }
 0x11e   : > { %v871_v26 = vpop.f32.mrf.mxu0 }
 0x11f   : > { %v4054_v28 = vadd.f32 %v1172_v14, %v871_v26 }
 0x120   : > { %v3312_v30 = vpop.f32.mrf.mxu0 }
 0x121   : > { %v4056_v31 = vadd.f32 %v3348_v24, %v3312_v30  ;;  %v1088_v24 = vadd.f32 %v3990_v35, %v4000_v7 }
 0x122   : > { %v874_v33 = vpop.f32.mrf.mxu0 }
 0x123   : > { %v4058_v34 = vadd.f32 %v1175_v32, %v874_v33 }
 0x124   : > { %v3355_v37 = vpop.f32.mrf.mxu0 }
 0x125   : > { %v1528_v38 = vadd.f32 %v3355_v37, %v3984_v57 }
 0x126   : > { %v3391_v40 = vpop.f32.mrf.mxu1  ;;  %v1399_v43 = vpop.f32.mrf.mxu0 }
 0x127   : > { %v2266_v46 = vadd.f32 %v3391_v40, %v1528_v38  ;;  %v1526_v48 = vadd.f32 %v1399_v43, %v3986_v60 }
 0x128   : > { %v2137_v49 = vpop.f32.mrf.mxu1  ;;  %v3356_v51 = vpop.f32.mrf.mxu0 }
 0x129   : > { %v4072_v57 = vadd.f32 %v4064_v41, %v2266_v46  ;;  %v2264_v56 = vadd.f32 %v2137_v49, %v1526_v48  ;;  %v1529_v58 = vadd.f32 %v3356_v51, %v1072_v45  ;;  %v1080_v45 = vadd.f32 %v3994_v63, %v4004_v9 }
 0x12a   : > { %v3392_v0 = vpop.f32.mrf.mxu1  ;;  %v1402_v2 = vpop.f32.mrf.mxu0 }
 0x12b   : > { %v3013_v6 = vmul.f32 -1.442695, %v4072_v57  ;;  %v4076_v12 = vadd.f32 %v4064_v41, %v2264_v56  ;;  %v2267_v53 = vadd.f32 %v3392_v0, %v1529_v58  ;;  %v1527_v61 = vadd.f32 %v1402_v2, %v1064_v52 }
 0x12c   : > { %v2140_v60 = vpop.f32.mrf.mxu1  ;;  %v3359_v14 = vpop.f32.mrf.mxu0 }
 0x12d   : > { %3470 = vpow2.f32 %v3013_v6  ;;  %v3011_v21 = vmul.f32 -1.442695, %v4076_v12  ;;  %v4080_v54 = vadd.f32 %v4064_v41, %v2267_v53  ;;  %v2265_v62 = vadd.f32 %v2140_v60, %v1527_v61 }
 0x12e   : > { %v1532_v26 = vadd.f32 %v3359_v14, %v3996_v1  ;;  %v1415_v30 = vpop.f32.mrf.mxu0  ;;  %v1104_v14 = vadd.f32 %v4002_v8, %v4012_v17 }
 0x12f   : > { %3472 = vpow2.f32 %v3011_v21  ;;  %v3014_v32 = vmul.f32 -1.442695, %v4080_v54  ;;  %v3395_v33 = vpop.f32.mrf.mxu1  ;;  %v4087_v37 = vadd.f32 %v4064_v41, %v2265_v62  ;;  %v1530_v38 = vadd.f32 %v1415_v30, %v3998_v5 }
 0x130   : > { %v2270_v40 = vadd.f32 %v3395_v33, %v1532_v26  ;;  %v3360_v43 = vpop.f32.mrf.mxu0  ;;  %v1096_v26 = vadd.f32 %v4006_v10, %v4016_v19 }
 0x131   : > { %3474 = vpow2.f32 %v3014_v32  ;;  %v3012_v35 = vmul.f32 -1.442695, %v4087_v37  ;;  %v2153_v7 = vpop.f32.mrf.mxu1  ;;  %v1533_v1 = vadd.f32 %v3360_v43, %v1088_v24 }
 0x132   : > { %v4094_v46 = vadd.f32 %v4064_v41, %v2270_v40  ;;  %v2268_v48 = vadd.f32 %v2153_v7, %v1530_v38  ;;  %v1418_v49 = vpop.f32.mrf.mxu0 }
 0x133   : > { %3476 = vpow2.f32 %v3012_v35  ;;  %v3396_v51 = vpop.f32.mrf.mxu1  ;;  %v1531_v52 = vadd.f32 %v1418_v49, %v1080_v45 }
 0x134   : > { %v3017_v5 = vmul.f32 -1.442695, %v4094_v46  ;;  %v4098_v56 = vadd.f32 %v4064_v41, %v2268_v48  ;;  %v2271_v58 = vadd.f32 %v3396_v51, %v1533_v1  ;;  %v3363_v63 = vpop.f32.mrf.mxu0 }
 0x135   : > { %v2156_v9 = vpop.f32.mrf.mxu1  ;;  %v1536_v0 = vadd.f32 %v3363_v63, %v4008_v13 }
 0x136   : > { %3478 = vpow2.f32 %v3017_v5  ;;  %v3015_v2 = vmul.f32 -1.442695, %v4098_v56  ;;  %v4103_v6 = vadd.f32 %v4064_v41, %v2271_v58  ;;  %v2269_v53 = vadd.f32 %v2156_v9, %v1531_v52  ;;  %v1431_v61 = vpop.f32.mrf.mxu0 }
 0x137   : > { %v1534_v60 = vadd.f32 %v1431_v61, %v4010_v16 }
 0x138   : > { %3480 = vpow2.f32 %v3015_v2  ;;  %v3018_v21 = vmul.f32 -1.442695, %v4103_v6  ;;  %v3399_v62 = vpop.f32.mrf.mxu1  ;;  %v4110_v24 = vadd.f32 %v4064_v41, %v2269_v53  ;;  %v3364_v13 = vpop.f32.mrf.mxu0  ;;  %v1120_v53 = vadd.f32 %v4014_v18, %v4024_v27 }
 0x139   : > { %v2274_v30 = vadd.f32 %v3399_v62, %v1536_v0  ;;  %v1537_v38 = vadd.f32 %v3364_v13, %v1104_v14 }
 0x13a   : > { %v3471_v32 = vpop.eup %3470  ;;  %3482 = vpow2.f32 %v3018_v21  ;;  %v3016_v33 = vmul.f32 -1.442695, %v4110_v24  ;;  %v2169_v16 = vpop.f32.mrf.mxu1 }
 0x13b   : > { %v1434_v40 = vpop.f32.mrf.mxu0  ;;  %v2433_v8 = vadd.f32 1.0, %v3471_v32  ;;  %v4116_v17 = vadd.f32 %v4064_v41, %v2274_v30  ;;  %v2272_v43 = vadd.f32 %v2169_v16, %v1534_v60 }
 0x13c   : > { %v1535_v45 = vadd.f32 %v1434_v40, %v1096_v26  ;;  %v3473_v35 = vpop.eup %3472  ;;  %3484 = vpow2.f32 %v3016_v33  ;;  %v3400_v7 = vpop.f32.mrf.mxu1  ;;  %v1112_v26 = vadd.f32 %v4018_v20, %v4026_v29 }
 0x13d   : > { %v3367_v1 = vpop.f32.mrf.mxu0  ;;  %3486 = vrcp.f32 %v2433_v8  ;;  %v2431_v10 = vadd.f32 1.0, %v3473_v35  ;;  %v3021_v19 = vmul.f32 -1.442695, %v4116_v17  ;;  %v4120_v48 = vadd.f32 %v4064_v41, %v2272_v43 }
 0x13e   : > { %v3475_v49 = vpop.eup %3474  ;;  %v2172_v51 = vpop.f32.mrf.mxu1  ;;  %v2275_v52 = vadd.f32 %v3400_v7, %v1537_v38  ;;  %v1540_v5 = vadd.f32 %v3367_v1, %v4020_v22 }
 0x13f   : > { %v1447_v58 = vpop.f32.mrf.mxu0  ;;  %3488 = vrcp.f32 %v2431_v10  ;;  %v2434_v63 = vadd.f32 1.0, %v3475_v49  ;;  %v3019_v9 = vmul.f32 -1.442695, %v4120_v48  ;;  %v2273_v0 = vadd.f32 %v2172_v51, %v1535_v45 }
 0x140   : > { %v3477_v2 = vpop.eup %3476  ;;  %3490 = vpow2.f32 %v3021_v19  ;;  %v4127_v61 = vadd.f32 %v4064_v41, %v2275_v52  ;;  %v3403_v60 = vpop.f32.mrf.mxu1  ;;  %v1538_v14 = vadd.f32 %v1447_v58, %v4022_v25 }
 0x141   : > { %v3368_v21 = vpop.f32.mrf.mxu0  ;;  %3492 = vrcp.f32 %v2434_v63  ;;  %v2432_v22 = vadd.f32 1.0, %v3477_v2  ;;  %v4131_v62 = vadd.f32 %v4064_v41, %v2273_v0  ;;  %v2278_v13 = vadd.f32 %v3403_v60, %v1540_v5 }
 0x142   : > { %3494 = vpow2.f32 %v3019_v9  ;;  %v3022_v18 = vmul.f32 -1.442695, %v4127_v61  ;;  %v2185_v27 = vpop.f32.mrf.mxu1  ;;  %v1541_v30 = vadd.f32 %v3368_v21, %v1120_v53 }
 0x143   : > { %v1450_v32 = vpop.f32.mrf.mxu0  ;;  %v3479_v33 = vpop.eup %3478  ;;  %3496 = vrcp.f32 %v2432_v22  ;;  %v3020_v25 = vmul.f32 -1.442695, %v4131_v62  ;;  %v4138_v16 = vadd.f32 %v4064_v41, %v2278_v13  ;;  %v2276_v38 = vadd.f32 %v2185_v27, %v1538_v14 }
 0x144   : > { %v2437_v40 = vadd.f32 1.0, %v3479_v33  ;;  %3498 = vpow2.f32 %v3022_v18  ;;  %v3404_v8 = vpop.f32.mrf.mxu1  ;;  %v1539_v43 = vadd.f32 %v1450_v32, %v1112_v26 }
 0x145   : > { %v3371_v45 = vpop.f32.mrf.mxu0  ;;  %v3481_v20 = vpop.eup %3480  ;;  %3500 = vpow2.f32 %v3020_v25  ;;  %v3025_v29 = vmul.f32 -1.442695, %v4138_v16  ;;  %v4142_v35 = vadd.f32 %v4064_v41, %v2276_v38  ;;  %v2279_v7 = vadd.f32 %v3404_v8, %v1541_v30 }
 0x146   : > { %3502 = vrcp.f32 %v2437_v40  ;;  %v2435_v1 = vadd.f32 1.0, %v3481_v20  ;;  %v2188_v10 = vpop.f32.mrf.mxu1  ;;  %v1544_v19 = vadd.f32 %v3371_v45, %v4028_v4 }
 0x147   : > { %v1463_v49 = vpop.f32.mrf.mxu0  ;;  %v3483_v51 = vpop.eup %3482  ;;  %3504 = vpow2.f32 %v3025_v29  ;;  %v3023_v52 = vmul.f32 -1.442695, %v4142_v35  ;;  %v4147_v5 = vadd.f32 %v4064_v41, %v2279_v7  ;;  %v2277_v58 = vadd.f32 %v2188_v10, %v1539_v43 }
 0x148   : > { %3506 = vrcp.f32 %v2435_v1  ;;  %v2438_v63 = vadd.f32 1.0, %v3483_v51  ;;  %v3407_v9 = vpop.f32.mrf.mxu1  ;;  %v1542_v0 = vadd.f32 %v1463_v49, %v4030_v36 }
 0x149   : > { %v3372_v2 = vpop.f32.mrf.mxu0  ;;  %v3485_v53 = vpop.eup %3484  ;;  %3508 = vpow2.f32 %v3023_v52  ;;  %v3026_v60 = vmul.f32 -1.442695, %v4147_v5  ;;  %v4152_v4 = vadd.f32 %v4064_v41, %v2277_v58  ;;  %v2282_v14 = vadd.f32 %v3407_v9, %v1544_v19 }
 0x14a   : > { %v3487_v21 = vpop.eup %3486  ;;  %3510 = vrcp.f32 %v2438_v63  ;;  %v2436_v22 = vadd.f32 1.0, %v3485_v53  ;;  %v2201_v13 = vpop.f32.mrf.mxu1  ;;  %v1545_v26 = vadd.f32 %v3372_v2, %v4032_v39 }
 0x14b   : > { %v1466_v18 = vpop.f32.mrf.mxu0  ;;  %3512 = vpow2.f32 %v3026_v60  ;;  %v3024_v36 = vmul.f32 -1.442695, %v4152_v4  ;;  %v4157_v27 = vadd.f32 %v4064_v41, %v2282_v14  ;;  %v2280_v33 = vadd.f32 %v2201_v13, %v1542_v0 }
 0x14c   : > { %v3489_v30 = vpop.eup %3488  ;;  %3514 = vrcp.f32 %v2436_v22  ;;  %v3408_v32 = vpop.f32.mrf.mxu1  ;;  %v1543_v25 = vadd.f32 %v1466_v18, %v4034_v42  ;;  %v2529_v8 = vmul.f32 %v3487_v21, %v4072_v57 }
 0x14d   : > { %v3375_v38 = vpop.f32.mrf.mxu0  ;;  %v3491_v40 = vpop.eup %3490  ;;  %3516 = vpow2.f32 %v3024_v36  ;;  %v3029_v39 = vmul.f32 -1.442695, %v4157_v27  ;;  %v2283_v43 = vadd.f32 %v3408_v32, %v1545_v26  ;;  %v2527_v20 = vmul.f32 %v3489_v30, %v4076_v12 }
 0x14e   : > { %v3493_v45 = vpop.eup %3492  ;;  %v2441_v29 = vadd.f32 1.0, %v3491_v40  ;;  %v4165_v7 = vadd.f32 %v4064_v41, %v2280_v33  ;;  %v2204_v1 = vpop.f32.mrf.mxu1  ;;  %v1548_v10 = vadd.f32 %v3375_v38, %v4036_v44 }
 0x14f   : > { %v1479_v42 = vpop.f32.mrf.mxu0  ;;  %v3495_v19 = vpop.eup %3494  ;;  %v2530_v49 = vmul.f32 %v3493_v45, %v4080_v54  ;;  %3518 = vpow2.f32 %v3029_v39  ;;  %v4170_v57 = vadd.f32 %v4064_v41, %v2283_v43  ;;  %v2281_v51 = vadd.f32 %v2204_v1, %v1543_v25 }
 0x150   : > { %v3497_v52 = vpop.eup %3496  ;;  %3520 = vrcp.f32 %v2441_v29  ;;  %v2439_v12 = vadd.f32 1.0, %v3495_v19  ;;  %v3027_v58 = vmul.f32 -1.442695, %v4165_v7  ;;  %v3411_v44 = vpop.f32.mrf.mxu1  ;;  %v1546_v63 = vadd.f32 %v1479_v42, %v4038_v47 }
 0x151   : > { %v3376_v54 = vpop.f32.mrf.mxu0  ;;  %v3499_v9 = vpop.eup %3498  ;;  %v3118_v0 = vpack.c.bf16 %v2530_v49, %v2529_v8  ;;  %v2528_v2 = vmul.f32 %v3497_v52, %v4087_v37  ;;  %v3030_v53 = vmul.f32 -1.442695, %v4170_v57  ;;  %v4182_v60 = vadd.f32 %v4064_v41, %v2281_v51 }
 0x152   : > { %v3501_v14 = vpop.eup %3500  ;;  %3522 = vrcp.f32 %v2439_v12  ;;  %v2442_v21 = vadd.f32 1.0, %v3499_v9  ;;  %v2217_v22 = vpop.f32.mrf.mxu1  ;;  %v2286_v13 = vadd.f32 %v3411_v44, %v1548_v10  ;;  %v1549_v26 = vadd.f32 %v3376_v54, %v4040_v50 }
 0x153   : > { %v1482_v18 = vpop.f32.mrf.mxu0  ;;  %v3503_v47 = vpop.eup %3502  ;;  %3190 = vst [vmem:[%s4175_s13 + $0x8] sm:$0xff] %v3118_v0   ;;  %v3113_v36 = vpack.c.bf16 %v2528_v2, %v2527_v20  ;;  %v2440_v30 = vadd.f32 1.0, %v3501_v14  ;;  %3524 = vpow2.f32 %v3027_v58  ;;  %v3028_v37 = vmul.f32 -1.442695, %v4182_v60 }
 0x154   : > { %v3505_v32 = vpop.eup %3504  ;;  %v2533_v33 = vmul.f32 %v3503_v47, %v4094_v46  ;;  %3526 = vrcp.f32 %v2442_v21  ;;  %v4189_v25 = vadd.f32 %v4064_v41, %v2286_v13  ;;  %v3412_v38 = vpop.f32.mrf.mxu1  ;;  %v2284_v40 = vadd.f32 %v2217_v22, %v1546_v63 }
 0x155   : > { %v3379_v8 = vpop.f32.mrf.mxu0  ;;  %v3507_v50 = vpop.eup %3506  ;;  %3114 = vst [vmem:[%s4175_s13] sm:$0xff] %v3113_v36   ;;  %3528 = vrcp.f32 %v2440_v30  ;;  %v2445_v39 = vadd.f32 1.0, %v3505_v32  ;;  %v2287_v43 = vadd.f32 %v3412_v38, %v1549_v26  ;;  %v1547_v45 = vadd.f32 %v1482_v18, %v4042_v55 }
 0x156   : > { %v3509_v20 = vpop.eup %3508  ;;  %v2531_v29 = vmul.f32 %v3507_v50, %v4098_v56  ;;  %3530 = vpow2.f32 %v3030_v53  ;;  %v3033_v46 = vmul.f32 -1.442695, %v4189_v25  ;;  %v4196_v1 = vadd.f32 %v4064_v41, %v2284_v40  ;;  %v2220_v10 = vpop.f32.mrf.mxu1 }
 0x157   : > { %v1495_v42 = vpop.f32.mrf.mxu0  ;;  %v3511_v19 = vpop.eup %3510  ;;  %3532 = vrcp.f32 %v2445_v39  ;;  %v2443_v49 = vadd.f32 1.0, %v3509_v20  ;;  %v4199_v51 = vadd.f32 %v4064_v41, %v2287_v43  ;;  %v2285_v52 = vadd.f32 %v2220_v10, %v1547_v45 }
 0x158   : > { %v3513_v12 = vpop.eup %3512  ;;  %v2534_v55 = vmul.f32 %v3511_v19, %v4103_v6  ;;  %3534 = vpow2.f32 %v3028_v37  ;;  %v3031_v56 = vmul.f32 -1.442695, %v4196_v1  ;;  %v1552_v58 = vadd.f32 %v3379_v8, %v4044_v59 }
 0x159   : > { %v3380_v44 = vpop.f32.mrf.mxu0  ;;  %v3515_v63 = vpop.eup %3514  ;;  %3536 = vrcp.f32 %v2443_v49  ;;  %v2446_v54 = vadd.f32 1.0, %v3513_v12  ;;  %v3034_v9 = vmul.f32 -1.442695, %v4199_v51  ;;  %v4206_v0 = vadd.f32 %v4064_v41, %v2285_v52 }
 0x15a   : > { %v3517_v2 = vpop.eup %3516  ;;  %v3128_v53 = vpack.c.bf16 %v2534_v55, %v2533_v33  ;;  %v2532_v14 = vmul.f32 %v3515_v63, %v4110_v24  ;;  %3538 = vpow2.f32 %v3033_v46  ;;  %v3415_v6 = vpop.f32.mrf.mxu1  ;;  %v1550_v21 = vadd.f32 %v1495_v42, %v4046_v3 }
 0x15b   : > { %v1498_v22 = vpop.f32.mrf.mxu0  ;;  %3540 = vrcp.f32 %v2446_v54  ;;  %v2444_v59 = vadd.f32 1.0, %v3517_v2  ;;  %v2290_v13 = vadd.f32 %v3415_v6, %v1552_v58  ;;  %v3032_v47 = vmul.f32 -1.442695, %v4206_v0 }
 0x15c   : > { %v3519_v26 = vpop.eup %3518  ;;  %3192 = vst [vmem:[%s4175_s13 + $0x18] sm:$0xff] %v3128_v53   ;;  %v3123_v18 = vpack.c.bf16 %v2532_v14, %v2531_v29  ;;  %3542 = vpow2.f32 %v3031_v56  ;;  %v2233_v36 = vpop.f32.mrf.mxu1  ;;  %v1553_v30 = vadd.f32 %v3380_v44, %v4048_v11  ;;  %v1551_v40 = vadd.f32 %v1498_v22, %v4050_v15 }
 0x15d   : > { %v3383_v37 = vpop.f32.mrf.mxu0  ;;  %v3521_v24 = vpop.eup %3520  ;;  %3544 = vrcp.f32 %v2444_v59  ;;  %v2449_v32 = vadd.f32 1.0, %v3519_v26  ;;  %v4214_v3 = vadd.f32 %v4064_v41, %v2290_v13  ;;  %v2288_v33 = vadd.f32 %v2233_v36, %v1550_v21 }
 0x15e   : > { %3191 = vst [vmem:[%s4175_s13 + $0x10] sm:$0xff] %v3123_v18   ;;  %3546 = vpow2.f32 %v3034_v9  ;;  %v3416_v38 = vpop.f32.mrf.mxu1  ;;  %v1556_v8 = vadd.f32 %v3383_v37, %v4052_v23  ;;  %v2537_v29 = vmul.f32 %v3521_v24, %v4116_v17 }
 0x15f   : > { %v1511_v50 = vpop.f32.mrf.mxu0  ;;  %v3523_v39 = vpop.eup %3522  ;;  %3548 = vrcp.f32 %v2449_v32  ;;  %v3037_v11 = vmul.f32 -1.442695, %v4214_v3  ;;  %v4221_v43 = vadd.f32 %v4064_v41, %v2288_v33  ;;  %v2291_v45 = vadd.f32 %v3416_v38, %v1553_v30 }
 0x160   : > { %v3525_v20 = vpop.eup %3524  ;;  %v2535_v46 = vmul.f32 %v3523_v39, %v4120_v48  ;;  %3550 = vpow2.f32 %v3032_v47  ;;  %v2236_v10 = vpop.f32.mrf.mxu1  ;;  %v1554_v17 = vadd.f32 %v1511_v50, %v4054_v28 }
 0x161   : > { %v3384_v42 = vpop.f32.mrf.mxu0  ;;  %v3527_v15 = vpop.eup %3526  ;;  %v2447_v19 = vadd.f32 1.0, %v3525_v20  ;;  %3552 = vpow2.f32 %v3037_v11  ;;  %v3035_v23 = vmul.f32 -1.442695, %v4221_v43  ;;  %v4227_v49 = vadd.f32 %v4064_v41, %v2291_v45 }
 0x162   : > { %v3529_v52 = vpop.eup %3528  ;;  %v2538_v12 = vmul.f32 %v3527_v15, %v4127_v61  ;;  %v3419_v55 = vpop.f32.mrf.mxu1  ;;  %v2289_v56 = vadd.f32 %v2236_v10, %v1551_v40  ;;  %v1557_v48 = vadd.f32 %v3384_v42, %v4056_v31 }
 0x163   : > { %v3531_v58 = vpop.eup %3530  ;;  %v2536_v44 = vmul.f32 %v3529_v52, %v4131_v62  ;;  %3554 = vrcp.f32 %v2447_v19  ;;  %v3038_v63 = vmul.f32 -1.442695, %v4227_v49  ;;  %v2294_v54 = vadd.f32 %v3419_v55, %v1556_v8  ;;  %v1514_v28 = vpop.f32.mrf.mxu0 }
 0x164   : > { %v3533_v9 = vpop.eup %3532  ;;  %v3138_v2 = vpack.c.bf16 %v2538_v12, %v2537_v29  ;;  %v2450_v53 = vadd.f32 1.0, %v3531_v58  ;;  %3556 = vpow2.f32 %v3035_v23  ;;  %v4235_v61 = vadd.f32 %v4064_v41, %v2289_v56  ;;  %v2249_v14 = vpop.f32.mrf.mxu1 }
 0x165   : > { %v3535_v6 = vpop.eup %3534  ;;  %v3133_v31 = vpack.c.bf16 %v2536_v44, %v2535_v46  ;;  %3558 = vpow2.f32 %v3038_v63  ;;  %v4238_v62 = vadd.f32 %v4064_v41, %v2294_v54  ;;  %v2292_v26 = vadd.f32 %v2249_v14, %v1554_v17 }
 0x166   : > { %v3537_v21 = vpop.eup %3536  ;;  %3194 = vst [vmem:[%s4175_s13 + $0x28] sm:$0xff] %v3138_v2   ;;  %3560 = vrcp.f32 %v2450_v53  ;;  %v2448_v22 = vadd.f32 1.0, %v3535_v6  ;;  %v3036_v59 = vmul.f32 -1.442695, %v4235_v61  ;;  %v3420_v13 = vpop.f32.mrf.mxu1  ;;  %v1555_v30 = vadd.f32 %v1514_v28, %v4058_v34 }
 0x167   : > { %v3539_v18 = vpop.eup %3538  ;;  %3193 = vst [vmem:[%s4175_s13 + $0x20] sm:$0xff] %v3133_v31   ;;  %v3041_v47 = vmul.f32 -1.442695, %v4238_v62  ;;  %v2295_v36 = vadd.f32 %v3420_v13, %v1557_v48  ;;  %v2541_v24 = vmul.f32 %v3533_v9, %v4138_v16  ;;  %v4247_v33 = vadd.f32 %v4064_v41, %v2292_v26 }
 0x168   : > { %v3541_v37 = vpop.eup %3540  ;;  %3562 = vrcp.f32 %v2448_v22  ;;  %v2453_v32 = vadd.f32 1.0, %v3539_v18  ;;  %v2252_v38 = vpop.f32.mrf.mxu1  ;;  %v2539_v34 = vmul.f32 %v3537_v21, %v4142_v35 }
 0x169   : > { %v3543_v40 = vpop.eup %3542  ;;  %v2542_v8 = vmul.f32 %v3541_v37, %v4147_v5  ;;  %3564 = vpow2.f32 %v3036_v59  ;;  %v4251_v50 = vadd.f32 %v4064_v41, %v2295_v36  ;;  %v2293_v39 = vadd.f32 %v2252_v38, %v1555_v30 }
 0x16a   : > { %v3545_v11 = vpop.eup %3544  ;;  %3566 = vrcp.f32 %v2453_v32  ;;  %v2451_v16 = vadd.f32 1.0, %v3543_v40  ;;  %v3039_v45 = vmul.f32 -1.442695, %v4247_v33 }
 0x16b   : > { %v3547_v20 = vpop.eup %3546  ;;  %v3148_v29 = vpack.c.bf16 %v2542_v8, %v2541_v24  ;;  %v2540_v46 = vmul.f32 %v3545_v11, %v4152_v4  ;;  %3568 = vpow2.f32 %v3041_v47  ;;  %v3042_v5 = vmul.f32 -1.442695, %v4251_v50 }
 0x16c   : > { %v3549_v10 = vpop.eup %3548  ;;  %3570 = vrcp.f32 %v2451_v16  ;;  %v2454_v42 = vadd.f32 1.0, %v3547_v20  ;;  %v4258_v15 = vadd.f32 %v4064_v41, %v2293_v39 }
 0x16d   : > { %v3551_v19 = vpop.eup %3550  ;;  %3196 = vst [vmem:[%s4175_s13 + $0x38] sm:$0xff] %v3148_v29   ;;  %v3143_v35 = vpack.c.bf16 %v2540_v46, %v2539_v34  ;;  %3572 = vpow2.f32 %v3039_v45  ;;  %v2545_v44 = vmul.f32 %v3549_v10, %v4157_v27 }
 0x16e   : > { %v3553_v23 = vpop.eup %3552  ;;  %3574 = vrcp.f32 %v2454_v42  ;;  %v2452_v52 = vadd.f32 1.0, %v3551_v19  ;;  %v3040_v12 = vmul.f32 -1.442695, %v4258_v15 }
 0x16f   : > { %3195 = vst [vmem:[%s4175_s13 + $0x30] sm:$0xff] %v3143_v35   ;;  %v2457_v4 = vadd.f32 1.0, %v3553_v23  ;;  %3576 = vpow2.f32 %v3042_v5 }
 0x170   : > { %v3555_v55 = vpop.eup %3554  ;;  %3578 = vrcp.f32 %v2452_v52 }
 0x171   : > { %v3557_v56 = vpop.eup %3556  ;;  %3580 = vpow2.f32 %v3040_v12  ;;  %v2543_v2 = vmul.f32 %v3555_v55, %v4165_v7 }
 0x172   : > { %v3559_v17 = vpop.eup %3558  ;;  %3582 = vrcp.f32 %v2457_v4  ;;  %v2455_v41 = vadd.f32 1.0, %v3557_v56 }
 0x173   : > { %v3561_v48 = vpop.eup %3560  ;;  %v2458_v58 = vadd.f32 1.0, %v3559_v17 }
 0x174   : > { %v2546_v63 = vmul.f32 %v3561_v48, %v4170_v57 }
 0x175   : > { %v3563_v54 = vpop.eup %3562  ;;  %3584 = vrcp.f32 %v2458_v58 }
 0x176   : > { %v3565_v9 = vpop.eup %3564  ;;  %v3158_v53 = vpack.c.bf16 %v2546_v63, %v2545_v44  ;;  %v2544_v14 = vmul.f32 %v3563_v54, %v4182_v60  ;;  %3586 = vrcp.f32 %v2455_v41 }
 0x177   : > { %v3567_v28 = vpop.eup %3566  ;;  %v2456_v6 = vadd.f32 1.0, %v3565_v9 }
 0x178   : > { %v3569_v31 = vpop.eup %3568  ;;  %3198 = vst [vmem:[%s4175_s13 + $0x48] sm:$0xff] %v3158_v53   ;;  %v3153_v21 = vpack.c.bf16 %v2544_v14, %v2543_v2  ;;  %v2549_v26 = vmul.f32 %v3567_v28, %v4189_v25 }
 0x179   : > { %v3571_v22 = vpop.eup %3570  ;;  %3588 = vrcp.f32 %v2456_v6  ;;  %v2461_v27 = vadd.f32 1.0, %v3569_v31 }
 0x17a   : > { %v3573_v59 = vpop.eup %3572  ;;  %3197 = vst [vmem:[%s4175_s13 + $0x40] sm:$0xff] %v3153_v21   ;;  %v2547_v36 = vmul.f32 %v3571_v22, %v4196_v1 }
 0x17b   : > { %v3575_v57 = vpop.eup %3574  ;;  %v2459_v60 = vadd.f32 1.0, %v3573_v59  ;;  %3590 = vrcp.f32 %v2461_v27 }
 0x17c   : > { %v3577_v13 = vpop.eup %3576  ;;  %v2550_v7 = vmul.f32 %v3575_v57, %v4199_v51 }
 0x17d   : > { %v3579_v18 = vpop.eup %3578  ;;  %v2462_v47 = vadd.f32 1.0, %v3577_v13 }
 0x17e   : > { %v3168_v30 = vpack.c.bf16 %v2550_v7, %v2549_v26  ;;  %v2548_v37 = vmul.f32 %v3579_v18, %v4206_v0  ;;  %v3581_v24 = vpop.eup %3580 }
 0x17f   : > { %3592 = vrcp.f32 %v2462_v47  ;;  %v3583_v32 = vpop.eup %3582  ;;  %v2460_v25 = vadd.f32 1.0, %v3581_v24 }
 0x180   : > { %3200 = vst [vmem:[%s4175_s13 + $0x58] sm:$0xff] %v3168_v30   ;;  %v3163_v38 = vpack.c.bf16 %v2548_v37, %v2547_v36  ;;  %3594 = vrcp.f32 %v2459_v60  ;;  %v2553_v40 = vmul.f32 %v3583_v32, %v4214_v3 }
 0x181   : > { %3596 = vrcp.f32 %v2460_v25 }
 0x182   : > { %v3585_v51 = vpop.eup %3584  ;;  %3199 = vst [vmem:[%s4175_s13 + $0x50] sm:$0xff] %v3163_v38  }
 0x183   : > { %v2554_v8 = vmul.f32 %v3585_v51, %v4227_v49  ;;  %v3587_v1 = vpop.eup %3586 }
 0x184   : > { %v2551_v11 = vmul.f32 %v3587_v1, %v4221_v43 }
 0x185   : > { %v3178_v39 = vpack.c.bf16 %v2554_v8, %v2553_v40 }
 0x186   : > { %v3589_v0 = vpop.eup %3588 }
 0x187   : > { %3202 = vst [vmem:[%s4175_s13 + $0x68] sm:$0xff] %v3178_v39   ;;  %v2552_v34 = vmul.f32 %v3589_v0, %v4235_v61 }
 0x188   : > { %v3591_v45 = vpop.eup %3590 }
 0x189   : > { %v3173_v16 = vpack.c.bf16 %v2552_v34, %v2551_v11  ;;  %v2557_v46 = vmul.f32 %v3591_v45, %v4238_v62 }
 0x18b   : > { %3201 = vst [vmem:[%s4175_s13 + $0x60] sm:$0xff] %v3173_v16  }
 0x18c   : > { %v3593_v20 = vpop.eup %3592 }
 0x18d   : > { %v3595_v29 = vpop.eup %3594  ;;  %v2558_v3 = vmul.f32 %v3593_v20, %v4251_v50 }
 0x18e   : > { %v3597_v49 = vpop.eup %3596  ;;  %v2555_v10 = vmul.f32 %v3595_v29, %v4247_v33 }
 0x18f   : > { %v3188_v5 = vpack.c.bf16 %v2558_v3, %v2557_v46  ;;  %v2556_v42 = vmul.f32 %v3597_v49, %v4258_v15 }
 0x191   : > { %3204 = vst [vmem:[%s4175_s13 + $0x78] sm:$0xff] %v3188_v5   ;;  %v3183_v43 = vpack.c.bf16 %v2556_v42, %v2555_v10 }
 0x193   : > { %3203 = vst [vmem:[%s4175_s13 + $0x70] sm:$0xff] %v3183_v43  }
 0x194 PF: > { %s13_s12 = sadd.s32 1, %s3604_s12  }
 0x195   : > { %p10_p4 = scmp.ge.s32.totalorder %s13_s12, 4  }
 0x197   :  { %12 = sbr.rel (!%p10_p4) target bundleno = 1 (0x1), region = 66 }

// kernel: efficientnet_forward.7
= control target key start
LH: loop header
LB: loop body
LE: loop exit
PB: predicated region body
PF: predicated region fallthrough
CT: control target
= control target key end

     0   :  { %s3104_s30 = smov 0   ;;  %s5119_s0 = inlined_call_operand.vmem [shape: bf16[2,256,128], index: 0, kind: input, shape index: {}]   ;;  %s5120_s1 = inlined_call_operand.vmem [shape: f32[9,128], index: 1, kind: input, shape index: {}]   ;;  %s5121_s2 = inlined_call_operand.vmem [shape: f32[1,128], index: 2, kind: input, shape index: {}]   ;;  %s5122_s3 = inlined_call_operand.vmem [shape: bf16[128,128], index: 3, kind: input, shape index: {}]   ;;  %s5123_s4 = inlined_call_operand.vmem [shape: f32[1,128], index: 4, kind: input, shape index: {}]   ;;  %s5124_s5 = inlined_call_operand.vmem [shape: bf16[128,128], index: 5, kind: input, shape index: {}]   ;;  %s5125_s6 = inlined_call_operand.vmem [shape: f32[1,128], index: 6, kind: input, shape index: {}]   ;;  %s5126_s7 = inlined_call_operand.vmem [shape: bf16[128,128], index: 7, kind: input, shape index: {}]   ;;  %s5127_s8 = inlined_call_operand.vmem [shape: f32[1,128], index: 8, kind: input, shape index: {}]   ;;  %s5128_s9 = inlined_call_operand.vmem [shape: bf16[2,256,128], index: 9, kind: output, shape index: {}]  }
   0x1 LB: > { %s2398_s10 = sadd.s32 4294967295, %s3050_s30   ;;  %p2402_p0 = scmp.ge.s32.totalorder %s3050_s30, 1  ;;  %s3050_s30 = sphi %s3104_s30, %s19_s30  }
   0x2   : > { %p287_p1 = scmp.lt.s32.totalorder %s3050_s30, 3 }
   0x4   : > { %p288_p2 = pnand %p2402_p0, %p287_p1 }
   0x6   : > { %291 = sbr.rel (%p288_p2) target bundleno = 1056 (0x420), region = 56 }
   0xb   : > { %v2850_v0 = vld [vmem:[%s5122_s3 + $0x38] sm:$0xff]   ;;  %v3052_v1 = vmov 0.0   ;;  %v2851_v2 = vld [vmem:[%s5122_s3 + $0x30] sm:$0xff]   ;;  %vm3053_vm0 = vmmov 0   ;;  %p323_p3 = scmp.lt.s32.totalorder %s2398_s10, 1  ;;  %v2852_v3 = vld [vmem:[%s5122_s3 + $0x28] sm:$0xff]   ;;  %v504_v57 = vlaneseq }
   0xc   : > { %2752 = vmatprep.subr.bf16.mxu1 %v3052_v1  ;;  %400 = vst [vmem:[#allocation2] sm:$0xff] %v3052_v1  ;;  %401 = vst [vmem:[#allocation2 + $0x8] sm:$0xff] %v3052_v1  ;;  %2768 = vmatprep.mubr.msk.bf16.mxu1 %vm3053_vm0, %v3052_v1  ;;  %v2853_v4 = vld [vmem:[%s5122_s3 + $0x20] sm:$0xff]   ;;  %v2854_v41 = vld [vmem:[%s5122_s3 + $0x18] sm:$0xff]  }
   0xd   : > { %402 = vst [vmem:[#allocation2 + $0x10] sm:$0x3] %v3052_v1  ;;  %404 = vst [vmem:[#allocation2 + $0x198] sm:$0xff] %v3052_v1  ;;  %2753 = vmatpush3.bf16.msra.mxu1 %v2850_v0  ;;  %s5580_s10 = smov (!%p323_p3, %s2398_s10), 1  ;;  %v2855_v54 = vld [vmem:[%s5122_s3 + $0x10] sm:$0xff]   ;;  %v2856_v55 = vld [vmem:[%s5122_s3 + $0x8] sm:$0xff]  }
   0xe   : > { %405 = vst [vmem:[#allocation2 + $0x1a0] sm:$0xff] %v3052_v1  ;;  %406 = vst [vmem:[#allocation2 + $0x1a8] sm:$0x3] %v3052_v1  ;;  %2754 = vmatprep.subr.bf16.mxu1 %v3052_v1  ;;  %s2502_s17 = sshll.u32 %s5580_s10, 7  ;;  %v2857_v56 = vld [vmem:[%s5122_s3] sm:$0xff]   ;;  %v3313_v58 = vshrl.u32 %v504_v57, 7 }
   0xf   : > { %408 = vst [vmem:[#allocation2 + $0x18] sm:$0x1] %v3052_v1  ;;  %409 = vst [vmem:[#allocation2 + $0x30] sm:$0x1] %v3052_v1  ;;  %s3176_s20 = scalar_lea.vmem %s5119_s0, %s2502_s17  ;;  %v3319_v60 = vld [vmem:[%s5120_s1] sm:$0xff]  ;;  %s5070_s23 = scalar_lea.vmem %s5128_s9, %s2502_s17 }
  0x10   : > { %410 = vst [vmem:[#allocation2 + $0x48] sm:$0x1] %v3052_v1  ;;  %411 = vst [vmem:[#allocation2 + $0x60] sm:$0x1] %v3052_v1  ;;  %v2537_v5 = vld [vmem:[%s3176_s20] sm:$0xff]   ;;  %v2680_v6 = vld [vmem:[%s3176_s20 + $0x8] sm:$0xff]  }
  0x11   : > { %412 = vst [vmem:[#allocation2 + $0x78] sm:$0x1] %v3052_v1  ;;  %413 = vst [vmem:[#allocation2 + $0x90] sm:$0x1] %v3052_v1  ;;  %2755 = vmatpush3.bf16.msra.mxu1 %v2851_v2  ;;  %v2681_v7 = vld [vmem:[%s3176_s20 + $0x10] sm:$0xff]   ;;  %v3184_v8 = vunpack.c.l.bf16 %v2537_v5  ;;  %v3186_v9 = vunpack.c.h.bf16 %v2537_v5  ;;  %v3188_v10 = vunpack.c.l.bf16 %v2680_v6  ;;  %v3190_v11 = vunpack.c.h.bf16 %v2680_v6  ;;  %v2682_v12 = vld [vmem:[%s3176_s20 + $0x18] sm:$0xff]  }
  0x12   : > { %414 = vst [vmem:[#allocation2 + $0xa8] sm:$0x1] %v3052_v1  ;;  %415 = vst [vmem:[#allocation2 + $0xc0] sm:$0x1] %v3052_v1  ;;  %2756 = vmatprep.subr.bf16.mxu1 %v3052_v1  ;;  %v2683_v13 = vld [vmem:[%s3176_s20 + $0x20] sm:$0xff]   ;;  %v2684_v14 = vld [vmem:[%s3176_s20 + $0x28] sm:$0xff]   ;;  %v3195_v15 = vunpack.c.l.bf16 %v2681_v7  ;;  %v3197_v16 = vunpack.c.h.bf16 %v2681_v7  ;;  %v3199_v17 = vunpack.c.l.bf16 %v2682_v12  ;;  %v3201_v18 = vunpack.c.h.bf16 %v2682_v12 }
  0x13   : > { %416 = vst [vmem:[#allocation2 + $0xd8] sm:$0x1] %v3052_v1  ;;  %417 = vst [vmem:[#allocation2 + $0xf0] sm:$0x1] %v3052_v1  ;;  %v2685_v19 = vld [vmem:[%s3176_s20 + $0x30] sm:$0xff]   ;;  %v2686_v20 = vld [vmem:[%s3176_s20 + $0x38] sm:$0xff]   ;;  %v3207_v22 = vunpack.c.l.bf16 %v2683_v13  ;;  %v3209_v23 = vunpack.c.h.bf16 %v2683_v13  ;;  %v3211_v24 = vunpack.c.l.bf16 %v2684_v14  ;;  %v3213_v25 = vunpack.c.h.bf16 %v2684_v14 }
  0x14   : > { %418 = vst [vmem:[#allocation2 + $0x108] sm:$0x1] %v3052_v1  ;;  %419 = vst [vmem:[#allocation2 + $0x120] sm:$0x1] %v3052_v1  ;;  %v2687_v21 = vld [vmem:[%s3176_s20 + $0x40] sm:$0xff]   ;;  %v2688_v26 = vld [vmem:[%s3176_s20 + $0x48] sm:$0xff]   ;;  %v3222_v29 = vunpack.c.l.bf16 %v2685_v19  ;;  %v3224_v30 = vunpack.c.h.bf16 %v2685_v19  ;;  %v3226_v31 = vunpack.c.l.bf16 %v2686_v20  ;;  %v3228_v32 = vunpack.c.h.bf16 %v2686_v20 }
  0x15   : > { %420 = vst [vmem:[#allocation2 + $0x138] sm:$0x1] %v3052_v1  ;;  %421 = vst [vmem:[#allocation2 + $0x150] sm:$0x1] %v3052_v1  ;;  %2757 = vmatpush3.bf16.msra.mxu1 %v2852_v3  ;;  %v2689_v27 = vld [vmem:[%s3176_s20 + $0x50] sm:$0xff]   ;;  %v2690_v28 = vld [vmem:[%s3176_s20 + $0x58] sm:$0xff]   ;;  %v3236_v35 = vunpack.c.l.bf16 %v2687_v21  ;;  %v3238_v36 = vunpack.c.h.bf16 %v2687_v21  ;;  %v3240_v37 = vunpack.c.l.bf16 %v2688_v26  ;;  %v3242_v38 = vunpack.c.h.bf16 %v2688_v26 }
  0x16   : > { %422 = vst [vmem:[#allocation2 + $0x168] sm:$0x1] %v3052_v1  ;;  %423 = vst [vmem:[#allocation2 + $0x180] sm:$0x1] %v3052_v1  ;;  %2758 = vmatprep.subr.bf16.mxu1 %v3052_v1  ;;  %v2691_v33 = vld [vmem:[%s3176_s20 + $0x60] sm:$0xff]   ;;  %v2692_v34 = vld [vmem:[%s3176_s20 + $0x68] sm:$0xff]   ;;  %v3255_v42 = vunpack.c.l.bf16 %v2689_v27  ;;  %v3257_v43 = vunpack.c.h.bf16 %v2689_v27  ;;  %v3259_v44 = vunpack.c.l.bf16 %v2690_v28  ;;  %v3261_v45 = vunpack.c.h.bf16 %v2690_v28 }
  0x17   : > { %424 = vst [vmem:[#allocation2 + $0x29] sm:$0x1] %v3052_v1  ;;  %425 = vst [vmem:[#allocation2 + $0x41] sm:$0x1] %v3052_v1  ;;  %v2693_v39 = vld [vmem:[%s3176_s20 + $0x70] sm:$0xff]   ;;  %v3246_v40 = vld [vmem:[%s3176_s20 + $0x78] sm:$0xff]   ;;  %v3268_v46 = vunpack.c.l.bf16 %v2691_v33  ;;  %v3270_v47 = vunpack.c.h.bf16 %v2691_v33  ;;  %v3272_v48 = vunpack.c.l.bf16 %v2692_v34  ;;  %v3274_v49 = vunpack.c.h.bf16 %v2692_v34 }
  0x18   : > { %426 = vst [vmem:[#allocation2 + $0x59] sm:$0x1] %v3052_v1  ;;  %427 = vst [vmem:[#allocation2 + $0x71] sm:$0x1] %v3052_v1  ;;  %v3280_v50 = vunpack.c.l.bf16 %v2693_v39  ;;  %v3282_v51 = vunpack.c.h.bf16 %v2693_v39  ;;  %v5131_v52 = vunpack.c.l.bf16 %v3246_v40  ;;  %v5130_v53 = vunpack.c.h.bf16 %v3246_v40  ;;  %v540_v2 = vld [vmem:[#allocation2 + $0x1] sm:$0xff]  ;;  %v541_v6 = vld [vmem:[#allocation2 + $0x9] sm:$0xff] }
  0x19   : > { %428 = vst [vmem:[#allocation2 + $0x89] sm:$0x1] %v3052_v1  ;;  %429 = vst [vmem:[#allocation2 + $0xa1] sm:$0x1] %v3052_v1  ;;  %2759 = vmatpush3.bf16.msra.mxu1 %v2853_v4  ;;  %v5129_v59 = vsub.s32 0, %v3313_v58  ;;  %v574_v61 = vsub.s32 1, %v3313_v58 }
  0x1a   : > { %430 = vst [vmem:[#allocation2 + $0xb9] sm:$0x1] %v3052_v1  ;;  %431 = vst [vmem:[#allocation2 + $0xd1] sm:$0x1] %v3052_v1  ;;  %2760 = vmatprep.subr.bf16.mxu1 %v3052_v1  ;;  %v674_v62 = vsub.s32 2, %v3313_v58  ;;  %v774_v63 = vsub.s32 3, %v3313_v58 }
  0x1b   : > { %432 = vst [vmem:[#allocation2 + $0xe9] sm:$0x1] %v3052_v1  ;;  %433 = vst [vmem:[#allocation2 + $0x101] sm:$0x1] %v3052_v1  ;;  %v874_v0 = vsub.s32 4, %v3313_v58  ;;  %v3337_v7 = vrot.slane %v3319_v60, %v574_v61 }
  0x1c   : > { %434 = vst [vmem:[#allocation2 + $0x119] sm:$0x1] %v3052_v1  ;;  %435 = vst [vmem:[#allocation2 + $0x131] sm:$0x1] %v3052_v1  ;;  %v3346_v19 = vrot.slane %v3319_v60, %v674_v62  ;;  %v3349_v20 = vrot.slane %v3319_v60, %v774_v63 }
  0x1d   : > { %436 = vst [vmem:[#allocation2 + $0x149] sm:$0x1] %v3052_v1  ;;  %437 = vst [vmem:[#allocation2 + $0x161] sm:$0x1] %v3052_v1  ;;  %2761 = vmatpush3.bf16.msra.mxu1 %v2854_v41  ;;  %v3358_v28 = vrot.slane %v3319_v60, %v874_v0 }
  0x1e   : > { %438 = vst [vmem:[#allocation2 + $0x179] sm:$0x1] %v3052_v1  ;;  %439 = vst [vmem:[#allocation2 + $0x191] sm:$0x1] %v3052_v1  ;;  %2762 = vmatprep.subr.bf16.mxu1 %v3052_v1 }
  0x1f   : > { %5240 = vst [vmem:[#allocation3_spill] sm:$0xff] %v3184_v8  ;;  %5241 = vst [vmem:[#allocation4_spill] sm:$0xff] %v3186_v9 }
  0x20   : > { %5242 = vst [vmem:[#allocation5_spill] sm:$0xff] %v3188_v10  ;;  %5243 = vst [vmem:[#allocation6_spill] sm:$0xff] %v3190_v11 }
  0x21   : > { %5244 = vst [vmem:[#allocation7_spill] sm:$0xff] %v3195_v15  ;;  %5245 = vst [vmem:[#allocation8_spill] sm:$0xff] %v3197_v16  ;;  %2763 = vmatpush3.bf16.msra.mxu1 %v2855_v54 }
  0x22   : > { %5246 = vst [vmem:[#allocation9_spill] sm:$0xff] %v3199_v17  ;;  %5247 = vst [vmem:[#allocation10_spill] sm:$0xff] %v3201_v18  ;;  %2764 = vmatprep.subr.bf16.mxu1 %v3052_v1 }
  0x23   : > { %5248 = vst [vmem:[#allocation11_spill] sm:$0xff] %v3207_v22  ;;  %5249 = vst [vmem:[#allocation12_spill] sm:$0xff] %v3209_v23 }
  0x24   : > { %5250 = vst [vmem:[#allocation13_spill] sm:$0xff] %v3211_v24  ;;  %5251 = vst [vmem:[#allocation14_spill] sm:$0xff] %v3213_v25 }
  0x25   : > { %440 = vst [vmem:[#allocation2 + $0x19] sm:$0xff] %v3184_v8  ;;  %441 = vst [vmem:[#allocation2 + $0x21] sm:$0xff] %v3186_v9  ;;  %2765 = vmatpush3.bf16.msra.mxu1 %v2856_v55 }
  0x26   : > { %442 = vst [vmem:[#allocation2 + $0x31] sm:$0xff] %v3188_v10  ;;  %443 = vst [vmem:[#allocation2 + $0x39] sm:$0xff] %v3190_v11  ;;  %2766 = vmatprep.subr.bf16.mxu1 %v3052_v1 }
  0x27   : > { %5252 = vst [vmem:[#allocation15_spill] sm:$0xff] %v3222_v29  ;;  %5253 = vst [vmem:[#allocation16_spill] sm:$0xff] %v3224_v30 }
  0x28   : > { %5254 = vst [vmem:[#allocation17_spill] sm:$0xff] %v3226_v31  ;;  %5255 = vst [vmem:[#allocation18_spill] sm:$0xff] %v3228_v32 }
  0x29   : > { %444 = vst [vmem:[#allocation2 + $0x49] sm:$0xff] %v3195_v15  ;;  %445 = vst [vmem:[#allocation2 + $0x51] sm:$0xff] %v3197_v16  ;;  %2767 = vmatpush3.bf16.msra.mxu1 %v2857_v56 }
  0x2a   : > { %446 = vst [vmem:[#allocation2 + $0x61] sm:$0xff] %v3199_v17  ;;  %447 = vst [vmem:[#allocation2 + $0x69] sm:$0xff] %v3201_v18  ;;  %2772 = vmatprep.subr.bf16.mxu1 %v3052_v1  ;;  %v3328_v1 = vrot.slane %v3319_v60, %v5129_v59 }
  0x2b   : > { %5256 = vst [vmem:[#allocation19_spill] sm:$0xff] %v3236_v35  ;;  %5257 = vst [vmem:[#allocation20_spill] sm:$0xff] %v3238_v36 }
  0x2c   : > { %5258 = vst [vmem:[#allocation21_spill] sm:$0xff] %v3240_v37  ;;  %5259 = vst [vmem:[#allocation22_spill] sm:$0xff] %v3242_v38  ;;  %v3330_v3 = vld [vmem:[#allocation2 + $0x18] sm:$0xff]  ;;  %v3332_v4 = vld [vmem:[#allocation2 + $0x20] sm:$0xff]  ;;  %v3370_v56 = vmul.f32 0.0, %v3328_v1 }
  0x2d   : > { %5260 = vst [vmem:[#allocation23_spill] sm:$0xff] %v3246_v40  ;;  %448 = vst [vmem:[#allocation2 + $0x79] sm:$0xff] %v3207_v22  ;;  %v3334_v5 = vld [vmem:[#allocation2 + $0x30] sm:$0xff]  ;;  %v3339_v12 = vld [vmem:[#allocation2 + $0x38] sm:$0xff]  ;;  %v3374_v57 = vmul.f32 %v3328_v1, %v3330_v3  ;;  %v3378_v61 = vmul.f32 %v3328_v1, %v3332_v4 }
  0x2e   : > { %449 = vst [vmem:[#allocation2 + $0x81] sm:$0xff] %v3209_v23  ;;  %450 = vst [vmem:[#allocation2 + $0x91] sm:$0xff] %v3211_v24  ;;  %v3382_v62 = vmul.f32 %v3328_v1, %v3334_v5  ;;  %v3392_v39 = vmul.f32 %v3328_v1, %v3339_v12 }
  0x2f   : > { %451 = vst [vmem:[#allocation2 + $0x99] sm:$0xff] %v3213_v25  ;;  %5261 = vst [vmem:[#allocation24_spill] sm:$0xff] %v3255_v42 }
  0x30   : > { %5262 = vst [vmem:[#allocation25_spill] sm:$0xff] %v3257_v43  ;;  %5263 = vst [vmem:[#allocation26_spill] sm:$0xff] %v3259_v44  ;;  %v3341_v13 = vld [vmem:[#allocation2 + $0x48] sm:$0xff]  ;;  %v3343_v14 = vld [vmem:[#allocation2 + $0x50] sm:$0xff] }
  0x31   : > { %5264 = vst [vmem:[#allocation27_spill] sm:$0xff] %v3261_v45  ;;  %452 = vst [vmem:[#allocation2 + $0xa9] sm:$0xff] %v3222_v29  ;;  %v3351_v21 = vld [vmem:[#allocation2 + $0x60] sm:$0xff]  ;;  %v3353_v26 = vld [vmem:[#allocation2 + $0x68] sm:$0xff]  ;;  %v3396_v34 = vmul.f32 %v3328_v1, %v3341_v13  ;;  %v3400_v33 = vmul.f32 %v3328_v1, %v3343_v14 }
  0x32   : > { %453 = vst [vmem:[#allocation2 + $0xb1] sm:$0xff] %v3224_v30  ;;  %454 = vst [vmem:[#allocation2 + $0xc1] sm:$0xff] %v3226_v31  ;;  %v3413_v40 = vmul.f32 %v3328_v1, %v3351_v21 }
  0x33   : > { %455 = vst [vmem:[#allocation2 + $0xc9] sm:$0xff] %v3228_v32  ;;  %5265 = vst [vmem:[#allocation28_spill] sm:$0xff] %v3268_v46 }
  0x34   : > { %5266 = vst [vmem:[#allocation29_spill] sm:$0xff] %v3270_v47  ;;  %5267 = vst [vmem:[#allocation30_spill] sm:$0xff] %v3272_v48  ;;  %v3355_v27 = vld [vmem:[#allocation2 + $0x78] sm:$0xff] }
  0x35   : > { %5268 = vst [vmem:[#allocation31_spill] sm:$0xff] %v3274_v49  ;;  %456 = vst [vmem:[#allocation2 + $0xd9] sm:$0xff] %v3236_v35  ;;  %v3363_v41 = vld [vmem:[#allocation2 + $0x80] sm:$0xff]  ;;  %v3365_v54 = vld [vmem:[#allocation2 + $0x90] sm:$0xff] }
  0x36   : > { %457 = vst [vmem:[#allocation2 + $0xe1] sm:$0xff] %v3238_v36  ;;  %458 = vst [vmem:[#allocation2 + $0xf1] sm:$0xff] %v3240_v37  ;;  %v3367_v55 = vld [vmem:[#allocation2 + $0x98] sm:$0xff] }
  0x37   : > { %459 = vst [vmem:[#allocation2 + $0xf9] sm:$0xff] %v3242_v38  ;;  %5269 = vst [vmem:[#allocation32_spill] sm:$0xff] %v3280_v50 }
  0x38   : > { %5270 = vst [vmem:[#allocation33_spill] sm:$0xff] %v3282_v51  ;;  %460 = vst [vmem:[#allocation2 + $0x109] sm:$0xff] %v3255_v42  ;;  %v3384_v63 = vld [vmem:[#allocation2 + $0xa8] sm:$0xff] }
  0x39   : > { %461 = vst [vmem:[#allocation2 + $0x111] sm:$0xff] %v3257_v43  ;;  %462 = vst [vmem:[#allocation2 + $0x121] sm:$0xff] %v3259_v44  ;;  %v3386_v0 = vld [vmem:[#allocation2 + $0xb0] sm:$0xff]  ;;  %v3388_v59 = vld [vmem:[#allocation2 + $0xc0] sm:$0xff] }
  0x3a   : > { %463 = vst [vmem:[#allocation2 + $0x129] sm:$0xff] %v3261_v45  ;;  %464 = vst [vmem:[#allocation2 + $0x139] sm:$0xff] %v3268_v46 }
  0x3b   : > { %465 = vst [vmem:[#allocation2 + $0x141] sm:$0xff] %v3270_v47  ;;  %466 = vst [vmem:[#allocation2 + $0x151] sm:$0xff] %v3272_v48 }
  0x3c   : > { %467 = vst [vmem:[#allocation2 + $0x159] sm:$0xff] %v3274_v49  ;;  %468 = vst [vmem:[#allocation2 + $0x169] sm:$0xff] %v3280_v50 }
  0x3d   : > { %469 = vst [vmem:[#allocation2 + $0x171] sm:$0xff] %v3282_v51  ;;  %470 = vst [vmem:[#allocation2 + $0x181] sm:$0xff] %v5131_v52  ;;  %v3405_v52 = vld [vmem:[#allocation2 + $0xc8] sm:$0xff] }
  0x3e   : > { %471 = vst [vmem:[#allocation2 + $0x189] sm:$0xff] %v5130_v53  ;;  %5271 = vst [vmem:[#allocation34_spill] sm:$0xff] %v3313_v58  ;;  %v3403_v53 = vmul.f32 %v3337_v7, %v540_v2  ;;  %v3409_v58 = vld [vmem:[#allocation2 + $0xe0] sm:$0xff]  ;;  %v3424_v2 = vmul.f32 %v3337_v7, %v541_v6  ;;  %v578_v6 = vmul.f32 %v3184_v8, %v3337_v7 }
  0x3f   : > { %5272 = vst [vmem:[#allocation35_spill] sm:$0xff] %v3319_v60  ;;  %5273 = vst [vmem:[#allocation36_spill] sm:$0xff] %v3330_v3  ;;  %v3407_v60 = vld [vmem:[#allocation2 + $0xd8] sm:$0xff]  ;;  %v579_v8 = vmul.f32 %v3186_v9, %v3337_v7  ;;  %v580_v9 = vmul.f32 %v3188_v10, %v3337_v7  ;;  %v581_v10 = vmul.f32 %v3190_v11, %v3337_v7 }
  0x40   : > { %5274 = vst [vmem:[#allocation37_spill] sm:$0xff] %v3332_v4  ;;  %5275 = vst [vmem:[#allocation38_spill] sm:$0xff] %v3334_v5  ;;  %v3430_v5 = vld [vmem:[#allocation2 + $0x108] sm:$0xff]  ;;  %v3446_v4 = vld [vmem:[#allocation2 + $0x110] sm:$0xff] }
  0x41   : > { %5276 = vst [vmem:[#allocation39_spill] sm:$0xff] %v3339_v12  ;;  %5277 = vst [vmem:[#allocation40_spill] sm:$0xff] %v3341_v13  ;;  %v3426_v13 = vld [vmem:[#allocation2 + $0xf0] sm:$0xff]  ;;  %v3428_v12 = vld [vmem:[#allocation2 + $0xf8] sm:$0xff] }
  0x42   : > { %5278 = vst [vmem:[#allocation41_spill] sm:$0xff] %v3343_v14  ;;  %5279 = vst [vmem:[#allocation42_spill] sm:$0xff] %v3346_v19  ;;  %v3421_v14 = vmul.f32 %v3328_v1, %v3355_v27  ;;  %v3450_v3 = vld [vmem:[#allocation2 + $0x128] sm:$0xff]  ;;  %v3466_v19 = vld [vmem:[#allocation2 + $0x138] sm:$0xff] }
  0x43   : > { %5280 = vst [vmem:[#allocation43_spill] sm:$0xff] %v3349_v20  ;;  %5281 = vst [vmem:[#allocation44_spill] sm:$0xff] %v3351_v21  ;;  %v3434_v21 = vmul.f32 %v3328_v1, %v3363_v41  ;;  %v3448_v20 = vld [vmem:[#allocation2 + $0x120] sm:$0xff] }
  0x44   : > { %5282 = vst [vmem:[#allocation45_spill] sm:$0xff] %v3353_v26  ;;  %5283 = vst [vmem:[#allocation46_spill] sm:$0xff] %v3355_v27  ;;  %v3442_v27 = vmul.f32 %v3328_v1, %v3367_v55 }
  0x45   : > { %5284 = vst [vmem:[#allocation47_spill] sm:$0xff] %v3358_v28  ;;  %5285 = vst [vmem:[#allocation48_spill] sm:$0xff] %v3363_v41  ;;  %v3417_v28 = vmul.f32 %v3328_v1, %v3353_v26  ;;  %v3438_v26 = vmul.f32 %v3328_v1, %v3365_v54  ;;  %v3454_v41 = vmul.f32 %v3328_v1, %v3384_v63 }
  0x46   : > { %5286 = vst [vmem:[#allocation49_spill] sm:$0xff] %v3365_v54  ;;  %5287 = vst [vmem:[#allocation50_spill] sm:$0xff] %v3367_v55  ;;  %v3458_v54 = vmul.f32 %v3328_v1, %v3386_v0  ;;  %v3462_v55 = vmul.f32 %v3328_v1, %v3388_v59 }
  0x47   : > { %5288 = vst [vmem:[#allocation51_spill] sm:$0xff] %v3384_v63  ;;  %5289 = vst [vmem:[#allocation52_spill] sm:$0xff] %v3386_v0  ;;  %v3474_v63 = vmul.f32 %v3328_v1, %v3405_v52  ;;  %v3478_v0 = vmul.f32 %v3328_v1, %v3407_v60 }
  0x48   : > { %5290 = vst [vmem:[#allocation53_spill] sm:$0xff] %v3388_v59  ;;  %5291 = vst [vmem:[#allocation54_spill] sm:$0xff] %v3405_v52  ;;  %v3482_v59 = vmul.f32 %v3328_v1, %v3409_v58  ;;  %v3494_v52 = vmul.f32 %v3328_v1, %v3426_v13 }
  0x49   : > { %5292 = vst [vmem:[#allocation55_spill] sm:$0xff] %v3407_v60  ;;  %5293 = vst [vmem:[#allocation56_spill] sm:$0xff] %v3409_v58  ;;  %v3498_v60 = vmul.f32 %v3328_v1, %v3428_v12  ;;  %v3502_v58 = vmul.f32 %v3328_v1, %v3430_v5 }
  0x4a   : > { %5294 = vst [vmem:[#allocation57_spill] sm:$0xff] %v3426_v13  ;;  %5295 = vst [vmem:[#allocation58_spill] sm:$0xff] %v3428_v12  ;;  %v3516_v13 = vmul.f32 %v3328_v1, %v3450_v3  ;;  %v582_v12 = vmul.f32 %v3195_v15, %v3337_v7 }
  0x4b   : > { %5296 = vst [vmem:[#allocation59_spill] sm:$0xff] %v3430_v5  ;;  %5297 = vst [vmem:[#allocation60_spill] sm:$0xff] %v3438_v26  ;;  %v3470_v26 = vld [vmem:[#allocation2 + $0x150] sm:$0xff]  ;;  %v3522_v5 = vmul.f32 %v3328_v1, %v3466_v19 }
  0x4c   : > { %5298 = vst [vmem:[#allocation61_spill] sm:$0xff] %v3442_v27  ;;  %5299 = vst [vmem:[#allocation62_spill] sm:$0xff] %v3446_v4  ;;  %v3468_v27 = vld [vmem:[#allocation2 + $0x140] sm:$0xff] }
  0x4d   : > { %5300 = vst [vmem:[#allocation63_spill] sm:$0xff] %v3448_v20  ;;  %5301 = vst [vmem:[#allocation64_spill] sm:$0xff] %v3450_v3  ;;  %v3526_v11 = vmul.f32 %v3328_v1, %v3468_v27 }
  0x4e   : > { %5302 = vst [vmem:[#allocation65_spill] sm:$0xff] %v3454_v41  ;;  %5303 = vst [vmem:[#allocation66_spill] sm:$0xff] %v3458_v54  ;;  %v3488_v54 = vld [vmem:[#allocation2 + $0x168] sm:$0xff]  ;;  %v3490_v41 = vld [vmem:[#allocation2 + $0x170] sm:$0xff] }
  0x4f   : > { %5304 = vst [vmem:[#allocation67_spill] sm:$0xff] %v3462_v55  ;;  %5305 = vst [vmem:[#allocation68_spill] sm:$0xff] %v3466_v19  ;;  %v3486_v55 = vld [vmem:[#allocation2 + $0x158] sm:$0xff]  ;;  %v3540_v15 = vmul.f32 %v3328_v1, %v3488_v54  ;;  %v3544_v19 = vmul.f32 %v3328_v1, %v3490_v41 }
  0x50   : > { %5306 = vst [vmem:[#allocation69_spill] sm:$0xff] %v3468_v27  ;;  %5307 = vst [vmem:[#allocation70_spill] sm:$0xff] %v3470_v26  ;;  %v3536_v3 = vmul.f32 %v3328_v1, %v3486_v55  ;;  %v584_v27 = vmul.f32 %v3199_v17, %v3337_v7  ;;  %v591_v17 = vmul.f32 %v3224_v30, %v3337_v7 }
  0x51   : > { %5308 = vst [vmem:[#allocation71_spill] sm:$0xff] %v3478_v0  ;;  %5309 = vst [vmem:[#allocation72_spill] sm:$0xff] %v3482_v59  ;;  %v3508_v59 = vmul.f32 %v3328_v1, %v3446_v4  ;;  %v3512_v0 = vmul.f32 %v3328_v1, %v3448_v20  ;;  %v3530_v4 = vmul.f32 %v3328_v1, %v3470_v26 }
  0x52   : > { %5310 = vst [vmem:[#allocation73_spill] sm:$0xff] %v3486_v55  ;;  %5311 = vst [vmem:[#allocation74_spill] sm:$0xff] %v3488_v54  ;;  %v583_v20 = vmul.f32 %v3197_v16, %v3337_v7  ;;  %v585_v26 = vmul.f32 %v3201_v18, %v3337_v7  ;;  %v586_v16 = vmul.f32 %v3207_v22, %v3337_v7 }
  0x53   : > { %5312 = vst [vmem:[#allocation75_spill] sm:$0xff] %v3490_v41  ;;  %5313 = vst [vmem:[#allocation76_spill] sm:$0xff] %v3540_v15  ;;  %v587_v55 = vmul.f32 %v3209_v23, %v3337_v7  ;;  %v588_v54 = vmul.f32 %v3211_v24, %v3337_v7  ;;  %v589_v15 = vmul.f32 %v3213_v25, %v3337_v7 }
  0x54   : > { %v590_v1 = vmul.f32 %v3222_v29, %v3337_v7  ;;  %v592_v18 = vmul.f32 %v3226_v31, %v3337_v7  ;;  %v593_v22 = vmul.f32 %v3228_v32, %v3337_v7  ;;  %v594_v23 = vmul.f32 %v3236_v35, %v3337_v7 }
  0x55   : > { %v595_v24 = vmul.f32 %v3238_v36, %v3337_v7  ;;  %v596_v25 = vmul.f32 %v3240_v37, %v3337_v7  ;;  %v597_v29 = vmul.f32 %v3242_v38, %v3337_v7  ;;  %v598_v30 = vmul.f32 %v3255_v42, %v3337_v7 }
  0x56   : > { %v599_v31 = vmul.f32 %v3257_v43, %v3337_v7  ;;  %v600_v32 = vmul.f32 %v3259_v44, %v3337_v7  ;;  %v601_v35 = vmul.f32 %v3261_v45, %v3337_v7  ;;  %v602_v36 = vmul.f32 %v3268_v46, %v3337_v7 }
  0x57   : > { %v603_v37 = vmul.f32 %v3270_v47, %v3337_v7  ;;  %v604_v38 = vmul.f32 %v3272_v48, %v3337_v7  ;;  %v605_v42 = vmul.f32 %v3274_v49, %v3337_v7  ;;  %v606_v43 = vmul.f32 %v3280_v50, %v3337_v7 }
  0x58   : > { %v607_v44 = vmul.f32 %v3282_v51, %v3337_v7  ;;  %v3596_v45 = vadd.f32 %v3403_v53, %v3370_v56  ;;  %v3600_v46 = vadd.f32 %v3424_v2, %v3370_v56  ;;  %v3603_v47 = vadd.f32 %v578_v6, %v3374_v57  ;;  %v5323_v2 = vld [vmem:[#allocation72_spill] sm:$0xff]  ;;  %v3754_v51 = vld [vmem:[#allocation2 + $0x12a] sm:$0xff] }
  0x59   : > { %v3606_v48 = vadd.f32 %v579_v8, %v3378_v61  ;;  %v3609_v49 = vadd.f32 %v580_v9, %v3382_v62  ;;  %v3612_v50 = vadd.f32 %v581_v10, %v3392_v39  ;;  %v3615_v7 = vadd.f32 %v582_v12, %v3396_v34  ;;  %v5314_v10 = vld [vmem:[#allocation60_spill] sm:$0xff]  ;;  %v640_v12 = vld [vmem:[#allocation2 + $0x2] sm:$0xff]  ;;  %5354 = vst [vmem:[#allocation99_spill] sm:$0xff] %v3754_v51 }
  0x5a   : > { %v3618_v53 = vadd.f32 %v583_v20, %v3400_v33  ;;  %v3621_v56 = vadd.f32 %v584_v27, %v3413_v40  ;;  %v3624_v57 = vadd.f32 %v585_v26, %v3417_v28  ;;  %v3627_v8 = vadd.f32 %v586_v16, %v3421_v14  ;;  %v5315_v34 = vld [vmem:[#allocation61_spill] sm:$0xff]  ;;  %v5317_v40 = vld [vmem:[#allocation66_spill] sm:$0xff]  ;;  %v5318_v26 = vld [vmem:[#allocation67_spill] sm:$0xff] }
  0x5b   : > { %v3630_v9 = vadd.f32 %v587_v55, %v3434_v21  ;;  %v3633_v39 = vadd.f32 %v588_v54, %v5314_v10  ;;  %v3636_v61 = vadd.f32 %v589_v15, %v5315_v34  ;;  %v5316_v20 = vld [vmem:[#allocation65_spill] sm:$0xff]  ;;  %v3642_v27 = vadd.f32 %v591_v17, %v5317_v40  ;;  %v641_v16 = vld [vmem:[#allocation2 + $0xa] sm:$0xff]  ;;  %v3651_v54 = vld [vmem:[#allocation2 + $0x32] sm:$0xff] }
  0x5c   : > { %v3639_v33 = vadd.f32 %v590_v1, %v5316_v20  ;;  %v3645_v28 = vadd.f32 %v592_v18, %v5318_v26  ;;  %v3647_v14 = vld [vmem:[#allocation2 + $0x1a] sm:$0xff]  ;;  %v3649_v21 = vld [vmem:[#allocation2 + $0x22] sm:$0xff]  ;;  %5321 = vst [vmem:[#allocation65_spill] sm:$0xff] %v3651_v54  ;;  %v3654_v55 = vadd.f32 %v593_v22, %v3474_v63  ;;  %v5322_v15 = vld [vmem:[#allocation71_spill] sm:$0xff]  ;;  %v3660_v6 = vadd.f32 %v595_v24, %v5323_v2 }
  0x5d   : > { %5319 = vst [vmem:[#allocation60_spill] sm:$0xff] %v3647_v14  ;;  %5320 = vst [vmem:[#allocation61_spill] sm:$0xff] %v3649_v21  ;;  %v3657_v62 = vadd.f32 %v594_v23, %v5322_v15  ;;  %v3663_v17 = vadd.f32 %v596_v25, %v3494_v52  ;;  %v3665_v18 = vld [vmem:[#allocation2 + $0x3a] sm:$0xff]  ;;  %v3667_v1 = vld [vmem:[#allocation2 + $0x4a] sm:$0xff]  ;;  %v3674_v22 = vadd.f32 %v597_v29, %v3498_v60 }
  0x5e   : > { %5324 = vst [vmem:[#allocation66_spill] sm:$0xff] %v3665_v18  ;;  %5325 = vst [vmem:[#allocation67_spill] sm:$0xff] %v3667_v1  ;;  %v3669_v10 = vld [vmem:[#allocation2 + $0x52] sm:$0xff]  ;;  %v3671_v34 = vld [vmem:[#allocation2 + $0x62] sm:$0xff]  ;;  %v3677_v23 = vadd.f32 %v598_v30, %v3502_v58  ;;  %v3680_v24 = vadd.f32 %v599_v31, %v3508_v59  ;;  %v3683_v25 = vadd.f32 %v600_v32, %v3512_v0 }
  0x5f   : > { %5326 = vst [vmem:[#allocation71_spill] sm:$0xff] %v3669_v10  ;;  %5327 = vst [vmem:[#allocation72_spill] sm:$0xff] %v3671_v34  ;;  %v3685_v52 = vld [vmem:[#allocation2 + $0x6a] sm:$0xff]  ;;  %v3687_v63 = vld [vmem:[#allocation2 + $0x7a] sm:$0xff]  ;;  %v3694_v29 = vadd.f32 %v601_v35, %v3516_v13  ;;  %v3697_v30 = vadd.f32 %v602_v36, %v3522_v5  ;;  %v3700_v31 = vadd.f32 %v603_v37, %v3526_v11 }
  0x60   : > { %5328 = vst [vmem:[#allocation77_spill] sm:$0xff] %v3683_v25  ;;  %5329 = vst [vmem:[#allocation78_spill] sm:$0xff] %v3685_v52  ;;  %v3689_v20 = vld [vmem:[#allocation2 + $0x82] sm:$0xff]  ;;  %v3691_v40 = vld [vmem:[#allocation2 + $0x92] sm:$0xff]  ;;  %v3703_v32 = vadd.f32 %v604_v38, %v3530_v4  ;;  %v3712_v0 = vadd.f32 %v605_v42, %v3536_v3  ;;  %v3718_v36 = vadd.f32 %v607_v44, %v3544_v19 }
  0x61   : > { %5330 = vst [vmem:[#allocation79_spill] sm:$0xff] %v3687_v63  ;;  %5331 = vst [vmem:[#allocation80_spill] sm:$0xff] %v3689_v20  ;;  %v3705_v58 = vld [vmem:[#allocation2 + $0x9a] sm:$0xff]  ;;  %v3707_v59 = vld [vmem:[#allocation2 + $0xaa] sm:$0xff] }
  0x62   : > { %5332 = vst [vmem:[#allocation81_spill] sm:$0xff] %v3691_v40  ;;  %5333 = vst [vmem:[#allocation82_spill] sm:$0xff] %v3694_v29  ;;  %v3709_v60 = vld [vmem:[#allocation2 + $0xb2] sm:$0xff]  ;;  %v3720_v11 = vld [vmem:[#allocation2 + $0xc2] sm:$0xff] }
  0x63   : > { %5334 = vst [vmem:[#allocation83_spill] sm:$0xff] %v3697_v30  ;;  %5335 = vst [vmem:[#allocation84_spill] sm:$0xff] %v3700_v31  ;;  %v5341_v35 = vld [vmem:[#allocation76_spill] sm:$0xff]  ;;  %v5345_v37 = vld [vmem:[#allocation42_spill] sm:$0xff] }
  0x64   : > { %5336 = vst [vmem:[#allocation85_spill] sm:$0xff] %v3703_v32  ;;  %5337 = vst [vmem:[#allocation86_spill] sm:$0xff] %v3705_v58  ;;  %v3715_v13 = vadd.f32 %v606_v43, %v5341_v35  ;;  %v676_v38 = vmul.f32 %v5345_v37, %v640_v12  ;;  %v3723_v4 = vld [vmem:[#allocation2 + $0xca] sm:$0xff]  ;;  %v3725_v5 = vld [vmem:[#allocation2 + $0xda] sm:$0xff]  ;;  %v677_v15 = vmul.f32 %v5345_v37, %v641_v16 }
  0x65   : > { %5338 = vst [vmem:[#allocation87_spill] sm:$0xff] %v3707_v59  ;;  %5339 = vst [vmem:[#allocation88_spill] sm:$0xff] %v3709_v60  ;;  %v3727_v26 = vld [vmem:[#allocation2 + $0xe2] sm:$0xff]  ;;  %v678_v42 = vmul.f32 %v5345_v37, %v3647_v14  ;;  %v679_v43 = vmul.f32 %v5345_v37, %v3649_v21  ;;  %v680_v44 = vmul.f32 %v5345_v37, %v3651_v54  ;;  %v3736_v3 = vld [vmem:[#allocation2 + $0xf2] sm:$0xff] }
  0x66   : > { %5340 = vst [vmem:[#allocation89_spill] sm:$0xff] %v3712_v0  ;;  %5342 = vst [vmem:[#allocation76_spill] sm:$0xff] %v3715_v13  ;;  %v3738_v19 = vld [vmem:[#allocation2 + $0xfa] sm:$0xff]  ;;  %v3740_v12 = vld [vmem:[#allocation2 + $0x10a] sm:$0xff]  ;;  %v681_v2 = vmul.f32 %v5345_v37, %v3665_v18  ;;  %v682_v16 = vmul.f32 %v5345_v37, %v3667_v1  ;;  %v683_v35 = vmul.f32 %v5345_v37, %v3669_v10 }
  0x67   : > { %5343 = vst [vmem:[#allocation90_spill] sm:$0xff] %v3718_v36  ;;  %5344 = vst [vmem:[#allocation91_spill] sm:$0xff] %v3720_v11  ;;  %v684_v21 = vmul.f32 %v5345_v37, %v3671_v34  ;;  %v3750_v14 = vld [vmem:[#allocation2 + $0x112] sm:$0xff]  ;;  %v3752_v54 = vld [vmem:[#allocation2 + $0x122] sm:$0xff]  ;;  %v685_v41 = vmul.f32 %v5345_v37, %v3685_v52  ;;  %v686_v18 = vmul.f32 %v5345_v37, %v3687_v63 }
  0x68   : > { %5346 = vst [vmem:[#allocation42_spill] sm:$0xff] %v3723_v4  ;;  %5347 = vst [vmem:[#allocation92_spill] sm:$0xff] %v3725_v5  ;;  %v687_v1 = vmul.f32 %v5345_v37, %v3689_v20  ;;  %v688_v10 = vmul.f32 %v5345_v37, %v3691_v40  ;;  %v3764_v36 = vld [vmem:[#allocation2 + $0x13a] sm:$0xff]  ;;  %v3766_v34 = vld [vmem:[#allocation2 + $0x142] sm:$0xff]  ;;  %v689_v0 = vmul.f32 %v5345_v37, %v3705_v58 }
  0x69   : > { %5348 = vst [vmem:[#allocation93_spill] sm:$0xff] %v3727_v26  ;;  %5349 = vst [vmem:[#allocation94_spill] sm:$0xff] %v3736_v3  ;;  %v3768_v13 = vld [vmem:[#allocation2 + $0x152] sm:$0xff]  ;;  %v690_v52 = vmul.f32 %v5345_v37, %v3707_v59  ;;  %v691_v63 = vmul.f32 %v5345_v37, %v3709_v60  ;;  %v692_v20 = vmul.f32 %v5345_v37, %v3720_v11  ;;  %v3778_v32 = vld [vmem:[#allocation2 + $0x15a] sm:$0xff] }
  0x6a   : > { %5350 = vst [vmem:[#allocation95_spill] sm:$0xff] %v3738_v19  ;;  %5351 = vst [vmem:[#allocation96_spill] sm:$0xff] %v3740_v12  ;;  %v3780_v40 = vld [vmem:[#allocation2 + $0x16a] sm:$0xff]  ;;  %v3782_v31 = vld [vmem:[#allocation2 + $0x172] sm:$0xff]  ;;  %v693_v30 = vmul.f32 %v5345_v37, %v3723_v4  ;;  %v694_v58 = vmul.f32 %v5345_v37, %v3725_v5  ;;  %v695_v59 = vmul.f32 %v5345_v37, %v3727_v26 }
  0x6b   : > { %5352 = vst [vmem:[#allocation97_spill] sm:$0xff] %v3750_v14  ;;  %5353 = vst [vmem:[#allocation98_spill] sm:$0xff] %v3752_v54  ;;  %v696_v60 = vmul.f32 %v5345_v37, %v3736_v3  ;;  %v697_v11 = vmul.f32 %v5345_v37, %v3738_v19  ;;  %v698_v29 = vmul.f32 %v5345_v37, %v3740_v12 }
  0x6c   : > { %5355 = vst [vmem:[#allocation100_spill] sm:$0xff] %v3764_v36  ;;  %5356 = vst [vmem:[#allocation101_spill] sm:$0xff] %v3766_v34  ;;  %v699_v25 = vmul.f32 %v5345_v37, %v3750_v14  ;;  %v700_v4 = vmul.f32 %v5345_v37, %v3752_v54  ;;  %v701_v5 = vmul.f32 %v5345_v37, %v3754_v51 }
  0x6d   : > { %5357 = vst [vmem:[#allocation102_spill] sm:$0xff] %v3768_v13  ;;  %5358 = vst [vmem:[#allocation103_spill] sm:$0xff] %v3778_v32  ;;  %v702_v26 = vmul.f32 %v5345_v37, %v3764_v36  ;;  %v703_v3 = vmul.f32 %v5345_v37, %v3766_v34  ;;  %v704_v19 = vmul.f32 %v5345_v37, %v3768_v13 }
  0x6e   : > { %5359 = vst [vmem:[#allocation104_spill] sm:$0xff] %v3780_v40  ;;  %5360 = vst [vmem:[#allocation105_spill] sm:$0xff] %v3782_v31  ;;  %v705_v12 = vmul.f32 %v5345_v37, %v3778_v32  ;;  %v706_v14 = vmul.f32 %v5345_v37, %v3780_v40  ;;  %v707_v54 = vmul.f32 %v5345_v37, %v3782_v31 }
  0x6f   : > { %v3815_v51 = vadd.f32 %v676_v38, %v3596_v45  ;;  %v3818_v36 = vadd.f32 %v677_v15, %v3600_v46  ;;  %v3821_v34 = vadd.f32 %v678_v42, %v3603_v47  ;;  %v3824_v13 = vadd.f32 %v679_v43, %v3606_v48  ;;  %v5381_v38 = vld [vmem:[#allocation39_spill] sm:$0xff]  ;;  %v5385_v43 = vld [vmem:[#allocation45_spill] sm:$0xff] }
  0x70   : > { %v3827_v32 = vadd.f32 %v680_v44, %v3609_v49  ;;  %v3830_v40 = vadd.f32 %v681_v2, %v3612_v50  ;;  %v3833_v37 = vadd.f32 %v682_v16, %v3615_v7  ;;  %v3836_v45 = vadd.f32 %v683_v35, %v3618_v53  ;;  %v5388_v16 = vld [vmem:[#allocation49_spill] sm:$0xff] }
  0x71   : > { %v3839_v46 = vadd.f32 %v684_v21, %v3621_v56  ;;  %v3842_v47 = vadd.f32 %v685_v41, %v3624_v57  ;;  %v3845_v48 = vadd.f32 %v686_v18, %v3627_v8  ;;  %v3848_v49 = vadd.f32 %v687_v1, %v3630_v9 }
  0x72   : > { %v3851_v50 = vadd.f32 %v688_v10, %v3633_v39  ;;  %v3854_v7 = vadd.f32 %v689_v0, %v3636_v61  ;;  %v3857_v53 = vadd.f32 %v690_v52, %v3639_v33  ;;  %v3860_v56 = vadd.f32 %v691_v63, %v3642_v27  ;;  %v5369_v10 = vld [vmem:[#allocation85_spill] sm:$0xff]  ;;  %v5375_v63 = vld [vmem:[#allocation90_spill] sm:$0xff] }
  0x73   : > { %v3863_v41 = vadd.f32 %v692_v20, %v3645_v28  ;;  %v3866_v57 = vadd.f32 %v693_v30, %v3654_v55  ;;  %v3869_v8 = vadd.f32 %v694_v58, %v3657_v62  ;;  %v3872_v9 = vadd.f32 %v695_v59, %v3660_v6  ;;  %v5361_v28 = vld [vmem:[#allocation77_spill] sm:$0xff]  ;;  %v5363_v55 = vld [vmem:[#allocation82_spill] sm:$0xff]  ;;  %v5365_v6 = vld [vmem:[#allocation83_spill] sm:$0xff] }
  0x74   : > { %v3875_v39 = vadd.f32 %v696_v60, %v3663_v17  ;;  %v3878_v61 = vadd.f32 %v697_v11, %v3674_v22  ;;  %v3881_v33 = vadd.f32 %v698_v29, %v3677_v23  ;;  %v3884_v27 = vadd.f32 %v699_v25, %v3680_v24  ;;  %v5367_v17 = vld [vmem:[#allocation84_spill] sm:$0xff]  ;;  %v5371_v23 = vld [vmem:[#allocation89_spill] sm:$0xff]  ;;  %v5378_v30 = vld [vmem:[#allocation43_spill] sm:$0xff] }
  0x75   : > { %v3887_v21 = vadd.f32 %v700_v4, %v5361_v28  ;;  %v3890_v62 = vadd.f32 %v701_v5, %v5363_v55  ;;  %v3893_v18 = vadd.f32 %v702_v26, %v5365_v6  ;;  %v3896_v1 = vadd.f32 %v703_v3, %v5367_v17  ;;  %v5373_v24 = vld [vmem:[#allocation76_spill] sm:$0xff]  ;;  %v5379_v59 = vld [vmem:[#allocation37_spill] sm:$0xff]  ;;  %v5380_v0 = vld [vmem:[#allocation38_spill] sm:$0xff] }
  0x76   : > { %v3899_v22 = vadd.f32 %v704_v19, %v5369_v10  ;;  %v3902_v52 = vadd.f32 %v705_v12, %v5371_v23  ;;  %v3905_v25 = vadd.f32 %v706_v14, %v5373_v24  ;;  %v3908_v20 = vadd.f32 %v707_v54, %v5375_v63  ;;  %v5377_v29 = vld [vmem:[#allocation36_spill] sm:$0xff]  ;;  %v5383_v14 = vld [vmem:[#allocation41_spill] sm:$0xff]  ;;  %v5386_v3 = vld [vmem:[#allocation46_spill] sm:$0xff] }
  0x77   : > { %5362 = vst [vmem:[#allocation77_spill] sm:$0xff] %v3887_v21  ;;  %5364 = vst [vmem:[#allocation82_spill] sm:$0xff] %v3890_v62  ;;  %v776_v58 = vmul.f32 %v5378_v30, %v5377_v29  ;;  %v777_v60 = vmul.f32 %v5378_v30, %v5379_v59  ;;  %v778_v11 = vmul.f32 %v5378_v30, %v5380_v0  ;;  %v5382_v5 = vld [vmem:[#allocation40_spill] sm:$0xff]  ;;  %v5389_v28 = vld [vmem:[#allocation50_spill] sm:$0xff] }
  0x78   : > { %5366 = vst [vmem:[#allocation83_spill] sm:$0xff] %v3893_v18  ;;  %5368 = vst [vmem:[#allocation84_spill] sm:$0xff] %v3896_v1  ;;  %v779_v4 = vmul.f32 %v5378_v30, %v5381_v38  ;;  %v780_v26 = vmul.f32 %v5378_v30, %v5382_v5  ;;  %v781_v15 = vmul.f32 %v5378_v30, %v5383_v14  ;;  %v5384_v54 = vld [vmem:[#allocation44_spill] sm:$0xff]  ;;  %v5390_v6 = vld [vmem:[#allocation51_spill] sm:$0xff] }
  0x79   : > { %5370 = vst [vmem:[#allocation85_spill] sm:$0xff] %v3899_v22  ;;  %5372 = vst [vmem:[#allocation89_spill] sm:$0xff] %v3902_v52  ;;  %v782_v42 = vmul.f32 %v5378_v30, %v5384_v54  ;;  %v783_v44 = vmul.f32 %v5378_v30, %v5385_v43  ;;  %v784_v19 = vmul.f32 %v5378_v30, %v5386_v3  ;;  %v5387_v12 = vld [vmem:[#allocation48_spill] sm:$0xff]  ;;  %v5392_v24 = vld [vmem:[#allocation53_spill] sm:$0xff] }
  0x7a   : > { %5374 = vst [vmem:[#allocation76_spill] sm:$0xff] %v3905_v25  ;;  %5376 = vst [vmem:[#allocation90_spill] sm:$0xff] %v3908_v20  ;;  %v785_v2 = vmul.f32 %v5378_v30, %v5387_v12  ;;  %v786_v35 = vmul.f32 %v5378_v30, %v5388_v16  ;;  %v787_v55 = vmul.f32 %v5378_v30, %v5389_v28  ;;  %v5391_v10 = vld [vmem:[#allocation52_spill] sm:$0xff]  ;;  %v5393_v29 = vld [vmem:[#allocation54_spill] sm:$0xff] }
  0x7b   : > { %v788_v17 = vmul.f32 %v5378_v30, %v5390_v6  ;;  %v789_v23 = vmul.f32 %v5378_v30, %v5391_v10  ;;  %v790_v63 = vmul.f32 %v5378_v30, %v5392_v24  ;;  %v791_v59 = vmul.f32 %v5378_v30, %v5393_v29  ;;  %v5394_v0 = vld [vmem:[#allocation55_spill] sm:$0xff]  ;;  %v3944_v5 = vld [vmem:[#allocation2 + $0x180] sm:$0xff]  ;;  %v3946_v14 = vld [vmem:[#allocation2 + $0x188] sm:$0xff] }
  0x7c   : > { %v792_v38 = vmul.f32 %v5378_v30, %v5394_v0  ;;  %5395 = vst [vmem:[#allocation36_spill] sm:$0xff] %v3944_v5  ;;  %5396 = vst [vmem:[#allocation43_spill] sm:$0xff] %v3946_v14  ;;  %v5397_v54 = vld [vmem:[#allocation56_spill] sm:$0xff]  ;;  %v5398_v3 = vld [vmem:[#allocation57_spill] sm:$0xff] }
  0x7d   : > { %v793_v43 = vmul.f32 %v5378_v30, %v5397_v54  ;;  %v794_v12 = vmul.f32 %v5378_v30, %v5398_v3  ;;  %v5399_v16 = vld [vmem:[#allocation58_spill] sm:$0xff]  ;;  %v5400_v6 = vld [vmem:[#allocation59_spill] sm:$0xff]  ;;  %v5403_v20 = vld [vmem:[#allocation64_spill] sm:$0xff] }
  0x7e   : > { %v795_v28 = vmul.f32 %v5378_v30, %v5399_v16  ;;  %v796_v10 = vmul.f32 %v5378_v30, %v5400_v6  ;;  %v5401_v24 = vld [vmem:[#allocation62_spill] sm:$0xff]  ;;  %v5402_v0 = vld [vmem:[#allocation63_spill] sm:$0xff]  ;;  %v799_v25 = vmul.f32 %v5378_v30, %v5403_v20  ;;  %v5404_v52 = vld [vmem:[#allocation68_spill] sm:$0xff]  ;;  %v806_v20 = vmul.f32 %v5378_v30, %v3944_v5 }
  0x7f   : > { %v797_v29 = vmul.f32 %v5378_v30, %v5401_v24  ;;  %v798_v31 = vmul.f32 %v5378_v30, %v5402_v0  ;;  %v800_v54 = vmul.f32 %v5378_v30, %v5404_v52  ;;  %v5405_v22 = vld [vmem:[#allocation69_spill] sm:$0xff]  ;;  %v5406_v1 = vld [vmem:[#allocation70_spill] sm:$0xff]  ;;  %v5409_v21 = vld [vmem:[#allocation75_spill] sm:$0xff]  ;;  %v807_v52 = vmul.f32 %v5378_v30, %v3946_v14 }
  0x80   : > { %v801_v3 = vmul.f32 %v5378_v30, %v5405_v22  ;;  %v802_v16 = vmul.f32 %v5378_v30, %v5406_v1  ;;  %v5407_v18 = vld [vmem:[#allocation73_spill] sm:$0xff]  ;;  %v5408_v62 = vld [vmem:[#allocation74_spill] sm:$0xff]  ;;  %v805_v0 = vmul.f32 %v5378_v30, %v5409_v21  ;;  %v3979_v22 = vadd.f32 %v776_v58, %v3815_v51 }
  0x81   : > { %v803_v6 = vmul.f32 %v5378_v30, %v5407_v18  ;;  %v804_v24 = vmul.f32 %v5378_v30, %v5408_v62  ;;  %v3982_v1 = vadd.f32 %v777_v60, %v3818_v36  ;;  %v3985_v18 = vadd.f32 %v778_v11, %v3821_v34 }
  0x82   : > { %v3988_v62 = vadd.f32 %v779_v4, %v3824_v13  ;;  %v3991_v21 = vadd.f32 %v780_v26, %v3827_v32  ;;  %v3994_v5 = vadd.f32 %v781_v15, %v3830_v40  ;;  %v3997_v30 = vadd.f32 %v782_v42, %v3833_v37  ;;  %v5425_v15 = vld [vmem:[#allocation90_spill] sm:$0xff] }
  0x83   : > { %v4000_v51 = vadd.f32 %v783_v44, %v3836_v45  ;;  %v4003_v36 = vadd.f32 %v784_v19, %v3839_v46  ;;  %v4006_v34 = vadd.f32 %v785_v2, %v3842_v47  ;;  %v4009_v13 = vadd.f32 %v786_v35, %v3845_v48  ;;  %v5427_v44 = vld [vmem:[#allocation47_spill] sm:$0xff]  ;;  %v5429_v35 = vld [vmem:[#allocation4_spill] sm:$0xff] }
  0x84   : > { %v4012_v32 = vadd.f32 %v787_v55, %v3848_v49  ;;  %v4015_v40 = vadd.f32 %v788_v17, %v3851_v50  ;;  %v4018_v37 = vadd.f32 %v789_v23, %v3854_v7  ;;  %v4021_v45 = vadd.f32 %v790_v63, %v3857_v53  ;;  %v5428_v19 = vld [vmem:[#allocation3_spill] sm:$0xff]  ;;  %v5430_v17 = vld [vmem:[#allocation5_spill] sm:$0xff]  ;;  %v5431_v63 = vld [vmem:[#allocation6_spill] sm:$0xff] }
  0x85   : > { %v4024_v46 = vadd.f32 %v791_v59, %v3860_v56  ;;  %v4027_v47 = vadd.f32 %v792_v38, %v3863_v41  ;;  %v4030_v48 = vadd.f32 %v793_v43, %v3866_v57  ;;  %v4033_v49 = vadd.f32 %v794_v12, %v3869_v8  ;;  %v5411_v57 = vld [vmem:[#allocation77_spill] sm:$0xff]  ;;  %v5413_v8 = vld [vmem:[#allocation82_spill] sm:$0xff]  ;;  %v5432_v38 = vld [vmem:[#allocation7_spill] sm:$0xff] }
  0x86   : > { %v4036_v50 = vadd.f32 %v795_v28, %v3872_v9  ;;  %v4039_v7 = vadd.f32 %v796_v10, %v3875_v39  ;;  %v4042_v53 = vadd.f32 %v797_v29, %v3878_v61  ;;  %v4045_v56 = vadd.f32 %v798_v31, %v3881_v33  ;;  %v5415_v9 = vld [vmem:[#allocation83_spill] sm:$0xff]  ;;  %v5417_v39 = vld [vmem:[#allocation84_spill] sm:$0xff]  ;;  %v5419_v61 = vld [vmem:[#allocation85_spill] sm:$0xff] }
  0x87   : > { %v4048_v41 = vadd.f32 %v799_v25, %v3884_v27  ;;  %v4051_v58 = vadd.f32 %v800_v54, %v5411_v57  ;;  %v4054_v60 = vadd.f32 %v801_v3, %v5413_v8  ;;  %v4057_v11 = vadd.f32 %v802_v16, %v5415_v9  ;;  %v5421_v31 = vld [vmem:[#allocation89_spill] sm:$0xff]  ;;  %v5423_v27 = vld [vmem:[#allocation76_spill] sm:$0xff]  ;;  %v5435_v54 = vld [vmem:[#allocation10_spill] sm:$0xff] }
  0x88   : > { %v4060_v4 = vadd.f32 %v803_v6, %v5417_v39  ;;  %v4063_v26 = vadd.f32 %v804_v24, %v5419_v61  ;;  %v4066_v33 = vadd.f32 %v805_v0, %v5421_v31  ;;  %v4069_v25 = vadd.f32 %v806_v20, %v5423_v27  ;;  %v5433_v12 = vld [vmem:[#allocation8_spill] sm:$0xff]  ;;  %v5434_v10 = vld [vmem:[#allocation9_spill] sm:$0xff]  ;;  %v5436_v16 = vld [vmem:[#allocation11_spill] sm:$0xff] }
  0x89   : > { %5410 = vst [vmem:[#allocation37_spill] sm:$0xff] %v4048_v41  ;;  %5412 = vst [vmem:[#allocation38_spill] sm:$0xff] %v4051_v58  ;;  %v4072_v42 = vadd.f32 %v807_v52, %v5425_v15  ;;  %v876_v2 = vmul.f32 %v5428_v19, %v5427_v44  ;;  %v877_v55 = vmul.f32 %v5429_v35, %v5427_v44  ;;  %v5437_v24 = vld [vmem:[#allocation12_spill] sm:$0xff]  ;;  %v5438_v20 = vld [vmem:[#allocation13_spill] sm:$0xff] }
  0x8a   : > { %5414 = vst [vmem:[#allocation39_spill] sm:$0xff] %v4054_v60  ;;  %5416 = vst [vmem:[#allocation40_spill] sm:$0xff] %v4057_v11  ;;  %v878_v23 = vmul.f32 %v5430_v17, %v5427_v44  ;;  %v879_v59 = vmul.f32 %v5431_v63, %v5427_v44  ;;  %v880_v43 = vmul.f32 %v5432_v38, %v5427_v44  ;;  %v5439_v57 = vld [vmem:[#allocation14_spill] sm:$0xff]  ;;  %v5440_v9 = vld [vmem:[#allocation15_spill] sm:$0xff] }
  0x8b   : > { %5418 = vst [vmem:[#allocation41_spill] sm:$0xff] %v4060_v4  ;;  %5420 = vst [vmem:[#allocation44_spill] sm:$0xff] %v4063_v26  ;;  %v881_v28 = vmul.f32 %v5433_v12, %v5427_v44  ;;  %v882_v29 = vmul.f32 %v5434_v10, %v5427_v44  ;;  %v883_v3 = vmul.f32 %v5435_v54, %v5427_v44  ;;  %v5441_v61 = vld [vmem:[#allocation16_spill] sm:$0xff]  ;;  %v5442_v27 = vld [vmem:[#allocation17_spill] sm:$0xff] }
  0x8c   : > { %5422 = vst [vmem:[#allocation45_spill] sm:$0xff] %v4066_v33  ;;  %5424 = vst [vmem:[#allocation46_spill] sm:$0xff] %v4069_v25  ;;  %v884_v6 = vmul.f32 %v5436_v16, %v5427_v44  ;;  %v885_v0 = vmul.f32 %v5437_v24, %v5427_v44  ;;  %v886_v52 = vmul.f32 %v5438_v20, %v5427_v44  ;;  %v5443_v19 = vld [vmem:[#allocation18_spill] sm:$0xff]  ;;  %v5444_v17 = vld [vmem:[#allocation19_spill] sm:$0xff] }
  0x8d   : > { %5426 = vst [vmem:[#allocation48_spill] sm:$0xff] %v4072_v42  ;;  %v887_v8 = vmul.f32 %v5439_v57, %v5427_v44  ;;  %v888_v39 = vmul.f32 %v5440_v9, %v5427_v44  ;;  %v889_v31 = vmul.f32 %v5441_v61, %v5427_v44  ;;  %v890_v15 = vmul.f32 %v5442_v27, %v5427_v44  ;;  %v5445_v38 = vld [vmem:[#allocation20_spill] sm:$0xff]  ;;  %v5446_v10 = vld [vmem:[#allocation21_spill] sm:$0xff]  ;;  %v5447_v16 = vld [vmem:[#allocation22_spill] sm:$0xff] }
  0x8e   : > { %v891_v35 = vmul.f32 %v5443_v19, %v5427_v44  ;;  %v892_v63 = vmul.f32 %v5444_v17, %v5427_v44  ;;  %v893_v12 = vmul.f32 %v5445_v38, %v5427_v44  ;;  %v894_v54 = vmul.f32 %v5446_v10, %v5427_v44  ;;  %v5448_v20 = vld [vmem:[#allocation24_spill] sm:$0xff]  ;;  %v5449_v9 = vld [vmem:[#allocation25_spill] sm:$0xff]  ;;  %v5450_v27 = vld [vmem:[#allocation26_spill] sm:$0xff] }
  0x8f   : > { %v895_v24 = vmul.f32 %v5447_v16, %v5427_v44  ;;  %v896_v57 = vmul.f32 %v5448_v20, %v5427_v44  ;;  %v897_v61 = vmul.f32 %v5449_v9, %v5427_v44  ;;  %v898_v19 = vmul.f32 %v5450_v27, %v5427_v44  ;;  %v5451_v17 = vld [vmem:[#allocation27_spill] sm:$0xff]  ;;  %v5452_v38 = vld [vmem:[#allocation28_spill] sm:$0xff]  ;;  %v5453_v10 = vld [vmem:[#allocation29_spill] sm:$0xff] }
  0x90   : > { %v899_v14 = vmul.f32 %v5451_v17, %v5427_v44  ;;  %v900_v42 = vmul.f32 %v5452_v38, %v5427_v44  ;;  %v901_v25 = vmul.f32 %v5453_v10, %v5427_v44  ;;  %v5454_v16 = vld [vmem:[#allocation30_spill] sm:$0xff]  ;;  %v5455_v20 = vld [vmem:[#allocation31_spill] sm:$0xff]  ;;  %v5456_v9 = vld [vmem:[#allocation32_spill] sm:$0xff]  ;;  %v4141_v41 = vadd.f32 %v876_v2, %v3979_v22 }
  0x91   : > { %v902_v33 = vmul.f32 %v5454_v16, %v5427_v44  ;;  %v903_v26 = vmul.f32 %v5455_v20, %v5427_v44  ;;  %v904_v4 = vmul.f32 %v5456_v9, %v5427_v44  ;;  %v5457_v27 = vld [vmem:[#allocation33_spill] sm:$0xff]  ;;  %v5458_v17 = vld [vmem:[#allocation23_spill] sm:$0xff]  ;;  %v4144_v16 = vadd.f32 %v877_v55, %v3982_v1  ;;  %v5466_v2 = vld [vmem:[#allocation34_spill] sm:$0xff] }
  0x92   : > { %v905_v11 = vmul.f32 %v5457_v27, %v5427_v44  ;;  %v5459_v60 = vunpack.c.l.bf16 %v5458_v17  ;;  %v5460_v38 = vunpack.c.h.bf16 %v5458_v17  ;;  %v4147_v20 = vadd.f32 %v878_v23, %v3985_v18  ;;  %v5468_v55 = vld [vmem:[#allocation35_spill] sm:$0xff] }
  0x93   : > { %v4150_v9 = vadd.f32 %v879_v59, %v3988_v62  ;;  %v4153_v27 = vadd.f32 %v880_v43, %v3991_v21  ;;  %v4162_v22 = vadd.f32 %v883_v3, %v4000_v51  ;;  %v4165_v1 = vadd.f32 %v884_v6, %v4003_v36  ;;  %v1242_v59 = vld [vmem:[#allocation2 + $0x3a] sm:$0xff]  ;;  %v5469_v43 = vld [vmem:[#allocation38_spill] sm:$0xff] }
  0x94   : > { %v906_v58 = vmul.f32 %v5459_v60, %v5427_v44  ;;  %v907_v10 = vmul.f32 %v5460_v38, %v5427_v44  ;;  %v4156_v60 = vadd.f32 %v881_v28, %v3994_v5  ;;  %v4159_v44 = vadd.f32 %v882_v29, %v3997_v30  ;;  %v5471_v29 = vld [vmem:[#allocation39_spill] sm:$0xff] }
  0x95   : > { %v4168_v18 = vadd.f32 %v885_v0, %v4006_v34  ;;  %v4171_v62 = vadd.f32 %v886_v52, %v4009_v13  ;;  %v4174_v21 = vadd.f32 %v887_v8, %v4012_v32  ;;  %v4177_v5 = vadd.f32 %v888_v39, %v4015_v40  ;;  %v5479_v8 = vld [vmem:[#allocation45_spill] sm:$0xff]  ;;  %v5495_v38 = vld [vmem:[#allocation67_spill] sm:$0xff] }
  0x96   : > { %v4180_v30 = vadd.f32 %v889_v31, %v4018_v37  ;;  %v4183_v51 = vadd.f32 %v890_v15, %v4021_v45  ;;  %v4186_v36 = vadd.f32 %v891_v35, %v4024_v46  ;;  %v4189_v34 = vadd.f32 %v892_v63, %v4027_v47  ;;  %v4206_v45 = vld [vmem:[%s5120_s1 + $0x8] ss:$0 sm:$0xff] }
  0x97   : > { %v4192_v13 = vadd.f32 %v893_v12, %v4030_v48  ;;  %v4195_v32 = vadd.f32 %v894_v54, %v4033_v49  ;;  %v4198_v40 = vadd.f32 %v895_v24, %v4036_v50  ;;  %v4201_v37 = vadd.f32 %v896_v57, %v4039_v7  ;;  %5461 = vst [vmem:[#allocation49_spill] sm:$0xff] %v4206_v45  ;;  %v5464_v48 = vld [vmem:[#allocation37_spill] sm:$0xff]  ;;  %v1241_v7 = vld [vmem:[#allocation2 + $0x32] sm:$0xff]  ;;  %v5481_v31 = vld [vmem:[#allocation46_spill] sm:$0xff] }
  0x98   : > { %v4209_v46 = vadd.f32 %v897_v61, %v4042_v53  ;;  %v4212_v47 = vadd.f32 %v898_v19, %v4045_v56  ;;  %v4215_v49 = vadd.f32 %v899_v14, %v5464_v48  ;;  %v5467_v50 = vsub.s32 5, %v5466_v2  ;;  %v5473_v53 = vld [vmem:[#allocation40_spill] sm:$0xff]  ;;  %v5475_v56 = vld [vmem:[#allocation41_spill] sm:$0xff]  ;;  %v5494_v19 = vld [vmem:[#allocation66_spill] sm:$0xff] }
  0x99   : > { %v4221_v28 = vadd.f32 %v900_v42, %v5469_v43  ;;  %v4224_v3 = vadd.f32 %v901_v25, %v5471_v29  ;;  %v4227_v6 = vadd.f32 %v902_v33, %v5473_v53  ;;  %v4230_v0 = vadd.f32 %v903_v26, %v5475_v56  ;;  %v5477_v14 = vld [vmem:[#allocation44_spill] sm:$0xff]  ;;  %v5492_v54 = vld [vmem:[#allocation61_spill] sm:$0xff]  ;;  %v5496_v48 = vld [vmem:[#allocation71_spill] sm:$0xff] }
  0x9a   : > { %5462 = vst [vmem:[#allocation50_spill] sm:$0xff] %v4209_v46  ;;  %5463 = vst [vmem:[#allocation51_spill] sm:$0xff] %v4212_v47  ;;  %v975_v23 = vrot.slane %v5468_v55, %v5467_v50  ;;  %v4233_v52 = vadd.f32 %v904_v4, %v5477_v14  ;;  %v4236_v39 = vadd.f32 %v905_v11, %v5479_v8  ;;  %v5483_v42 = vld [vmem:[#allocation48_spill] sm:$0xff]  ;;  %v5485_v25 = vsub.s32 6, %v5466_v2  ;;  %v5493_v57 = vld [vmem:[#allocation65_spill] sm:$0xff] }
  0x9b   : > { %5465 = vst [vmem:[#allocation52_spill] sm:$0xff] %v4215_v49  ;;  %5470 = vst [vmem:[#allocation53_spill] sm:$0xff] %v4221_v28  ;;  %v4239_v15 = vadd.f32 %v906_v58, %v5481_v31  ;;  %v4242_v35 = vadd.f32 %v907_v10, %v5483_v42  ;;  %v5487_v26 = vsub.s32 7, %v5466_v2  ;;  %v4255_v4 = vmul.f32 %v4206_v45, %v1241_v7  ;;  %v5491_v58 = vld [vmem:[#allocation60_spill] sm:$0xff]  ;;  %v5498_v29 = vld [vmem:[#allocation78_spill] sm:$0xff] }
  0x9c   : > { %5472 = vst [vmem:[#allocation54_spill] sm:$0xff] %v4224_v3  ;;  %5474 = vst [vmem:[#allocation55_spill] sm:$0xff] %v4227_v6  ;;  %v4247_v33 = vrot.slane %v5468_v55, %v5485_v25  ;;  %v4258_v11 = vmul.f32 %v4206_v45, %v1242_v59  ;;  %v976_v12 = vmul.f32 %v975_v23, %v5491_v58  ;;  %v5499_v53 = vld [vmem:[#allocation79_spill] sm:$0xff]  ;;  %v5500_v59 = vld [vmem:[#allocation80_spill] sm:$0xff] }
  0x9d   : > { %5476 = vst [vmem:[#allocation56_spill] sm:$0xff] %v4230_v0  ;;  %5478 = vst [vmem:[#allocation57_spill] sm:$0xff] %v4233_v52  ;;  %v4252_v63 = vrot.slane %v5468_v55, %v5487_v26  ;;  %v977_v24 = vmul.f32 %v975_v23, %v5492_v54  ;;  %v978_v61 = vmul.f32 %v975_v23, %v5493_v57  ;;  %v5497_v55 = vld [vmem:[#allocation72_spill] sm:$0xff]  ;;  %v5501_v8 = vld [vmem:[#allocation81_spill] sm:$0xff] }
  0x9e   : > { %5480 = vst [vmem:[#allocation58_spill] sm:$0xff] %v4236_v39  ;;  %5482 = vst [vmem:[#allocation59_spill] sm:$0xff] %v4239_v15  ;;  %v979_v17 = vmul.f32 %v975_v23, %v5494_v19  ;;  %v980_v10 = vmul.f32 %v975_v23, %v5495_v38  ;;  %v981_v50 = vmul.f32 %v975_v23, %v5496_v48  ;;  %v5502_v42 = vld [vmem:[#allocation86_spill] sm:$0xff]  ;;  %v5503_v26 = vld [vmem:[#allocation87_spill] sm:$0xff] }
  0x9f   : > { %5484 = vst [vmem:[#allocation62_spill] sm:$0xff] %v4242_v35  ;;  %5486 = vst [vmem:[#allocation63_spill] sm:$0xff] %v4247_v33  ;;  %v982_v43 = vmul.f32 %v975_v23, %v5497_v55  ;;  %v983_v7 = vmul.f32 %v975_v23, %v5498_v29  ;;  %v984_v56 = vmul.f32 %v975_v23, %v5499_v53  ;;  %v5504_v54 = vld [vmem:[#allocation88_spill] sm:$0xff]  ;;  %v5505_v19 = vld [vmem:[#allocation91_spill] sm:$0xff] }
  0xa0   : > { %5488 = vst [vmem:[#allocation64_spill] sm:$0xff] %v4252_v63  ;;  %5489 = vst [vmem:[#allocation68_spill] sm:$0xff] %v4255_v4  ;;  %v985_v14 = vmul.f32 %v975_v23, %v5500_v59  ;;  %v986_v31 = vmul.f32 %v975_v23, %v5501_v8  ;;  %v987_v25 = vmul.f32 %v975_v23, %v5502_v42  ;;  %v5506_v2 = vld [vmem:[#allocation42_spill] sm:$0xff]  ;;  %v5509_v29 = vld [vmem:[#allocation92_spill] sm:$0xff] }
  0xa1   : > { %5490 = vst [vmem:[#allocation69_spill] sm:$0xff] %v4258_v11  ;;  %v988_v58 = vmul.f32 %v975_v23, %v5503_v26  ;;  %v989_v57 = vmul.f32 %v975_v23, %v5504_v54  ;;  %v990_v38 = vmul.f32 %v975_v23, %v5505_v19  ;;  %v991_v48 = vmul.f32 %v975_v23, %v5506_v2  ;;  %v4276_v11 = vld [vmem:[#allocation2 + $0x182] sm:$0xff]  ;;  %v4278_v55 = vld [vmem:[#allocation2 + $0x18a] sm:$0xff]  ;;  %v5513_v33 = vld [vmem:[#allocation96_spill] sm:$0xff] }
  0xa2   : > { %5507 = vst [vmem:[#allocation70_spill] sm:$0xff] %v4276_v11  ;;  %5508 = vst [vmem:[#allocation73_spill] sm:$0xff] %v4278_v55  ;;  %v992_v53 = vmul.f32 %v975_v23, %v5509_v29  ;;  %v5510_v4 = vld [vmem:[#allocation93_spill] sm:$0xff]  ;;  %v5511_v45 = vld [vmem:[#allocation94_spill] sm:$0xff]  ;;  %v996_v26 = vmul.f32 %v975_v23, %v5513_v33  ;;  %v1006_v33 = vmul.f32 %v975_v23, %v4276_v11 }
  0xa3   : > { %v993_v59 = vmul.f32 %v975_v23, %v5510_v4  ;;  %v994_v8 = vmul.f32 %v975_v23, %v5511_v45  ;;  %v5512_v63 = vld [vmem:[#allocation95_spill] sm:$0xff]  ;;  %v5514_v35 = vld [vmem:[#allocation97_spill] sm:$0xff]  ;;  %v5515_v15 = vld [vmem:[#allocation98_spill] sm:$0xff] }
  0xa4   : > { %v995_v42 = vmul.f32 %v975_v23, %v5512_v63  ;;  %v997_v54 = vmul.f32 %v975_v23, %v5514_v35  ;;  %v998_v19 = vmul.f32 %v975_v23, %v5515_v15  ;;  %v5516_v39 = vld [vmem:[#allocation99_spill] sm:$0xff]  ;;  %v5517_v52 = vld [vmem:[#allocation100_spill] sm:$0xff]  ;;  %v5518_v6 = vld [vmem:[#allocation101_spill] sm:$0xff]  ;;  %v1007_v35 = vmul.f32 %v975_v23, %v4278_v55 }
  0xa5   : > { %v999_v2 = vmul.f32 %v975_v23, %v5516_v39  ;;  %v1000_v0 = vmul.f32 %v975_v23, %v5517_v52  ;;  %v1001_v3 = vmul.f32 %v975_v23, %v5518_v6  ;;  %v5519_v28 = vld [vmem:[#allocation102_spill] sm:$0xff]  ;;  %v5520_v49 = vld [vmem:[#allocation103_spill] sm:$0xff]  ;;  %v5521_v47 = vld [vmem:[#allocation104_spill] sm:$0xff]  ;;  %v4297_v15 = vadd.f32 %v976_v12, %v4141_v41 }
  0xa6   : > { %v1002_v29 = vmul.f32 %v975_v23, %v5519_v28  ;;  %v1003_v4 = vmul.f32 %v975_v23, %v5520_v49  ;;  %v1004_v45 = vmul.f32 %v975_v23, %v5521_v47  ;;  %v5522_v46 = vld [vmem:[#allocation105_spill] sm:$0xff]  ;;  %v4300_v39 = vadd.f32 %v977_v24, %v4144_v16  ;;  %v1043_v52 = vld [vmem:[#allocation2 + $0x48] sm:$0xff]  ;;  %v1063_v11 = vld [vmem:[#allocation2 + $0x138] sm:$0xff] }
  0xa7   : > { %v1005_v63 = vmul.f32 %v975_v23, %v5522_v46  ;;  %v4303_v6 = vadd.f32 %v978_v61, %v4147_v20  ;;  %v4306_v28 = vadd.f32 %v979_v17, %v4150_v9  ;;  %v4309_v47 = vadd.f32 %v980_v10, %v4153_v27  ;;  %v1042_v23 = vld [vmem:[#allocation2 + $0x38] sm:$0xff]  ;;  %v1046_v24 = vld [vmem:[#allocation2 + $0x68] sm:$0xff] }
  0xa8   : > { %v4312_v46 = vadd.f32 %v981_v50, %v4156_v60  ;;  %v4315_v49 = vadd.f32 %v982_v43, %v4159_v44  ;;  %v4318_v41 = vadd.f32 %v983_v7, %v4162_v22  ;;  %v4321_v16 = vadd.f32 %v984_v56, %v4165_v1  ;;  %v5523_v17 = vld [vmem:[#allocation50_spill] sm:$0xff]  ;;  %v1049_v7 = vld [vmem:[#allocation2 + $0x90] sm:$0xff]  ;;  %v1050_v56 = vld [vmem:[#allocation2 + $0x98] sm:$0xff] }
  0xa9   : > { %v4324_v20 = vadd.f32 %v985_v14, %v4168_v18  ;;  %v4327_v9 = vadd.f32 %v986_v31, %v4171_v62  ;;  %v4330_v27 = vadd.f32 %v987_v25, %v4174_v21  ;;  %v4333_v60 = vadd.f32 %v988_v58, %v4177_v5  ;;  %v1041_v18 = vld [vmem:[#allocation2 + $0x30] sm:$0xff]  ;;  %v5529_v31 = vld [vmem:[#allocation54_spill] sm:$0xff] }
  0xaa   : > { %v4336_v44 = vadd.f32 %v989_v57, %v4180_v30  ;;  %v4339_v22 = vadd.f32 %v990_v38, %v4183_v51  ;;  %v4342_v1 = vadd.f32 %v991_v48, %v4186_v36  ;;  %v1044_v62 = vld [vmem:[#allocation2 + $0x50] sm:$0xff]  ;;  %v4345_v12 = vadd.f32 %v992_v53, %v4189_v34  ;;  %v1045_v51 = vld [vmem:[#allocation2 + $0x60] sm:$0xff]  ;;  %v1047_v36 = vld [vmem:[#allocation2 + $0x78] sm:$0xff] }
  0xab   : > { %v4348_v21 = vadd.f32 %v993_v59, %v4192_v13  ;;  %v4351_v5 = vadd.f32 %v994_v8, %v4195_v32  ;;  %v4354_v30 = vadd.f32 %v995_v42, %v4198_v40  ;;  %v4357_v61 = vadd.f32 %v996_v26, %v4201_v37  ;;  %v5524_v34 = vld [vmem:[#allocation51_spill] sm:$0xff]  ;;  %v5525_v13 = vld [vmem:[#allocation52_spill] sm:$0xff]  ;;  %v1048_v32 = vld [vmem:[#allocation2 + $0x80] sm:$0xff] }
  0xac   : > { %v4360_v10 = vadd.f32 %v997_v54, %v5523_v17  ;;  %v4363_v50 = vadd.f32 %v998_v19, %v5524_v34  ;;  %v4366_v43 = vadd.f32 %v999_v2, %v5525_v13  ;;  %v5527_v40 = vld [vmem:[#allocation53_spill] sm:$0xff]  ;;  %v4372_v25 = vadd.f32 %v1001_v3, %v5529_v31  ;;  %v5531_v37 = vld [vmem:[#allocation55_spill] sm:$0xff]  ;;  %v5533_v57 = vld [vmem:[#allocation56_spill] sm:$0xff] }
  0xad   : > { %v4369_v14 = vadd.f32 %v1000_v0, %v5527_v40  ;;  %v4375_v58 = vadd.f32 %v1002_v29, %v5531_v37  ;;  %v4378_v38 = vadd.f32 %v1003_v4, %v5533_v57  ;;  %v1051_v48 = vld [vmem:[#allocation2 + $0xa8] sm:$0xff]  ;;  %v1052_v53 = vld [vmem:[#allocation2 + $0xb0] sm:$0xff]  ;;  %v1053_v59 = vld [vmem:[#allocation2 + $0xc0] sm:$0xff] }
  0xae   : > { %5526 = vst [vmem:[#allocation74_spill] sm:$0xff] %v4366_v43  ;;  %5530 = vst [vmem:[#allocation77_spill] sm:$0xff] %v4372_v25  ;;  %v5535_v8 = vld [vmem:[#allocation57_spill] sm:$0xff]  ;;  %v5537_v26 = vld [vmem:[#allocation58_spill] sm:$0xff] }
  0xaf   : > { %5528 = vst [vmem:[#allocation75_spill] sm:$0xff] %v4369_v14  ;;  %5532 = vst [vmem:[#allocation82_spill] sm:$0xff] %v4375_v58  ;;  %v4381_v42 = vadd.f32 %v1004_v45, %v5535_v8  ;;  %v4384_v54 = vadd.f32 %v1005_v63, %v5537_v26  ;;  %v5539_v0 = vld [vmem:[#allocation59_spill] sm:$0xff]  ;;  %v5541_v3 = vld [vmem:[#allocation62_spill] sm:$0xff] }
  0xb0   : > { %5534 = vst [vmem:[#allocation83_spill] sm:$0xff] %v4378_v38  ;;  %v4387_v19 = vadd.f32 %v1006_v33, %v5539_v0  ;;  %v4390_v2 = vadd.f32 %v1007_v35, %v5541_v3  ;;  %v1054_v29 = vld [vmem:[#allocation2 + $0xc8] sm:$0xff]  ;;  %v1055_v17 = vld [vmem:[#allocation2 + $0xd8] sm:$0xff]  ;;  %v1056_v34 = vld [vmem:[#allocation2 + $0xe0] sm:$0xff] }
  0xb1   : > { %5536 = vst [vmem:[#allocation84_spill] sm:$0xff] %v4381_v42  ;;  %5538 = vst [vmem:[#allocation85_spill] sm:$0xff] %v4384_v54  ;;  %v1057_v4 = vld [vmem:[#allocation2 + $0xf0] sm:$0xff]  ;;  %v1058_v13 = vld [vmem:[#allocation2 + $0xf8] sm:$0xff] }
  0xb2   : > { %5540 = vst [vmem:[#allocation89_spill] sm:$0xff] %v4387_v19  ;;  %5542 = vst [vmem:[#allocation76_spill] sm:$0xff] %v4390_v2  ;;  %v1059_v40 = vld [vmem:[#allocation2 + $0x108] sm:$0xff]  ;;  %v5543_v31 = vld [vmem:[#allocation63_spill] sm:$0xff] }
  0xb3   : > { %v1077_v37 = vmul.f32 %v5543_v31, %v1041_v18  ;;  %v1078_v45 = vmul.f32 %v5543_v31, %v1042_v23  ;;  %v1079_v57 = vmul.f32 %v5543_v31, %v1043_v52  ;;  %v1080_v63 = vmul.f32 %v5543_v31, %v1044_v62  ;;  %v1060_v8 = vld [vmem:[#allocation2 + $0x110] sm:$0xff]  ;;  %v1061_v33 = vld [vmem:[#allocation2 + $0x120] sm:$0xff]  ;;  %v1062_v26 = vld [vmem:[#allocation2 + $0x128] sm:$0xff] }
  0xb4   : > { %v1081_v35 = vmul.f32 %v5543_v31, %v1045_v51  ;;  %v1082_v0 = vmul.f32 %v5543_v31, %v1046_v24  ;;  %v1083_v3 = vmul.f32 %v5543_v31, %v1047_v36  ;;  %v1084_v55 = vmul.f32 %v5543_v31, %v1048_v32  ;;  %v1064_v2 = vld [vmem:[#allocation2 + $0x140] sm:$0xff]  ;;  %v1065_v18 = vld [vmem:[#allocation2 + $0x150] sm:$0xff]  ;;  %v1066_v54 = vld [vmem:[#allocation2 + $0x158] sm:$0xff] }
  0xb5   : > { %v1085_v23 = vmul.f32 %v5543_v31, %v1049_v7  ;;  %v1086_v52 = vmul.f32 %v5543_v31, %v1050_v56  ;;  %v1087_v62 = vmul.f32 %v5543_v31, %v1051_v48  ;;  %v1088_v19 = vmul.f32 %v5543_v31, %v1052_v53  ;;  %v1067_v42 = vld [vmem:[#allocation2 + $0x168] sm:$0xff]  ;;  %v1068_v51 = vld [vmem:[#allocation2 + $0x170] sm:$0xff]  ;;  %v5544_v14 = vld [vmem:[#allocation36_spill] sm:$0xff] }
  0xb6   : > { %v1089_v24 = vmul.f32 %v5543_v31, %v1053_v59  ;;  %v1090_v36 = vmul.f32 %v5543_v31, %v1054_v29  ;;  %v1091_v32 = vmul.f32 %v5543_v31, %v1055_v17  ;;  %v1092_v38 = vmul.f32 %v5543_v31, %v1056_v34  ;;  %v3010_v43 = vld [vmem:[#allocation2] sm:$0xff] }
  0xb7   : > { %v1093_v58 = vmul.f32 %v5543_v31, %v1057_v4  ;;  %v1094_v7 = vmul.f32 %v5543_v31, %v1058_v13  ;;  %v1095_v56 = vmul.f32 %v5543_v31, %v1059_v40  ;;  %v1096_v48 = vmul.f32 %v5543_v31, %v1060_v8  ;;  %v5545_v8 = vld [vmem:[#allocation43_spill] sm:$0xff] }
  0xb8   : > { %v1097_v53 = vmul.f32 %v5543_v31, %v1061_v33  ;;  %v1098_v25 = vmul.f32 %v5543_v31, %v1062_v26  ;;  %v1099_v59 = vmul.f32 %v5543_v31, %v1063_v11  ;;  %v1100_v29 = vmul.f32 %v5543_v31, %v1064_v2 }
  0xb9   : > { %v1101_v17 = vmul.f32 %v5543_v31, %v1065_v18  ;;  %v1102_v34 = vmul.f32 %v5543_v31, %v1066_v54  ;;  %v1103_v4 = vmul.f32 %v5543_v31, %v1067_v42  ;;  %v1104_v13 = vmul.f32 %v5543_v31, %v1068_v51  ;;  %v5558_v51 = vld [vmem:[#allocation85_spill] sm:$0xff] }
  0xba   : > { %v1105_v40 = vmul.f32 %v5543_v31, %v5544_v14  ;;  %v1106_v33 = vmul.f32 %v5543_v31, %v5545_v8  ;;  %v1107_v26 = vmul.f32 %v3010_v43, %v5543_v31  ;;  %v4426_v11 = vadd.f32 %v1077_v37, %v4297_v15  ;;  %v1144_v31 = vld [vmem:[#allocation2 + $0x51] sm:$0xff]  ;;  %v1146_v37 = vld [vmem:[#allocation2 + $0x69] sm:$0xff] }
  0xbb   : > { %v4429_v2 = vadd.f32 %v1078_v45, %v4300_v39  ;;  %v4432_v54 = vadd.f32 %v1079_v57, %v4303_v6  ;;  %v4435_v42 = vadd.f32 %v1080_v63, %v4306_v28  ;;  %v4438_v14 = vadd.f32 %v1081_v35, %v4309_v47  ;;  %v5549_v45 = vld [vmem:[#allocation77_spill] sm:$0xff]  ;;  %v5551_v57 = vld [vmem:[#allocation82_spill] sm:$0xff] }
  0xbc   : > { %v4441_v18 = vadd.f32 %v1082_v0, %v4312_v46  ;;  %v4444_v43 = vadd.f32 %v1083_v3, %v4315_v49  ;;  %v4447_v15 = vadd.f32 %v1084_v55, %v4318_v41  ;;  %v4450_v39 = vadd.f32 %v1085_v23, %v4321_v16  ;;  %v1148_v35 = vld [vmem:[#allocation2 + $0x81] sm:$0xff]  ;;  %v1149_v0 = vld [vmem:[#allocation2 + $0x91] sm:$0xff] }
  0xbd   : > { %v4453_v6 = vadd.f32 %v1086_v52, %v4324_v20  ;;  %v4456_v28 = vadd.f32 %v1087_v62, %v4327_v9  ;;  %v4459_v47 = vadd.f32 %v1088_v19, %v4330_v27  ;;  %v4462_v46 = vadd.f32 %v1089_v24, %v4333_v60  ;;  %v1141_v20 = vld [vmem:[#allocation2 + $0x31] sm:$0xff]  ;;  %v1143_v19 = vld [vmem:[#allocation2 + $0x49] sm:$0xff] }
  0xbe   : > { %v4465_v49 = vadd.f32 %v1090_v36, %v4336_v44  ;;  %v4468_v55 = vadd.f32 %v1091_v32, %v4339_v22  ;;  %v4471_v41 = vadd.f32 %v1092_v38, %v4342_v1  ;;  %v4474_v16 = vadd.f32 %v1093_v58, %v4345_v12  ;;  %v1142_v22 = vld [vmem:[#allocation2 + $0x39] sm:$0xff]  ;;  %v5546_v58 = vld [vmem:[#allocation74_spill] sm:$0xff]  ;;  %v5547_v38 = vld [vmem:[#allocation75_spill] sm:$0xff] }
  0xbf   : > { %v4477_v9 = vadd.f32 %v1094_v7, %v4348_v21  ;;  %v4480_v27 = vadd.f32 %v1095_v56, %v4351_v5  ;;  %v4483_v60 = vadd.f32 %v1096_v48, %v4354_v30  ;;  %v4486_v44 = vadd.f32 %v1097_v53, %v4357_v61  ;;  %v1145_v30 = vld [vmem:[#allocation2 + $0x61] sm:$0xff]  ;;  %v5555_v3 = vld [vmem:[#allocation64_spill] sm:$0xff]  ;;  %v1151_v56 = vld [vmem:[#allocation2 + $0xa9] sm:$0xff] }
  0xc0   : > { %v4489_v1 = vadd.f32 %v1098_v25, %v4360_v10  ;;  %v4492_v12 = vadd.f32 %v1099_v59, %v4363_v50  ;;  %v4495_v21 = vadd.f32 %v1100_v29, %v5546_v58  ;;  %v4498_v5 = vadd.f32 %v1101_v17, %v5547_v38  ;;  %v5553_v10 = vld [vmem:[#allocation83_spill] sm:$0xff]  ;;  %v1147_v50 = vld [vmem:[#allocation2 + $0x79] sm:$0xff]  ;;  %v1153_v17 = vld [vmem:[#allocation2 + $0xc1] sm:$0xff] }
  0xc1   : > { %v4501_v61 = vadd.f32 %v1102_v34, %v5549_v45  ;;  %v4504_v63 = vadd.f32 %v1103_v4, %v5551_v57  ;;  %v4507_v25 = vadd.f32 %v1104_v13, %v5553_v10  ;;  %v1177_v23 = vmul.f32 %v5555_v3, %v1141_v20  ;;  %v5556_v52 = vld [vmem:[#allocation84_spill] sm:$0xff]  ;;  %v5560_v36 = vld [vmem:[#allocation89_spill] sm:$0xff]  ;;  %v1154_v34 = vld [vmem:[#allocation2 + $0xc9] sm:$0xff] }
  0xc2   : > { %5548 = vst [vmem:[#allocation90_spill] sm:$0xff] %v4498_v5  ;;  %v4511_v62 = vadd.f32 %v1105_v40, %v5556_v52  ;;  %v4514_v24 = vadd.f32 %v1106_v33, %v5558_v51  ;;  %v4517_v32 = vadd.f32 %v1107_v26, %v5560_v36  ;;  %v1150_v7 = vld [vmem:[#allocation2 + $0x99] sm:$0xff]  ;;  %v1152_v48 = vld [vmem:[#allocation2 + $0xb1] sm:$0xff]  ;;  %v1178_v53 = vmul.f32 %v5555_v3, %v1142_v22  ;;  %v1156_v33 = vld [vmem:[#allocation2 + $0xe1] sm:$0xff] }
  0xc3   : > { %5550 = vst [vmem:[#allocation47_spill] sm:$0xff] %v4501_v61  ;;  %5552 = vst [vmem:[#allocation3_spill] sm:$0xff] %v4504_v63  ;;  %v5562_v59 = vld [vmem:[#allocation76_spill] sm:$0xff]  ;;  %v1179_v13 = vmul.f32 %v5555_v3, %v1143_v19  ;;  %v1180_v40 = vmul.f32 %v5555_v3, %v1144_v31  ;;  %v1181_v8 = vmul.f32 %v5555_v3, %v1145_v30  ;;  %v1243_v45 = vld [vmem:[#allocation2 + $0x4a] sm:$0xff] }
  0xc4   : > { %5554 = vst [vmem:[#allocation4_spill] sm:$0xff] %v4507_v25  ;;  %5557 = vst [vmem:[#allocation5_spill] sm:$0xff] %v4511_v62  ;;  %v4521_v29 = vadd.f32 %v1107_v26, %v5562_v59  ;;  %v1155_v4 = vld [vmem:[#allocation2 + $0xd9] sm:$0xff]  ;;  %v1157_v20 = vld [vmem:[#allocation2 + $0xf1] sm:$0xff]  ;;  %v1182_v58 = vmul.f32 %v5555_v3, %v1146_v37  ;;  %v1183_v38 = vmul.f32 %v5555_v3, %v1147_v50 }
  0xc5   : > { %5559 = vst [vmem:[#allocation6_spill] sm:$0xff] %v4514_v24  ;;  %5561 = vst [vmem:[#allocation7_spill] sm:$0xff] %v4517_v32  ;;  %v1184_v22 = vmul.f32 %v5555_v3, %v1148_v35  ;;  %v1185_v26 = vmul.f32 %v5555_v3, %v1149_v0  ;;  %v1158_v57 = vld [vmem:[#allocation2 + $0xf9] sm:$0xff]  ;;  %v1159_v10 = vld [vmem:[#allocation2 + $0x109] sm:$0xff]  ;;  %v1186_v52 = vmul.f32 %v5555_v3, %v1150_v7 }
  0xc6   : > { %5563 = vst [vmem:[#allocation8_spill] sm:$0xff] %v4521_v29  ;;  %v1187_v19 = vmul.f32 %v5555_v3, %v1151_v56  ;;  %v1188_v31 = vmul.f32 %v5555_v3, %v1152_v48  ;;  %v1209_v30 = vadd.f32 %v1177_v23, %v4426_v11  ;;  %v1244_v51 = vld [vmem:[#allocation2 + $0x52] sm:$0xff]  ;;  %v1189_v37 = vmul.f32 %v5555_v3, %v1153_v17  ;;  %v1245_v59 = vld [vmem:[#allocation2 + $0x62] sm:$0xff]  ;;  %v1246_v23 = vld [vmem:[#allocation2 + $0x6a] sm:$0xff] }
  0xc7   : > { %v1160_v36 = vld [vmem:[#allocation2 + $0x111] sm:$0xff]  ;;  %v1190_v50 = vmul.f32 %v5555_v3, %v1154_v34  ;;  %v4537_v35 = vmul.f32 %v5555_v3, %v1155_v4  ;;  %v1210_v0 = vadd.f32 %v1178_v53, %v4429_v2  ;;  %v1161_v29 = vld [vmem:[#allocation2 + $0x121] sm:$0xff]  ;;  %v4541_v7 = vmul.f32 %v5555_v3, %v1156_v33  ;;  %v1162_v32 = vld [vmem:[#allocation2 + $0x129] sm:$0xff] }
  0xc8   : > { %v4544_v56 = vmul.f32 %v5555_v3, %v1157_v20  ;;  %v1211_v11 = vadd.f32 %v1179_v13, %v4432_v54  ;;  %v5564_v48 = vld [vmem:[#allocation49_spill] sm:$0xff]  ;;  %v4549_v4 = vmul.f32 %v5555_v3, %v1158_v57  ;;  %v4552_v2 = vmul.f32 %v5555_v3, %v1159_v10  ;;  %v1165_v20 = vld [vmem:[#allocation2 + $0x151] sm:$0xff]  ;;  %v1167_v61 = vld [vmem:[#allocation2 + $0x169] sm:$0xff] }
  0xc9   : > { %v1279_v17 = vmul.f32 %v5564_v48, %v1243_v45  ;;  %v1163_v34 = vld [vmem:[#allocation2 + $0x139] sm:$0xff]  ;;  %v1164_v24 = vld [vmem:[#allocation2 + $0x141] sm:$0xff]  ;;  %v1212_v53 = vadd.f32 %v1180_v40, %v4435_v42  ;;  %v1280_v33 = vmul.f32 %v5564_v48, %v1244_v51  ;;  %v4557_v62 = vmul.f32 %v5555_v3, %v1160_v36 }
  0xca   : > { %v1213_v54 = vadd.f32 %v1181_v8, %v4438_v14  ;;  %v1247_v13 = vld [vmem:[#allocation2 + $0x7a] sm:$0xff]  ;;  %v1281_v45 = vmul.f32 %v5564_v48, %v1245_v59  ;;  %v4563_v10 = vmul.f32 %v5555_v3, %v1161_v29  ;;  %v1214_v42 = vadd.f32 %v1182_v58, %v4441_v18 }
  0xcb   : > { %v5565_v25 = vld [vmem:[#allocation68_spill] sm:$0xff]  ;;  %v1282_v40 = vmul.f32 %v5564_v48, %v1246_v23  ;;  %v5566_v51 = vld [vmem:[#allocation69_spill] sm:$0xff]  ;;  %v4574_v8 = vmul.f32 %v5555_v3, %v1162_v32  ;;  %v4580_v29 = vmul.f32 %v5555_v3, %v1164_v24  ;;  %v1311_v18 = vadd.f32 %v1279_v17, %v1211_v11 }
  0xcc   : > { %v1309_v63 = vadd.f32 %v5565_v25, %v1209_v30  ;;  %v1166_v57 = vld [vmem:[#allocation2 + $0x159] sm:$0xff]  ;;  %v1310_v5 = vadd.f32 %v5566_v51, %v1210_v0  ;;  %v4577_v25 = vmul.f32 %v5555_v3, %v1163_v34  ;;  %v1248_v30 = vld [vmem:[#allocation2 + $0x82] sm:$0xff]  ;;  %v4583_v58 = vmul.f32 %v5555_v3, %v1165_v20 }
  0xcd   : > { %v4571_v14 = vld [vmem:[%s5121_s2] ss:$0 sm:$0xff]  ;;  %v1215_v36 = vadd.f32 %v1183_v38, %v4444_v43  ;;  %v1283_v0 = vmul.f32 %v5564_v48, %v1247_v13  ;;  %v1312_v59 = vadd.f32 %v1280_v33, %v1212_v53  ;;  %v4588_v23 = vmul.f32 %v5555_v3, %v1166_v57  ;;  %v1249_v34 = vld [vmem:[#allocation2 + $0x92] sm:$0xff]  ;;  %v1251_v13 = vld [vmem:[#allocation2 + $0xaa] sm:$0xff] }
  0xce   : > { %v4591_v32 = vmul.f32 %v5555_v3, %v1167_v61  ;;  %v1313_v51 = vadd.f32 %v1281_v45, %v1213_v54  ;;  %v4594_v24 = vadd.f32 %v4571_v14, %v1309_v63  ;;  %v1216_v11 = vadd.f32 %v1184_v22, %v4447_v15  ;;  %v1250_v33 = vld [vmem:[#allocation2 + $0x9a] sm:$0xff] }
  0xcf   : > { %v1284_v17 = vmul.f32 %v5564_v48, %v1248_v30  ;;  %v1314_v20 = vadd.f32 %v1282_v40, %v1214_v42  ;;  %v4599_v43 = vadd.f32 %v4571_v14, %v1310_v5  ;;  %v1217_v38 = vadd.f32 %v1185_v26, %v4450_v39  ;;  %v1255_v40 = vld [vmem:[#allocation2 + $0xda] sm:$0xff]  ;;  %v1256_v30 = vld [vmem:[#allocation2 + $0xe2] sm:$0xff] }
  0xd0   : > { %v1218_v53 = vadd.f32 %v1186_v52, %v4453_v6  ;;  %v1219_v61 = vadd.f32 %v1187_v19, %v4456_v28  ;;  %v4605_v54 = vadd.f32 %v4571_v14, %v1311_v18  ;;  %v1220_v63 = vadd.f32 %v1188_v31, %v4459_v47  ;;  %v1252_v6 = vld [vmem:[#allocation2 + $0xb2] sm:$0xff]  ;;  %v1253_v52 = vld [vmem:[#allocation2 + $0xc2] sm:$0xff]  ;;  %v1254_v19 = vld [vmem:[#allocation2 + $0xca] sm:$0xff] }
  0xd1   : > { %v1285_v15 = vmul.f32 %v5564_v48, %v1249_v34  ;;  %v1315_v22 = vadd.f32 %v1283_v0, %v1215_v36  ;;  %v4610_v45 = vadd.f32 %v4571_v14, %v1312_v59  ;;  %v1221_v5 = vadd.f32 %v1189_v37, %v4462_v46 }
  0xd2   : > { %v1222_v39 = vadd.f32 %v1190_v50, %v4465_v49  ;;  %v4615_v28 = vadd.f32 %v4571_v14, %v1313_v51  ;;  %v2409_v26 = vmul.f32 -1.442695, %v4594_v24  ;;  %v1286_v47 = vmul.f32 %v5564_v48, %v1250_v33 }
  0xd3   : > { %v1316_v31 = vadd.f32 %v1284_v17, %v1216_v11  ;;  %v4620_v57 = vadd.f32 %v4571_v14, %v1314_v20  ;;  %v2410_v42 = vmul.f32 -1.442695, %v4599_v43  ;;  %v1223_v46 = vadd.f32 %v4537_v35, %v4468_v55  ;;  %v1168_v35 = vld [vmem:[#allocation2 + $0x171] sm:$0xff] }
  0xd4   : > { %v1224_v49 = vadd.f32 %v4541_v7, %v4471_v41  ;;  %v1287_v37 = vmul.f32 %v5564_v48, %v1251_v13  ;;  %v2411_v50 = vmul.f32 -1.442695, %v4605_v54  ;;  %v1288_v18 = vmul.f32 %v5564_v48, %v1252_v6  ;;  %v1169_v7 = vld [vmem:[#allocation2 + $0x181] sm:$0xff]  ;;  %v1170_v13 = vld [vmem:[#allocation2 + $0x189] sm:$0xff] }
  0xd5   : > { %v1317_v36 = vadd.f32 %v1285_v15, %v1217_v38  ;;  %v4631_v0 = vadd.f32 %v4571_v14, %v1315_v22  ;;  %v2412_v59 = vmul.f32 -1.442695, %v4610_v45  ;;  %v1289_v34 = vmul.f32 %v5564_v48, %v1253_v52  ;;  %v1171_v15 = vld [vmem:[#allocation2 + $0x199] sm:$0xff] }
  0xd6   : > { %v1290_v55 = vmul.f32 %v5564_v48, %v1254_v19  ;;  %2874 = vpow2.f32 %v2409_v26  ;;  %v2413_v41 = vmul.f32 -1.442695, %v4615_v28  ;;  %v1318_v51 = vadd.f32 %v1286_v47, %v1218_v53  ;;  %v1172_v47 = vld [vmem:[#allocation2 + $0x1a1] sm:$0xff] }
  0xd7   : > { %v4638_v11 = vadd.f32 %v4571_v14, %v1316_v31  ;;  %2876 = vpow2.f32 %v2410_v42  ;;  %v2414_v17 = vmul.f32 -1.442695, %v4620_v57  ;;  %v1291_v20 = vmul.f32 %v5564_v48, %v1255_v40 }
  0xd8   : > { %v1292_v38 = vmul.f32 %v5564_v48, %v1256_v30  ;;  %v1319_v33 = vadd.f32 %v1287_v37, %v1219_v61  ;;  %2878 = vpow2.f32 %v2411_v50  ;;  %v1320_v22 = vadd.f32 %v1288_v18, %v1220_v63 }
  0xd9   : > { %v4644_v6 = vadd.f32 %v4571_v14, %v1317_v36  ;;  %2880 = vpow2.f32 %v2412_v59  ;;  %v2415_v53 = vmul.f32 -1.442695, %v4631_v0  ;;  %v4648_v26 = vmul.f32 %v5555_v3, %v1168_v35 }
  0xda   : > { %v4651_v52 = vmul.f32 %v5555_v3, %v1169_v7  ;;  %v1321_v19 = vadd.f32 %v1289_v34, %v1221_v5  ;;  %2882 = vpow2.f32 %v2413_v41  ;;  %v1322_v61 = vadd.f32 %v1290_v55, %v1222_v39  ;;  %v1257_v5 = vld [vmem:[#allocation2 + $0xf2] sm:$0xff]  ;;  %v1258_v55 = vld [vmem:[#allocation2 + $0xfa] sm:$0xff] }
  0xdb   : > { %v4654_v31 = vadd.f32 %v4571_v14, %v1318_v51  ;;  %2884 = vpow2.f32 %v2414_v17  ;;  %v2416_v63 = vmul.f32 -1.442695, %v4638_v11  ;;  %v4658_v42 = vmul.f32 %v5555_v3, %v1170_v13 }
  0xdc   : > { %v4661_v37 = vmul.f32 %v5555_v3, %v1171_v15  ;;  %v1323_v50 = vadd.f32 %v1291_v20, %v1223_v46  ;;  %v4664_v40 = vadd.f32 %v4571_v14, %v1319_v33  ;;  %v1324_v30 = vadd.f32 %v1292_v38, %v1224_v49  ;;  %v5567_v20 = vld [vmem:[#allocation90_spill] sm:$0xff]  ;;  %v1260_v33 = vld [vmem:[#allocation2 + $0x112] sm:$0xff] }
  0xdd   : > { %v4667_v39 = vadd.f32 %v4571_v14, %v1320_v22  ;;  %2886 = vpow2.f32 %v2415_v53  ;;  %v2417_v18 = vmul.f32 -1.442695, %v4644_v6  ;;  %v4671_v36 = vmul.f32 %v5555_v3, %v1172_v47  ;;  %v5568_v53 = vld [vmem:[#allocation47_spill] sm:$0xff] }
  0xde   : > { %v1225_v59 = vadd.f32 %v4544_v56, %v4474_v16  ;;  %v1226_v46 = vadd.f32 %v4549_v4, %v4477_v9  ;;  %v4678_v34 = vadd.f32 %v4571_v14, %v1321_v19  ;;  %v1227_v49 = vadd.f32 %v4552_v2, %v4480_v27  ;;  %v1259_v4 = vld [vmem:[#allocation2 + $0x10a] sm:$0xff] }
  0xdf   : > { %v4683_v41 = vadd.f32 %v4571_v14, %v1322_v61  ;;  %2888 = vpow2.f32 %v2416_v63  ;;  %v2418_v3 = vmul.f32 -1.442695, %v4654_v31  ;;  %v1228_v35 = vadd.f32 %v4557_v62, %v4483_v60  ;;  %v1262_v61 = vld [vmem:[#allocation2 + $0x12a] sm:$0xff] }
  0xe0   : > { %v1293_v16 = vmul.f32 %v5564_v48, %v1257_v5  ;;  %v4690_v9 = vadd.f32 %v4571_v14, %v1323_v50  ;;  %v2419_v56 = vmul.f32 -1.442695, %v4664_v40  ;;  %v1229_v27 = vadd.f32 %v4563_v10, %v4486_v44 }
  0xe1   : > { %v4696_v2 = vadd.f32 %v4571_v14, %v1324_v30  ;;  %2890 = vpow2.f32 %v2417_v18  ;;  %v2420_v7 = vmul.f32 -1.442695, %v4667_v39  ;;  %v4701_v60 = vadd.f32 %v4574_v8, %v4489_v1  ;;  %v5570_v18 = vld [vmem:[#allocation4_spill] sm:$0xff] }
  0xe2   : > { %v4705_v62 = vadd.f32 %v4577_v25, %v4492_v12  ;;  %v1294_v51 = vmul.f32 %v5564_v48, %v1258_v55  ;;  %v2421_v17 = vmul.f32 -1.442695, %v4678_v34  ;;  %v4711_v10 = vadd.f32 %v4580_v29, %v4495_v21  ;;  %v1261_v12 = vld [vmem:[#allocation2 + $0x122] sm:$0xff]  ;;  %v5569_v29 = vld [vmem:[#allocation3_spill] sm:$0xff] }
  0xe3   : > { %v2875_v44 = vpop.eup %2874  ;;  %v4715_v38 = vadd.f32 %v4583_v58, %v5567_v20  ;;  %2892 = vpow2.f32 %v2418_v3  ;;  %v2422_v1 = vmul.f32 -1.442695, %v4683_v41  ;;  %v1295_v25 = vmul.f32 %v5564_v48, %v1259_v4  ;;  %v1263_v3 = vld [vmem:[#allocation2 + $0x13a] sm:$0xff] }
  0xe4   : > { %v2877_v8 = vpop.eup %2876  ;;  %v1325_v13 = vadd.f32 %v1293_v16, %v1225_v59  ;;  %2894 = vpow2.f32 %v2419_v56  ;;  %v2423_v15 = vmul.f32 -1.442695, %v4690_v9  ;;  %v4722_v21 = vadd.f32 %v4588_v23, %v5568_v53  ;;  %v5573_v53 = vld [vmem:[#allocation7_spill] sm:$0xff] }
  0xe5   : > { %v2879_v22 = vpop.eup %2878  ;;  %v4726_v58 = vadd.f32 %v4591_v32, %v5569_v29  ;;  %2896 = vpow2.f32 %v2420_v7  ;;  %v2424_v19 = vmul.f32 -1.442695, %v4696_v2  ;;  %v1296_v63 = vmul.f32 %v5564_v48, %v1260_v33 }
  0xe6   : > { %v2881_v47 = vpop.eup %2880  ;;  %v1326_v50 = vadd.f32 %v1294_v51, %v1226_v46  ;;  %2898 = vpow2.f32 %v2421_v17  ;;  %v1476_v5 = vadd.f32 1.0, %v2875_v44  ;;  %v4732_v59 = vadd.f32 %v4648_v26, %v5570_v18  ;;  %v5571_v46 = vld [vmem:[#allocation5_spill] sm:$0xff] }
  0xe7   : > { %v2883_v30 = vpop.eup %2882  ;;  %v1297_v23 = vmul.f32 %v5564_v48, %v1261_v12  ;;  %2900 = vpow2.f32 %v2422_v1  ;;  %v1477_v32 = vadd.f32 1.0, %v2877_v8  ;;  %v1327_v16 = vadd.f32 %v1295_v25, %v1227_v49  ;;  %v1264_v44 = vld [vmem:[#allocation2 + $0x142] sm:$0xff] }
  0xe8   : > { %v2885_v55 = vpop.eup %2884  ;;  %v4736_v56 = vadd.f32 %v4571_v14, %v1325_v13  ;;  %2902 = vpow2.f32 %v2423_v15  ;;  %v1478_v4 = vadd.f32 1.0, %v2879_v22  ;;  %v4740_v7 = vadd.f32 %v4651_v52, %v5571_v46  ;;  %v5572_v1 = vld [vmem:[#allocation6_spill] sm:$0xff]  ;;  %v1265_v13 = vld [vmem:[#allocation2 + $0x152] sm:$0xff] }
  0xe9   : > { %v1298_v51 = vmul.f32 %v5564_v48, %v1262_v61  ;;  %2904 = vpow2.f32 %v2424_v19  ;;  %v1479_v26 = vadd.f32 1.0, %v2881_v47  ;;  %v1328_v20 = vadd.f32 %v1296_v63, %v1228_v35  ;;  %v1266_v61 = vld [vmem:[#allocation2 + $0x15a] sm:$0xff]  ;;  %v1267_v63 = vld [vmem:[#allocation2 + $0x16a] sm:$0xff] }
  0xea   : > { %v2887_v17 = vpop.eup %2886  ;;  %v4744_v33 = vadd.f32 %v4571_v14, %v1326_v50  ;;  %v1480_v49 = vadd.f32 1.0, %v2883_v30  ;;  %2906 = vrcp.f32 %v1476_v5  ;;  %v4748_v8 = vadd.f32 %v4658_v42, %v5572_v1  ;;  %v5574_v30 = vld [vmem:[#allocation8_spill] sm:$0xff] }
  0xeb   : > { %v1299_v12 = vmul.f32 %v5564_v48, %v1263_v3  ;;  %v1481_v52 = vadd.f32 1.0, %v2885_v55  ;;  %2908 = vrcp.f32 %v1477_v32  ;;  %v1329_v15 = vadd.f32 %v1297_v23, %v1229_v27  ;;  %v1268_v55 = vld [vmem:[#allocation2 + $0x172] sm:$0xff] }
  0xec   : > { %v2889_v25 = vpop.eup %2888  ;;  %v4752_v22 = vadd.f32 %v4571_v14, %v1327_v16  ;;  %v2425_v35 = vmul.f32 -1.442695, %v4736_v56  ;;  %2910 = vrcp.f32 %v1478_v4  ;;  %v4757_v29 = vadd.f32 %v4661_v37, %v5573_v53 }
  0xed   : > { %v1300_v42 = vmul.f32 %v5564_v48, %v1264_v44  ;;  %v1482_v19 = vadd.f32 1.0, %v2887_v17  ;;  %2912 = vrcp.f32 %v1479_v26  ;;  %v1330_v50 = vadd.f32 %v1298_v51, %v4701_v60  ;;  %v1271_v17 = vld [vmem:[#allocation2 + $0x19a] sm:$0xff] }
  0xee   : > { %v2891_v47 = vpop.eup %2890  ;;  %v4762_v27 = vadd.f32 %v4571_v14, %v1328_v20  ;;  %v2426_v5 = vmul.f32 -1.442695, %v4744_v33  ;;  %2914 = vrcp.f32 %v1480_v49  ;;  %v4767_v18 = vadd.f32 %v4671_v36, %v5574_v30 }
  0xef   : > { %v1301_v37 = vmul.f32 %v5564_v48, %v1265_v13  ;;  %v1483_v23 = vadd.f32 1.0, %v2889_v25  ;;  %2916 = vrcp.f32 %v1481_v52  ;;  %v1331_v3 = vadd.f32 %v1299_v12, %v4705_v62  ;;  %v5575_v12 = vld [vmem:[#allocation70_spill] sm:$0xff] }
  0xf0   : > { %v2893_v32 = vpop.eup %2892  ;;  %v4772_v60 = vadd.f32 %v4571_v14, %v1329_v15  ;;  %2918 = vpow2.f32 %v2425_v35  ;;  %v2427_v16 = vmul.f32 -1.442695, %v4752_v22  ;;  %v1302_v46 = vmul.f32 %v5564_v48, %v1266_v61  ;;  %v1272_v15 = vld [vmem:[#allocation2 + $0x1a2] sm:$0xff] }
  0xf1   : > { %v2895_v4 = vpop.eup %2894  ;;  %v1303_v36 = vmul.f32 %v5564_v48, %v1267_v63  ;;  %v1484_v51 = vadd.f32 1.0, %v2891_v47  ;;  %2920 = vrcp.f32 %v1482_v19  ;;  %v1332_v44 = vadd.f32 %v1300_v42, %v4711_v10  ;;  %v5576_v19 = vld [vmem:[#allocation73_spill] sm:$0xff] }
  0xf2   : > { %v2897_v26 = vpop.eup %2896  ;;  %v4779_v20 = vadd.f32 %v4571_v14, %v1330_v50  ;;  %2922 = vpow2.f32 %v2426_v5  ;;  %v2428_v62 = vmul.f32 -1.442695, %v4762_v27  ;;  %v1304_v1 = vmul.f32 %v5564_v48, %v1268_v55 }
  0xf3   : > { %v2899_v49 = vpop.eup %2898  ;;  %v1305_v52 = vmul.f32 %v5564_v48, %v5575_v12  ;;  %v1485_v25 = vadd.f32 1.0, %v2893_v32  ;;  %2924 = vrcp.f32 %v1483_v23  ;;  %v1333_v35 = vadd.f32 %v1301_v37, %v4715_v38 }
  0xf4   : > { %v2901_v13 = vpop.eup %2900  ;;  %v4787_v10 = vadd.f32 %v4571_v14, %v1331_v3  ;;  %2926 = vpow2.f32 %v2427_v16  ;;  %v2429_v53 = vmul.f32 -1.442695, %v4772_v60  ;;  %v1306_v47 = vmul.f32 %v5564_v48, %v5576_v19 }
  0xf5   : > { %v2903_v42 = vpop.eup %2902  ;;  %v1307_v61 = vmul.f32 %v5564_v48, %v1271_v17  ;;  %v1486_v63 = vadd.f32 1.0, %v2895_v4  ;;  %2928 = vrcp.f32 %v1484_v51  ;;  %v1334_v5 = vadd.f32 %v1302_v46, %v4722_v21 }
  0xf6   : > { %v2905_v50 = vpop.eup %2904  ;;  %v4795_v30 = vadd.f32 %v4571_v14, %v1332_v44  ;;  %2930 = vpow2.f32 %v2428_v62  ;;  %v2430_v38 = vmul.f32 -1.442695, %v4779_v20  ;;  %v1308_v23 = vmul.f32 %v5564_v48, %v1272_v15 }
  0xf7   : > { %v2907_v37 = vpop.eup %2906  ;;  %v1335_v32 = vadd.f32 %v1303_v36, %v4726_v58  ;;  %v1487_v55 = vadd.f32 1.0, %v2897_v26  ;;  %2932 = vrcp.f32 %v1485_v25  ;;  %v4801_v16 = vadd.f32 %v4571_v14, %v1333_v35 }
  0xf8   : > { %v2909_v3 = vpop.eup %2908  ;;  %2934 = vpow2.f32 %v2429_v53  ;;  %v2431_v21 = vmul.f32 -1.442695, %v4787_v10  ;;  %v4805_v4 = vmul.f32 %v2907_v37, %v4594_v24  ;;  %v1336_v51 = vadd.f32 %v1304_v1, %v4732_v59 }
  0xf9   : > { %v2911_v46 = vpop.eup %2910  ;;  %v1488_v17 = vadd.f32 1.0, %v2899_v49  ;;  %2936 = vrcp.f32 %v1486_v63  ;;  %v4809_v48 = vmul.f32 %v2909_v3, %v4599_v43  ;;  %v4812_v36 = vadd.f32 %v4571_v14, %v1334_v5 }
  0xfa   : > { %v2913_v58 = vpop.eup %2912  ;;  %2938 = vpow2.f32 %v2430_v38  ;;  %v2432_v26 = vmul.f32 -1.442695, %v4795_v30  ;;  %v4816_v44 = vmul.f32 %v2911_v46, %v4605_v54  ;;  %v1489_v62 = vadd.f32 1.0, %v2901_v13 }
  0xfb   : > { %v2915_v24 = vpop.eup %2914  ;;  %2940 = vrcp.f32 %v1487_v55  ;;  %v4819_v59 = vmul.f32 %v2913_v58, %v4610_v45  ;;  %v1604_v43 = vadd.f32 %v4809_v48, %v4805_v4  ;;  %v1337_v1 = vadd.f32 %v1305_v52, %v4740_v7 }
  0xfc   : > { %v2917_v49 = vpop.eup %2916  ;;  %v4825_v12 = vadd.f32 %v4571_v14, %v1335_v32  ;;  %2942 = vpow2.f32 %v2431_v21  ;;  %v2433_v25 = vmul.f32 -1.442695, %v4801_v16  ;;  %v1490_v15 = vadd.f32 1.0, %v2903_v42 }
  0xfd   : > { %v2919_v54 = vpop.eup %2918  ;;  %2944 = vrcp.f32 %v1488_v17  ;;  %v4829_v13 = vmul.f32 %v2915_v24, %v4615_v28  ;;  %v1605_v45 = vadd.f32 %v1604_v43, %v4816_v44  ;;  %v1338_v53 = vadd.f32 %v1306_v47, %v4748_v8 }
  0xfe   : > { %v2921_v35 = vpop.eup %2920  ;;  %v4834_v19 = vadd.f32 %v4571_v14, %v1336_v51  ;;  %2946 = vpow2.f32 %v2432_v26  ;;  %v2434_v7 = vmul.f32 -1.442695, %v4812_v36  ;;  %v1491_v63 = vadd.f32 1.0, %v2905_v50 }
  0xff   : > { %v2923_v52 = vpop.eup %2922  ;;  %2948 = vrcp.f32 %v1489_v62  ;;  %v4838_v42 = vmul.f32 %v2917_v49, %v4620_v57  ;;  %v1606_v28 = vadd.f32 %v1605_v45, %v4819_v59  ;;  %v1339_v38 = vadd.f32 %v1307_v61, %v4757_v29 }
 0x100   : > { %v2925_v5 = vpop.eup %2924  ;;  %v4843_v37 = vadd.f32 %v4571_v14, %v1337_v1  ;;  %2950 = vpow2.f32 %v2433_v25  ;;  %v2435_v8 = vmul.f32 -1.442695, %v4825_v12  ;;  %v1492_v32 = vadd.f32 1.0, %v2919_v54 }
 0x101   : > { %v2927_v47 = vpop.eup %2926  ;;  %2952 = vrcp.f32 %v1490_v15  ;;  %v4847_v50 = vmul.f32 %v2921_v35, %v4631_v0  ;;  %v1607_v57 = vadd.f32 %v1606_v28, %v4829_v13  ;;  %v1340_v3 = vadd.f32 %v1308_v23, %v4767_v18 }
 0x102   : > { %v2929_v55 = vpop.eup %2928  ;;  %v4852_v21 = vadd.f32 %v4571_v14, %v1338_v53  ;;  %2954 = vpow2.f32 %v2434_v7  ;;  %v2436_v29 = vmul.f32 -1.442695, %v4834_v19  ;;  %v1493_v46 = vadd.f32 1.0, %v2923_v52 }
 0x103   : > { %v2931_v61 = vpop.eup %2930  ;;  %2956 = vrcp.f32 %v1491_v63  ;;  %v4856_v51 = vmul.f32 %v2925_v5, %v4638_v11  ;;  %v1608_v0 = vadd.f32 %v1607_v57, %v4838_v42  ;;  %v4860_v58 = vadd.f32 %v4571_v14, %v1339_v38 }
 0x104   : > { %v2933_v17 = vpop.eup %2932  ;;  %2958 = vpow2.f32 %v2435_v8  ;;  %v2437_v18 = vmul.f32 -1.442695, %v4843_v37  ;;  %v1494_v26 = vadd.f32 1.0, %v2927_v47  ;;  %v4864_v24 = vmul.f32 %v2929_v55, %v4644_v6 }
 0x105   : > { %v2935_v23 = vpop.eup %2934  ;;  %2960 = vrcp.f32 %v1492_v32  ;;  %v1609_v62 = vadd.f32 %v1608_v0, %v4847_v50  ;;  %v4868_v11 = vadd.f32 %v4571_v14, %v1340_v3  ;;  %v2438_v49 = vmul.f32 -1.442695, %v4852_v21 }
 0x106   : > { %v2937_v43 = vpop.eup %2936  ;;  %2962 = vpow2.f32 %v2436_v29  ;;  %v1495_v25 = vadd.f32 1.0, %v2931_v61  ;;  %v4872_v54 = vmul.f32 %v2933_v17, %v4654_v31  ;;  %v2439_v6 = vmul.f32 -1.442695, %v4860_v58 }
 0x107   : > { %v2939_v1 = vpop.eup %2938  ;;  %2964 = vrcp.f32 %v1493_v46  ;;  %v1610_v15 = vadd.f32 %v1609_v62, %v4856_v51  ;;  %v1496_v53 = vadd.f32 1.0, %v2935_v23  ;;  %v4877_v14 = vmul.f32 %v2937_v43, %v4664_v40 }
 0x108   : > { %v2941_v45 = vpop.eup %2940  ;;  %2966 = vpow2.f32 %v2437_v18  ;;  %v2440_v63 = vmul.f32 -1.442695, %v4868_v11  ;;  %v1497_v28 = vadd.f32 1.0, %v2939_v1 }
 0x109   : > { %v2943_v35 = vpop.eup %2942  ;;  %2968 = vrcp.f32 %v1494_v26  ;;  %v1611_v7 = vadd.f32 %v1610_v15, %v4864_v24  ;;  %v4882_v5 = vmul.f32 %v2941_v45, %v4667_v39 }
 0x10a   : > { %v2945_v52 = vpop.eup %2944  ;;  %2970 = vpow2.f32 %v2438_v49  ;;  %v1498_v32 = vadd.f32 1.0, %v2943_v35 }
 0x10b   : > { %v2947_v31 = vpop.eup %2946  ;;  %2972 = vrcp.f32 %v1495_v25  ;;  %v1612_v38 = vadd.f32 %v1611_v7, %v4872_v54  ;;  %v4886_v40 = vmul.f32 %v2945_v52, %v4678_v34 }
 0x10c   : > { %v2949_v8 = vpop.eup %2948  ;;  %2974 = vpow2.f32 %v2439_v6  ;;  %v1499_v29 = vadd.f32 1.0, %v2947_v31 }
 0x10d   : > { %v2951_v47 = vpop.eup %2950  ;;  %2976 = vrcp.f32 %v1496_v53  ;;  %v1613_v57 = vadd.f32 %v1612_v38, %v4877_v14  ;;  %v4890_v39 = vmul.f32 %v2949_v8, %v4683_v41 }
 0x10e   : > { %v2953_v55 = vpop.eup %2952  ;;  %2978 = vpow2.f32 %v2440_v63  ;;  %v1500_v17 = vadd.f32 1.0, %v2951_v47 }
 0x10f   : > { %v2955_v3 = vpop.eup %2954  ;;  %2980 = vrcp.f32 %v1497_v28  ;;  %v1614_v61 = vadd.f32 %v1613_v57, %v4882_v5  ;;  %v4894_v18 = vmul.f32 %v2953_v55, %v4690_v9 }
 0x110   : > { %v2957_v46 = vpop.eup %2956  ;;  %2982 = vrcp.f32 %v1498_v32  ;;  %v1501_v62 = vadd.f32 1.0, %v2955_v3 }
 0x111   : > { %v2959_v0 = vpop.eup %2958  ;;  %v1615_v34 = vadd.f32 %v1614_v61, %v4886_v40  ;;  %2984 = vrcp.f32 %v1499_v29  ;;  %v4898_v43 = vmul.f32 %v2957_v46, %v4696_v2 }
 0x112   : > { %v2961_v23 = vpop.eup %2960  ;;  %v1502_v25 = vadd.f32 1.0, %v2959_v0  ;;  %2986 = vrcp.f32 %v1500_v17 }
 0x113   : > { %v2963_v26 = vpop.eup %2962  ;;  %v1616_v41 = vadd.f32 %v1615_v34, %v4890_v39  ;;  %v4902_v15 = vmul.f32 %v2961_v23, %v4736_v56  ;;  %2988 = vrcp.f32 %v1501_v62 }
 0x114   : > { %v2965_v49 = vpop.eup %2964  ;;  %v1503_v35 = vadd.f32 1.0, %v2963_v26  ;;  %2990 = vrcp.f32 %v1502_v25 }
 0x115   : > { %v2967_v1 = vpop.eup %2966  ;;  %v1617_v9 = vadd.f32 %v1616_v41, %v4894_v18  ;;  %v4906_v53 = vmul.f32 %v2965_v49, %v4744_v33 }
 0x116   : > { %v2969_v45 = vpop.eup %2968  ;;  %v1504_v63 = vadd.f32 1.0, %v2967_v1  ;;  %2992 = vrcp.f32 %v1503_v35 }
 0x117   : > { %v2971_v6 = vpop.eup %2970  ;;  %v1618_v2 = vadd.f32 %v1617_v9, %v4898_v43  ;;  %v4910_v31 = vmul.f32 %v2969_v45, %v4752_v22 }
 0x118   : > { %v2973_v7 = vpop.eup %2972  ;;  %v1505_v8 = vadd.f32 1.0, %v2971_v6  ;;  %2994 = vrcp.f32 %v1504_v63 }
 0x119   : > { %v2975_v52 = vpop.eup %2974  ;;  %v1619_v56 = vadd.f32 %v1618_v2, %v4902_v15  ;;  %v4914_v47 = vmul.f32 %v2973_v7, %v4762_v27 }
 0x11a   : > { %v2977_v28 = vpop.eup %2976  ;;  %v1506_v57 = vadd.f32 1.0, %v2975_v52  ;;  %2996 = vrcp.f32 %v1505_v8 }
 0x11b   : > { %v2979_v38 = vpop.eup %2978  ;;  %v1620_v33 = vadd.f32 %v1619_v56, %v4906_v53  ;;  %v4918_v55 = vmul.f32 %v2977_v28, %v4772_v60 }
 0x11c   : > { %v2981_v32 = vpop.eup %2980  ;;  %v1507_v29 = vadd.f32 1.0, %v2979_v38  ;;  %2998 = vrcp.f32 %v1506_v57 }
 0x11d   : > { %v1621_v22 = vadd.f32 %v1620_v33, %v4910_v31  ;;  %v2983_v3 = vpop.eup %2982  ;;  %v4922_v61 = vmul.f32 %v2981_v32, %v4779_v20 }
 0x11e   : > { %v2985_v27 = vpop.eup %2984  ;;  %v4926_v0 = vmul.f32 %v2983_v3, %v4787_v10  ;;  %3000 = vrcp.f32 %v1507_v29  ;;  %v3011_v29 = vld [vmem:[#allocation2] sm:$0xff] }
 0x11f   : > { %v1622_v46 = vadd.f32 %v1621_v22, %v4914_v47  ;;  %v2987_v34 = vpop.eup %2986  ;;  %v4930_v60 = vmul.f32 %v2985_v27, %v4795_v30  ;;  %v2860_v27 = vld [vmem:[%s5124_s5 + $0x28] sm:$0xff]  }
 0x120   : > { %v2989_v26 = vpop.eup %2988  ;;  %v4934_v20 = vmul.f32 %v2987_v34, %v4801_v16  ;;  %v2862_v34 = vld [vmem:[%s5124_s5 + $0x18] sm:$0xff]  }
 0x121   : > { %v1623_v17 = vadd.f32 %v1622_v46, %v4918_v55  ;;  %v2991_v41 = vpop.eup %2990  ;;  %v4938_v49 = vmul.f32 %v2989_v26, %v4812_v36  ;;  %v2859_v46 = vld [vmem:[%s5124_s5 + $0x30] sm:$0xff]   ;;  %v2864_v26 = vld [vmem:[%s5124_s5 + $0x8] sm:$0xff]  }
 0x122   : > { %v4942_v25 = vmul.f32 %v2991_v41, %v4825_v12  ;;  %v1659_v41 = vld [vmem:[%s5123_s4] sm:$0x1] }
 0x123   : > { %v1624_v23 = vadd.f32 %v1623_v17, %v4922_v61  ;;  %v2993_v1 = vpop.eup %2992  ;;  %v2861_v17 = vld [vmem:[%s5124_s5 + $0x20] sm:$0xff]  }
 0x124   : > { %v4946_v45 = vmul.f32 %v2993_v1, %v4834_v19 }
 0x125   : > { %v1625_v62 = vadd.f32 %v1624_v23, %v4926_v0  ;;  %v2995_v9 = vpop.eup %2994  ;;  %v2863_v23 = vld [vmem:[%s5124_s5 + $0x10] sm:$0xff]  }
 0x126   : > { %v4950_v35 = vmul.f32 %v2995_v9, %v4843_v37 }
 0x127   : > { %v1626_v10 = vadd.f32 %v1625_v62, %v4930_v60  ;;  %v2997_v6 = vpop.eup %2996  ;;  %v2865_v62 = vld [vmem:[%s5124_s5] sm:$0xff]  }
 0x128   : > { %v4954_v7 = vmul.f32 %v2997_v6, %v4852_v21 }
 0x129   : > { %v1627_v30 = vadd.f32 %v1626_v10, %v4934_v20  ;;  %v2999_v2 = vpop.eup %2998 }
 0x12a   : > { %v4958_v63 = vmul.f32 %v2999_v2, %v4860_v58 }
 0x12b   : > { %v1628_v16 = vadd.f32 %v1627_v30, %v4938_v49  ;;  %v3001_v52 = vpop.eup %3000 }
 0x12c   : > { %v4962_v56 = vmul.f32 %v3001_v52, %v4868_v11  ;;  %v2858_v11 = vld [vmem:[%s5124_s5 + $0x38] sm:$0xff]  }
 0x12d   : > { %v1629_v36 = vadd.f32 %v1628_v16, %v4942_v25 }
 0x12f   : > { %v1630_v12 = vadd.f32 %v1629_v36, %v4946_v45 }
 0x131   : > { %v1631_v19 = vadd.f32 %v1630_v12, %v4950_v35 }
 0x133   : > { %v1632_v37 = vadd.f32 %v1631_v19, %v4954_v7 }
 0x135   : > { %v1633_v28 = vadd.f32 %v1632_v37, %v4958_v63  ;;  %v2866_v37 = vld [vmem:[%s5126_s7 + $0x38] sm:$0xff]  }
 0x136   : > { %2792 = vmatprep.subr.bf16.mxu0 %v2866_v37 }
 0x137   : > { %v1634_v38 = vadd.f32 %v1633_v28, %v4962_v56  ;;  %2793 = vmatpush3.bf16.msra.mxu0 %v2866_v37  ;;  %v2867_v28 = vld [vmem:[%s5126_s7 + $0x30] sm:$0xff]  }
 0x138   : > { %2794 = vmatprep.subr.bf16.mxu0 %v2867_v28 }
 0x139   : > { %v1635_v8 = vrot.slane %v1634_v38, 4 }
 0x13b   : > { %v1636_v21 = vadd.f32 %v1635_v8, %v1634_v38  ;;  %2795 = vmatpush3.bf16.msra.mxu0 %v2867_v28  ;;  %v2868_v38 = vld [vmem:[%s5126_s7 + $0x28] sm:$0xff]   ;;  %v2869_v8 = vld [vmem:[%s5126_s7 + $0x20] sm:$0xff]  }
 0x13c   : > { %2796 = vmatprep.subr.bf16.mxu0 %v2868_v38 }
 0x13d   : > { %v1637_v33 = vrot.slane %v1636_v21, 2 }
 0x13f   : > { %v1638_v32 = vadd.f32 %v1637_v33, %v1636_v21  ;;  %2797 = vmatpush3.bf16.msra.mxu0 %v2868_v38  ;;  %v2870_v21 = vld [vmem:[%s5126_s7 + $0x18] sm:$0xff]   ;;  %v2871_v33 = vld [vmem:[%s5126_s7 + $0x10] sm:$0xff]  }
 0x140   : > { %2798 = vmatprep.subr.bf16.mxu0 %v2869_v8 }
 0x141   : > { %v1639_v57 = vrot.slane %v1638_v32, 1 }
 0x143   : > { %v1640_v22 = vadd.f32 %v1639_v57, %v1638_v32  ;;  %2799 = vmatpush3.bf16.msra.mxu0 %v2869_v8  ;;  %v2872_v32 = vld [vmem:[%s5126_s7 + $0x8] sm:$0xff]   ;;  %v2873_v57 = vld [vmem:[%s5126_s7] sm:$0xff]  }
 0x144   : > { %2800 = vmatprep.subr.bf16.mxu0 %v2870_v21 }
 0x145   : > { %v1641_v3 = vmul.f32 0.00390625, %v1640_v22  ;;  %v1772_v22 = vld [vmem:[%s5125_s6] sm:$0x1] }
 0x147   : > { %v1642_v58 = vpack.c.bf16 %v1641_v3, %v1641_v3  ;;  %2801 = vmatpush3.bf16.msra.mxu0 %v2870_v21 }
 0x148   : > { %2802 = vmatprep.subr.bf16.mxu0 %v2871_v33 }
 0x149   : > { %2769 = vmatmul.mubr.bf16.vlgmr.msra.gmra.mxu1 %v1642_v58 }
 0x14a   : > { %2788 = vmatprep.mubr.msk.bf16.mxu1 %vm3053_vm0, %v3011_v29  ;;  %2773 = vmatpush3.bf16.msra.mxu1 %v2858_v11 }
 0x14b   : > { %2774 = vmatprep.subr.bf16.mxu1 %v3011_v29  ;;  %2803 = vmatpush3.bf16.msra.mxu0 %v2871_v33 }
 0x14c   : > { %2804 = vmatprep.subr.bf16.mxu0 %v2872_v32 }
 0x14e   : > { %2775 = vmatpush3.bf16.msra.mxu1 %v2859_v46 }
 0x14f   : > { %2776 = vmatprep.subr.bf16.mxu1 %v3011_v29  ;;  %2805 = vmatpush3.bf16.msra.mxu0 %v2872_v32 }
 0x150   : > { %2806 = vmatprep.subr.bf16.mxu0 %v2873_v57 }
 0x152   : > { %2777 = vmatpush3.bf16.msra.mxu1 %v2860_v27 }
 0x153   : > { %2778 = vmatprep.subr.bf16.mxu1 %v3011_v29  ;;  %2807 = vmatpush3.bf16.msra.mxu0 %v2873_v57 }
 0x156   : > { %2779 = vmatpush3.bf16.msra.mxu1 %v2861_v17 }
 0x157   : > { %2780 = vmatprep.subr.bf16.mxu1 %v3011_v29 }
 0x15a   : > { %2781 = vmatpush3.bf16.msra.mxu1 %v2862_v34 }
 0x15b   : > { %2782 = vmatprep.subr.bf16.mxu1 %v3011_v29 }
 0x15e   : > { %2783 = vmatpush3.bf16.msra.mxu1 %v2863_v23 }
 0x15f   : > { %2784 = vmatprep.subr.bf16.mxu1 %v3011_v29 }
 0x162   : > { %2785 = vmatpush3.bf16.msra.mxu1 %v2864_v26  ;;  %v5577_v26 = vld [vmem:[#allocation34_spill] sm:$0xff] }
 0x163   : > { %2786 = vmatprep.subr.bf16.mxu1 %v3011_v29 }
 0x166   : > { %2787 = vmatpush3.bf16.msra.mxu1 %v2865_v62  ;;  %v5578_v62 = vsub.s32 0, %v5577_v26 }
 0x209   : > { %v1742_v10 = vpop.f32.mrf.mxu1 }
 0x20a   : > { %v1743_v1 = vadd.f32 %v1742_v10, %v1659_v41 }
 0x20b   : > { %v2770_v30 = vpop.f32.mrf.mxu1 }
 0x20c   : > { %v2449_v9 = vmul.f32 -1.442695, %v1743_v1 }
 0x20d   : > { %v1745_v16 = vpop.f32.mrf.mxu1 }
 0x20e   : > { %3002 = vpow2.f32 %v2449_v9 }
 0x20f   : > { %v2771_v6 = vpop.f32.mrf.mxu1 }
 0x21b   : > { %v3003_v36 = vpop.eup %3002 }
 0x21c   : > { %v1751_v2 = vadd.f32 1.0, %v3003_v36 }
 0x21e   : > { %3004 = vrcp.f32 %v1751_v2 }
 0x22b   : > { %v3005_v12 = vpop.eup %3004 }
 0x22c   : > { %v1754_v52 = vmul.f32 %v3005_v12, %v1743_v1 }
 0x22e   : > { %v1755_v19 = vpack.c.bf16 %v1754_v52, %v1754_v52 }
 0x230   : > { %2789 = vmatmul.mubr.bf16.vlgmr.msra.gmra.mxu1 %v1755_v19 }
 0x2f0   : > { %v1855_v3 = vpop.f32.mrf.mxu1 }
 0x2f1   : > { %v1856_v58 = vadd.f32 %v1855_v3, %v1772_v22 }
 0x2f2   : > { %v2790_v29 = vpop.f32.mrf.mxu1 }
 0x2f3   : > { %v2458_v11 = vmul.f32 -1.442695, %v1856_v58 }
 0x2f4   : > { %v1858_v46 = vpop.f32.mrf.mxu1 }
 0x2f5   : > { %3006 = vpow2.f32 %v2458_v11 }
 0x2f6   : > { %v2791_v27 = vpop.f32.mrf.mxu1 }
 0x2f7   : > { %v3012_v27 = vld [vmem:[#allocation2 + $0x31] sm:$0xff] }
 0x302   : > { %v3007_v17 = vpop.eup %3006 }
 0x303   : > { %v1864_v34 = vadd.f32 1.0, %v3007_v17  ;;  %v3013_v17 = vld [vmem:[#allocation2 + $0x39] sm:$0xff] }
 0x305   : > { %3008 = vrcp.f32 %v1864_v34 }
 0x312   : > { %v3009_v23 = vpop.eup %3008 }
 0x313   : > { %v1870_v41 = vrot.slane %v3009_v23, %v5578_v62  ;;  %v3014_v62 = vld [vmem:[#allocation2 + $0x19] sm:$0xff] }
 0x315   : > { %v1871_v10 = vmul.f32 %v1870_v41, %v4805_v4  ;;  %v1872_v1 = vmul.f32 %v1870_v41, %v4809_v48  ;;  %v1873_v30 = vmul.f32 %v1870_v41, %v4816_v44  ;;  %v1874_v9 = vmul.f32 %v1870_v41, %v4819_v59 }
 0x316   : > { %v1875_v16 = vmul.f32 %v1870_v41, %v4829_v13  ;;  %v1876_v6 = vmul.f32 %v1870_v41, %v4838_v42  ;;  %v1877_v52 = vmul.f32 %v1870_v41, %v4847_v50  ;;  %v1878_v4 = vmul.f32 %v1870_v41, %v4856_v51 }
 0x317   : > { %v1903_v36 = vpack.c.bf16 %v1872_v1, %v1871_v10  ;;  %v1904_v2 = vpack.c.bf16 %v1874_v9, %v1873_v30  ;;  %v1879_v48 = vmul.f32 %v1870_v41, %v4864_v24  ;;  %v1880_v44 = vmul.f32 %v1870_v41, %v4872_v54  ;;  %v3015_v1 = vld [vmem:[#allocation2 + $0x21] sm:$0xff] }
 0x318   : > { %v1905_v12 = vpack.c.bf16 %v1876_v6, %v1875_v16  ;;  %v1906_v19 = vpack.c.bf16 %v1878_v4, %v1877_v52  ;;  %v1881_v13 = vmul.f32 %v1870_v41, %v4877_v14  ;;  %v1882_v42 = vmul.f32 %v1870_v41, %v4882_v5  ;;  %v3016_v4 = vld [vmem:[#allocation2 + $0x61] sm:$0xff] }
 0x319   : > { %2808 = vmatprep.mubr.bf16.mxu0 %v1903_v36  ;;  %v1907_v59 = vpack.c.bf16 %v1880_v44, %v1879_v48  ;;  %v1883_v37 = vmul.f32 %v1870_v41, %v4886_v40  ;;  %v1884_v28 = vmul.f32 %v1870_v41, %v4890_v39  ;;  %v1885_v51 = vmul.f32 %v1870_v41, %v4894_v18  ;;  %v3017_v44 = vld [vmem:[#allocation2 + $0x69] sm:$0xff] }
 0x31a   : > { %2809 = vmatmul.mubr.bf16.vlgmr.msra.gmra.mxu0 %v1904_v2  ;;  %v1908_v38 = vpack.c.bf16 %v1882_v42, %v1881_v13  ;;  %v1886_v24 = vmul.f32 %v1870_v41, %v4898_v43  ;;  %v1887_v54 = vmul.f32 %v1870_v41, %v4902_v15  ;;  %v1888_v8 = vmul.f32 %v1870_v41, %v4906_v53  ;;  %v3018_v42 = vld [vmem:[#allocation2 + $0x49] sm:$0xff] }
 0x31b   : > { %2812 = vmatprep.mubr.bf16.mxu0 %v1905_v12  ;;  %v1909_v50 = vpack.c.bf16 %v1884_v28, %v1883_v37  ;;  %v1889_v5 = vmul.f32 %v1870_v41, %v4910_v31  ;;  %v1890_v40 = vmul.f32 %v1870_v41, %v4914_v47  ;;  %v1891_v39 = vmul.f32 %v1870_v41, %v4918_v55 }
 0x31c   : > { %v1910_v21 = vpack.c.bf16 %v1886_v24, %v1885_v51  ;;  %v1911_v14 = vpack.c.bf16 %v1888_v8, %v1887_v54  ;;  %v1892_v33 = vmul.f32 %v1870_v41, %v4922_v61  ;;  %v1893_v43 = vmul.f32 %v1870_v41, %v4926_v0 }
 0x31d   : > { %v1912_v32 = vpack.c.bf16 %v1890_v40, %v1889_v5  ;;  %v1894_v15 = vmul.f32 %v1870_v41, %v4930_v60  ;;  %v1895_v53 = vmul.f32 %v1870_v41, %v4934_v20  ;;  %v1896_v57 = vmul.f32 %v1870_v41, %v4938_v49  ;;  %v3020_v40 = vld [vmem:[#allocation2 + $0x91] sm:$0xff] }
 0x31e   : > { %v1913_v18 = vpack.c.bf16 %v1892_v33, %v1891_v39  ;;  %v1897_v47 = vmul.f32 %v1870_v41, %v4942_v25  ;;  %v1898_v55 = vmul.f32 %v1870_v41, %v4946_v45  ;;  %v1899_v61 = vmul.f32 %v1870_v41, %v4950_v35  ;;  %v5059_v25 = vld [vmem:[%s5127_s8] ss:$0 sm:$0xff] }
 0x31f   : > { %v1914_v22 = vpack.c.bf16 %v1894_v15, %v1893_v43  ;;  %v1915_v31 = vpack.c.bf16 %v1896_v57, %v1895_v53  ;;  %v1900_v3 = vmul.f32 %v1870_v41, %v4954_v7  ;;  %v1901_v60 = vmul.f32 %v1870_v41, %v4958_v63  ;;  %v3021_v33 = vld [vmem:[#allocation2 + $0x99] sm:$0xff] }
 0x320   : > { %v1916_v58 = vpack.c.bf16 %v1898_v55, %v1897_v47  ;;  %v1902_v20 = vmul.f32 %v1870_v41, %v4962_v56  ;;  %v3022_v15 = vld [vmem:[#allocation2 + $0x79] sm:$0xff] }
 0x321   : > { %v1917_v0 = vpack.c.bf16 %v1900_v3, %v1899_v61 }
 0x322   : > { %2813 = vmatmul.mubr.bf16.gmra.mxu0 %v1906_v19  ;;  %v1918_v49 = vpack.c.bf16 %v1902_v20, %v1901_v60  ;;  %v3024_v20 = vld [vmem:[#allocation2 + $0xc1] sm:$0xff] }
 0x323   : > { %2816 = vmatprep.mubr.bf16.mxu0 %v1907_v59 }
 0x32a   : > { %2817 = vmatmul.mubr.bf16.gmra.mxu0 %v1908_v38  ;;  %v3019_v38 = vld [vmem:[#allocation2 + $0x51] sm:$0xff] }
 0x32b   : > { %2820 = vmatprep.mubr.bf16.mxu0 %v1909_v50 }
 0x332   : > { %2821 = vmatmul.mubr.bf16.gmra.mxu0 %v1910_v21 }
 0x333   : > { %2824 = vmatprep.mubr.bf16.mxu0 %v1911_v14 }
 0x33a   : > { %2825 = vmatmul.mubr.bf16.gmra.mxu0 %v1912_v32 }
 0x33b   : > { %2828 = vmatprep.mubr.bf16.mxu0 %v1913_v18 }
 0x342   : > { %2829 = vmatmul.mubr.bf16.gmra.mxu0 %v1914_v22  ;;  %v3023_v22 = vld [vmem:[#allocation2 + $0x81] sm:$0xff] }
 0x343   : > { %2832 = vmatprep.mubr.bf16.mxu0 %v1915_v31 }
 0x34a   : > { %2833 = vmatmul.mubr.bf16.gmra.mxu0 %v1916_v58 }
 0x34b   : > { %2836 = vmatprep.mubr.bf16.mxu0 %v1917_v0 }
 0x352   : > { %2837 = vmatmul.mubr.bf16.gmra.mxu0 %v1918_v49 }
 0x3da   : > { %v2810_v29 = vpop.f32.mrf.mxu0 }
 0x3db   : > { %v2033_v35 = vadd.f32 %v2810_v29, %v5059_v25  ;;  %v3025_v29 = vld [vmem:[#allocation2 + $0xc9] sm:$0xff] }
 0x3dc   : > { %v2024_v45 = vpop.f32.mrf.mxu0 }
 0x3dd   : > { %v2025_v11 = vadd.f32 %v5059_v25, %v2024_v45  ;;  %v2153_v56 = vadd.f32 %v3012_v27, %v2033_v35  ;;  %v3027_v27 = vld [vmem:[#allocation2 + $0xb1] sm:$0xff] }
 0x3de   : > { %v2811_v7 = vpop.f32.mrf.mxu0 }
 0x3df   : > { %v2036_v46 = vadd.f32 %v2811_v7, %v5059_v25  ;;  %v2151_v41 = vadd.f32 %v3014_v62, %v2025_v11  ;;  %v3026_v11 = vld [vmem:[#allocation2 + $0xa9] sm:$0xff] }
 0x3e0   : > { %v2027_v63 = vpop.f32.mrf.mxu0 }
 0x3e1   : > { %v2154_v34 = vadd.f32 %v3013_v17, %v2036_v46  ;;  %v2028_v23 = vadd.f32 %v5059_v25, %v2027_v63 }
 0x3e2   : > { %v2814_v26 = vpop.f32.mrf.mxu0 }
 0x3e3   : > { %v2608_v10 = vpack.c.bf16 %v2154_v34, %v2153_v56  ;;  %v2152_v30 = vadd.f32 %v3015_v1, %v2028_v23  ;;  %v2049_v6 = vadd.f32 %v2814_v26, %v5059_v25  ;;  %v3028_v1 = vld [vmem:[#allocation2 + $0xf1] sm:$0xff] }
 0x3e4   : > { %v2040_v9 = vpop.f32.mrf.mxu0 }
 0x3e5   : > { %2695 = vst [vmem:[%s5070_s23 + $0x8] sm:$0xff] %v2608_v10   ;;  %v2603_v16 = vpack.c.bf16 %v2152_v30, %v2151_v41  ;;  %v2041_v2 = vadd.f32 %v5059_v25, %v2040_v9  ;;  %v2157_v48 = vadd.f32 %v3016_v4, %v2049_v6  ;;  %v3029_v9 = vld [vmem:[#allocation2 + $0xf9] sm:$0xff]  ;;  %v3031_v4 = vld [vmem:[#allocation2 + $0xe1] sm:$0xff] }
 0x3e6   : > { %v2815_v36 = vpop.f32.mrf.mxu0 }
 0x3e7   : > { %2604 = vst [vmem:[%s5070_s23] sm:$0xff] %v2603_v16   ;;  %v2052_v12 = vadd.f32 %v2815_v36, %v5059_v25  ;;  %v2155_v37 = vadd.f32 %v3018_v42, %v2041_v2  ;;  %v3030_v2 = vld [vmem:[#allocation2 + $0xd9] sm:$0xff] }
 0x3e8   : > { %v2043_v52 = vpop.f32.mrf.mxu0 }
 0x3e9   : > { %v2158_v19 = vadd.f32 %v3017_v44, %v2052_v12  ;;  %v2044_v59 = vadd.f32 %v5059_v25, %v2043_v52 }
 0x3ea   : > { %v2818_v13 = vpop.f32.mrf.mxu0 }
 0x3eb   : > { %v2618_v28 = vpack.c.bf16 %v2158_v19, %v2157_v48  ;;  %v2156_v50 = vadd.f32 %v3019_v38, %v2044_v59  ;;  %v2065_v54 = vadd.f32 %v2818_v13, %v5059_v25  ;;  %v3032_v38 = vld [vmem:[#allocation2 + $0x121] sm:$0xff] }
 0x3ec   : > { %v2056_v51 = vpop.f32.mrf.mxu0 }
 0x3ed   : > { %2697 = vst [vmem:[%s5070_s23 + $0x18] sm:$0xff] %v2618_v28   ;;  %v2613_v24 = vpack.c.bf16 %v2156_v50, %v2155_v37  ;;  %v2057_v21 = vadd.f32 %v5059_v25, %v2056_v51  ;;  %v2161_v39 = vadd.f32 %v3020_v40, %v2065_v54  ;;  %v3033_v51 = vld [vmem:[#allocation2 + $0x129] sm:$0xff]  ;;  %v3035_v40 = vld [vmem:[#allocation2 + $0x111] sm:$0xff] }
 0x3ee   : > { %v2819_v8 = vpop.f32.mrf.mxu0 }
 0x3ef   : > { %2696 = vst [vmem:[%s5070_s23 + $0x10] sm:$0xff] %v2613_v24   ;;  %v2068_v14 = vadd.f32 %v2819_v8, %v5059_v25  ;;  %v2159_v53 = vadd.f32 %v3022_v15, %v2057_v21  ;;  %v3034_v21 = vld [vmem:[#allocation2 + $0x109] sm:$0xff] }
 0x3f0   : > { %v2059_v5 = vpop.f32.mrf.mxu0 }
 0x3f1   : > { %v2162_v32 = vadd.f32 %v3021_v33, %v2068_v14  ;;  %v2060_v18 = vadd.f32 %v5059_v25, %v2059_v5 }
 0x3f2   : > { %v2822_v43 = vpop.f32.mrf.mxu0 }
 0x3f3   : > { %v2628_v57 = vpack.c.bf16 %v2162_v32, %v2161_v39  ;;  %v2160_v31 = vadd.f32 %v3023_v22, %v2060_v18  ;;  %v2081_v61 = vadd.f32 %v2822_v43, %v5059_v25  ;;  %v3036_v22 = vld [vmem:[#allocation2 + $0x151] sm:$0xff] }
 0x3f4   : > { %v2072_v47 = vpop.f32.mrf.mxu0 }
 0x3f5   : > { %2699 = vst [vmem:[%s5070_s23 + $0x28] sm:$0xff] %v2628_v57   ;;  %v2623_v55 = vpack.c.bf16 %v2160_v31, %v2159_v53  ;;  %v2073_v58 = vadd.f32 %v5059_v25, %v2072_v47  ;;  %v2165_v49 = vadd.f32 %v3024_v20, %v2081_v61  ;;  %v3037_v47 = vld [vmem:[#allocation2 + $0x159] sm:$0xff]  ;;  %v3039_v20 = vld [vmem:[#allocation2 + $0x141] sm:$0xff] }
 0x3f6   : > { %v2823_v3 = vpop.f32.mrf.mxu0 }
 0x3f7   : > { %2698 = vst [vmem:[%s5070_s23 + $0x20] sm:$0xff] %v2623_v55   ;;  %v2084_v0 = vadd.f32 %v2823_v3, %v5059_v25  ;;  %v2163_v46 = vadd.f32 %v3026_v11, %v2073_v58  ;;  %v3038_v58 = vld [vmem:[#allocation2 + $0x139] sm:$0xff] }
 0x3f8   : > { %v2075_v60 = vpop.f32.mrf.mxu0 }
 0x3f9   : > { %v2166_v45 = vadd.f32 %v3025_v29, %v2084_v0  ;;  %v2076_v35 = vadd.f32 %v5059_v25, %v2075_v60 }
 0x3fa   : > { %v2826_v7 = vpop.f32.mrf.mxu0 }
 0x3fb   : > { %v2638_v63 = vpack.c.bf16 %v2166_v45, %v2165_v49  ;;  %v2164_v56 = vadd.f32 %v3027_v27, %v2076_v35  ;;  %v2097_v23 = vadd.f32 %v2826_v7, %v5059_v25  ;;  %v3040_v27 = vld [vmem:[#allocation2 + $0x181] sm:$0xff] }
 0x3fc   : > { %v2088_v17 = vpop.f32.mrf.mxu0 }
 0x3fd   : > { %2701 = vst [vmem:[%s5070_s23 + $0x38] sm:$0xff] %v2638_v63   ;;  %v2633_v34 = vpack.c.bf16 %v2164_v56, %v2163_v46  ;;  %v2089_v62 = vadd.f32 %v5059_v25, %v2088_v17  ;;  %v2169_v30 = vadd.f32 %v3028_v1, %v2097_v23  ;;  %v3041_v17 = vld [vmem:[#allocation2 + $0x189] sm:$0xff] }
 0x3fe   : > { %v2827_v26 = vpop.f32.mrf.mxu0 }
 0x3ff   : > { %2700 = vst [vmem:[%s5070_s23 + $0x30] sm:$0xff] %v2633_v34   ;;  %v2100_v41 = vadd.f32 %v2827_v26, %v5059_v25  ;;  %v2167_v12 = vadd.f32 %v3030_v2, %v2089_v62  ;;  %v3042_v26 = vld [vmem:[#allocation2 + $0x169] sm:$0xff] }
 0x400   : > { %v2091_v10 = vpop.f32.mrf.mxu0 }
 0x401   : > { %v2170_v16 = vadd.f32 %v3029_v9, %v2100_v41  ;;  %v2092_v6 = vadd.f32 %v5059_v25, %v2091_v10  ;;  %v3043_v10 = vld [vmem:[#allocation2 + $0x171] sm:$0xff] }
 0x402   : > { %v2830_v36 = vpop.f32.mrf.mxu0 }
 0x403   : > { %v2648_v52 = vpack.c.bf16 %v2170_v16, %v2169_v30  ;;  %v2168_v48 = vadd.f32 %v3031_v4, %v2092_v6  ;;  %v2113_v59 = vadd.f32 %v2830_v36, %v5059_v25 }
 0x404   : > { %v2104_v44 = vpop.f32.mrf.mxu0 }
 0x405   : > { %2703 = vst [vmem:[%s5070_s23 + $0x48] sm:$0xff] %v2648_v52   ;;  %v2643_v19 = vpack.c.bf16 %v2168_v48, %v2167_v12  ;;  %v2105_v42 = vadd.f32 %v5059_v25, %v2104_v44  ;;  %v2173_v50 = vadd.f32 %v3032_v38, %v2113_v59 }
 0x406   : > { %v2831_v13 = vpop.f32.mrf.mxu0 }
 0x407   : > { %2702 = vst [vmem:[%s5070_s23 + $0x40] sm:$0xff] %v2643_v19   ;;  %v2116_v37 = vadd.f32 %v2831_v13, %v5059_v25  ;;  %v2171_v14 = vadd.f32 %v3034_v21, %v2105_v42 }
 0x408   : > { %v2107_v28 = vpop.f32.mrf.mxu0 }
 0x409   : > { %v2174_v24 = vadd.f32 %v3033_v51, %v2116_v37  ;;  %v2108_v54 = vadd.f32 %v5059_v25, %v2107_v28 }
 0x40a   : > { %v2834_v8 = vpop.f32.mrf.mxu0 }
 0x40b   : > { %v2658_v5 = vpack.c.bf16 %v2174_v24, %v2173_v50  ;;  %v2172_v39 = vadd.f32 %v3035_v40, %v2108_v54  ;;  %v2129_v18 = vadd.f32 %v2834_v8, %v5059_v25 }
 0x40c   : > { %v2120_v33 = vpop.f32.mrf.mxu0 }
 0x40d   : > { %2705 = vst [vmem:[%s5070_s23 + $0x58] sm:$0xff] %v2658_v5   ;;  %v2653_v32 = vpack.c.bf16 %v2172_v39, %v2171_v14  ;;  %v2121_v15 = vadd.f32 %v5059_v25, %v2120_v33  ;;  %v2177_v31 = vadd.f32 %v3036_v22, %v2129_v18 }
 0x40e   : > { %v2835_v43 = vpop.f32.mrf.mxu0 }
 0x40f   : > { %2704 = vst [vmem:[%s5070_s23 + $0x50] sm:$0xff] %v2653_v32   ;;  %v2132_v53 = vadd.f32 %v2835_v43, %v5059_v25  ;;  %v2175_v0 = vadd.f32 %v3038_v58, %v2121_v15 }
 0x410   : > { %v2123_v57 = vpop.f32.mrf.mxu0 }
 0x411   : > { %v2178_v55 = vadd.f32 %v3037_v47, %v2132_v53  ;;  %v2124_v61 = vadd.f32 %v5059_v25, %v2123_v57 }
 0x412   : > { %v2838_v3 = vpop.f32.mrf.mxu0 }
 0x413   : > { %v2668_v60 = vpack.c.bf16 %v2178_v55, %v2177_v31  ;;  %v2176_v49 = vadd.f32 %v3039_v20, %v2124_v61  ;;  %v2145_v35 = vadd.f32 %v2838_v3, %v5059_v25 }
 0x414   : > { %v2136_v29 = vpop.f32.mrf.mxu0 }
 0x415   : > { %2707 = vst [vmem:[%s5070_s23 + $0x68] sm:$0xff] %v2668_v60   ;;  %v2663_v45 = vpack.c.bf16 %v2176_v49, %v2175_v0  ;;  %v2137_v11 = vadd.f32 %v5059_v25, %v2136_v29  ;;  %v2181_v56 = vadd.f32 %v3040_v27, %v2145_v35 }
 0x416   : > { %v2839_v7 = vpop.f32.mrf.mxu0 }
 0x417   : > { %2706 = vst [vmem:[%s5070_s23 + $0x60] sm:$0xff] %v2663_v45   ;;  %v2148_v46 = vadd.f32 %v2839_v7, %v5059_v25  ;;  %v2179_v62 = vadd.f32 %v3042_v26, %v2137_v11 }
 0x418   : > { %v2139_v63 = vpop.f32.mrf.mxu0 }
 0x419   : > { %v2182_v34 = vadd.f32 %v3041_v17, %v2148_v46  ;;  %v2140_v23 = vadd.f32 %v5059_v25, %v2139_v63 }
 0x41b   : > { %v2678_v41 = vpack.c.bf16 %v2182_v34, %v2181_v56  ;;  %v2180_v1 = vadd.f32 %v3043_v10, %v2140_v23 }
 0x41d   : > { %2709 = vst [vmem:[%s5070_s23 + $0x78] sm:$0xff] %v2678_v41   ;;  %v2673_v30 = vpack.c.bf16 %v2180_v1, %v2179_v62 }
 0x41f   : > { %2708 = vst [vmem:[%s5070_s23 + $0x70] sm:$0xff] %v2673_v30  }
 0x420 PF: > { %s19_s30 = sadd.s32 1, %s3050_s30  }
 0x421   : > { %p16_p4 = scmp.ge.s32.totalorder %s19_s30, 4  }
 0x423   :  { %18 = sbr.rel (!%p16_p4) target bundleno = 1 (0x1), region = 89 }

// kernel: efficientnet_forward.9
= control target key start
LH: loop header
LB: loop body
LE: loop exit
PB: predicated region body
PF: predicated region fallthrough
CT: control target
= control target key end

     0   :  { %s1896_s17 = smov 0   ;;  %s2360_s0 = inlined_call_operand.vmem [shape: bf16[2,64,128], index: 0, kind: input, shape index: {}]   ;;  %s2361_s1 = inlined_call_operand.vmem [shape: bf16[128,128], index: 1, kind: input, shape index: {}]   ;;  %s2362_s2 = inlined_call_operand.vmem [shape: f32[1,128], index: 2, kind: input, shape index: {}]   ;;  %s2363_s3 = inlined_call_operand.vmem [shape: f32[9,128], index: 3, kind: input, shape index: {}]   ;;  %s2364_s4 = inlined_call_operand.vmem [shape: f32[1,128], index: 4, kind: input, shape index: {}]   ;;  %s2365_s5 = inlined_call_operand.vmem [shape: bf16[128,128], index: 5, kind: input, shape index: {}]   ;;  %s2366_s6 = inlined_call_operand.vmem [shape: f32[1,128], index: 6, kind: input, shape index: {}]   ;;  %s2367_s7 = inlined_call_operand.vmem [shape: bf16[128,128], index: 7, kind: input, shape index: {}]   ;;  %s2368_s8 = inlined_call_operand.vmem [shape: f32[1,128], index: 8, kind: input, shape index: {}]   ;;  %s2369_s9 = inlined_call_operand.vmem [shape: bf16[128,128], index: 9, kind: input, shape index: {}]   ;;  %s2370_s10 = inlined_call_operand.vmem [shape: f32[1,128], index: 10, kind: input, shape index: {}]   ;;  %s2371_s11 = inlined_call_operand.vmem [shape: bf16[2,64,128], index: 11, kind: output, shape index: {}]  }
   0x1 LB: > { %s1462_s18 = sadd.s32 4294967295, %s1832_s17   ;;  %p1466_p0 = scmp.ge.s32.totalorder %s1832_s17, 1  ;;  %s1832_s17 = sphi %s1896_s17, %s21_s17  }
   0x2   : > { %p337_p1 = scmp.lt.s32.totalorder %s1832_s17, 3 }
   0x4   : > { %p338_p2 = pnand %p1466_p0, %p337_p1 }
   0x6   : > { %341 = sbr.rel (%p338_p2) target bundleno = 1056 (0x420), region = 64 }
   0xb   : > { %v1712_v0 = vld [vmem:[%s2361_s1 + $0x38] sm:$0xff]   ;;  %p377_p3 = scmp.lt.s32.totalorder %s1462_s18, 1  ;;  %v1713_v1 = vld [vmem:[%s2361_s1 + $0x30] sm:$0xff]   ;;  %v1714_v2 = vld [vmem:[%s2361_s1 + $0x28] sm:$0xff]   ;;  %v2373_v12 = vmov 0.0   ;;  %vm1835_vm0 = vmmov 0   ;;  %v652_v47 = vlaneseq }
   0xc   : > { %1614 = vmatprep.subr.bf16.mxu0 %v1712_v0  ;;  %v1715_v3 = vld [vmem:[%s2361_s1 + $0x20] sm:$0xff]   ;;  %v1716_v5 = vld [vmem:[%s2361_s1 + $0x18] sm:$0xff]   ;;  %v1717_v6 = vld [vmem:[%s2361_s1 + $0x10] sm:$0xff]   ;;  %622 = vst [vmem:[#allocation2 + $0x30] sm:$0x1] %v2373_v12  ;;  %1638 = vmatprep.subr.bf16.mxu1 %v2373_v12 }
   0xd   : > { %s2400_s18 = smov (!%p377_p3, %s1462_s18), 1  ;;  %1615 = vmatpush3.bf16.msra.mxu0 %v1712_v0  ;;  %v1718_v7 = vld [vmem:[%s2361_s1 + $0x8] sm:$0xff]   ;;  %v1719_v8 = vld [vmem:[%s2361_s1] sm:$0xff]   ;;  %630 = vst [vmem:[#allocation2 + $0x39] sm:$0x1] %v2373_v12  ;;  %614 = vst [vmem:[#allocation2] sm:$0xff] %v2373_v12  ;;  %1654 = vmatprep.mubr.msk.bf16.mxu1 %vm1835_vm0, %v2373_v12 }
   0xe   : > { %1616 = vmatprep.subr.bf16.mxu0 %v1713_v1  ;;  %s1539_s25 = sshll.u32 %s2400_s18, 5  ;;  %615 = vst [vmem:[#allocation2 + $0x8] sm:$0x3] %v2373_v12  ;;  %617 = vst [vmem:[#allocation2 + $0x90] sm:$0xff] %v2373_v12  ;;  %v1724_v13 = vld [vmem:[%s2365_s5 + $0x38] sm:$0xff]   ;;  %v1725_v14 = vld [vmem:[%s2365_s5 + $0x30] sm:$0xff]  }
   0xf   : > { %s1921_s28 = scalar_lea.vmem %s2360_s0, %s1539_s25  ;;  %618 = vst [vmem:[#allocation2 + $0x98] sm:$0x3] %v2373_v12  ;;  %620 = vst [vmem:[#allocation2 + $0x10] sm:$0x1] %v2373_v12  ;;  %1639 = vmatpush3.bf16.msra.mxu1 %v1724_v13  ;;  %v1726_v15 = vld [vmem:[%s2365_s5 + $0x28] sm:$0xff]   ;;  %v1727_v16 = vld [vmem:[%s2365_s5 + $0x20] sm:$0xff]   ;;  %s386_s27 = scalar_lea.vmem %s2371_s11, %s1539_s25 }
  0x10   : > { %v388_v4 = vld [vmem:[%s1921_s28] sm:$0xff]   ;;  %v1940_v9 = vld [vmem:[%s1921_s28 + $0x8] sm:$0xff]   ;;  %v392_v10 = vld [vmem:[%s1921_s28 + $0x10] sm:$0xff]   ;;  %621 = vst [vmem:[#allocation2 + $0x20] sm:$0x1] %v2373_v12  ;;  %1640 = vmatprep.subr.bf16.mxu1 %v2373_v12  ;;  %v2030_v52 = vshrl.u32 %v652_v47, 7 }
  0x11   : > { %1617 = vmatpush3.bf16.msra.mxu0 %v1713_v1  ;;  %1630 = vmatprep.mubr.bf16.mxu0 %v388_v4  ;;  %2383 = vst [vmem:[#allocation3_spill] sm:$0xff] %v1940_v9  ;;  %v1945_v11 = vld [vmem:[%s1921_s28 + $0x18] sm:$0xff]   ;;  %623 = vst [vmem:[#allocation2 + $0x40] sm:$0x1] %v2373_v12  ;;  %v1729_v18 = vld [vmem:[%s2365_s5 + $0x10] sm:$0xff]  }
  0x12   : > { %1618 = vmatprep.subr.bf16.mxu0 %v1714_v2  ;;  %2384 = vst [vmem:[#allocation4_spill] sm:$0xff] %v1945_v11  ;;  %624 = vst [vmem:[#allocation2 + $0x50] sm:$0x1] %v2373_v12  ;;  %v1728_v17 = vld [vmem:[%s2365_s5 + $0x18] sm:$0xff]   ;;  %v1730_v19 = vld [vmem:[%s2365_s5 + $0x8] sm:$0xff]   ;;  %v2372_v55 = vsub.s32 0, %v2030_v52 }
  0x13   : > { %625 = vst [vmem:[#allocation2 + $0x60] sm:$0x1] %v2373_v12  ;;  %626 = vst [vmem:[#allocation2 + $0x70] sm:$0x1] %v2373_v12  ;;  %1641 = vmatpush3.bf16.msra.mxu1 %v1725_v14  ;;  %v1731_v20 = vld [vmem:[%s2365_s5] sm:$0xff]   ;;  %v674_v58 = vsub.s32 1, %v2030_v52 }
  0x14   : > { %627 = vst [vmem:[#allocation2 + $0x80] sm:$0x1] %v2373_v12  ;;  %628 = vst [vmem:[#allocation2 + $0x19] sm:$0x1] %v2373_v12  ;;  %1642 = vmatprep.subr.bf16.mxu1 %v2373_v12  ;;  %v1471_v21 = vld [vmem:[%s2362_s2] ss:$0 sm:$0xff] }
  0x15   : > { %1619 = vmatpush3.bf16.msra.mxu0 %v1714_v2  ;;  %629 = vst [vmem:[#allocation2 + $0x29] sm:$0x1] %v2373_v12  ;;  %631 = vst [vmem:[#allocation2 + $0x49] sm:$0x1] %v2373_v12  ;;  %v612_v59 = vld [vmem:[%s2363_s3] sm:$0xff]  ;;  %v702_v63 = vsub.s32 2, %v2030_v52 }
  0x16   : > { %1620 = vmatprep.subr.bf16.mxu0 %v1715_v3  ;;  %632 = vst [vmem:[#allocation2 + $0x59] sm:$0x1] %v2373_v12  ;;  %633 = vst [vmem:[#allocation2 + $0x69] sm:$0x1] %v2373_v12  ;;  %v2039_v62 = vrot.slane %v612_v59, %v2372_v55  ;;  %v664_v0 = vld [vmem:[#allocation2 + $0x1] sm:$0xff] }
  0x17   : > { %634 = vst [vmem:[#allocation2 + $0x79] sm:$0x1] %v2373_v12  ;;  %635 = vst [vmem:[#allocation2 + $0x89] sm:$0x1] %v2373_v12  ;;  %1643 = vmatpush3.bf16.msra.mxu1 %v1726_v15  ;;  %v758_v15 = vsub.s32 4, %v2030_v52 }
  0x18   : > { %1644 = vmatprep.subr.bf16.mxu1 %v2373_v12  ;;  %2385 = vst [vmem:[#allocation5_spill] sm:$0xff] %v2030_v52 }
  0x19   : > { %1621 = vmatpush3.bf16.msra.mxu0 %v1715_v3  ;;  %v2042_v3 = vrot.slane %v612_v59, %v674_v58 }
  0x1a   : > { %1622 = vmatprep.subr.bf16.mxu0 %v1716_v5 }
  0x1b   : > { %1645 = vmatpush3.bf16.msra.mxu1 %v1727_v16  ;;  %v843_v16 = vsub.s32 7, %v2030_v52 }
  0x1c   : > { %1646 = vmatprep.subr.bf16.mxu1 %v2373_v12 }
  0x1d   : > { %1623 = vmatpush3.bf16.msra.mxu0 %v1716_v5 }
  0x1e   : > { %1624 = vmatprep.subr.bf16.mxu0 %v1717_v6 }
  0x1f   : > { %1647 = vmatpush3.bf16.msra.mxu1 %v1728_v17 }
  0x20   : > { %1648 = vmatprep.subr.bf16.mxu1 %v2373_v12 }
  0x21   : > { %1625 = vmatpush3.bf16.msra.mxu0 %v1717_v6  ;;  %v2044_v6 = vrot.slane %v612_v59, %v702_v63 }
  0x22   : > { %1626 = vmatprep.subr.bf16.mxu0 %v1718_v7 }
  0x23   : > { %1649 = vmatpush3.bf16.msra.mxu1 %v1729_v18  ;;  %v815_v18 = vsub.s32 6, %v2030_v52 }
  0x24   : > { %1650 = vmatprep.subr.bf16.mxu1 %v2373_v12 }
  0x25   : > { %1627 = vmatpush3.bf16.msra.mxu0 %v1718_v7  ;;  %v656_v7 = vmul.f32 0.0, %v2039_v62 }
  0x26   : > { %1628 = vmatprep.subr.bf16.mxu0 %v1719_v8 }
  0x27   : > { %1651 = vmatpush3.bf16.msra.mxu1 %v1730_v19 }
  0x28   : > { %1652 = vmatprep.subr.bf16.mxu1 %v2373_v12 }
  0x29   : > { %1629 = vmatpush3.bf16.msra.mxu0 %v1719_v8  ;;  %v676_v8 = vmul.f32 %v2042_v3, %v664_v0 }
  0x2a   : > { %1658 = vmatprep.subr.bf16.mxu0 %v2373_v12 }
  0x2b   : > { %1653 = vmatpush3.bf16.msra.mxu1 %v1731_v20  ;;  %v730_v20 = vsub.s32 3, %v2030_v52 }
  0x2c   : > { %1631 = vmatmul.mubr.bf16.vlgmr.msra.gmra.mxu0 %v1940_v9 }
  0x2d   : > { %1634 = vmatprep.mubr.bf16.mxu0 %v392_v10  ;;  %v692_v10 = vld [vmem:[#allocation2 + $0x2] sm:$0xff] }
  0x34   : > { %1635 = vmatmul.mubr.bf16.gmra.mxu0 %v1945_v11 }
  0x35   : > { %1674 = vmatprep.mubr.msk.bf16.mxu0 %vm1835_vm0, %v2373_v12 }
  0xec   : > { %v1632_v22 = vpop.f32.mrf.mxu0 }
  0xed   : > { %v2006_v23 = vadd.f32 %v1632_v22, %v1471_v21  ;;  %v704_v22 = vmul.f32 %v2044_v6, %v692_v10 }
  0xee   : > { %v525_v24 = vpop.f32.mrf.mxu0 }
  0xef   : > { %v1486_v25 = vmul.f32 -1.442695, %v2006_v23  ;;  %v2009_v26 = vadd.f32 %v1471_v21, %v525_v24  ;;  %v786_v24 = vsub.s32 5, %v2030_v52 }
  0xf0   : > { %v1633_v27 = vpop.f32.mrf.mxu0 }
  0xf1   : > { %1752 = vpow2.f32 %v1486_v25  ;;  %v1484_v28 = vmul.f32 -1.442695, %v2009_v26  ;;  %v2012_v29 = vadd.f32 %v1633_v27, %v1471_v21 }
  0xf2   : > { %v528_v30 = vpop.f32.mrf.mxu0 }
  0xf3   : > { %1754 = vpow2.f32 %v1484_v28  ;;  %v1487_v31 = vmul.f32 -1.442695, %v2012_v29  ;;  %v2015_v32 = vadd.f32 %v1471_v21, %v528_v30  ;;  %v2056_v28 = vrot.slane %v612_v59, %v758_v15  ;;  %v840_v30 = vld [vmem:[#allocation2 + $0x91] sm:$0xff] }
  0xf4   : > { %v1636_v33 = vpop.f32.mrf.mxu0 }
  0xf5   : > { %1756 = vpow2.f32 %v1487_v31  ;;  %v1485_v34 = vmul.f32 -1.442695, %v2015_v32  ;;  %v2018_v35 = vadd.f32 %v1636_v33, %v1471_v21  ;;  %v2058_v31 = vrot.slane %v612_v59, %v843_v16 }
  0xf6   : > { %v541_v36 = vpop.f32.mrf.mxu0 }
  0xf7   : > { %1758 = vpow2.f32 %v1485_v34  ;;  %v1490_v37 = vmul.f32 -1.442695, %v2018_v35  ;;  %v2021_v38 = vadd.f32 %v1471_v21, %v541_v36  ;;  %v2061_v34 = vrot.slane %v612_v59, %v815_v18 }
  0xf8   : > { %v1637_v39 = vpop.f32.mrf.mxu0 }
  0xf9   : > { %1760 = vpow2.f32 %v1490_v37  ;;  %v1488_v40 = vmul.f32 -1.442695, %v2021_v38  ;;  %v2024_v41 = vadd.f32 %v1637_v39, %v1471_v21  ;;  %v2063_v37 = vrot.slane %v612_v59, %v730_v20 }
  0xfa   : > { %v544_v42 = vpop.f32.mrf.mxu0 }
  0xfb   : > { %1762 = vpow2.f32 %v1488_v40  ;;  %v1491_v43 = vmul.f32 -1.442695, %v2024_v41  ;;  %v2027_v44 = vadd.f32 %v1471_v21, %v544_v42  ;;  %v684_v21 = vadd.f32 %v676_v8, %v656_v7 }
  0xfc   : > { %v2065_v40 = vrot.slane %v612_v59, %v786_v24 }
  0xfd   : > { %1764 = vpow2.f32 %v1491_v43  ;;  %v1489_v45 = vmul.f32 -1.442695, %v2027_v44  ;;  %v712_v39 = vadd.f32 %v704_v22, %v684_v21  ;;  %v2074_v43 = vmul.f32 0.0, %v2061_v34 }
  0xfe   : > { %v1753_v46 = vpop.eup %1752 }
  0xff   : > { %v582_v48 = vadd.f32 1.0, %v1753_v46  ;;  %1766 = vpow2.f32 %v1489_v45 }
 0x100   : > { %v1755_v49 = vpop.eup %1754 }
 0x101   : > { %1768 = vrcp.f32 %v582_v48  ;;  %v580_v50 = vadd.f32 1.0, %v1755_v49 }
 0x102   : > { %v1757_v51 = vpop.eup %1756 }
 0x103   : > { %1770 = vrcp.f32 %v580_v50  ;;  %v583_v53 = vadd.f32 1.0, %v1757_v51 }
 0x104   : > { %v1759_v54 = vpop.eup %1758 }
 0x105   : > { %1772 = vrcp.f32 %v583_v53  ;;  %v581_v56 = vadd.f32 1.0, %v1759_v54 }
 0x106   : > { %v1761_v57 = vpop.eup %1760 }
 0x107   : > { %1774 = vrcp.f32 %v581_v56  ;;  %v586_v60 = vadd.f32 1.0, %v1761_v57 }
 0x108   : > { %v1763_v61 = vpop.eup %1762 }
 0x109   : > { %1776 = vrcp.f32 %v586_v60  ;;  %v584_v1 = vadd.f32 1.0, %v1763_v61 }
 0x10a   : > { %v1765_v2 = vpop.eup %1764 }
 0x10b   : > { %1778 = vrcp.f32 %v584_v1  ;;  %v587_v4 = vadd.f32 1.0, %v1765_v2 }
 0x10c   : > { %v1767_v5 = vpop.eup %1766 }
 0x10d   : > { %1780 = vrcp.f32 %v587_v4  ;;  %v585_v13 = vadd.f32 1.0, %v1767_v5 }
 0x10e   : > { %v1769_v14 = vpop.eup %1768 }
 0x10f   : > { %v606_v17 = vmul.f32 %v1769_v14, %v2006_v23  ;;  %1782 = vrcp.f32 %v585_v13  ;;  %v868_v23 = vld [vmem:[#allocation2 + $0x92] sm:$0xff] }
 0x110   : > { %v1771_v19 = vpop.eup %1770 }
 0x111   : > { %638 = vst [vmem:[#allocation2 + $0x31] sm:$0xff] %v606_v17  ;;  %v604_v25 = vmul.f32 %v1771_v19, %v2009_v26  ;;  %v2070_v26 = vld [vmem:[%s2363_s3 + $0x8] ss:$0 sm:$0xff]  ;;  %v679_v47 = vmul.f32 %v2042_v3, %v606_v17  ;;  %v2084_v48 = vmul.f32 %v2056_v28, %v606_v17  ;;  %v2088_v50 = vmul.f32 %v2058_v31, %v606_v17 }
 0x112   : > { %v1773_v27 = vpop.eup %1772  ;;  %v2080_v45 = vmul.f32 %v2070_v26, %v868_v23 }
 0x113   : > { %636 = vst [vmem:[#allocation2 + $0x11] sm:$0xff] %v604_v25  ;;  %v607_v33 = vmul.f32 %v1773_v27, %v2012_v29  ;;  %v2077_v29 = vmul.f32 %v2058_v31, %v840_v30  ;;  %v677_v49 = vmul.f32 %v2042_v3, %v604_v25 }
 0x114   : > { %v1775_v36 = vpop.eup %1774  ;;  %2386 = vst [vmem:[#allocation6_spill] sm:$0xff] %v2080_v45 }
 0x115   : > { %639 = vst [vmem:[#allocation2 + $0x41] sm:$0xff] %v607_v33  ;;  %v605_v42 = vmul.f32 %v1775_v36, %v2015_v32  ;;  %v2091_v32 = vmul.f32 %v2056_v28, %v604_v25  ;;  %v680_v51 = vmul.f32 %v2042_v3, %v607_v33  ;;  %v2098_v54 = vmul.f32 %v2056_v28, %v607_v33 }
 0x116   : > { %v1777_v46 = vpop.eup %1776  ;;  %v2110_v63 = vmul.f32 %v2058_v31, %v607_v33 }
 0x117   : > { %637 = vst [vmem:[#allocation2 + $0x21] sm:$0xff] %v605_v42  ;;  %v2095_v53 = vmul.f32 %v1777_v46, %v2018_v35  ;;  %v678_v59 = vmul.f32 %v2042_v3, %v605_v42  ;;  %v2104_v60 = vmul.f32 %v2056_v28, %v605_v42  ;;  %v2107_v61 = vmul.f32 %v2058_v31, %v605_v42 }
 0x118   : > { %v1779_v56 = vpop.eup %1778  ;;  %v647_v57 = vld [vmem:[#allocation2 + $0x30] sm:$0xff] }
 0x119   : > { %v2100_v58 = vld [vmem:[#allocation2 + $0x32] sm:$0xff]  ;;  %v659_v35 = vmul.f32 %v2039_v62, %v647_v57  ;;  %v2116_v1 = vmul.f32 %v2063_v37, %v647_v57  ;;  %642 = vst [vmem:[#allocation2 + $0x71] sm:$0xff] %v2095_v53  ;;  %v2120_v2 = vmul.f32 %v1779_v56, %v2021_v38  ;;  %v683_v8 = vmul.f32 %v2042_v3, %v2095_v53 }
 0x11a   : > { %v707_v0 = vmul.f32 %v2044_v6, %v2100_v58  ;;  %v1781_v4 = vpop.eup %1780  ;;  %v645_v5 = vld [vmem:[#allocation2 + $0x10] sm:$0xff]  ;;  %v2126_v10 = vmul.f32 %v2056_v28, %v2095_v53  ;;  %v2130_v13 = vmul.f32 %v2065_v40, %v2100_v58  ;;  %v2133_v14 = vmul.f32 %v2061_v34, %v647_v57 }
 0x11b   : > { %v693_v7 = vld [vmem:[#allocation2 + $0x12] sm:$0xff]  ;;  %v687_v15 = vadd.f32 %v679_v47, %v659_v35  ;;  %v657_v38 = vmul.f32 %v2039_v62, %v645_v5  ;;  %v732_v17 = vmul.f32 %v2063_v37, %v645_v5  ;;  %640 = vst [vmem:[#allocation2 + $0x51] sm:$0xff] %v2120_v2  ;;  %v681_v22 = vmul.f32 %v2042_v3, %v2120_v2 }
 0x11c   : > { %v705_v16 = vmul.f32 %v2044_v6, %v693_v7  ;;  %v1783_v18 = vpop.eup %1782  ;;  %v788_v19 = vmul.f32 %v2065_v40, %v693_v7  ;;  %v2140_v20 = vld [vmem:[#allocation2 + $0x40] sm:$0xff]  ;;  %v2147_v24 = vmul.f32 %v1781_v4, %v2024_v41  ;;  %v764_v25 = vmul.f32 %v2056_v28, %v2120_v2 }
 0x11d   : > { %v2142_v21 = vld [vmem:[#allocation2 + $0x42] sm:$0xff]  ;;  %v685_v27 = vadd.f32 %v677_v49, %v657_v38  ;;  %v740_v30 = vadd.f32 %v732_v17, %v712_v39  ;;  %v660_v23 = vmul.f32 %v2039_v62, %v2140_v20  ;;  %v735_v36 = vmul.f32 %v2063_v37, %v2140_v20 }
 0x11e   : > { %v708_v33 = vmul.f32 %v2044_v6, %v2142_v21  ;;  %v646_v42 = vld [vmem:[#allocation2 + $0x20] sm:$0xff]  ;;  %643 = vst [vmem:[#allocation2 + $0x81] sm:$0xff] %v2147_v24  ;;  %v2161_v41 = vmul.f32 %v1783_v18, %v2027_v44  ;;  %v715_v47 = vadd.f32 %v707_v0, %v687_v15  ;;  %v767_v39 = vmul.f32 %v2056_v28, %v2147_v24 }
 0x11f   : > { %v2157_v46 = vld [vmem:[#allocation2 + $0x22] sm:$0xff]  ;;  %v713_v49 = vadd.f32 %v705_v16, %v685_v27  ;;  %v658_v56 = vmul.f32 %v2039_v62, %v646_v42  ;;  %v733_v35 = vmul.f32 %v2063_v37, %v646_v42  ;;  %v688_v0 = vadd.f32 %v680_v51, %v660_v23 }
 0x120   : > { %v706_v57 = vmul.f32 %v2044_v6, %v2157_v46  ;;  %v789_v4 = vmul.f32 %v2065_v40, %v2157_v46  ;;  %641 = vst [vmem:[#allocation2 + $0x61] sm:$0xff] %v2161_v41  ;;  %v651_v5 = vld [vmem:[#allocation2 + $0x70] sm:$0xff]  ;;  %v682_v44 = vmul.f32 %v2042_v3, %v2161_v41  ;;  %v743_v15 = vadd.f32 %v735_v36, %v715_v47 }
 0x121   : > { %v2174_v7 = vld [vmem:[#allocation2 + $0x72] sm:$0xff]  ;;  %v686_v38 = vadd.f32 %v678_v59, %v658_v56  ;;  %v741_v16 = vadd.f32 %v733_v35, %v713_v49  ;;  %v663_v17 = vmul.f32 %v2039_v62, %v651_v5  ;;  %v716_v12 = vadd.f32 %v708_v33, %v688_v0 }
 0x122   : > { %2387 = vst [vmem:[#allocation7_spill] sm:$0xff] %v2174_v7  ;;  %v711_v18 = vmul.f32 %v2044_v6, %v2174_v7  ;;  %v649_v27 = vld [vmem:[#allocation2 + $0x50] sm:$0xff]  ;;  %v738_v11 = vmul.f32 %v2063_v37, %v651_v5  ;;  %v765_v3 = vmul.f32 %v2056_v28, %v2161_v41  ;;  %v768_v51 = vadd.f32 %v2091_v32, %v740_v30 }
 0x123   : > { %v2179_v55 = vld [vmem:[#allocation2 + $0x52] sm:$0xff]  ;;  %v714_v23 = vadd.f32 %v706_v57, %v686_v38  ;;  %v661_v59 = vmul.f32 %v2039_v62, %v649_v27  ;;  %v691_v36 = vadd.f32 %v683_v8, %v663_v17  ;;  %v736_v49 = vmul.f32 %v2063_v37, %v649_v27 }
 0x124   : > { %2388 = vst [vmem:[#allocation8_spill] sm:$0xff] %v2179_v55  ;;  %v709_v47 = vmul.f32 %v2044_v6, %v2179_v55  ;;  %v769_v56 = vadd.f32 %v2104_v60, %v741_v16  ;;  %v771_v33 = vadd.f32 %v2098_v54, %v743_v15  ;;  %v791_v35 = vmul.f32 %v2065_v40, %v2142_v21 }
 0x125   : > { %v689_v0 = vadd.f32 %v681_v22, %v661_v59  ;;  %v719_v28 = vadd.f32 %v711_v18, %v691_v36  ;;  %v727_v9 = vld [vmem:[#allocation2 + $0x80] sm:$0xff]  ;;  %v742_v32 = vadd.f32 %v2116_v1, %v714_v23  ;;  %v792_v8 = vmul.f32 %v2065_v40, %v2179_v55 }
 0x126   : > { %v2194_v30 = vld [vmem:[#allocation2 + $0x82] sm:$0xff]  ;;  %v739_v57 = vmul.f32 %v2063_v37, %v727_v9  ;;  %v744_v38 = vadd.f32 %v736_v49, %v716_v12  ;;  %v794_v60 = vmul.f32 %v2065_v40, %v2174_v7  ;;  %v796_v1 = vadd.f32 %v788_v19, %v768_v51 }
 0x127   : > { %2389 = vst [vmem:[#allocation9_spill] sm:$0xff] %v2194_v30  ;;  %v795_v54 = vmul.f32 %v2065_v40, %v2194_v30  ;;  %v650_v15 = vld [vmem:[#allocation2 + $0x60] sm:$0xff]  ;;  %v717_v16 = vadd.f32 %v709_v47, %v689_v0  ;;  %v770_v17 = vadd.f32 %v2084_v48, %v742_v32  ;;  %v797_v18 = vadd.f32 %v789_v4, %v769_v56 }
 0x128   : > { %v698_v22 = vld [vmem:[#allocation2 + $0x62] sm:$0xff]  ;;  %v662_v23 = vmul.f32 %v2039_v62, %v650_v15  ;;  %v737_v36 = vmul.f32 %v2063_v37, %v650_v15  ;;  %v747_v12 = vadd.f32 %v739_v57, %v719_v28  ;;  %v772_v49 = vadd.f32 %v764_v25, %v744_v38 }
 0x129   : > { %v710_v59 = vmul.f32 %v2044_v6, %v698_v22  ;;  %v793_v52 = vmul.f32 %v2065_v40, %v698_v22  ;;  %v798_v45 = vadd.f32 %v2130_v13, %v770_v17  ;;  %v799_v30 = vadd.f32 %v791_v35, %v771_v33 }
 0x12a   : > { %v690_v7 = vadd.f32 %v682_v44, %v662_v23  ;;  %v745_v55 = vadd.f32 %v737_v36, %v717_v16  ;;  %v775_v47 = vadd.f32 %v767_v39, %v747_v12  ;;  %v817_v48 = vmul.f32 %v2061_v34, %v646_v42 }
 0x12b   : > { %v800_v19 = vadd.f32 %v792_v8, %v772_v49  ;;  %v819_v62 = vmul.f32 %v2061_v34, %v2140_v20  ;;  %v820_v6 = vmul.f32 %v2061_v34, %v649_v27  ;;  %v821_v37 = vmul.f32 %v2061_v34, %v650_v15  ;;  %v2393_v15 = vld [vmem:[#allocation6_spill] sm:$0xff] }
 0x12c   : > { %v718_v4 = vadd.f32 %v710_v59, %v690_v7  ;;  %v773_v25 = vadd.f32 %v765_v3, %v745_v55  ;;  %v803_v51 = vadd.f32 %v795_v54, %v775_v47  ;;  %v822_v40 = vmul.f32 %v2061_v34, %v651_v5 }
 0x12d   : > { %v823_v13 = vmul.f32 %v2061_v34, %v727_v9  ;;  %v825_v44 = vadd.f32 %v817_v48, %v796_v1  ;;  %v826_v39 = vadd.f32 %v2133_v14, %v797_v18  ;;  %v827_v56 = vadd.f32 %v819_v62, %v798_v45 }
 0x12e   : > { %v746_v42 = vadd.f32 %v738_v11, %v718_v4  ;;  %v801_v33 = vadd.f32 %v793_v52, %v773_v25  ;;  %v828_v35 = vadd.f32 %v820_v6, %v799_v30  ;;  %v829_v0 = vadd.f32 %v821_v37, %v800_v19 }
 0x12f   : > { %v832_v20 = vadd.f32 %v2074_v43, %v803_v51  ;;  %v848_v27 = vmul.f32 %v2058_v31, %v2120_v2  ;;  %v849_v55 = vmul.f32 %v2058_v31, %v2161_v41  ;;  %v850_v5 = vmul.f32 %v2058_v31, %v2095_v53 }
 0x130   : > { %v774_v9 = vadd.f32 %v2126_v10, %v746_v42  ;;  %v830_v34 = vadd.f32 %v822_v40, %v801_v33  ;;  %v851_v11 = vmul.f32 %v2058_v31, %v2147_v24  ;;  %v853_v52 = vadd.f32 %v2107_v61, %v825_v44  ;;  %v2390_v61 = vld [vmem:[#allocation8_spill] sm:$0xff]  ;;  %v1493_v24 = vld [vmem:[%s2364_s4] ss:$0 sm:$0xff] }
 0x131   : > { %v854_v45 = vadd.f32 %v2088_v50, %v826_v39  ;;  %v855_v43 = vadd.f32 %v2110_v63, %v827_v56  ;;  %v856_v14 = vadd.f32 %v848_v27, %v828_v35  ;;  %v857_v2 = vadd.f32 %v849_v55, %v829_v0 }
 0x132   : > { %v802_v7 = vadd.f32 %v794_v60, %v774_v9  ;;  %v858_v3 = vadd.f32 %v850_v5, %v830_v34  ;;  %v860_v41 = vadd.f32 %v2077_v29, %v832_v20  ;;  %v873_v53 = vmul.f32 %v2070_v26, %v2157_v46  ;;  %v2391_v29 = vld [vmem:[#allocation7_spill] sm:$0xff]  ;;  %v2392_v46 = vld [vmem:[#allocation9_spill] sm:$0xff] }
 0x133   : > { %v874_v10 = vmul.f32 %v2070_v26, %v2100_v58  ;;  %v875_v31 = vmul.f32 %v2070_v26, %v2142_v21  ;;  %v876_v50 = vmul.f32 %v2070_v26, %v2390_v61  ;;  %v877_v63 = vmul.f32 %v2070_v26, %v698_v22 }
 0x134   : > { %v831_v28 = vadd.f32 %v823_v13, %v802_v7  ;;  %v878_v32 = vmul.f32 %v2070_v26, %v2391_v29  ;;  %v879_v30 = vmul.f32 %v2070_v26, %v2392_v46  ;;  %v881_v58 = vadd.f32 %v873_v53, %v853_v52 }
 0x135   : > { %v882_v8 = vadd.f32 %v874_v10, %v854_v45  ;;  %v883_v57 = vadd.f32 %v875_v31, %v855_v43  ;;  %v884_v21 = vadd.f32 %v876_v50, %v856_v14  ;;  %v885_v38 = vadd.f32 %v877_v63, %v857_v2 }
 0x136   : > { %v859_v60 = vadd.f32 %v851_v11, %v831_v28  ;;  %v886_v54 = vadd.f32 %v878_v32, %v858_v3  ;;  %v888_v22 = vadd.f32 %v2393_v15, %v860_v41  ;;  %v896_v16 = vadd.f32 %v1493_v24, %v881_v58 }
 0x137   : > { %v897_v17 = vadd.f32 %v1493_v24, %v882_v8  ;;  %v898_v1 = vadd.f32 %v1493_v24, %v883_v57  ;;  %v899_v18 = vadd.f32 %v1493_v24, %v884_v21  ;;  %v900_v23 = vadd.f32 %v1493_v24, %v885_v38 }
 0x138   : > { %v887_v59 = vadd.f32 %v879_v30, %v859_v60  ;;  %v901_v36 = vadd.f32 %v1493_v24, %v886_v54  ;;  %v1494_v12 = vmul.f32 -1.442695, %v896_v16  ;;  %v903_v49 = vadd.f32 %v1493_v24, %v888_v22 }
 0x139   : > { %v1495_v47 = vmul.f32 -1.442695, %v897_v17  ;;  %v1496_v26 = vmul.f32 -1.442695, %v898_v1  ;;  %v1497_v48 = vmul.f32 -1.442695, %v899_v18 }
 0x13a   : > { %v902_v19 = vadd.f32 %v1493_v24, %v887_v59  ;;  %1784 = vpow2.f32 %v1494_v12  ;;  %v1498_v62 = vmul.f32 -1.442695, %v900_v23  ;;  %v1499_v6 = vmul.f32 -1.442695, %v901_v36  ;;  %v1736_v59 = vld [vmem:[%s2367_s7 + $0x18] sm:$0xff]   ;;  %v1738_v12 = vld [vmem:[%s2367_s7 + $0x8] sm:$0xff]  }
 0x13b   : > { %1786 = vpow2.f32 %v1495_v47  ;;  %v1501_v4 = vmul.f32 -1.442695, %v903_v49  ;;  %v991_v47 = vld [vmem:[%s2366_s6] sm:$0x1] }
 0x13c   : > { %1788 = vpow2.f32 %v1496_v26  ;;  %v1500_v37 = vmul.f32 -1.442695, %v902_v19 }
 0x13d   : > { %1790 = vpow2.f32 %v1497_v48 }
 0x13e   : > { %1792 = vpow2.f32 %v1498_v62 }
 0x13f   : > { %1794 = vpow2.f32 %v1499_v6 }
 0x140   : > { %1796 = vpow2.f32 %v1500_v37 }
 0x141   : > { %1798 = vpow2.f32 %v1501_v4 }
 0x147   : > { %v1785_v25 = vpop.eup %1784 }
 0x148   : > { %v1787_v51 = vpop.eup %1786  ;;  %v928_v40 = vadd.f32 1.0, %v1785_v25 }
 0x149   : > { %v1789_v13 = vpop.eup %1788  ;;  %v929_v44 = vadd.f32 1.0, %v1787_v51 }
 0x14a   : > { %v1791_v39 = vpop.eup %1790  ;;  %v930_v56 = vadd.f32 1.0, %v1789_v13  ;;  %1800 = vrcp.f32 %v928_v40 }
 0x14b   : > { %v1793_v42 = vpop.eup %1792  ;;  %v931_v33 = vadd.f32 1.0, %v1791_v39  ;;  %1802 = vrcp.f32 %v929_v44  ;;  %v1740_v44 = vld [vmem:[%s2369_s9 + $0x38] sm:$0xff]   ;;  %v1741_v39 = vld [vmem:[%s2369_s9 + $0x30] sm:$0xff]  }
 0x14c   : > { %v1795_v35 = vpop.eup %1794  ;;  %v932_v0 = vadd.f32 1.0, %v1793_v42  ;;  %1804 = vrcp.f32 %v930_v56  ;;  %1678 = vmatprep.subr.bf16.mxu1 %v1740_v44  ;;  %v1742_v56 = vld [vmem:[%s2369_s9 + $0x28] sm:$0xff]   ;;  %v1743_v42 = vld [vmem:[%s2369_s9 + $0x20] sm:$0xff]  }
 0x14d   : > { %v1797_v20 = vpop.eup %1796  ;;  %v933_v27 = vadd.f32 1.0, %v1795_v35  ;;  %1806 = vrcp.f32 %v931_v33  ;;  %v1744_v33 = vld [vmem:[%s2369_s9 + $0x18] sm:$0xff]   ;;  %v1745_v35 = vld [vmem:[%s2369_s9 + $0x10] sm:$0xff]  }
 0x14e   : > { %v1799_v55 = vpop.eup %1798  ;;  %v934_v5 = vadd.f32 1.0, %v1797_v20  ;;  %1808 = vrcp.f32 %v932_v0  ;;  %v1746_v0 = vld [vmem:[%s2369_s9 + $0x8] sm:$0xff]   ;;  %v1747_v20 = vld [vmem:[%s2369_s9] sm:$0xff]  }
 0x14f   : > { %1810 = vrcp.f32 %v933_v27  ;;  %v935_v9 = vadd.f32 1.0, %v1799_v55  ;;  %v1104_v27 = vld [vmem:[%s2368_s8] sm:$0x1] }
 0x150   : > { %1812 = vrcp.f32 %v934_v5 }
 0x151   : > { %1814 = vrcp.f32 %v935_v9 }
 0x157   : > { %v1801_v34 = vpop.eup %1800 }
 0x158   : > { %v1803_v11 = vpop.eup %1802  ;;  %v2248_v45 = vmul.f32 %v1801_v34, %v896_v16  ;;  %v1732_v16 = vld [vmem:[%s2367_s7 + $0x38] sm:$0xff]  }
 0x159   : > { %v1805_v52 = vpop.eup %1804  ;;  %v2250_v43 = vmul.f32 %v1803_v11, %v897_v17  ;;  %1659 = vmatpush3.bf16.msra.mxu0 %v1732_v16  ;;  %v2394_v17 = vmov 0.0   ;;  %v1824_v16 = vld [vmem:[%s1921_s28] sm:$0xff]  }
 0x15a   : > { %v1807_v14 = vpop.eup %1806  ;;  %v2252_v2 = vmul.f32 %v1805_v52, %v898_v1  ;;  %1660 = vmatprep.subr.bf16.mxu0 %v2394_v17  ;;  %v1733_v1 = vld [vmem:[%s2367_s7 + $0x30] sm:$0xff]  }
 0x15b   : > { %v960_v7 = vadd.f32 %v2250_v43, %v2248_v45  ;;  %v1809_v3 = vpop.eup %1808  ;;  %v2256_v53 = vmul.f32 %v1807_v14, %v899_v18  ;;  %v1734_v18 = vld [vmem:[%s2367_s7 + $0x28] sm:$0xff]  }
 0x15c   : > { %v1811_v41 = vpop.eup %1810  ;;  %v2259_v61 = vmul.f32 %v1809_v3, %v900_v23  ;;  %v1735_v23 = vld [vmem:[%s2367_s7 + $0x20] sm:$0xff]  }
 0x15d   : > { %v961_v10 = vadd.f32 %v960_v7, %v2252_v2  ;;  %v1813_v31 = vpop.eup %1812  ;;  %v2262_v63 = vmul.f32 %v1811_v41, %v901_v36  ;;  %1661 = vmatpush3.bf16.msra.mxu0 %v1733_v1  ;;  %v1737_v36 = vld [vmem:[%s2367_s7 + $0x10] sm:$0xff]  }
 0x15e   : > { %v2264_v24 = vmul.f32 %v1813_v31, %v902_v19  ;;  %v1815_v29 = vpop.eup %1814  ;;  %1662 = vmatprep.subr.bf16.mxu0 %v2394_v17  ;;  %v2395_v41 = vld [vmem:[#allocation5_spill] sm:$0xff] }
 0x15f   : > { %v962_v50 = vadd.f32 %v961_v10, %v2256_v53  ;;  %v2268_v46 = vmul.f32 %v1815_v29, %v903_v49  ;;  %v1739_v49 = vld [vmem:[%s2367_s7] sm:$0xff]   ;;  %v2396_v10 = vsub.s32 0, %v2395_v41 }
 0x161   : > { %v963_v28 = vadd.f32 %v962_v50, %v2259_v61  ;;  %1663 = vmatpush3.bf16.msra.mxu0 %v1734_v18 }
 0x162   : > { %1664 = vmatprep.subr.bf16.mxu0 %v2394_v17 }
 0x163   : > { %v964_v32 = vadd.f32 %v963_v28, %v2262_v63 }
 0x165   : > { %v965_v30 = vadd.f32 %v964_v32, %v2264_v24  ;;  %1665 = vmatpush3.bf16.msra.mxu0 %v1735_v23 }
 0x166   : > { %1666 = vmatprep.subr.bf16.mxu0 %v2394_v17 }
 0x167   : > { %v966_v58 = vadd.f32 %v965_v30, %v2268_v46 }
 0x169   : > { %v967_v8 = vrot.slane %v966_v58, 4  ;;  %1667 = vmatpush3.bf16.msra.mxu0 %v1736_v59 }
 0x16a   : > { %1668 = vmatprep.subr.bf16.mxu0 %v2394_v17 }
 0x16b   : > { %v968_v57 = vadd.f32 %v967_v8, %v966_v58 }
 0x16d   : > { %v969_v21 = vrot.slane %v968_v57, 2  ;;  %1669 = vmatpush3.bf16.msra.mxu0 %v1737_v36 }
 0x16e   : > { %1670 = vmatprep.subr.bf16.mxu0 %v2394_v17 }
 0x16f   : > { %v970_v38 = vadd.f32 %v969_v21, %v968_v57 }
 0x171   : > { %v971_v60 = vrot.slane %v970_v38, 1  ;;  %1671 = vmatpush3.bf16.msra.mxu0 %v1738_v12 }
 0x172   : > { %1672 = vmatprep.subr.bf16.mxu0 %v2394_v17  ;;  %v1351_v17 = vunpack.c.l.bf16 %v1824_v16 }
 0x173   : > { %v972_v54 = vadd.f32 %v971_v60, %v970_v38  ;;  %v2397_v60 = vld [vmem:[#allocation3_spill] sm:$0xff] }
 0x175   : > { %v973_v15 = vmul.f32 0.015625, %v972_v54  ;;  %1673 = vmatpush3.bf16.msra.mxu0 %v1739_v49  ;;  %v1353_v54 = vunpack.c.l.bf16 %v2397_v60 }
 0x177   : > { %v974_v22 = vpack.c.bf16 %v973_v15, %v973_v15  ;;  %v1354_v15 = vunpack.c.h.bf16 %v2397_v60 }
 0x179   : > { %1655 = vmatmul.mubr.bf16.vlgmr.msra.gmra.mxu1 %v974_v22 }
 0x17a   : > { %1679 = vmatpush3.bf16.msra.mxu1 %v1740_v44 }
 0x17b   : > { %1680 = vmatprep.subr.bf16.mxu1 %v1741_v39 }
 0x17e   : > { %1681 = vmatpush3.bf16.msra.mxu1 %v1741_v39 }
 0x17f   : > { %1682 = vmatprep.subr.bf16.mxu1 %v1742_v56 }
 0x182   : > { %1683 = vmatpush3.bf16.msra.mxu1 %v1742_v56 }
 0x183   : > { %1684 = vmatprep.subr.bf16.mxu1 %v1743_v42 }
 0x186   : > { %1685 = vmatpush3.bf16.msra.mxu1 %v1743_v42 }
 0x187   : > { %1686 = vmatprep.subr.bf16.mxu1 %v1744_v33 }
 0x18a   : > { %1687 = vmatpush3.bf16.msra.mxu1 %v1744_v33 }
 0x18b   : > { %1688 = vmatprep.subr.bf16.mxu1 %v1745_v35 }
 0x18e   : > { %1689 = vmatpush3.bf16.msra.mxu1 %v1745_v35 }
 0x18f   : > { %1690 = vmatprep.subr.bf16.mxu1 %v1746_v0 }
 0x192   : > { %1691 = vmatpush3.bf16.msra.mxu1 %v1746_v0 }
 0x193   : > { %1692 = vmatprep.subr.bf16.mxu1 %v1747_v20 }
 0x196   : > { %1693 = vmatpush3.bf16.msra.mxu1 %v1747_v20 }
 0x239   : > { %v1074_v26 = vpop.f32.mrf.mxu1 }
 0x23a   : > { %v1075_v48 = vadd.f32 %v1074_v26, %v991_v47 }
 0x23b   : > { %v1656_v19 = vpop.f32.mrf.mxu1 }
 0x23c   : > { %v1510_v62 = vmul.f32 -1.442695, %v1075_v48 }
 0x23d   : > { %v1077_v6 = vpop.f32.mrf.mxu1 }
 0x23e   : > { %1816 = vpow2.f32 %v1510_v62  ;;  %v2398_v6 = vld [vmem:[#allocation4_spill] sm:$0xff] }
 0x23f   : > { %v1657_v37 = vpop.f32.mrf.mxu1 }
 0x240   : > { %v1357_v37 = vunpack.c.l.bf16 %v2398_v6 }
 0x24b   : > { %v1817_v4 = vpop.eup %1816 }
 0x24c   : > { %v1083_v25 = vadd.f32 1.0, %v1817_v4  ;;  %v1358_v4 = vunpack.c.h.bf16 %v2398_v6 }
 0x24e   : > { %1818 = vrcp.f32 %v1083_v25 }
 0x25b   : > { %v1819_v51 = vpop.eup %1818 }
 0x25c   : > { %v1086_v40 = vmul.f32 %v1819_v51, %v1075_v48 }
 0x25e   : > { %v1087_v13 = vpack.c.bf16 %v1086_v40, %v1086_v40  ;;  %v1825_v40 = vld [vmem:[%s1921_s28 + $0x10] sm:$0xff]  }
 0x25f   : > { %v1356_v39 = vunpack.c.h.bf16 %v1825_v40 }
 0x260   : > { %1675 = vmatmul.mubr.bf16.vlgmr.msra.gmra.mxu0 %v1087_v13  ;;  %v1355_v13 = vunpack.c.l.bf16 %v1825_v40 }
 0x320   : > { %v1187_v55 = vpop.f32.mrf.mxu0 }
 0x321   : > { %v1188_v5 = vadd.f32 %v1187_v55, %v1104_v27 }
 0x322   : > { %v1676_v9 = vpop.f32.mrf.mxu0 }
 0x323   : > { %v1519_v34 = vmul.f32 -1.442695, %v1188_v5 }
 0x324   : > { %v1190_v11 = vpop.f32.mrf.mxu0 }
 0x325   : > { %1820 = vpow2.f32 %v1519_v34 }
 0x326   : > { %v1677_v52 = vpop.f32.mrf.mxu0 }
 0x332   : > { %v1821_v14 = vpop.eup %1820 }
 0x333   : > { %v1196_v7 = vadd.f32 1.0, %v1821_v14 }
 0x335   : > { %1822 = vrcp.f32 %v1196_v7 }
 0x342   : > { %v1823_v3 = vpop.eup %1822 }
 0x343   : > { %v1202_v31 = vrot.slane %v1823_v3, %v2396_v10 }
 0x345   : > { %v1203_v50 = vmul.f32 %v1202_v31, %v2248_v45  ;;  %v1204_v28 = vmul.f32 %v1202_v31, %v2250_v43  ;;  %v1205_v29 = vmul.f32 %v1202_v31, %v2252_v2  ;;  %v1206_v32 = vmul.f32 %v1202_v31, %v2256_v53  ;;  %v1520_v53 = vld [vmem:[%s2370_s10] ss:$0 sm:$0xff] }
 0x346   : > { %v1207_v30 = vmul.f32 %v1202_v31, %v2259_v61  ;;  %v1208_v58 = vmul.f32 %v1202_v31, %v2262_v63  ;;  %v1209_v38 = vmul.f32 %v1202_v31, %v2264_v24  ;;  %v1210_v45 = vmul.f32 %v1202_v31, %v2268_v46 }
 0x347   : > { %v1211_v8 = vpack.c.bf16 %v1204_v28, %v1203_v50  ;;  %v1212_v57 = vpack.c.bf16 %v1206_v32, %v1205_v29  ;;  %v1352_v24 = vunpack.c.h.bf16 %v1824_v16 }
 0x348   : > { %v1213_v21 = vpack.c.bf16 %v1208_v58, %v1207_v30  ;;  %v1214_v43 = vpack.c.bf16 %v1210_v45, %v1209_v38 }
 0x349   : > { %1694 = vmatprep.mubr.bf16.mxu1 %v1211_v8 }
 0x34a   : > { %1695 = vmatmul.mubr.bf16.vlgmr.msra.gmra.mxu1 %v1212_v57 }
 0x34b   : > { %1698 = vmatprep.mubr.bf16.mxu1 %v1213_v21 }
 0x352   : > { %1699 = vmatmul.mubr.bf16.gmra.mxu1 %v1214_v43 }
 0x40a   : > { %v1696_v2 = vpop.f32.mrf.mxu1 }
 0x40b   : > { %v1329_v63 = vadd.f32 %v1696_v2, %v1520_v53 }
 0x40c   : > { %v1320_v61 = vpop.f32.mrf.mxu1 }
 0x40d   : > { %v1321_v1 = vadd.f32 %v1520_v53, %v1320_v61  ;;  %v1361_v23 = vadd.f32 %v1353_v54, %v1329_v63 }
 0x40e   : > { %v1697_v22 = vpop.f32.mrf.mxu1 }
 0x40f   : > { %v1332_v46 = vadd.f32 %v1697_v22, %v1520_v53  ;;  %v1359_v49 = vadd.f32 %v1351_v17, %v1321_v1 }
 0x410   : > { %v1323_v18 = vpop.f32.mrf.mxu1 }
 0x411   : > { %v1362_v59 = vadd.f32 %v1354_v15, %v1332_v46  ;;  %v1324_v36 = vadd.f32 %v1520_v53, %v1323_v18 }
 0x412   : > { %v1700_v12 = vpop.f32.mrf.mxu1 }
 0x413   : > { %v1557_v47 = vpack.c.bf16 %v1362_v59, %v1361_v23  ;;  %v1360_v26 = vadd.f32 %v1352_v24, %v1324_v36  ;;  %v1345_v62 = vadd.f32 %v1700_v12, %v1520_v53 }
 0x414   : > { %v1336_v48 = vpop.f32.mrf.mxu1 }
 0x415   : > { %1569 = vst [vmem:[%s386_s27 + $0x8] sm:$0xff] %v1557_v47   ;;  %v1552_v19 = vpack.c.bf16 %v1360_v26, %v1359_v49  ;;  %v1337_v51 = vadd.f32 %v1520_v53, %v1336_v48  ;;  %v1365_v42 = vadd.f32 %v1357_v37, %v1345_v62 }
 0x416   : > { %v1701_v25 = vpop.f32.mrf.mxu1 }
 0x417   : > { %1553 = vst [vmem:[%s386_s27] sm:$0xff] %v1552_v19   ;;  %v1348_v44 = vadd.f32 %v1701_v25, %v1520_v53  ;;  %v1363_v0 = vadd.f32 %v1355_v13, %v1337_v51 }
 0x418   : > { %v1339_v56 = vpop.f32.mrf.mxu1 }
 0x419   : > { %v1366_v33 = vadd.f32 %v1358_v4, %v1348_v44  ;;  %v1340_v35 = vadd.f32 %v1520_v53, %v1339_v56 }
 0x41b   : > { %v1567_v20 = vpack.c.bf16 %v1366_v33, %v1365_v42  ;;  %v1364_v27 = vadd.f32 %v1356_v39, %v1340_v35 }
 0x41d   : > { %1571 = vst [vmem:[%s386_s27 + $0x18] sm:$0xff] %v1567_v20   ;;  %v1562_v55 = vpack.c.bf16 %v1364_v27, %v1363_v0 }
 0x41f   : > { %1570 = vst [vmem:[%s386_s27 + $0x10] sm:$0xff] %v1562_v55  }
 0x420 PF: > { %s21_s17 = sadd.s32 1, %s1832_s17  }
 0x421   : > { %p18_p4 = scmp.ge.s32.totalorder %s21_s17, 4  }
 0x423   :  { %20 = sbr.rel (!%p18_p4) target bundleno = 1 (0x1), region = 97 }

// kernel: efficientnet_forward.8
= control target key start
LH: loop header
LB: loop body
LE: loop exit
PB: predicated region body
PF: predicated region fallthrough
CT: control target
= control target key end

     0   :  { %s2552_s17 = smov 0   ;;  %s3179_s0 = inlined_call_operand.vmem [shape: bf16[2,256,128], index: 0, kind: input, shape index: {}]   ;;  %s3180_s1 = inlined_call_operand.vmem [shape: bf16[128,128], index: 1, kind: input, shape index: {}]   ;;  %s3181_s2 = inlined_call_operand.vmem [shape: f32[1,128], index: 2, kind: input, shape index: {}]   ;;  %s3182_s3 = inlined_call_operand.vmem [shape: f32[9,128], index: 3, kind: input, shape index: {}]   ;;  %s3183_s4 = inlined_call_operand.vmem [shape: f32[1,128], index: 4, kind: input, shape index: {}]   ;;  %s3184_s5 = inlined_call_operand.vmem [shape: bf16[128,128], index: 5, kind: input, shape index: {}]   ;;  %s3185_s6 = inlined_call_operand.vmem [shape: f32[1,128], index: 6, kind: input, shape index: {}]   ;;  %s3186_s7 = inlined_call_operand.vmem [shape: bf16[128,128], index: 7, kind: input, shape index: {}]   ;;  %s3187_s8 = inlined_call_operand.vmem [shape: f32[1,128], index: 8, kind: input, shape index: {}]   ;;  %s3188_s9 = inlined_call_operand.vmem [shape: bf16[128,128], index: 9, kind: input, shape index: {}]   ;;  %s3189_s10 = inlined_call_operand.vmem [shape: f32[1,128], index: 10, kind: input, shape index: {}]   ;;  %s3190_s11 = inlined_call_operand.vmem [shape: bf16[2,64,128], index: 11, kind: output, shape index: {}]  }
   0x1 LB: > { %s1927_s18 = sadd.s32 4294967295, %s2488_s17   ;;  %p1931_p0 = scmp.ge.s32.totalorder %s2488_s17, 1  ;;  %s2488_s17 = sphi %s2552_s17, %s21_s17  }
   0x2   : > { %p337_p1 = scmp.lt.s32.totalorder %s2488_s17, 3 }
   0x4   : > { %p338_p2 = pnand %p1931_p0, %p337_p1 }
   0x5   : > { %p377_p3 = scmp.lt.s32.totalorder (!%p338_p2), %s1927_s18, 1 }
   0x6   : > { %341 = sbr.rel (%p338_p2) target bundleno = 1100 (0x44c), region = 64 }
   0xb   : > { %v2265_v0 = vld [vmem:[%s3180_s1 + $0x38] sm:$0xff]   ;;  %v2266_v1 = vld [vmem:[%s3180_s1 + $0x30] sm:$0xff]   ;;  %s3192_s18 = smov (!%p377_p3, %s1927_s18), 1  ;;  %v2267_v2 = vld [vmem:[%s3180_s1 + $0x28] sm:$0xff]   ;;  %v2490_v24 = vmov 0.0   ;;  %vm2491_vm0 = vmmov 0  }
   0xc   : > { %2127 = vmatprep.subr.bf16.mxu0 %v2265_v0  ;;  %2239 = vmatprep.subr.bf16.mxu1 %v2265_v0  ;;  %s2040_s25 = sshll.u32 %s3192_s18, 7  ;;  %v2268_v3 = vld [vmem:[%s3180_s1 + $0x20] sm:$0xff]   ;;  %v2269_v6 = vld [vmem:[%s3180_s1 + $0x18] sm:$0xff]   ;;  %v2270_v7 = vld [vmem:[%s3180_s1 + $0x10] sm:$0xff]   ;;  %1074 = vst [vmem:[#allocation3 + $0x8] sm:$0x1] %v2490_v24 }
   0xd   : > { %2128 = vmatpush3.bf16.msra.mxu0 %v2265_v0  ;;  %2247 = vmatpush3.bf16.msra.mxu1 %v2265_v0  ;;  %s2575_s28 = scalar_lea.vmem %s3179_s0, %s2040_s25  ;;  %v2271_v8 = vld [vmem:[%s3180_s1 + $0x8] sm:$0xff]   ;;  %v2272_v9 = vld [vmem:[%s3180_s1] sm:$0xff]   ;;  %1070 = vst [vmem:[#allocation3 + $0x100] sm:$0xff] %v2490_v24  ;;  %1071 = vst [vmem:[#allocation3 + $0x108] sm:$0x1] %v2490_v24  ;;  %s2041_s14 = sshll.u32 %s3192_s18, 5 }
   0xe   : > { %2129 = vmatprep.subr.bf16.mxu0 %v2266_v1  ;;  %2240 = vmatprep.subr.bf16.mxu1 %v2266_v1  ;;  %v2273_v4 = vld [vmem:[%s2575_s28] sm:$0xff]   ;;  %v2275_v10 = vld [vmem:[%s2575_s28 + $0x8] sm:$0xff]   ;;  %v2277_v12 = vld [vmem:[%s2575_s28 + $0x10] sm:$0xff]   ;;  %1075 = vst [vmem:[#allocation3 + $0x18] sm:$0x1] %v2490_v24  ;;  %s386_s19 = scalar_lea.vmem %s3190_s11, %s2041_s14 }
   0xf   : > { %v2274_v5 = vld [vmem:[%s2575_s28 + $0x40] sm:$0xff]   ;;  %2143 = vmatprep.mubr.bf16.mxu0 %v2273_v4  ;;  %v2276_v11 = vld [vmem:[%s2575_s28 + $0x48] sm:$0xff]   ;;  %v2278_v13 = vld [vmem:[%s2575_s28 + $0x50] sm:$0xff]   ;;  %1076 = vst [vmem:[#allocation3 + $0x28] sm:$0x1] %v2490_v24 }
  0x10   : > { %2159 = vmatprep.mubr.bf16.mxu1 %v2274_v5  ;;  %v2279_v14 = vld [vmem:[%s2575_s28 + $0x18] sm:$0xff]   ;;  %v2281_v16 = vld [vmem:[%s2575_s28 + $0x20] sm:$0xff]   ;;  %v2283_v18 = vld [vmem:[%s2575_s28 + $0x28] sm:$0xff]   ;;  %1077 = vst [vmem:[#allocation3 + $0x38] sm:$0x1] %v2490_v24 }
  0x11   : > { %2130 = vmatpush3.bf16.msra.mxu0 %v2266_v1  ;;  %2248 = vmatpush3.bf16.msra.mxu1 %v2266_v1  ;;  %v2280_v15 = vld [vmem:[%s2575_s28 + $0x58] sm:$0xff]   ;;  %v2282_v17 = vld [vmem:[%s2575_s28 + $0x60] sm:$0xff]   ;;  %v2284_v19 = vld [vmem:[%s2575_s28 + $0x68] sm:$0xff]   ;;  %1078 = vst [vmem:[#allocation3 + $0x48] sm:$0x1] %v2490_v24 }
  0x12   : > { %2131 = vmatprep.subr.bf16.mxu0 %v2267_v2  ;;  %2241 = vmatprep.subr.bf16.mxu1 %v2267_v2  ;;  %v2285_v20 = vld [vmem:[%s2575_s28 + $0x30] sm:$0xff]   ;;  %v2287_v22 = vld [vmem:[%s2575_s28 + $0x38] sm:$0xff]   ;;  %1079 = vst [vmem:[#allocation3 + $0x58] sm:$0x1] %v2490_v24  ;;  %1080 = vst [vmem:[#allocation3 + $0x68] sm:$0x1] %v2490_v24 }
  0x13   : > { %v2286_v21 = vld [vmem:[%s2575_s28 + $0x70] sm:$0xff]   ;;  %v2288_v23 = vld [vmem:[%s2575_s28 + $0x78] sm:$0xff]   ;;  %1081 = vst [vmem:[#allocation3 + $0x78] sm:$0x1] %v2490_v24  ;;  %1082 = vst [vmem:[#allocation3 + $0x88] sm:$0x1] %v2490_v24 }
  0x14   : > { %1083 = vst [vmem:[#allocation3 + $0x98] sm:$0x1] %v2490_v24  ;;  %1084 = vst [vmem:[#allocation3 + $0xa8] sm:$0x1] %v2490_v24  ;;  %v2289_v25 = vld [vmem:[%s3184_s5 + $0x38] sm:$0xff]   ;;  %v2290_v26 = vld [vmem:[%s3184_s5 + $0x30] sm:$0xff]  }
  0x15   : > { %2132 = vmatpush3.bf16.msra.mxu0 %v2267_v2  ;;  %2249 = vmatpush3.bf16.msra.mxu1 %v2267_v2  ;;  %1085 = vst [vmem:[#allocation3 + $0xb8] sm:$0x1] %v2490_v24  ;;  %1086 = vst [vmem:[#allocation3 + $0xc8] sm:$0x1] %v2490_v24  ;;  %v2291_v27 = vld [vmem:[%s3184_s5 + $0x28] sm:$0xff]   ;;  %v2292_v28 = vld [vmem:[%s3184_s5 + $0x20] sm:$0xff]  }
  0x16   : > { %2133 = vmatprep.subr.bf16.mxu0 %v2268_v3  ;;  %2242 = vmatprep.subr.bf16.mxu1 %v2268_v3  ;;  %1087 = vst [vmem:[#allocation3 + $0xd8] sm:$0x1] %v2490_v24  ;;  %1088 = vst [vmem:[#allocation3 + $0xe8] sm:$0x1] %v2490_v24  ;;  %v2647_v29 = vld [vmem:[%s3181_s2] ss:$0 sm:$0xff] }
  0x17   : > { %1089 = vst [vmem:[#allocation3 + $0xf8] sm:$0x1] %v2490_v24  ;;  %v2293_v30 = vld [vmem:[%s3184_s5 + $0x18] sm:$0xff]   ;;  %v2294_v37 = vld [vmem:[%s3184_s5 + $0x10] sm:$0xff]   ;;  %v2295_v50 = vld [vmem:[%s3184_s5 + $0x8] sm:$0xff]  }
  0x18   : > { %v2296_v63 = vld [vmem:[%s3184_s5] sm:$0xff]  }
  0x19   : > { %2134 = vmatpush3.bf16.msra.mxu0 %v2268_v3  ;;  %2250 = vmatpush3.bf16.msra.mxu1 %v2268_v3 }
  0x1a   : > { %2135 = vmatprep.subr.bf16.mxu0 %v2269_v6  ;;  %2243 = vmatprep.subr.bf16.mxu1 %v2269_v6 }
  0x1d   : > { %2136 = vmatpush3.bf16.msra.mxu0 %v2269_v6  ;;  %2251 = vmatpush3.bf16.msra.mxu1 %v2269_v6 }
  0x1e   : > { %2137 = vmatprep.subr.bf16.mxu0 %v2270_v7  ;;  %2244 = vmatprep.subr.bf16.mxu1 %v2270_v7 }
  0x21   : > { %2138 = vmatpush3.bf16.msra.mxu0 %v2270_v7  ;;  %2252 = vmatpush3.bf16.msra.mxu1 %v2270_v7 }
  0x22   : > { %2139 = vmatprep.subr.bf16.mxu0 %v2271_v8  ;;  %2245 = vmatprep.subr.bf16.mxu1 %v2271_v8 }
  0x25   : > { %2140 = vmatpush3.bf16.msra.mxu0 %v2271_v8  ;;  %2253 = vmatpush3.bf16.msra.mxu1 %v2271_v8 }
  0x26   : > { %2141 = vmatprep.subr.bf16.mxu0 %v2272_v9  ;;  %2246 = vmatprep.subr.bf16.mxu1 %v2272_v9 }
  0x29   : > { %2142 = vmatpush3.bf16.msra.mxu0 %v2272_v9  ;;  %2254 = vmatpush3.bf16.msra.mxu1 %v2272_v9 }
  0x2a   : > { %2175 = vmatprep.subr.bf16.mxu1 %v2490_v24 }
  0x2c   : > { %2144 = vmatmul.mubr.bf16.vlgmr.msra.gmra.mxu0 %v2275_v10  ;;  %2160 = vmatmul.mubr.bf16.vlgmr.msra.gmra.mxu1 %v2276_v11 }
  0x2d   : > { %2147 = vmatprep.mubr.bf16.mxu0 %v2277_v12  ;;  %2163 = vmatprep.mubr.bf16.mxu1 %v2278_v13 }
  0x2e   : > { %2176 = vmatpush3.bf16.msra.mxu1 %v2289_v25 }
  0x2f   : > { %2177 = vmatprep.subr.bf16.mxu1 %v2490_v24 }
  0x32   : > { %2178 = vmatpush3.bf16.msra.mxu1 %v2290_v26 }
  0x33   : > { %2179 = vmatprep.subr.bf16.mxu1 %v2490_v24 }
  0x34   : > { %2148 = vmatmul.mubr.bf16.gmra.mxu0 %v2279_v14  ;;  %2164 = vmatmul.mubr.bf16.gmra.mxu1 %v2280_v15 }
  0x35   : > { %2151 = vmatprep.mubr.bf16.mxu0 %v2281_v16  ;;  %2167 = vmatprep.mubr.bf16.mxu1 %v2282_v17 }
  0x36   : > { %2180 = vmatpush3.bf16.msra.mxu1 %v2291_v27 }
  0x37   : > { %2181 = vmatprep.subr.bf16.mxu1 %v2490_v24 }
  0x3a   : > { %2182 = vmatpush3.bf16.msra.mxu1 %v2292_v28 }
  0x3b   : > { %2183 = vmatprep.subr.bf16.mxu1 %v2490_v24 }
  0x3c   : > { %2152 = vmatmul.mubr.bf16.gmra.mxu0 %v2283_v18  ;;  %2168 = vmatmul.mubr.bf16.gmra.mxu1 %v2284_v19 }
  0x3d   : > { %2155 = vmatprep.mubr.bf16.mxu0 %v2285_v20  ;;  %2171 = vmatprep.mubr.bf16.mxu1 %v2286_v21 }
  0x3e   : > { %2184 = vmatpush3.bf16.msra.mxu1 %v2293_v30 }
  0x3f   : > { %2185 = vmatprep.subr.bf16.mxu1 %v2490_v24 }
  0x42   : > { %2186 = vmatpush3.bf16.msra.mxu1 %v2294_v37 }
  0x43   : > { %2187 = vmatprep.subr.bf16.mxu1 %v2490_v24 }
  0x44   : > { %2156 = vmatmul.mubr.bf16.gmra.mxu0 %v2287_v22  ;;  %2172 = vmatmul.mubr.bf16.gmra.mxu1 %v2288_v23 }
  0x45   : > { %2191 = vmatprep.mubr.msk.bf16.mxu1 %vm2491_vm0, %v2490_v24 }
  0x46   : > { %2188 = vmatpush3.bf16.msra.mxu1 %v2295_v50 }
  0x47   : > { %2189 = vmatprep.subr.bf16.mxu1 %v2490_v24 }
  0x4a   : > { %2190 = vmatpush3.bf16.msra.mxu1 %v2296_v63 }
  0x4b   : > { %2195 = vmatprep.subr.bf16.mxu1 %v2490_v24 }
  0xec   : > { %v2145_v31 = vpop.f32.mrf.mxu0  ;;  %v2161_v32 = vpop.f32.mrf.mxu1 }
  0xed   : > { %v2654_v33 = vadd.f32 %v2145_v31, %v2647_v29  ;;  %v2657_v34 = vadd.f32 %v2161_v32, %v2647_v29 }
  0xee   : > { %v621_v35 = vpop.f32.mrf.mxu0  ;;  %v685_v36 = vpop.f32.mrf.mxu1 }
  0xef   : > { %v1963_v38 = vmul.f32 -1.442695, %v2654_v33  ;;  %v1979_v39 = vmul.f32 -1.442695, %v2657_v34  ;;  %v2665_v40 = vadd.f32 %v2647_v29, %v621_v35  ;;  %v2668_v41 = vadd.f32 %v2647_v29, %v685_v36 }
  0xf0   : > { %v2146_v42 = vpop.f32.mrf.mxu0  ;;  %v2162_v43 = vpop.f32.mrf.mxu1 }
  0xf1   : > { %2313 = vpow2.f32 %v1963_v38  ;;  %v1961_v44 = vmul.f32 -1.442695, %v2665_v40  ;;  %v1977_v45 = vmul.f32 -1.442695, %v2668_v41  ;;  %v2674_v46 = vadd.f32 %v2146_v42, %v2647_v29 }
  0xf2   : > { %2315 = vpow2.f32 %v1979_v39  ;;  %v2677_v47 = vadd.f32 %v2162_v43, %v2647_v29  ;;  %v624_v48 = vpop.f32.mrf.mxu0  ;;  %v688_v49 = vpop.f32.mrf.mxu1 }
  0xf3   : > { %2317 = vpow2.f32 %v1961_v44  ;;  %v1964_v51 = vmul.f32 -1.442695, %v2674_v46  ;;  %v2684_v52 = vadd.f32 %v2647_v29, %v624_v48  ;;  %v2687_v53 = vadd.f32 %v2647_v29, %v688_v49 }
  0xf4   : > { %2319 = vpow2.f32 %v1977_v45  ;;  %v1980_v54 = vmul.f32 -1.442695, %v2677_v47  ;;  %v2149_v55 = vpop.f32.mrf.mxu0  ;;  %v2165_v56 = vpop.f32.mrf.mxu1 }
  0xf5   : > { %2321 = vpow2.f32 %v1964_v51  ;;  %v1962_v57 = vmul.f32 -1.442695, %v2684_v52  ;;  %v1978_v58 = vmul.f32 -1.442695, %v2687_v53  ;;  %v2694_v59 = vadd.f32 %v2149_v55, %v2647_v29 }
  0xf6   : > { %2323 = vpow2.f32 %v1980_v54  ;;  %v2697_v60 = vadd.f32 %v2165_v56, %v2647_v29  ;;  %v637_v61 = vpop.f32.mrf.mxu0  ;;  %v701_v62 = vpop.f32.mrf.mxu1 }
  0xf7   : > { %2325 = vpow2.f32 %v1962_v57  ;;  %v1967_v0 = vmul.f32 -1.442695, %v2694_v59  ;;  %v2704_v1 = vadd.f32 %v2647_v29, %v637_v61  ;;  %v2707_v2 = vadd.f32 %v2647_v29, %v701_v62 }
  0xf8   : > { %2327 = vpow2.f32 %v1978_v58  ;;  %v1983_v3 = vmul.f32 -1.442695, %v2697_v60  ;;  %v2150_v4 = vpop.f32.mrf.mxu0  ;;  %v2166_v5 = vpop.f32.mrf.mxu1 }
  0xf9   : > { %2329 = vpow2.f32 %v1967_v0  ;;  %v1965_v6 = vmul.f32 -1.442695, %v2704_v1  ;;  %v1981_v7 = vmul.f32 -1.442695, %v2707_v2  ;;  %v2714_v8 = vadd.f32 %v2150_v4, %v2647_v29 }
  0xfa   : > { %2331 = vpow2.f32 %v1983_v3  ;;  %v2717_v9 = vadd.f32 %v2166_v5, %v2647_v29  ;;  %v640_v10 = vpop.f32.mrf.mxu0  ;;  %v704_v11 = vpop.f32.mrf.mxu1 }
  0xfb   : > { %2333 = vpow2.f32 %v1965_v6  ;;  %v1968_v12 = vmul.f32 -1.442695, %v2714_v8  ;;  %v2721_v13 = vadd.f32 %v2647_v29, %v640_v10  ;;  %v2724_v14 = vadd.f32 %v2647_v29, %v704_v11 }
  0xfc   : > { %2335 = vpow2.f32 %v1981_v7  ;;  %v1984_v15 = vmul.f32 -1.442695, %v2717_v9  ;;  %v2153_v16 = vpop.f32.mrf.mxu0  ;;  %v2169_v17 = vpop.f32.mrf.mxu1 }
  0xfd   : > { %2337 = vpow2.f32 %v1968_v12  ;;  %v1966_v18 = vmul.f32 -1.442695, %v2721_v13  ;;  %v1982_v19 = vmul.f32 -1.442695, %v2724_v14  ;;  %v2731_v61 = vadd.f32 %v2153_v16, %v2647_v29 }
  0xfe   : > { %v2314_v20 = vpop.eup %2313  ;;  %2339 = vpow2.f32 %v1984_v15  ;;  %v653_v21 = vpop.f32.mrf.mxu0  ;;  %v2734_v0 = vadd.f32 %v2169_v17, %v2647_v29 }
  0xff   : > { %v2316_v22 = vpop.eup %2315  ;;  %v846_v23 = vadd.f32 1.0, %v2314_v20  ;;  %2341 = vpow2.f32 %v1966_v18  ;;  %v717_v25 = vpop.f32.mrf.mxu1  ;;  %v2737_v5 = vadd.f32 %v2647_v29, %v653_v21  ;;  %v1971_v17 = vmul.f32 -1.442695, %v2731_v61 }
 0x100   : > { %v2318_v26 = vpop.eup %2317  ;;  %v862_v27 = vadd.f32 1.0, %v2316_v22  ;;  %2343 = vpow2.f32 %v1982_v19  ;;  %v2154_v24 = vpop.f32.mrf.mxu0  ;;  %v2740_v11 = vadd.f32 %v2647_v29, %v717_v25  ;;  %v1987_v21 = vmul.f32 -1.442695, %v2734_v0 }
 0x101   : > { %v2320_v28 = vpop.eup %2319  ;;  %2345 = vrcp.f32 %v846_v23  ;;  %v844_v30 = vadd.f32 1.0, %v2318_v26  ;;  %v2170_v37 = vpop.f32.mrf.mxu1  ;;  %v2744_v18 = vadd.f32 %v2154_v24, %v2647_v29  ;;  %v1969_v26 = vmul.f32 -1.442695, %v2737_v5 }
 0x102   : > { %v2322_v31 = vpop.eup %2321  ;;  %2347 = vrcp.f32 %v862_v27  ;;  %v860_v32 = vadd.f32 1.0, %v2320_v28  ;;  %v656_v42 = vpop.f32.mrf.mxu0  ;;  %v2748_v22 = vadd.f32 %v2170_v37, %v2647_v29 }
 0x103   : > { %v2324_v35 = vpop.eup %2323  ;;  %2349 = vrcp.f32 %v844_v30  ;;  %v847_v36 = vadd.f32 1.0, %v2322_v31  ;;  %v720_v51 = vpop.f32.mrf.mxu1  ;;  %v2753_v27 = vadd.f32 %v2647_v29, %v656_v42  ;;  %v1985_v31 = vmul.f32 -1.442695, %v2740_v11 }
 0x104   : > { %v2326_v38 = vpop.eup %2325  ;;  %2351 = vrcp.f32 %v860_v32  ;;  %v863_v39 = vadd.f32 1.0, %v2324_v35  ;;  %v2157_v56 = vpop.f32.mrf.mxu0  ;;  %v2758_v32 = vadd.f32 %v2647_v29, %v720_v51  ;;  %v1972_v37 = vmul.f32 -1.442695, %v2744_v18 }
 0x105   : > { %v2328_v43 = vpop.eup %2327  ;;  %2353 = vrcp.f32 %v847_v36  ;;  %v845_v44 = vadd.f32 1.0, %v2326_v38  ;;  %v2173_v6 = vpop.f32.mrf.mxu1  ;;  %v2763_v38 = vadd.f32 %v2157_v56, %v2647_v29  ;;  %v1988_v42 = vmul.f32 -1.442695, %v2748_v22 }
 0x106   : > { %v2330_v45 = vpop.eup %2329  ;;  %2355 = vrcp.f32 %v863_v39  ;;  %v861_v48 = vadd.f32 1.0, %v2328_v43  ;;  %v669_v12 = vpop.f32.mrf.mxu0  ;;  %v2768_v43 = vadd.f32 %v2173_v6, %v2647_v29  ;;  %v1986_v51 = vmul.f32 -1.442695, %v2758_v32 }
 0x107   : > { %v2332_v49 = vpop.eup %2331  ;;  %2357 = vrcp.f32 %v845_v44  ;;  %v850_v50 = vadd.f32 1.0, %v2330_v45  ;;  %v733_v28 = vpop.f32.mrf.mxu1  ;;  %v1970_v45 = vmul.f32 -1.442695, %v2753_v27 }
 0x108   : > { %v2334_v54 = vpop.eup %2333  ;;  %2359 = vrcp.f32 %v861_v48  ;;  %v866_v55 = vadd.f32 1.0, %v2332_v49  ;;  %v2158_v35 = vpop.f32.mrf.mxu0  ;;  %v2773_v48 = vadd.f32 %v2647_v29, %v669_v12 }
 0x109   : > { %v2336_v57 = vpop.eup %2335  ;;  %2361 = vrcp.f32 %v850_v50  ;;  %v848_v58 = vadd.f32 1.0, %v2334_v54  ;;  %v2174_v49 = vpop.f32.mrf.mxu1  ;;  %v2778_v54 = vadd.f32 %v2647_v29, %v733_v28 }
 0x10a   : > { %v2338_v62 = vpop.eup %2337  ;;  %2363 = vrcp.f32 %v866_v55  ;;  %v864_v63 = vadd.f32 1.0, %v2336_v57  ;;  %v672_v55 = vpop.f32.mrf.mxu0  ;;  %v1975_v57 = vmul.f32 -1.442695, %v2763_v38  ;;  %v1973_v6 = vmul.f32 -1.442695, %v2773_v48 }
 0x10b   : > { %v2340_v3 = vpop.eup %2339  ;;  %2365 = vrcp.f32 %v848_v58  ;;  %v851_v4 = vadd.f32 1.0, %v2338_v62  ;;  %v2783_v58 = vadd.f32 %v2158_v35, %v2647_v29  ;;  %v1989_v12 = vmul.f32 -1.442695, %v2778_v54 }
 0x10c   : > { %v2342_v7 = vpop.eup %2341  ;;  %2367 = vrcp.f32 %v864_v63  ;;  %v867_v10 = vadd.f32 1.0, %v2340_v3  ;;  %v1991_v63 = vmul.f32 -1.442695, %v2768_v43  ;;  %v2788_v3 = vadd.f32 %v2174_v49, %v2647_v29 }
 0x10d   : > { %v2344_v15 = vpop.eup %2343  ;;  %2369 = vrcp.f32 %v851_v4  ;;  %v849_v16 = vadd.f32 1.0, %v2342_v7  ;;  %v2793_v7 = vadd.f32 %v2647_v29, %v672_v55 }
 0x10e   : > { %v2346_v19 = vpop.eup %2345  ;;  %2371 = vrcp.f32 %v867_v10  ;;  %v865_v20 = vadd.f32 1.0, %v2344_v15 }
 0x10f   : > { %v2348_v23 = vpop.eup %2347  ;;  %v942_v25 = vmul.f32 %v2346_v19, %v2654_v33  ;;  %2373 = vrcp.f32 %v849_v16 }
 0x110   : > { %v2350_v24 = vpop.eup %2349  ;;  %v958_v30 = vmul.f32 %v2348_v23, %v2657_v34  ;;  %2375 = vrcp.f32 %v865_v20  ;;  %v1992_v20 = vmul.f32 -1.442695, %v2788_v3  ;;  %v1974_v23 = vmul.f32 -1.442695, %v2793_v7 }
 0x111   : > { %v2352_v36 = vpop.eup %2351  ;;  %976 = vst [vmem:[#allocation2 + $0x10] sm:$0xff] %v942_v25  ;;  %v940_v33 = vmul.f32 %v2350_v24, %v2665_v40  ;;  %2377 = vpow2.f32 %v1971_v17 }
 0x112   : > { %v2354_v39 = vpop.eup %2353  ;;  %992 = vst [vmem:[#allocation2 + $0x90] sm:$0xff] %v958_v30  ;;  %v956_v34 = vmul.f32 %v2352_v36, %v2668_v41  ;;  %2379 = vpow2.f32 %v1987_v21 }
 0x113   : > { %v2356_v44 = vpop.eup %2355  ;;  %974 = vst [vmem:[#allocation2] sm:$0xff] %v940_v33  ;;  %v943_v40 = vmul.f32 %v2354_v39, %v2674_v46  ;;  %2381 = vpow2.f32 %v1969_v26 }
 0x114   : > { %v2358_v50 = vpop.eup %2357  ;;  %990 = vst [vmem:[#allocation2 + $0x80] sm:$0xff] %v956_v34  ;;  %v959_v41 = vmul.f32 %v2356_v44, %v2677_v47  ;;  %2383 = vpow2.f32 %v1985_v31 }
 0x115   : > { %v2360_v56 = vpop.eup %2359  ;;  %977 = vst [vmem:[#allocation2 + $0x18] sm:$0xff] %v943_v40  ;;  %v941_v46 = vmul.f32 %v2358_v50, %v2684_v52  ;;  %2385 = vpow2.f32 %v1972_v37 }
 0x116   : > { %v2362_v62 = vpop.eup %2361  ;;  %993 = vst [vmem:[#allocation2 + $0x98] sm:$0xff] %v959_v41  ;;  %v957_v47 = vmul.f32 %v2360_v56, %v2687_v53  ;;  %2387 = vpow2.f32 %v1988_v42 }
 0x117   : > { %v2364_v4 = vpop.eup %2363  ;;  %975 = vst [vmem:[#allocation2 + $0x8] sm:$0xff] %v941_v46  ;;  %v946_v52 = vmul.f32 %v2362_v62, %v2694_v59  ;;  %2389 = vpow2.f32 %v1970_v45  ;;  %v1976_v59 = vmul.f32 -1.442695, %v2783_v58  ;;  %v1130_v45 = vlaneseq }
 0x118   : > { %v2366_v10 = vpop.eup %2365  ;;  %991 = vst [vmem:[#allocation2 + $0x88] sm:$0xff] %v957_v47  ;;  %v962_v53 = vmul.f32 %v2364_v4, %v2697_v60  ;;  %2391 = vpow2.f32 %v1986_v51  ;;  %v736_v4 = vpop.f32.mrf.mxu1 }
 0x119   : > { %v2368_v15 = vpop.eup %2367  ;;  %980 = vst [vmem:[#allocation2 + $0x30] sm:$0xff] %v946_v52  ;;  %v944_v16 = vmul.f32 %v2366_v10, %v2704_v1  ;;  %2393 = vpow2.f32 %v1975_v57 }
 0x11a   : > { %v2370_v17 = vpop.eup %2369  ;;  %996 = vst [vmem:[#allocation2 + $0xb0] sm:$0xff] %v962_v53  ;;  %v960_v19 = vmul.f32 %v2368_v15, %v2707_v2  ;;  %2395 = vpow2.f32 %v1991_v63  ;;  %v2829_v63 = vshrl.u32 %v1130_v45, 7 }
 0x11b   : > { %v2372_v21 = vpop.eup %2371  ;;  %978 = vst [vmem:[#allocation2 + $0x20] sm:$0xff] %v944_v16  ;;  %v947_v60 = vmul.f32 %v2370_v17, %v2714_v8  ;;  %2397 = vpow2.f32 %v1973_v6 }
 0x11c   : > { %v2374_v25 = vpop.eup %2373  ;;  %v2803_v26 = vld [vmem:[#allocation2 + $0x10] ss:$2 sm:$0xff]  ;;  %994 = vst [vmem:[#allocation2 + $0xa0] sm:$0xff] %v960_v19  ;;  %v963_v1 = vmul.f32 %v2372_v21, %v2717_v9  ;;  %2399 = vpow2.f32 %v1989_v12  ;;  %v1132_v53 = vsub.s32 0, %v2829_v63  ;;  %v1152_v12 = vsub.s32 1, %v2829_v63 }
 0x11d   : > { %v2376_v28 = vpop.eup %2375  ;;  %1091 = vst [vmem:[#allocation3 + $0x10] sm:$0xff] %v2803_v26  ;;  %v2807_v2 = vld [vmem:[#allocation2 + $0x90] ss:$2 sm:$0xff]  ;;  %981 = vst [vmem:[#allocation2 + $0x38] sm:$0xff] %v947_v60  ;;  %v945_v24 = vmul.f32 %v2374_v25, %v2721_v13  ;;  %2401 = vpow2.f32 %v1976_v59  ;;  %v1180_v25 = vsub.s32 2, %v2829_v63 }
 0x11e   : > { %v2378_v8 = vpop.eup %2377  ;;  %1099 = vst [vmem:[#allocation3 + $0x90] sm:$0xff] %v2807_v2  ;;  %v2811_v30 = vld [vmem:[#allocation2] ss:$2 sm:$0xff]  ;;  %997 = vst [vmem:[#allocation2 + $0xb8] sm:$0xff] %v963_v1  ;;  %v961_v31 = vmul.f32 %v2376_v28, %v2724_v14  ;;  %2403 = vpow2.f32 %v1992_v20  ;;  %v2835_v20 = vadd.f32 %v2647_v29, %v736_v4 }
 0x11f   : > { %v2380_v9 = vpop.eup %2379  ;;  %1090 = vst [vmem:[#allocation3] sm:$0xff] %v2811_v30  ;;  %v2815_v35 = vld [vmem:[#allocation2 + $0x80] ss:$2 sm:$0xff]  ;;  %979 = vst [vmem:[#allocation2 + $0x28] sm:$0xff] %v945_v24  ;;  %v854_v36 = vadd.f32 1.0, %v2378_v8  ;;  %2405 = vpow2.f32 %v1974_v23 }
 0x120   : > { %v2382_v33 = vpop.eup %2381  ;;  %1098 = vst [vmem:[#allocation3 + $0x80] sm:$0xff] %v2815_v35  ;;  %995 = vst [vmem:[#allocation2 + $0xa8] sm:$0xff] %v961_v31  ;;  %v870_v13 = vadd.f32 1.0, %v2380_v9  ;;  %v2840_v23 = vld [vmem:[%s3182_s3] sm:$0xff] }
 0x121   : > { %v2384_v37 = vpop.eup %2383  ;;  %2407 = vrcp.f32 %v854_v36  ;;  %v852_v39 = vadd.f32 1.0, %v2382_v33  ;;  %v2846_v24 = vrot.slane %v2840_v23, %v1132_v53  ;;  %v2849_v31 = vrot.slane %v2840_v23, %v1152_v12 }
 0x122   : > { %v2386_v34 = vpop.eup %2385  ;;  %2409 = vrcp.f32 %v870_v13  ;;  %v868_v14 = vadd.f32 1.0, %v2384_v37  ;;  %v1990_v33 = vmul.f32 -1.442695, %v2835_v20  ;;  %v1038_v37 = vld [vmem:[#allocation2 + $0x1] ss:$2 sm:$0xff] }
 0x123   : > { %v2388_v42 = vpop.eup %2387  ;;  %2411 = vrcp.f32 %v852_v39  ;;  %v855_v44 = vadd.f32 1.0, %v2386_v34 }
 0x124   : > { %v2390_v40 = vpop.eup %2389  ;;  %v2818_v49 = vld [vmem:[#allocation2 + $0x30] ss:$2 sm:$0xff]  ;;  %2413 = vrcp.f32 %v868_v14  ;;  %v871_v50 = vadd.f32 1.0, %v2388_v42  ;;  %v2857_v14 = vrot.slane %v2840_v23, %v1180_v25  ;;  %v1209_v42 = vsub.s32 3, %v2829_v63 }
 0x125   : > { %v2392_v41 = vpop.eup %2391  ;;  %1093 = vst [vmem:[#allocation3 + $0x30] sm:$0xff] %v2818_v49  ;;  %v2821_v51 = vld [vmem:[#allocation2 + $0xb0] ss:$2 sm:$0xff]  ;;  %2415 = vrcp.f32 %v855_v44  ;;  %v853_v46 = vadd.f32 1.0, %v2390_v40 }
 0x126   : > { %v2394_v55 = vpop.eup %2393  ;;  %1101 = vst [vmem:[#allocation3 + $0xb0] sm:$0xff] %v2821_v51  ;;  %v2824_v56 = vld [vmem:[#allocation2 + $0x20] ss:$2 sm:$0xff]  ;;  %2417 = vrcp.f32 %v871_v50  ;;  %v869_v6 = vadd.f32 1.0, %v2392_v41  ;;  %v2851_v9 = vld [vmem:[#allocation2 + $0x21] ss:$2 sm:$0xff]  ;;  %v2878_v12 = vrot.slane %v2840_v23, %v1209_v42 }
 0x127   : > { %v2396_v57 = vpop.eup %2395  ;;  %1092 = vst [vmem:[#allocation3 + $0x20] sm:$0xff] %v2824_v56  ;;  %v2827_v62 = vld [vmem:[#allocation2 + $0xa0] ss:$2 sm:$0xff]  ;;  %2419 = vrcp.f32 %v853_v46  ;;  %v858_v15 = vadd.f32 1.0, %v2394_v55  ;;  %v1135_v50 = vmul.f32 %v2846_v24, %v2824_v56  ;;  %v1134_v46 = vmul.f32 %v2846_v24, %v2811_v30 }
 0x128   : > { %v2398_v47 = vpop.eup %2397  ;;  %1100 = vst [vmem:[#allocation3 + $0xa0] sm:$0xff] %v2827_v62  ;;  %v874_v16 = vadd.f32 1.0, %v2396_v57  ;;  %2421 = vrcp.f32 %v869_v6  ;;  %v1170_v45 = vld [vmem:[#allocation3 + $0x1] sm:$0xff]  ;;  %v1154_v57 = vmul.f32 %v2849_v31, %v1038_v37  ;;  %v1238_v30 = vsub.s32 4, %v2829_v63 }
 0x129   : > { %v2400_v52 = vpop.eup %2399  ;;  %v856_v17 = vadd.f32 1.0, %v2398_v47  ;;  %2423 = vrcp.f32 %v858_v15 }
 0x12a   : > { %v2402_v10 = vpop.eup %2401  ;;  %v872_v19 = vadd.f32 1.0, %v2400_v52  ;;  %2425 = vrcp.f32 %v874_v16  ;;  %v1182_v52 = vmul.f32 %v2857_v14, %v1170_v45 }
 0x12b   : > { %v2404_v59 = vpop.eup %2403  ;;  %v859_v60 = vadd.f32 1.0, %v2402_v10  ;;  %2427 = vrcp.f32 %v856_v17  ;;  %v1162_v10 = vadd.f32 %v1154_v57, %v1134_v46 }
 0x12c   : > { %v2406_v21 = vpop.eup %2405  ;;  %v875_v1 = vadd.f32 1.0, %v2404_v59  ;;  %2429 = vrcp.f32 %v872_v19  ;;  %v2883_v19 = vld [vmem:[#allocation3 + $0x81] sm:$0xff] }
 0x12d   : > { %v857_v29 = vadd.f32 1.0, %v2406_v21  ;;  %2431 = vrcp.f32 %v859_v60  ;;  %v1266_v21 = vsub.s32 5, %v2829_v63 }
 0x12e   : > { %v2408_v28 = vpop.eup %2407  ;;  %v2860_v44 = vld [vmem:[#allocation3 + $0x21] sm:$0xff]  ;;  %2433 = vrcp.f32 %v875_v1  ;;  %v1138_v1 = vmul.f32 %v2846_v24, %v2815_v35 }
 0x12f   : > { %v2410_v8 = vpop.eup %2409  ;;  %v950_v36 = vmul.f32 %v2408_v28, %v2731_v61  ;;  %2435 = vrcp.f32 %v857_v29  ;;  %v1183_v47 = vmul.f32 %v2857_v14, %v2860_v44  ;;  %v2915_v46 = vld [vmem:[#allocation3 + $0xa1] sm:$0xff] }
 0x130   : > { %v2412_v13 = vpop.eup %2411  ;;  %v966_v39 = vmul.f32 %v2410_v8, %v2734_v0  ;;  %v1155_v0 = vmul.f32 %v2849_v31, %v2851_v9  ;;  %2437 = vpow2.f32 %v1990_v33  ;;  %v1211_v33 = vmul.f32 %v2878_v12, %v2803_v26 }
 0x131   : > { %v2414_v34 = vpop.eup %2413  ;;  %984 = vst [vmem:[#allocation2 + $0x50] sm:$0xff] %v950_v36  ;;  %v948_v40 = vmul.f32 %v2412_v13, %v2737_v5  ;;  %v2895_v36 = vrot.slane %v2840_v23, %v1238_v30  ;;  %v1256_v30 = vld [vmem:[#allocation3 + $0x11] sm:$0xff] }
 0x132   : > { %v2416_v61 = vpop.eup %2415  ;;  %1000 = vst [vmem:[#allocation2 + $0xd0] sm:$0xff] %v966_v39  ;;  %v964_v41 = vmul.f32 %v2414_v34, %v2740_v11  ;;  %v1163_v6 = vadd.f32 %v1155_v0, %v1135_v50  ;;  %v1040_v39 = vld [vmem:[#allocation2 + $0x11] ss:$2 sm:$0xff]  ;;  %v1186_v34 = vmul.f32 %v2857_v14, %v2883_v19 }
 0x133   : > { %v2418_v55 = vpop.eup %2417  ;;  %982 = vst [vmem:[#allocation2 + $0x40] sm:$0xff] %v948_v40  ;;  %v951_v5 = vmul.f32 %v2416_v61, %v2744_v18  ;;  %v2880_v18 = vld [vmem:[#allocation2 + $0x81] ss:$2 sm:$0xff] }
 0x134   : > { %998 = vst [vmem:[#allocation2 + $0xc0] sm:$0xff] %v964_v41  ;;  %v967_v4 = vmul.f32 %v2418_v55, %v2748_v22  ;;  %v2420_v11 = vpop.eup %2419  ;;  %v1191_v59 = vadd.f32 %v1183_v47, %v1163_v6  ;;  %v1190_v22 = vadd.f32 %v1182_v52, %v1162_v10  ;;  %v1158_v28 = vmul.f32 %v2849_v31, %v2880_v18 }
 0x135   : > { %985 = vst [vmem:[#allocation2 + $0x58] sm:$0xff] %v951_v5  ;;  %v949_v15 = vmul.f32 %v2420_v11, %v2753_v27  ;;  %v2422_v16 = vpop.eup %2421  ;;  %v1212_v27 = vmul.f32 %v2878_v12, %v2818_v49  ;;  %v2902_v49 = vld [vmem:[#allocation2 + $0xa1] ss:$2 sm:$0xff]  ;;  %v2913_v55 = vrot.slane %v2840_v23, %v1266_v21  ;;  %v1240_v5 = vmul.f32 %v2895_v36, %v1040_v39 }
 0x136   : > { %1001 = vst [vmem:[#allocation2 + $0xd8] sm:$0xff] %v967_v4  ;;  %v2424_v17 = vpop.eup %2423  ;;  %v965_v60 = vmul.f32 %v2422_v16, %v2758_v32  ;;  %v1044_v32 = vld [vmem:[#allocation2 + $0x31] ss:$2 sm:$0xff]  ;;  %v1219_v45 = vadd.f32 %v1211_v33, %v1190_v22  ;;  %v1166_v0 = vadd.f32 %v1158_v28, %v1138_v1  ;;  %v1159_v47 = vmul.f32 %v2849_v31, %v2902_v49 }
 0x137   : > { %983 = vst [vmem:[#allocation2 + $0x48] sm:$0xff] %v949_v15  ;;  %v2426_v25 = vpop.eup %2425  ;;  %v954_v29 = vmul.f32 %v2424_v17, %v2763_v38  ;;  %v1220_v42 = vadd.f32 %v1212_v27, %v1191_v59  ;;  %v1241_v41 = vmul.f32 %v2895_v36, %v1044_v32  ;;  %v1257_v4 = vld [vmem:[#allocation3 + $0x31] sm:$0xff]  ;;  %v1295_v10 = vsub.s32 6, %v2829_v63 }
 0x138   : > { %v2428_v8 = vpop.eup %2427  ;;  %999 = vst [vmem:[#allocation2 + $0xc8] sm:$0xff] %v965_v60  ;;  %v970_v13 = vmul.f32 %v2426_v25, %v2768_v43  ;;  %v1194_v6 = vadd.f32 %v1186_v34, %v1166_v0  ;;  %v1248_v59 = vadd.f32 %v1240_v5, %v1219_v45  ;;  %v1187_v17 = vmul.f32 %v2857_v14, %v2915_v46  ;;  %v1056_v1 = vld [vmem:[#allocation2 + $0x91] ss:$2 sm:$0xff] }
 0x139   : > { %v2430_v37 = vpop.eup %2429  ;;  %988 = vst [vmem:[#allocation2 + $0x70] sm:$0xff] %v954_v29  ;;  %v952_v40 = vmul.f32 %v2428_v8, %v2773_v48  ;;  %v1269_v21 = vmul.f32 %v2913_v55, %v1257_v4  ;;  %v1215_v25 = vmul.f32 %v2878_v12, %v2807_v2  ;;  %v1324_v28 = vsub.s32 7, %v2829_v63  ;;  %v1260_v0 = vld [vmem:[#allocation3 + $0x91] sm:$0xff] }
 0x13a   : > { %v2432_v61 = vpop.eup %2431  ;;  %1004 = vst [vmem:[#allocation2 + $0xf0] sm:$0xff] %v970_v13  ;;  %v968_v43 = vmul.f32 %v2430_v37, %v2778_v54  ;;  %v1139_v54 = vmul.f32 %v2846_v24, %v2827_v62  ;;  %v2938_v29 = vrot.slane %v2840_v23, %v1295_v10  ;;  %v1244_v34 = vmul.f32 %v2895_v36, %v1056_v1 }
 0x13b   : > { %v2434_v50 = vpop.eup %2433  ;;  %986 = vst [vmem:[#allocation2 + $0x60] sm:$0xff] %v952_v40  ;;  %v955_v48 = vmul.f32 %v2432_v61, %v2783_v58  ;;  %v1249_v58 = vadd.f32 %v1241_v41, %v1220_v42  ;;  %v1223_v33 = vadd.f32 %v1215_v25, %v1194_v6  ;;  %v2947_v40 = vrot.slane %v2840_v23, %v1324_v28  ;;  %v1060_v61 = vld [vmem:[#allocation2 + $0xb1] ss:$2 sm:$0xff] }
 0x13c   : > { %v2904_v38 = vld [vmem:[#allocation2 + $0x50] ss:$2 sm:$0xff]  ;;  %v2436_v57 = vpop.eup %2435  ;;  %1002 = vst [vmem:[#allocation2 + $0xe0] sm:$0xff] %v968_v43  ;;  %v971_v52 = vmul.f32 %v2434_v50, %v2788_v3  ;;  %v1167_v27 = vadd.f32 %v1159_v47, %v1139_v54  ;;  %v1297_v45 = vmul.f32 %v2938_v29, %v2824_v56  ;;  %v1216_v50 = vmul.f32 %v2878_v12, %v2821_v51  ;;  %v1048_v6 = vld [vmem:[#allocation2 + $0x51] ss:$2 sm:$0xff] }
 0x13d   : > { %1095 = vst [vmem:[#allocation3 + $0x50] sm:$0xff] %v2904_v38  ;;  %v2908_v26 = vld [vmem:[#allocation2 + $0xd0] ss:$2 sm:$0xff]  ;;  %v2438_v11 = vpop.eup %2437  ;;  %989 = vst [vmem:[#allocation2 + $0x78] sm:$0xff] %v955_v48  ;;  %v953_v16 = vmul.f32 %v2436_v57, %v2793_v7  ;;  %v1268_v7 = vmul.f32 %v2913_v55, %v1256_v30  ;;  %v1277_v8 = vadd.f32 %v1269_v21, %v1249_v58 }
 0x13e   : > { %1103 = vst [vmem:[#allocation3 + $0xd0] sm:$0xff] %v2908_v26  ;;  %v1014_v15 = vld [vmem:[#allocation2 + $0x40] ss:$2 sm:$0xff]  ;;  %1005 = vst [vmem:[#allocation2 + $0xf8] sm:$0xff] %v971_v52  ;;  %v1046_v22 = vld [vmem:[#allocation2 + $0x41] ss:$2 sm:$0xff]  ;;  %v1195_v13 = vadd.f32 %v1187_v17, %v1167_v27  ;;  %v1252_v54 = vadd.f32 %v1244_v34, %v1223_v33  ;;  %v1326_v58 = vmul.f32 %v2947_v40, %v2851_v9 }
 0x13f   : > { %1094 = vst [vmem:[#allocation3 + $0x40] sm:$0xff] %v1014_v15  ;;  %v2930_v3 = vld [vmem:[#allocation2 + $0xc0] ss:$2 sm:$0xff]  ;;  %987 = vst [vmem:[#allocation2 + $0x68] sm:$0xff] %v953_v16  ;;  %v873_v60 = vadd.f32 1.0, %v2438_v11  ;;  %v1276_v32 = vadd.f32 %v1268_v7, %v1248_v59  ;;  %v1136_v37 = vmul.f32 %v2846_v24, %v1014_v15  ;;  %v1156_v2 = vmul.f32 %v2849_v31, %v1046_v22 }
 0x140   : > { %1102 = vst [vmem:[#allocation3 + $0xc0] sm:$0xff] %v2930_v3  ;;  %v2942_v39 = vld [vmem:[#allocation2 + $0xc1] ss:$2 sm:$0xff]  ;;  %v1298_v42 = vmul.f32 %v2938_v29, %v1014_v15  ;;  %v1140_v23 = vmul.f32 %v2846_v24, %v2930_v3  ;;  %v1224_v52 = vadd.f32 %v1216_v50, %v1195_v13  ;;  %v1245_v11 = vmul.f32 %v2895_v36, %v1060_v61 }
 0x141   : > { %2439 = vrcp.f32 %v873_v60  ;;  %v1160_v5 = vmul.f32 %v2849_v31, %v2942_v39  ;;  %v1305_v56 = vadd.f32 %v1297_v45, %v1276_v32  ;;  %v1164_v47 = vadd.f32 %v1156_v2, %v1136_v37  ;;  %v1064_v45 = vld [vmem:[#allocation2 + $0xd1] ss:$2 sm:$0xff] }
 0x142   : > { %v1306_v48 = vadd.f32 %v1298_v42, %v1277_v8  ;;  %v1327_v30 = vmul.f32 %v2947_v40, %v1046_v22  ;;  %v1272_v15 = vmul.f32 %v2913_v55, %v1260_v0  ;;  %v1213_v59 = vmul.f32 %v2878_v12, %v2904_v38  ;;  %v1261_v22 = vld [vmem:[#allocation3 + $0xb1] sm:$0xff]  ;;  %v2981_v38 = vld [vmem:[%s3182_s3 + $0x8] ss:$0 sm:$0xff] }
 0x143   : > { %v1168_v25 = vadd.f32 %v1160_v5, %v1140_v23  ;;  %v1301_v7 = vmul.f32 %v2938_v29, %v2827_v62  ;;  %v1334_v27 = vadd.f32 %v1326_v58, %v1305_v56  ;;  %v1242_v8 = vmul.f32 %v2895_v36, %v1048_v6 }
 0x144   : > { %v2951_v43 = vld [vmem:[#allocation2 + $0x70] ss:$2 sm:$0xff]  ;;  %v1335_v60 = vadd.f32 %v1327_v30, %v1306_v48  ;;  %v1280_v28 = vadd.f32 %v1272_v15, %v1252_v54  ;;  %v1253_v33 = vadd.f32 %v1245_v11, %v1224_v52  ;;  %v1273_v42 = vmul.f32 %v2913_v55, %v1261_v22  ;;  %v1052_v30 = vld [vmem:[#allocation2 + $0x71] ss:$2 sm:$0xff] }
 0x145   : > { %1097 = vst [vmem:[#allocation3 + $0x70] sm:$0xff] %v2951_v43  ;;  %v2956_v57 = vld [vmem:[#allocation2 + $0xf0] ss:$2 sm:$0xff]  ;;  %v1354_v61 = vmul.f32 %v2981_v38, %v2860_v44  ;;  %v1217_v50 = vmul.f32 %v2878_v12, %v2908_v26  ;;  %v2998_v44 = vld [vmem:[%s3183_s4] ss:$0 sm:$0xff]  ;;  %v1246_v26 = vmul.f32 %v2895_v36, %v1064_v45  ;;  %v1329_v45 = vmul.f32 %v2947_v40, %v2880_v18 }
 0x146   : > { %v1172_v41 = vld [vmem:[#allocation3 + $0x41] sm:$0xff]  ;;  %1105 = vst [vmem:[#allocation3 + $0xf0] sm:$0xff] %v2956_v57  ;;  %v1258_v1 = vld [vmem:[#allocation3 + $0x51] sm:$0xff]  ;;  %v1309_v0 = vadd.f32 %v1301_v7, %v1280_v28  ;;  %v1281_v56 = vadd.f32 %v1273_v42, %v1253_v33 }
 0x147   : > { %v1184_v4 = vmul.f32 %v2857_v14, %v1172_v41  ;;  %v1018_v51 = vld [vmem:[#allocation2 + $0x60] ss:$2 sm:$0xff]  ;;  %v1050_v17 = vld [vmem:[#allocation2 + $0x61] ss:$2 sm:$0xff]  ;;  %v1355_v2 = vmul.f32 %v2981_v38, %v1172_v41  ;;  %v1270_v62 = vmul.f32 %v2913_v55, %v1258_v1 }
 0x148   : > { %1096 = vst [vmem:[#allocation3 + $0x60] sm:$0xff] %v1018_v51  ;;  %v2966_v10 = vld [vmem:[#allocation3 + $0xc1] sm:$0xff]  ;;  %v1137_v32 = vmul.f32 %v2846_v24, %v1018_v51  ;;  %v1157_v13 = vmul.f32 %v2849_v31, %v1050_v17  ;;  %v1299_v41 = vmul.f32 %v2938_v29, %v1018_v51  ;;  %v1328_v15 = vmul.f32 %v2947_v40, %v1050_v17 }
 0x149   : > { %v1192_v16 = vadd.f32 %v1184_v4, %v1164_v47  ;;  %v1188_v21 = vmul.f32 %v2857_v14, %v2966_v10  ;;  %v1363_v48 = vadd.f32 %v1355_v2, %v1335_v60  ;;  %v1362_v47 = vadd.f32 %v1354_v61, %v1334_v27 }
 0x14a   : > { %v1165_v4 = vadd.f32 %v1157_v13, %v1137_v32  ;;  %v1330_v51 = vmul.f32 %v2947_v40, %v2902_v49  ;;  %v1243_v49 = vmul.f32 %v2895_v36, %v1052_v30 }
 0x14b   : > { %v1221_v9 = vadd.f32 %v1213_v59, %v1192_v16  ;;  %v1196_v37 = vadd.f32 %v1188_v21, %v1168_v25  ;;  %v1214_v59 = vmul.f32 %v2878_v12, %v2951_v43  ;;  %v3009_v21 = vadd.f32 %v2998_v44, %v1363_v48  ;;  %v1262_v25 = vld [vmem:[#allocation3 + $0xd1] sm:$0xff] }
 0x14c   : > { %v1259_v60 = vld [vmem:[#allocation3 + $0x71] sm:$0xff]  ;;  %v1338_v22 = vadd.f32 %v1330_v51, %v1309_v0  ;;  %v3013_v28 = vadd.f32 %v2998_v44, %v1362_v47  ;;  %v1274_v13 = vmul.f32 %v2913_v55, %v1262_v25 }
 0x14d   : > { %v1250_v34 = vadd.f32 %v1242_v8, %v1221_v9  ;;  %v1225_v6 = vadd.f32 %v1217_v50, %v1196_v37  ;;  %v1358_v8 = vmul.f32 %v2981_v38, %v2915_v46  ;;  %v1271_v32 = vmul.f32 %v2913_v55, %v1259_v60 }
 0x14e   : > { %v2440_v23 = vpop.eup %2439  ;;  %v1996_v37 = vmul.f32 -1.442695, %v3009_v21 }
 0x14f   : > { %v1173_v5 = vld [vmem:[#allocation3 + $0x61] sm:$0xff]  ;;  %v1278_v54 = vadd.f32 %v1270_v62, %v1250_v34  ;;  %v969_v11 = vmul.f32 %v2440_v23, %v2835_v20  ;;  %v1302_v20 = vmul.f32 %v2938_v29, %v2930_v3  ;;  %v1254_v43 = vadd.f32 %v1246_v26, %v1225_v6 }
 0x150   : > { %v1185_v52 = vmul.f32 %v2857_v14, %v1173_v5  ;;  %v1356_v17 = vmul.f32 %v2981_v38, %v1173_v5  ;;  %v1331_v3 = vmul.f32 %v2947_v40, %v2942_v39  ;;  %v1366_v2 = vadd.f32 %v1358_v8, %v1338_v22 }
 0x151   : > { %v1307_v58 = vadd.f32 %v1299_v41, %v1278_v54  ;;  %1003 = vst [vmem:[#allocation2 + $0xe8] sm:$0xff] %v969_v11  ;;  %v1310_v27 = vadd.f32 %v1302_v20, %v1281_v56  ;;  %v1995_v62 = vmul.f32 -1.442695, %v3013_v28  ;;  %v1282_v61 = vadd.f32 %v1274_v13, %v1254_v43 }
 0x152   : > { %v1193_v16 = vadd.f32 %v1185_v52, %v1165_v4  ;;  %v1300_v39 = vmul.f32 %v2938_v29, %v2815_v35  ;;  %v1359_v5 = vmul.f32 %v2981_v38, %v2966_v10  ;;  %2441 = vpow2.f32 %v1996_v37 }
 0x153   : > { %v1336_v1 = vadd.f32 %v1328_v15, %v1307_v58  ;;  %v1339_v46 = vadd.f32 %v1331_v3, %v1310_v27  ;;  %v1357_v56 = vmul.f32 %v2981_v38, %v2883_v19  ;;  %v3038_v35 = vadd.f32 %v2998_v44, %v1366_v2 }
 0x154   : > { %v1222_v7 = vadd.f32 %v1214_v59, %v1193_v16  ;;  %2443 = vpow2.f32 %v1995_v62  ;;  %v1068_v16 = vld [vmem:[#allocation2 + $0xf1] ss:$2 sm:$0xff]  ;;  %v1218_v59 = vmul.f32 %v2878_v12, %v2956_v57 }
 0x155   : > { %v1364_v9 = vadd.f32 %v1356_v17, %v1336_v1  ;;  %v1367_v47 = vadd.f32 %v1359_v5, %v1339_v46  ;;  %v1999_v6 = vmul.f32 -1.442695, %v3038_v35  ;;  %v1263_v1 = vld [vmem:[#allocation3 + $0xf1] sm:$0xff]  ;;  %v1247_v17 = vmul.f32 %v2895_v36, %v1068_v16 }
 0x156   : > { %v1251_v33 = vadd.f32 %v1243_v49, %v1222_v7  ;;  %v3058_v7 = vld [vmem:[#allocation3 + $0x100] sm:$0xff]  ;;  %v1275_v57 = vmul.f32 %v2913_v55, %v1263_v1 }
 0x157   : > { %v3024_v34 = vadd.f32 %v2998_v44, %v1364_v9  ;;  %v3048_v30 = vadd.f32 %v2998_v44, %v1367_v47  ;;  %v1304_v43 = vmul.f32 %v3058_v7, %v2938_v29  ;;  %v1349_v9 = vld [vmem:[#allocation3 + $0x101] sm:$0xff] }
 0x158   : > { %v1279_v42 = vadd.f32 %v1271_v32, %v1251_v33  ;;  %v1034_v50 = vld [vmem:[#allocation2 + $0xe0] ss:$2 sm:$0xff]  ;;  %v1066_v54 = vld [vmem:[#allocation2 + $0xe1] ss:$2 sm:$0xff]  ;;  %v1333_v32 = vmul.f32 0.0, %v2947_v40  ;;  %v1361_v2 = vmul.f32 %v2981_v38, %v1349_v9 }
 0x159   : > { %v1997_v0 = vmul.f32 -1.442695, %v3024_v34  ;;  %1104 = vst [vmem:[#allocation3 + $0xe0] sm:$0xff] %v1034_v50  ;;  %v1303_v48 = vmul.f32 %v2938_v29, %v1034_v50  ;;  %v1141_v4 = vmul.f32 %v2846_v24, %v1034_v50  ;;  %v1161_v52 = vmul.f32 %v2849_v31, %v1066_v54  ;;  %v1472_v9 = vld [vmem:[%s3185_s6] sm:$0x1] }
 0x15a   : > { %v1308_v23 = vadd.f32 %v1300_v39, %v1279_v42  ;;  %v1332_v11 = vmul.f32 %v2947_v40, %v1066_v54  ;;  %v2000_v25 = vmul.f32 -1.442695, %v3048_v30 }
 0x15b   : > { %v1311_v18 = vadd.f32 %v1303_v48, %v1282_v61  ;;  %2445 = vpow2.f32 %v1997_v0  ;;  %v1169_v58 = vadd.f32 %v1161_v52, %v1141_v4 }
 0x15c   : > { %v1337_v41 = vadd.f32 %v1329_v45, %v1308_v23  ;;  %2447 = vpow2.f32 %v1999_v6 }
 0x15d   : > { %v1340_v26 = vadd.f32 %v1332_v11, %v1311_v18 }
 0x15e   : > { %v1365_v10 = vadd.f32 %v1357_v56, %v1337_v41 }
 0x15f   : > { %v2442_v49 = vpop.eup %2441 }
 0x160   : > { %v3045_v19 = vadd.f32 %v2998_v44, %v1365_v10  ;;  %v1177_v15 = vld [vmem:[#allocation3 + $0xe1] sm:$0xff]  ;;  %v1410_v36 = vadd.f32 1.0, %v2442_v49  ;;  %v2298_v49 = vld [vmem:[%s3186_s7 + $0x30] sm:$0xff]  }
 0x161   : > { %v1189_v51 = vmul.f32 %v2857_v14, %v1177_v15  ;;  %v1360_v24 = vmul.f32 %v2981_v38, %v1177_v15  ;;  %v2444_v27 = vpop.eup %2443 }
 0x162   : > { %v1998_v31 = vmul.f32 -1.442695, %v3045_v19  ;;  %v1409_v13 = vadd.f32 1.0, %v2444_v27  ;;  %v2300_v27 = vld [vmem:[%s3186_s7 + $0x20] sm:$0xff]  }
 0x163   : > { %v1197_v20 = vadd.f32 %v1189_v51, %v1169_v58  ;;  %v1368_v60 = vadd.f32 %v1360_v24, %v1340_v26 }
 0x164   : > { %2449 = vpow2.f32 %v1998_v31 }
 0x165   : > { %v1226_v22 = vadd.f32 %v1218_v59, %v1197_v20  ;;  %v1383_v14 = vadd.f32 %v2998_v44, %v1368_v60  ;;  %2451 = vpow2.f32 %v2000_v25 }
 0x167   : > { %v1255_v12 = vadd.f32 %v1247_v17, %v1226_v22  ;;  %v2001_v3 = vmul.f32 -1.442695, %v1383_v14 }
 0x168   : > { %v2446_v8 = vpop.eup %2445 }
 0x169   : > { %v1283_v33 = vadd.f32 %v1275_v57, %v1255_v12  ;;  %2453 = vpow2.f32 %v2001_v3  ;;  %v1411_v62 = vadd.f32 1.0, %v2446_v8  ;;  %v2448_v29 = vpop.eup %2447  ;;  %v2301_v12 = vld [vmem:[%s3186_s7 + $0x18] sm:$0xff]   ;;  %v2302_v57 = vld [vmem:[%s3186_s7 + $0x10] sm:$0xff]   ;;  %v2303_v3 = vld [vmem:[%s3186_s7 + $0x8] sm:$0xff]  }
 0x16a   : > { %2455 = vrcp.f32 %v1410_v36  ;;  %v1413_v50 = vadd.f32 1.0, %v2448_v29  ;;  %v2304_v8 = vld [vmem:[%s3186_s7] sm:$0xff]  }
 0x16b   : > { %v1312_v37 = vadd.f32 %v1304_v43, %v1283_v33  ;;  %2457 = vrcp.f32 %v1409_v13  ;;  %v2299_v43 = vld [vmem:[%s3186_s7 + $0x28] sm:$0xff]  }
 0x16c   : > { %2459 = vrcp.f32 %v1411_v62 }
 0x16d   : > { %v1341_v42 = vadd.f32 %v1333_v32, %v1312_v37 }
 0x16f   : > { %v1369_v61 = vadd.f32 %v1361_v2, %v1341_v42 }
 0x171   : > { %v2450_v55 = vpop.eup %2449  ;;  %v1384_v39 = vadd.f32 %v2998_v44, %v1369_v61 }
 0x172   : > { %v1412_v46 = vadd.f32 1.0, %v2450_v55  ;;  %v2452_v40 = vpop.eup %2451 }
 0x173   : > { %v2002_v45 = vmul.f32 -1.442695, %v1384_v39  ;;  %v1414_v0 = vadd.f32 1.0, %v2452_v40  ;;  %v2310_v40 = vld [vmem:[%s3188_s9 + $0x10] sm:$0xff]  }
 0x174   : > { %2461 = vrcp.f32 %v1412_v46  ;;  %v2307_v46 = vld [vmem:[%s3188_s9 + $0x28] sm:$0xff]  }
 0x175   : > { %2463 = vpow2.f32 %v2002_v45  ;;  %v2308_v45 = vld [vmem:[%s3188_s9 + $0x20] sm:$0xff]  }
 0x176   : > { %2465 = vrcp.f32 %v1413_v50  ;;  %v2454_v38 = vpop.eup %2453  ;;  %v2309_v50 = vld [vmem:[%s3188_s9 + $0x18] sm:$0xff]  }
 0x177   : > { %v2456_v48 = vpop.eup %2455  ;;  %v1415_v5 = vadd.f32 1.0, %v2454_v38  ;;  %2467 = vrcp.f32 %v1414_v0  ;;  %v2311_v0 = vld [vmem:[%s3188_s9 + $0x8] sm:$0xff]   ;;  %v2312_v38 = vld [vmem:[%s3188_s9] sm:$0xff]  }
 0x178   : > { %v2458_v23 = vpop.eup %2457  ;;  %v3067_v56 = vmul.f32 %v2456_v48, %v3009_v21  ;;  %v1585_v48 = vld [vmem:[%s3187_s8] sm:$0x1] }
 0x179   : > { %v2460_v54 = vpop.eup %2459  ;;  %2469 = vrcp.f32 %v1415_v5  ;;  %v3070_v44 = vmul.f32 %v2458_v23, %v3013_v28 }
 0x17a   : > { %v3073_v18 = vmul.f32 %v2460_v54, %v3024_v34 }
 0x17b   : > { %v1441_v4 = vadd.f32 %v3067_v56, %v3070_v44 }
 0x17d   : > { %v1442_v10 = vadd.f32 %v1441_v4, %v3073_v18 }
 0x181   : > { %v2462_v41 = vpop.eup %2461 }
 0x182   : > { %v3076_v47 = vmul.f32 %v2462_v41, %v3045_v19  ;;  %v2464_v52 = vpop.eup %2463 }
 0x183   : > { %v1416_v11 = vadd.f32 1.0, %v2464_v52  ;;  %v2466_v21 = vpop.eup %2465 }
 0x184   : > { %v1443_v6 = vadd.f32 %v1442_v10, %v3076_v47  ;;  %v3083_v28 = vmul.f32 %v2466_v21, %v3038_v35  ;;  %v2468_v34 = vpop.eup %2467 }
 0x185   : > { %2471 = vrcp.f32 %v1416_v11  ;;  %v3087_v19 = vmul.f32 %v2468_v34, %v3048_v30 }
 0x186   : > { %v1444_v26 = vadd.f32 %v1443_v6, %v3083_v28  ;;  %v2470_v15 = vpop.eup %2469 }
 0x187   : > { %v3090_v51 = vmul.f32 %v2470_v15, %v1383_v14  ;;  %v2297_v14 = vld [vmem:[%s3186_s7 + $0x38] sm:$0xff]  }
 0x188   : > { %v1445_v58 = vadd.f32 %v1444_v26, %v3087_v19 }
 0x18a   : > { %v1446_v24 = vadd.f32 %v1445_v58, %v3090_v51 }
 0x192   : > { %v2472_v31 = vpop.eup %2471 }
 0x193   : > { %v3093_v16 = vmul.f32 %v2472_v31, %v1384_v39  ;;  %v2306_v39 = vld [vmem:[%s3188_s9 + $0x30] sm:$0xff]  }
 0x195   : > { %v1447_v59 = vadd.f32 %v1446_v24, %v3093_v16 }
 0x197   : > { %v1448_v35 = vrot.slane %v1447_v59, 4 }
 0x199   : > { %v1449_v20 = vadd.f32 %v1448_v35, %v1447_v59 }
 0x19b   : > { %v1450_v60 = vrot.slane %v1449_v20, 2 }
 0x19d   : > { %v1451_v25 = vadd.f32 %v1450_v60, %v1449_v20 }
 0x19f   : > { %v1452_v1 = vrot.slane %v1451_v25, 1 }
 0x1a1   : > { %v1453_v22 = vadd.f32 %v1452_v1, %v1451_v25 }
 0x1a3   : > { %v1454_v30 = vmul.f32 0.015625, %v1453_v22 }
 0x1a5   : > { %v1455_v17 = vpack.c.bf16 %v1454_v30, %v1454_v30 }
 0x1a7   : > { %2192 = vmatmul.mubr.bf16.vlgmr.msra.gmra.mxu1 %v1455_v17 }
 0x1a8   : > { %2211 = vmatprep.mubr.msk.bf16.mxu1 %vm2491_vm0, %v3058_v7  ;;  %2196 = vmatpush3.bf16.msra.mxu1 %v2297_v14 }
 0x1a9   : > { %2197 = vmatprep.subr.bf16.mxu1 %v3058_v7 }
 0x1ac   : > { %2198 = vmatpush3.bf16.msra.mxu1 %v2298_v49 }
 0x1ad   : > { %2199 = vmatprep.subr.bf16.mxu1 %v3058_v7 }
 0x1b0   : > { %2200 = vmatpush3.bf16.msra.mxu1 %v2299_v43 }
 0x1b1   : > { %2201 = vmatprep.subr.bf16.mxu1 %v3058_v7 }
 0x1b4   : > { %2202 = vmatpush3.bf16.msra.mxu1 %v2300_v27 }
 0x1b5   : > { %2203 = vmatprep.subr.bf16.mxu1 %v3058_v7 }
 0x1b8   : > { %2204 = vmatpush3.bf16.msra.mxu1 %v2301_v12 }
 0x1b9   : > { %2205 = vmatprep.subr.bf16.mxu1 %v3058_v7 }
 0x1bc   : > { %2206 = vmatpush3.bf16.msra.mxu1 %v2302_v57 }
 0x1bd   : > { %2207 = vmatprep.subr.bf16.mxu1 %v3058_v7 }
 0x1c0   : > { %2208 = vmatpush3.bf16.msra.mxu1 %v2303_v3 }
 0x1c1   : > { %2209 = vmatprep.subr.bf16.mxu1 %v3058_v7  ;;  %v2305_v7 = vld [vmem:[%s3188_s9 + $0x38] sm:$0xff]  }
 0x1c2   : > { %2215 = vmatprep.subr.bf16.mxu0 %v2305_v7 }
 0x1c3   : > { %2216 = vmatpush3.bf16.msra.mxu0 %v2305_v7 }
 0x1c4   : > { %2210 = vmatpush3.bf16.msra.mxu1 %v2304_v8  ;;  %2217 = vmatprep.subr.bf16.mxu0 %v2306_v39 }
 0x1c7   : > { %2218 = vmatpush3.bf16.msra.mxu0 %v2306_v39 }
 0x1c8   : > { %2219 = vmatprep.subr.bf16.mxu0 %v2307_v46 }
 0x1cb   : > { %2220 = vmatpush3.bf16.msra.mxu0 %v2307_v46 }
 0x1cc   : > { %2221 = vmatprep.subr.bf16.mxu0 %v2308_v45 }
 0x1cf   : > { %2222 = vmatpush3.bf16.msra.mxu0 %v2308_v45 }
 0x1d0   : > { %2223 = vmatprep.subr.bf16.mxu0 %v2309_v50 }
 0x1d3   : > { %2224 = vmatpush3.bf16.msra.mxu0 %v2309_v50 }
 0x1d4   : > { %2225 = vmatprep.subr.bf16.mxu0 %v2310_v40 }
 0x1d7   : > { %2226 = vmatpush3.bf16.msra.mxu0 %v2310_v40 }
 0x1d8   : > { %2227 = vmatprep.subr.bf16.mxu0 %v2311_v0 }
 0x1db   : > { %2228 = vmatpush3.bf16.msra.mxu0 %v2311_v0 }
 0x1dc   : > { %2229 = vmatprep.subr.bf16.mxu0 %v2312_v38 }
 0x1df   : > { %2230 = vmatpush3.bf16.msra.mxu0 %v2312_v38 }
 0x267   : > { %v1555_v33 = vpop.f32.mrf.mxu1 }
 0x268   : > { %v1556_v32 = vadd.f32 %v1555_v33, %v1472_v9 }
 0x269   : > { %v2193_v36 = vpop.f32.mrf.mxu1 }
 0x26a   : > { %v2011_v13 = vmul.f32 -1.442695, %v1556_v32 }
 0x26b   : > { %v1558_v37 = vpop.f32.mrf.mxu1 }
 0x26c   : > { %2473 = vpow2.f32 %v2011_v13 }
 0x26d   : > { %v2194_v2 = vpop.f32.mrf.mxu1 }
 0x279   : > { %v2474_v62 = vpop.eup %2473 }
 0x27a   : > { %v1564_v42 = vadd.f32 1.0, %v2474_v62 }
 0x27c   : > { %2475 = vrcp.f32 %v1564_v42 }
 0x289   : > { %v2476_v29 = vpop.eup %2475 }
 0x28a   : > { %v1567_v61 = vmul.f32 %v2476_v29, %v1556_v32 }
 0x28c   : > { %v1568_v55 = vpack.c.bf16 %v1567_v61, %v1567_v61 }
 0x28e   : > { %2212 = vmatmul.mubr.bf16.vlgmr.msra.gmra.mxu1 %v1568_v55 }
 0x34e   : > { %v1668_v23 = vpop.f32.mrf.mxu1 }
 0x34f   : > { %v1669_v5 = vadd.f32 %v1668_v23, %v1585_v48 }
 0x350   : > { %v2213_v54 = vpop.f32.mrf.mxu1 }
 0x351   : > { %v2020_v41 = vmul.f32 -1.442695, %v1669_v5 }
 0x352   : > { %v1671_v4 = vpop.f32.mrf.mxu1 }
 0x353   : > { %2477 = vpow2.f32 %v2020_v41 }
 0x354   : > { %v2214_v52 = vpop.f32.mrf.mxu1 }
 0x360   : > { %v2478_v11 = vpop.eup %2477 }
 0x361   : > { %v1677_v10 = vadd.f32 1.0, %v2478_v11 }
 0x363   : > { %2479 = vrcp.f32 %v1677_v10 }
 0x370   : > { %v2480_v21 = vpop.eup %2479 }
 0x371   : > { %v1683_v6 = vrot.slane %v2480_v21, %v1132_v53 }
 0x373   : > { %v1684_v34 = vmul.f32 %v1683_v6, %v3070_v44  ;;  %v1685_v26 = vmul.f32 %v1683_v6, %v3067_v56  ;;  %v1686_v15 = vmul.f32 %v1683_v6, %v3073_v18  ;;  %v1687_v58 = vmul.f32 %v1683_v6, %v3076_v47  ;;  %v2021_v18 = vld [vmem:[%s3189_s10] ss:$0 sm:$0xff] }
 0x374   : > { %v1688_v24 = vmul.f32 %v1683_v6, %v3083_v28  ;;  %v1689_v31 = vmul.f32 %v1683_v6, %v3087_v19  ;;  %v1690_v63 = vmul.f32 %v1683_v6, %v3090_v51  ;;  %v1691_v53 = vmul.f32 %v1683_v6, %v3093_v16 }
 0x375   : > { %v1692_v59 = vpack.c.bf16 %v1685_v26, %v1684_v34  ;;  %v1693_v35 = vpack.c.bf16 %v1687_v58, %v1686_v15 }
 0x376   : > { %v1694_v20 = vpack.c.bf16 %v1689_v31, %v1688_v24  ;;  %v1695_v56 = vpack.c.bf16 %v1691_v53, %v1690_v63 }
 0x377   : > { %2231 = vmatprep.mubr.bf16.mxu0 %v1692_v59 }
 0x378   : > { %2232 = vmatmul.mubr.bf16.vlgmr.msra.gmra.mxu0 %v1693_v35 }
 0x379   : > { %2235 = vmatprep.mubr.bf16.mxu0 %v1694_v20 }
 0x380   : > { %2236 = vmatmul.mubr.bf16.gmra.mxu0 %v1695_v56 }
 0x438   : > { %v2233_v44 = vpop.f32.mrf.mxu0 }
 0x439   : > { %v1810_v19 = vadd.f32 %v2233_v44, %v2021_v18 }
 0x43a   : > { %v1801_v47 = vpop.f32.mrf.mxu0 }
 0x43b   : > { %v1802_v51 = vadd.f32 %v2021_v18, %v1801_v47 }
 0x43c   : > { %v2234_v28 = vpop.f32.mrf.mxu0 }
 0x43d   : > { %v1813_v60 = vadd.f32 %v2234_v28, %v2021_v18 }
 0x43e   : > { %v1804_v25 = vpop.f32.mrf.mxu0 }
 0x43f   : > { %v2058_v1 = vpack.c.bf16 %v1813_v60, %v1810_v19  ;;  %v1805_v16 = vadd.f32 %v2021_v18, %v1804_v25 }
 0x440   : > { %v2237_v22 = vpop.f32.mrf.mxu0 }
 0x441   : > { %2070 = vst [vmem:[%s386_s19 + $0x8] sm:$0xff] %v2058_v1   ;;  %v2053_v30 = vpack.c.bf16 %v1805_v16, %v1802_v51  ;;  %v1826_v49 = vadd.f32 %v2237_v22, %v2021_v18 }
 0x442   : > { %v1817_v17 = vpop.f32.mrf.mxu0 }
 0x443   : > { %2054 = vst [vmem:[%s386_s19] sm:$0xff] %v2053_v30   ;;  %v1818_v12 = vadd.f32 %v2021_v18, %v1817_v17 }
 0x444   : > { %v2238_v14 = vpop.f32.mrf.mxu0 }
 0x445   : > { %v1829_v43 = vadd.f32 %v2238_v14, %v2021_v18 }
 0x446   : > { %v1820_v27 = vpop.f32.mrf.mxu0 }
 0x447   : > { %v2068_v57 = vpack.c.bf16 %v1829_v43, %v1826_v49  ;;  %v1821_v3 = vadd.f32 %v2021_v18, %v1820_v27 }
 0x449   : > { %2072 = vst [vmem:[%s386_s19 + $0x18] sm:$0xff] %v2068_v57   ;;  %v2063_v8 = vpack.c.bf16 %v1821_v3, %v1818_v12 }
 0x44b   : > { %2071 = vst [vmem:[%s386_s19 + $0x10] sm:$0xff] %v2063_v8  }
 0x44c PF: > { %s21_s17 = sadd.s32 1, %s2488_s17  }
 0x44d   : > { %p18_p4 = scmp.ge.s32.totalorder %s21_s17, 4  }
 0x44f   :  { %20 = sbr.rel (!%p18_p4) target bundleno = 1 (0x1), region = 131 }

// kernel: efficientnet_forward.10
= control target key start
LH: loop header
LB: loop body
LE: loop exit
PB: predicated region body
PF: predicated region fallthrough
CT: control target
= control target key end

     0   :  { %s1683_s17 = smov 0   ;;  %s1955_s0 = inlined_call_operand.vmem [shape: bf16[2,64,128], index: 0, kind: input, shape index: {}]   ;;  %s1956_s1 = inlined_call_operand.vmem [shape: bf16[128,128], index: 1, kind: input, shape index: {}]   ;;  %s1957_s2 = inlined_call_operand.vmem [shape: f32[1,128], index: 2, kind: input, shape index: {}]   ;;  %s1958_s3 = inlined_call_operand.vmem [shape: f32[9,128], index: 3, kind: input, shape index: {}]   ;;  %s1959_s4 = inlined_call_operand.vmem [shape: f32[1,128], index: 4, kind: input, shape index: {}]   ;;  %s1960_s5 = inlined_call_operand.vmem [shape: bf16[128,128], index: 5, kind: input, shape index: {}]   ;;  %s1961_s6 = inlined_call_operand.vmem [shape: f32[1,128], index: 6, kind: input, shape index: {}]   ;;  %s1962_s7 = inlined_call_operand.vmem [shape: bf16[128,128], index: 7, kind: input, shape index: {}]   ;;  %s1963_s8 = inlined_call_operand.vmem [shape: f32[1,128], index: 8, kind: input, shape index: {}]   ;;  %s1964_s9 = inlined_call_operand.vmem [shape: bf16[128,128], index: 9, kind: input, shape index: {}]   ;;  %s1965_s10 = inlined_call_operand.vmem [shape: f32[1,128], index: 10, kind: input, shape index: {}]   ;;  %s1966_s11 = inlined_call_operand.vmem [shape: bf16[2,16,128], index: 11, kind: output, shape index: {}]  }
   0x1 LB: > { %s1312_s18 = sadd.s32 4294967295, %s1619_s17   ;;  %p1316_p0 = scmp.ge.s32.totalorder %s1619_s17, 1  ;;  %s1619_s17 = sphi %s1683_s17, %s21_s17  }
   0x2   : > { %p337_p1 = scmp.lt.s32.totalorder %s1619_s17, 3 }
   0x4   : > { %p338_p2 = pnand %p1316_p0, %p337_p1 }
   0x5   : > { %p377_p3 = scmp.lt.s32.totalorder (!%p338_p2), %s1312_s18, 1 }
   0x6   : > { %341 = sbr.rel (%p338_p2) target bundleno = 1050 (0x41a), region = 64 }
   0xb   : > { %v1521_v0 = vld [vmem:[%s1956_s1 + $0x38] sm:$0xff]   ;;  %v1522_v1 = vld [vmem:[%s1956_s1 + $0x30] sm:$0xff]   ;;  %s1968_s18 = smov (!%p377_p3, %s1312_s18), 1  ;;  %v1523_v2 = vld [vmem:[%s1956_s1 + $0x28] sm:$0xff]   ;;  %v1621_v12 = vmov 0.0   ;;  %vm1622_vm0 = vmmov 0  }
   0xc   : > { %1427 = vmatprep.subr.bf16.mxu0 %v1521_v0  ;;  %s1379_s25 = sshll.u32 %s1968_s18, 5  ;;  %v1524_v3 = vld [vmem:[%s1956_s1 + $0x20] sm:$0xff]   ;;  %v1525_v5 = vld [vmem:[%s1956_s1 + $0x18] sm:$0xff]   ;;  %v1526_v6 = vld [vmem:[%s1956_s1 + $0x10] sm:$0xff]   ;;  %1451 = vmatprep.subr.bf16.mxu1 %v1621_v12  ;;  %638 = vst [vmem:[#allocation3 + $0x40] sm:$0x1f] %v1621_v12 }
   0xd   : > { %1428 = vmatpush3.bf16.msra.mxu0 %v1521_v0  ;;  %s381_s28 = scalar_lea.vmem %s1955_s0, %s1379_s25  ;;  %v1527_v7 = vld [vmem:[%s1956_s1 + $0x8] sm:$0xff]   ;;  %v1528_v8 = vld [vmem:[%s1956_s1] sm:$0xff]   ;;  %640 = vst [vmem:[#allocation4 + $0x20] sm:$0xf] %v1621_v12  ;;  %641 = vst [vmem:[#allocation3 + $0x4] sm:$0x1] %v1621_v12  ;;  %1467 = vmatprep.mubr.msk.bf16.mxu1 %vm1622_vm0, %v1621_v12 }
   0xe   : > { %1429 = vmatprep.subr.bf16.mxu0 %v1522_v1  ;;  %v1529_v4 = vld [vmem:[%s381_s28] sm:$0xff]   ;;  %v1530_v9 = vld [vmem:[%s381_s28 + $0x8] sm:$0xff]   ;;  %v1531_v10 = vld [vmem:[%s381_s28 + $0x10] sm:$0xff]   ;;  %642 = vst [vmem:[#allocation3 + $0xc] sm:$0x1] %v1621_v12  ;;  %s1380_s14 = sshll.u32 %s1968_s18, 3 }
   0xf   : > { %1443 = vmatprep.mubr.bf16.mxu0 %v1529_v4  ;;  %v1532_v11 = vld [vmem:[%s381_s28 + $0x18] sm:$0xff]   ;;  %643 = vst [vmem:[#allocation3 + $0x14] sm:$0x1] %v1621_v12  ;;  %644 = vst [vmem:[#allocation3 + $0x1c] sm:$0x1] %v1621_v12  ;;  %v1534_v14 = vld [vmem:[%s1960_s5 + $0x30] sm:$0xff]   ;;  %s386_s19 = scalar_lea.vmem %s1966_s11, %s1380_s14 }
  0x10   : > { %645 = vst [vmem:[#allocation3 + $0x24] sm:$0x1] %v1621_v12  ;;  %646 = vst [vmem:[#allocation3 + $0x2c] sm:$0x1] %v1621_v12  ;;  %v1533_v13 = vld [vmem:[%s1960_s5 + $0x38] sm:$0xff]   ;;  %v1535_v15 = vld [vmem:[%s1960_s5 + $0x28] sm:$0xff]  }
  0x11   : > { %1430 = vmatpush3.bf16.msra.mxu0 %v1522_v1  ;;  %647 = vst [vmem:[#allocation3 + $0x34] sm:$0x1] %v1621_v12  ;;  %648 = vst [vmem:[#allocation3 + $0x3c] sm:$0x1] %v1621_v12  ;;  %1452 = vmatpush3.bf16.msra.mxu1 %v1533_v13  ;;  %v1536_v16 = vld [vmem:[%s1960_s5 + $0x20] sm:$0xff]   ;;  %v1537_v17 = vld [vmem:[%s1960_s5 + $0x18] sm:$0xff]  }
  0x12   : > { %1431 = vmatprep.subr.bf16.mxu0 %v1523_v2  ;;  %1453 = vmatprep.subr.bf16.mxu1 %v1621_v12  ;;  %v1538_v18 = vld [vmem:[%s1960_s5 + $0x10] sm:$0xff]   ;;  %v1539_v19 = vld [vmem:[%s1960_s5 + $0x8] sm:$0xff]   ;;  %v1540_v20 = vld [vmem:[%s1960_s5] sm:$0xff]  }
  0x13   : > { %v1321_v21 = vld [vmem:[%s1957_s2] ss:$0 sm:$0xff] }
  0x15   : > { %1432 = vmatpush3.bf16.msra.mxu0 %v1523_v2  ;;  %1454 = vmatpush3.bf16.msra.mxu1 %v1534_v14 }
  0x16   : > { %1433 = vmatprep.subr.bf16.mxu0 %v1524_v3  ;;  %1455 = vmatprep.subr.bf16.mxu1 %v1621_v12 }
  0x19   : > { %1434 = vmatpush3.bf16.msra.mxu0 %v1524_v3  ;;  %1456 = vmatpush3.bf16.msra.mxu1 %v1535_v15 }
  0x1a   : > { %1435 = vmatprep.subr.bf16.mxu0 %v1525_v5  ;;  %1457 = vmatprep.subr.bf16.mxu1 %v1621_v12 }
  0x1d   : > { %1436 = vmatpush3.bf16.msra.mxu0 %v1525_v5  ;;  %1458 = vmatpush3.bf16.msra.mxu1 %v1536_v16 }
  0x1e   : > { %1437 = vmatprep.subr.bf16.mxu0 %v1526_v6  ;;  %1459 = vmatprep.subr.bf16.mxu1 %v1621_v12 }
  0x21   : > { %1438 = vmatpush3.bf16.msra.mxu0 %v1526_v6  ;;  %1460 = vmatpush3.bf16.msra.mxu1 %v1537_v17  ;;  %v693_v6 = vlaneseq }
  0x22   : > { %1439 = vmatprep.subr.bf16.mxu0 %v1527_v7  ;;  %1461 = vmatprep.subr.bf16.mxu1 %v1621_v12 }
  0x25   : > { %1440 = vmatpush3.bf16.msra.mxu0 %v1527_v7  ;;  %1462 = vmatpush3.bf16.msra.mxu1 %v1538_v18 }
  0x26   : > { %1441 = vmatprep.subr.bf16.mxu0 %v1528_v8  ;;  %1463 = vmatprep.subr.bf16.mxu1 %v1621_v12 }
  0x29   : > { %1442 = vmatpush3.bf16.msra.mxu0 %v1528_v8  ;;  %1464 = vmatpush3.bf16.msra.mxu1 %v1539_v19 }
  0x2a   : > { %1471 = vmatprep.subr.bf16.mxu0 %v1621_v12  ;;  %1465 = vmatprep.subr.bf16.mxu1 %v1621_v12 }
  0x2c   : > { %1444 = vmatmul.mubr.bf16.vlgmr.msra.gmra.mxu0 %v1530_v9 }
  0x2d   : > { %1447 = vmatprep.mubr.bf16.mxu0 %v1531_v10  ;;  %1466 = vmatpush3.bf16.msra.mxu1 %v1540_v20 }
  0x2e   : > { %1491 = vmatprep.subr.bf16.mxu1 %v1621_v12 }
  0x34   : > { %1448 = vmatmul.mubr.bf16.gmra.mxu0 %v1532_v11  ;;  %v1772_v11 = vshrl.u32 %v693_v6, 7 }
  0x35   : > { %1487 = vmatprep.mubr.msk.bf16.mxu0 %vm1622_vm0, %v1621_v12 }
  0xec   : > { %v1445_v22 = vpop.f32.mrf.mxu0 }
  0xed   : > { %v534_v23 = vadd.f32 %v1445_v22, %v1321_v21 }
  0xee   : > { %v525_v24 = vpop.f32.mrf.mxu0 }
  0xef   : > { %v1336_v25 = vmul.f32 -1.442695, %v534_v23  ;;  %v526_v26 = vadd.f32 %v1321_v21, %v525_v24  ;;  %v1778_v24 = vld [vmem:[%s1958_s3] sm:$0xff] }
  0xf0   : > { %v1446_v27 = vpop.f32.mrf.mxu0 }
  0xf1   : > { %1557 = vpow2.f32 %v1336_v25  ;;  %v1334_v28 = vmul.f32 -1.442695, %v526_v26  ;;  %v537_v29 = vadd.f32 %v1446_v27, %v1321_v21  ;;  %v707_v25 = vsub.s32 1, %v1772_v11 }
  0xf2   : > { %v528_v30 = vpop.f32.mrf.mxu0 }
  0xf3   : > { %1559 = vpow2.f32 %v1334_v28  ;;  %v1337_v31 = vmul.f32 -1.442695, %v537_v29  ;;  %v529_v32 = vadd.f32 %v1321_v21, %v528_v30  ;;  %v723_v28 = vsub.s32 2, %v1772_v11 }
  0xf4   : > { %v1449_v33 = vpop.f32.mrf.mxu0  ;;  %v1788_v30 = vrot.slane %v1778_v24, %v707_v25 }
  0xf5   : > { %1561 = vpow2.f32 %v1337_v31  ;;  %v1335_v34 = vmul.f32 -1.442695, %v529_v32  ;;  %v550_v35 = vadd.f32 %v1449_v33, %v1321_v21  ;;  %v740_v31 = vsub.s32 3, %v1772_v11 }
  0xf6   : > { %v541_v36 = vpop.f32.mrf.mxu0  ;;  %v790_v33 = vsub.s32 6, %v1772_v11 }
  0xf7   : > { %1563 = vpow2.f32 %v1335_v34  ;;  %v1340_v37 = vmul.f32 -1.442695, %v550_v35  ;;  %v542_v38 = vadd.f32 %v1321_v21, %v541_v36 }
  0xf8   : > { %v1450_v39 = vpop.f32.mrf.mxu0 }
  0xf9   : > { %1565 = vpow2.f32 %v1340_v37  ;;  %v1338_v40 = vmul.f32 -1.442695, %v542_v38  ;;  %v553_v41 = vadd.f32 %v1450_v39, %v1321_v21  ;;  %v1794_v37 = vrot.slane %v1778_v24, %v723_v28 }
  0xfa   : > { %v544_v42 = vpop.f32.mrf.mxu0 }
  0xfb   : > { %1567 = vpow2.f32 %v1338_v40  ;;  %v1341_v43 = vmul.f32 -1.442695, %v553_v41  ;;  %v545_v44 = vadd.f32 %v1321_v21, %v544_v42  ;;  %v695_v21 = vsub.s32 0, %v1772_v11 }
  0xfd   : > { %1569 = vpow2.f32 %v1341_v43  ;;  %v1339_v45 = vmul.f32 -1.442695, %v545_v44  ;;  %v773_v43 = vsub.s32 5, %v1772_v11 }
  0xfe   : > { %v1558_v46 = vpop.eup %1557 }
  0xff   : > { %v582_v47 = vadd.f32 1.0, %v1558_v46  ;;  %1571 = vpow2.f32 %v1339_v45 }
 0x100   : > { %v1560_v48 = vpop.eup %1559 }
 0x101   : > { %1573 = vrcp.f32 %v582_v47  ;;  %v580_v49 = vadd.f32 1.0, %v1560_v48  ;;  %v1800_v48 = vrot.slane %v1778_v24, %v740_v31 }
 0x102   : > { %v1562_v50 = vpop.eup %1561 }
 0x103   : > { %1575 = vrcp.f32 %v580_v49  ;;  %v583_v51 = vadd.f32 1.0, %v1562_v50 }
 0x104   : > { %v1564_v52 = vpop.eup %1563 }
 0x105   : > { %1577 = vrcp.f32 %v583_v51  ;;  %v581_v53 = vadd.f32 1.0, %v1564_v52 }
 0x106   : > { %v1566_v54 = vpop.eup %1565 }
 0x107   : > { %1579 = vrcp.f32 %v581_v53  ;;  %v586_v55 = vadd.f32 1.0, %v1566_v54 }
 0x108   : > { %v1568_v56 = vpop.eup %1567 }
 0x109   : > { %1581 = vrcp.f32 %v586_v55  ;;  %v584_v57 = vadd.f32 1.0, %v1568_v56 }
 0x10a   : > { %v1570_v58 = vpop.eup %1569 }
 0x10b   : > { %1583 = vrcp.f32 %v584_v57  ;;  %v587_v59 = vadd.f32 1.0, %v1570_v58 }
 0x10c   : > { %v1572_v60 = vpop.eup %1571 }
 0x10d   : > { %1585 = vrcp.f32 %v587_v59  ;;  %v585_v61 = vadd.f32 1.0, %v1572_v60 }
 0x10e   : > { %v1574_v62 = vpop.eup %1573 }
 0x10f   : > { %v606_v63 = vmul.f32 %v1574_v62, %v534_v23  ;;  %1587 = vrcp.f32 %v585_v61  ;;  %v807_v61 = vsub.s32 7, %v1772_v11 }
 0x110   : > { %v1576_v0 = vpop.eup %1575 }
 0x111   : > { %616 = vst [vmem:[#allocation2 + $0x10] sm:$0xff] %v606_v63  ;;  %v604_v1 = vmul.f32 %v1576_v0, %v526_v26 }
 0x112   : > { %v1578_v2 = vpop.eup %1577 }
 0x113   : > { %614 = vst [vmem:[#allocation2] sm:$0xff] %v604_v1  ;;  %v607_v3 = vmul.f32 %v1578_v2, %v537_v29  ;;  %v1785_v29 = vrot.slane %v1778_v24, %v695_v21 }
 0x114   : > { %v1580_v4 = vpop.eup %1579 }
 0x115   : > { %617 = vst [vmem:[#allocation2 + $0x18] sm:$0xff] %v607_v3  ;;  %v605_v5 = vmul.f32 %v1580_v4, %v529_v32  ;;  %v757_v32 = vsub.s32 4, %v1772_v11  ;;  %v1812_v3 = vrot.slane %v1778_v24, %v773_v43  ;;  %v787_v4 = vld [vmem:[#allocation3 + $0x40] sm:$0xf] }
 0x116   : > { %v1582_v7 = vpop.eup %1581 }
 0x117   : > { %615 = vst [vmem:[#allocation2 + $0x8] sm:$0xff] %v605_v5  ;;  %v610_v8 = vmul.f32 %v1582_v7, %v550_v35  ;;  %v1806_v58 = vrot.slane %v1778_v24, %v757_v32  ;;  %v1815_v5 = vrot.slane %v1778_v24, %v790_v33 }
 0x118   : > { %v1584_v9 = vpop.eup %1583 }
 0x119   : > { %620 = vst [vmem:[#allocation2 + $0x30] sm:$0xff] %v610_v8  ;;  %v608_v10 = vmul.f32 %v1584_v9, %v542_v38  ;;  %v795_v31 = vmul.f32 %v1815_v5, %v787_v4 }
 0x11a   : > { %v1586_v13 = vpop.eup %1585 }
 0x11b   : > { %618 = vst [vmem:[#allocation2 + $0x20] sm:$0xff] %v608_v10  ;;  %v611_v14 = vmul.f32 %v1586_v13, %v553_v41 }
 0x11c   : > { %v1588_v15 = vpop.eup %1587  ;;  %v624_v16 = vld [vmem:[#allocation2 + $0x10] ss:$2 sm:$0xff]  ;;  %v632_v17 = vld [vmem:[#allocation2 + $0x11] ss:$2 sm:$0xff] }
 0x11d   : > { %v654_v18 = vcombine.high %v624_v16, %v624_v16  ;;  %663 = vst [vmem:[#allocation3 + $0x10] sm:$0xf] %v624_v16  ;;  %v674_v19 = vcombine.high %v632_v17, %v632_v17  ;;  %683 = vst [vmem:[#allocation4 + $0x8] sm:$0xf] %v632_v17  ;;  %v609_v20 = vmul.f32 %v1588_v15, %v545_v44 }
 0x11e   : > { %621 = vst [vmem:[#allocation2 + $0x38] sm:$0xff] %v611_v14  ;;  %v622_v22 = vld [vmem:[#allocation2] ss:$2 sm:$0xff]  ;;  %v630_v23 = vld [vmem:[#allocation2 + $0x1] ss:$2 sm:$0xff] }
 0x11f   : > { %664 = vst [vmem:[#allocation3 + $0x18] sm:$0xf] %v654_v18  ;;  %684 = vst [vmem:[#allocation4 + $0xc] sm:$0xf] %v674_v19  ;;  %v653_v26 = vcombine.high %v622_v22, %v622_v22  ;;  %v673_v27 = vcombine.high %v630_v23, %v630_v23  ;;  %v1822_v19 = vrot.slane %v1778_v24, %v807_v61 }
 0x120   : > { %661 = vst [vmem:[#allocation3] sm:$0xf] %v622_v22  ;;  %681 = vst [vmem:[#allocation4] sm:$0xf] %v630_v23 }
 0x121   : > { %619 = vst [vmem:[#allocation2 + $0x28] sm:$0xff] %v609_v20  ;;  %662 = vst [vmem:[#allocation3 + $0x8] sm:$0xf] %v653_v26  ;;  %v1827_v20 = vld [vmem:[%s1959_s4] ss:$0 sm:$0xff] }
 0x122   : > { %682 = vst [vmem:[#allocation4 + $0x4] sm:$0xf] %v673_v27  ;;  %v840_v43 = vcombine.high %v1827_v20, %v1827_v20 }
 0x124   : > { %v690_v36 = vld [vmem:[#allocation3 + $0x10] sm:$0xf] }
 0x125   : > { %v628_v34 = vld [vmem:[#allocation2 + $0x30] ss:$2 sm:$0xff]  ;;  %v636_v35 = vld [vmem:[#allocation2 + $0x31] ss:$2 sm:$0xff]  ;;  %v698_v40 = vmul.f32 %v1785_v29, %v690_v36 }
 0x126   : > { %v656_v38 = vcombine.high %v628_v34, %v628_v34  ;;  %667 = vst [vmem:[#allocation3 + $0x30] sm:$0xf] %v628_v34  ;;  %v676_v39 = vcombine.high %v636_v35, %v636_v35  ;;  %687 = vst [vmem:[#allocation4 + $0x18] sm:$0xf] %v636_v35  ;;  %v702_v41 = vld [vmem:[#allocation4 + $0x8] sm:$0xf] }
 0x127   : > { %v718_v42 = vld [vmem:[#allocation3 + $0x11] sm:$0xf]  ;;  %v689_v46 = vld [vmem:[#allocation3] sm:$0xf]  ;;  %v710_v47 = vmul.f32 %v1788_v30, %v702_v41  ;;  %v701_v52 = vld [vmem:[#allocation4] sm:$0xf] }
 0x128   : > { %v626_v44 = vld [vmem:[#allocation2 + $0x20] ss:$2 sm:$0xff]  ;;  %v634_v45 = vld [vmem:[#allocation2 + $0x21] ss:$2 sm:$0xff]  ;;  %668 = vst [vmem:[#allocation3 + $0x38] sm:$0xf] %v656_v38  ;;  %v697_v51 = vmul.f32 %v1785_v29, %v689_v46  ;;  %v709_v55 = vmul.f32 %v1788_v30, %v701_v52  ;;  %v726_v57 = vmul.f32 %v1794_v37, %v718_v42 }
 0x129   : > { %688 = vst [vmem:[#allocation4 + $0x1c] sm:$0xf] %v676_v39  ;;  %v655_v49 = vcombine.high %v626_v44, %v626_v44  ;;  %665 = vst [vmem:[#allocation3 + $0x20] sm:$0xf] %v626_v44  ;;  %v675_v50 = vcombine.high %v634_v45, %v634_v45  ;;  %v717_v53 = vld [vmem:[#allocation3 + $0x1] sm:$0xf]  ;;  %v714_v56 = vadd.f32 %v710_v47, %v698_v40 }
 0x12a   : > { %685 = vst [vmem:[#allocation4 + $0x10] sm:$0xf] %v634_v45  ;;  %v735_v54 = vld [vmem:[#allocation3 + $0x18] sm:$0xf]  ;;  %v734_v59 = vld [vmem:[#allocation3 + $0x8] sm:$0xf]  ;;  %v713_v62 = vadd.f32 %v709_v55, %v697_v51  ;;  %v725_v63 = vmul.f32 %v1794_v37, %v717_v53 }
 0x12b   : > { %666 = vst [vmem:[#allocation3 + $0x28] sm:$0xf] %v655_v49  ;;  %686 = vst [vmem:[#allocation4 + $0x14] sm:$0xf] %v675_v50  ;;  %v752_v60 = vld [vmem:[#allocation4 + $0xc] sm:$0xf]  ;;  %v730_v0 = vadd.f32 %v726_v57, %v714_v56  ;;  %v743_v1 = vmul.f32 %v1800_v48, %v735_v54  ;;  %v742_v10 = vmul.f32 %v1800_v48, %v734_v59 }
 0x12c   : > { %v751_v2 = vld [vmem:[#allocation4 + $0x4] sm:$0xf]  ;;  %v729_v9 = vadd.f32 %v725_v63, %v713_v62  ;;  %v760_v14 = vmul.f32 %v1806_v58, %v752_v60  ;;  %v768_v18 = vld [vmem:[#allocation3 + $0x19] sm:$0xf]  ;;  %v784_v36 = vld [vmem:[#allocation3 + $0x10] sm:$0xf] }
 0x12d   : > { %v692_v6 = vld [vmem:[#allocation3 + $0x30] sm:$0xf]  ;;  %v704_v7 = vld [vmem:[#allocation4 + $0x18] sm:$0xf]  ;;  %v747_v13 = vadd.f32 %v743_v1, %v730_v0  ;;  %v767_v17 = vld [vmem:[#allocation3 + $0x9] sm:$0xf]  ;;  %v759_v27 = vmul.f32 %v1806_v58, %v751_v2  ;;  %v776_v42 = vmul.f32 %v1812_v3, %v768_v18  ;;  %v792_v54 = vmul.f32 %v1815_v5, %v784_v36 }
 0x12e   : > { %v720_v8 = vld [vmem:[#allocation3 + $0x31] sm:$0xf]  ;;  %v700_v15 = vmul.f32 %v1785_v29, %v692_v6  ;;  %v712_v16 = vmul.f32 %v1788_v30, %v704_v7  ;;  %v746_v26 = vadd.f32 %v742_v10, %v729_v9  ;;  %v775_v41 = vmul.f32 %v1812_v3, %v767_v17  ;;  %v1342_v56 = vld [vmem:[%s1958_s3 + $0x8] ss:$0 sm:$0xff] }
 0x12f   : > { %v764_v28 = vadd.f32 %v760_v14, %v747_v13  ;;  %v728_v34 = vmul.f32 %v1794_v37, %v720_v8  ;;  %v737_v35 = vld [vmem:[#allocation3 + $0x38] sm:$0xf]  ;;  %v801_v47 = vld [vmem:[#allocation4 + $0x8] sm:$0xf]  ;;  %v804_v2 = vld [vmem:[#allocation4 + $0x20] sm:$0xf] }
 0x130   : > { %v691_v22 = vld [vmem:[#allocation3 + $0x20] sm:$0xf]  ;;  %v716_v24 = vadd.f32 %v712_v16, %v700_v15  ;;  %v754_v39 = vld [vmem:[#allocation4 + $0x1c] sm:$0xf]  ;;  %v763_v40 = vadd.f32 %v759_v27, %v746_v26  ;;  %v770_v51 = vld [vmem:[#allocation3 + $0x39] sm:$0xf]  ;;  %v809_v4 = vmul.f32 %v1822_v19, %v801_v47 }
 0x131   : > { %v703_v23 = vld [vmem:[#allocation4 + $0x10] sm:$0xf]  ;;  %v719_v25 = vld [vmem:[#allocation3 + $0x21] sm:$0xf]  ;;  %v699_v32 = vmul.f32 %v1785_v29, %v691_v22  ;;  %v780_v53 = vadd.f32 %v776_v42, %v764_v28  ;;  %v762_v60 = vmul.f32 %v1806_v58, %v754_v39  ;;  %v817_v61 = vld [vmem:[#allocation3 + $0x11] sm:$0xf]  ;;  %v778_v10 = vmul.f32 %v1812_v3, %v770_v51 }
 0x132   : > { %v711_v33 = vmul.f32 %v1788_v30, %v703_v23  ;;  %v736_v38 = vld [vmem:[#allocation3 + $0x28] sm:$0xf]  ;;  %v727_v29 = vmul.f32 %v1794_v37, %v719_v25  ;;  %v732_v45 = vadd.f32 %v728_v34, %v716_v24  ;;  %v745_v30 = vmul.f32 %v1800_v48, %v737_v35  ;;  %v785_v46 = vld [vmem:[#allocation3 + $0x20] sm:$0xf]  ;;  %v802_v49 = vld [vmem:[#allocation4 + $0x10] sm:$0xf] }
 0x133   : > { %v753_v50 = vld [vmem:[#allocation4 + $0x14] sm:$0xf]  ;;  %v779_v52 = vadd.f32 %v775_v41, %v763_v40  ;;  %v793_v55 = vmul.f32 %v1815_v5, %v785_v46  ;;  %v744_v37 = vmul.f32 %v1800_v48, %v736_v38  ;;  %v818_v62 = vld [vmem:[#allocation3 + $0x21] sm:$0xf]  ;;  %v769_v63 = vld [vmem:[#allocation3 + $0x29] sm:$0xf]  ;;  %v810_v6 = vmul.f32 %v1822_v19, %v802_v49 }
 0x134   : > { %v715_v44 = vadd.f32 %v711_v33, %v699_v32  ;;  %v749_v59 = vadd.f32 %v745_v30, %v732_v45  ;;  %v761_v8 = vmul.f32 %v1806_v58, %v753_v50  ;;  %v786_v48 = vld [vmem:[#allocation3 + $0x30] sm:$0xf]  ;;  %v820_v15 = vld [vmem:[#allocation3 + $0x41] sm:$0xf]  ;;  %v825_v16 = vmul.f32 %v1342_v56, %v817_v61 }
 0x135   : > { %v796_v0 = vadd.f32 %v792_v54, %v779_v52  ;;  %v797_v1 = vadd.f32 %v793_v55, %v780_v53  ;;  %v826_v17 = vmul.f32 %v1342_v56, %v818_v62  ;;  %v777_v22 = vmul.f32 %v1812_v3, %v769_v63  ;;  %v803_v26 = vld [vmem:[#allocation4 + $0x18] sm:$0xf]  ;;  %v819_v34 = vld [vmem:[#allocation3 + $0x31] sm:$0xf] }
 0x136   : > { %v731_v57 = vadd.f32 %v727_v29, %v715_v44  ;;  %v766_v9 = vadd.f32 %v762_v60, %v749_v59  ;;  %v812_v25 = vmul.f32 %v1822_v19, %v804_v2  ;;  %v794_v58 = vmul.f32 %v1815_v5, %v786_v48  ;;  %v1542_v48 = vld [vmem:[%s1962_s7 + $0x30] sm:$0xff]  }
 0x137   : > { %v813_v13 = vadd.f32 %v809_v4, %v796_v0  ;;  %v814_v14 = vadd.f32 %v810_v6, %v797_v1  ;;  %v828_v24 = vmul.f32 %v1342_v56, %v820_v15  ;;  %v811_v39 = vmul.f32 %v1822_v19, %v803_v26  ;;  %v1545_v15 = vld [vmem:[%s1962_s7 + $0x18] sm:$0xff]  }
 0x138   : > { %v748_v7 = vadd.f32 %v744_v37, %v731_v57  ;;  %v782_v23 = vadd.f32 %v778_v10, %v766_v9  ;;  %v827_v44 = vmul.f32 %v1342_v56, %v819_v34  ;;  %v1541_v10 = vld [vmem:[%s1962_s7 + $0x38] sm:$0xff]  }
 0x139   : > { %v829_v27 = vadd.f32 %v825_v16, %v813_v13  ;;  %v830_v28 = vadd.f32 %v826_v17, %v814_v14  ;;  %1472 = vmatpush3.bf16.msra.mxu0 %v1541_v10  ;;  %v1543_v13 = vld [vmem:[%s1962_s7 + $0x28] sm:$0xff]   ;;  %v1544_v14 = vld [vmem:[%s1962_s7 + $0x20] sm:$0xff]   ;;  %v1546_v16 = vld [vmem:[%s1962_s7 + $0x10] sm:$0xff]  }
 0x13a   : > { %v765_v18 = vadd.f32 %v761_v8, %v748_v7  ;;  %v799_v33 = vadd.f32 %v795_v31, %v782_v23  ;;  %1473 = vmatprep.subr.bf16.mxu0 %v1621_v12  ;;  %v1547_v17 = vld [vmem:[%s1962_s7 + $0x8] sm:$0xff]  }
 0x13b   : > { %v842_v35 = vadd.f32 %v1827_v20, %v829_v27  ;;  %v843_v36 = vadd.f32 %v840_v43, %v830_v28 }
 0x13c   : > { %v781_v32 = vadd.f32 %v777_v22, %v765_v18  ;;  %v816_v40 = vadd.f32 %v812_v25, %v799_v33  ;;  %v1548_v18 = vld [vmem:[%s1962_s7] sm:$0xff]  }
 0x13d   : > { %v1344_v3 = vmul.f32 -1.442695, %v842_v35  ;;  %v1345_v41 = vmul.f32 -1.442695, %v843_v36  ;;  %1474 = vmatpush3.bf16.msra.mxu0 %v1542_v48  ;;  %v907_v22 = vld [vmem:[%s1961_s6] sm:$0x1] }
 0x13e   : > { %v798_v38 = vadd.f32 %v794_v58, %v781_v32  ;;  %v832_v29 = vadd.f32 %v828_v24, %v816_v40  ;;  %1475 = vmatprep.subr.bf16.mxu0 %v1621_v12  ;;  %v1552_v40 = vld [vmem:[%s1964_s9 + $0x20] sm:$0xff]  }
 0x13f   : > { %1589 = vpow2.f32 %v1344_v3  ;;  %v1553_v3 = vld [vmem:[%s1964_s9 + $0x18] sm:$0xff]  }
 0x140   : > { %v815_v42 = vadd.f32 %v811_v39, %v798_v38  ;;  %v845_v30 = vadd.f32 %v840_v43, %v832_v29  ;;  %1591 = vpow2.f32 %v1345_v41  ;;  %v1550_v38 = vld [vmem:[%s1964_s9 + $0x30] sm:$0xff]   ;;  %v1551_v39 = vld [vmem:[%s1964_s9 + $0x28] sm:$0xff]   ;;  %v1020_v29 = vld [vmem:[%s1963_s8] sm:$0x1] }
 0x141   : > { %1476 = vmatpush3.bf16.msra.mxu0 %v1543_v13  ;;  %v1554_v41 = vld [vmem:[%s1964_s9 + $0x10] sm:$0xff]  }
 0x142   : > { %v831_v45 = vadd.f32 %v827_v44, %v815_v42  ;;  %v1347_v31 = vmul.f32 -1.442695, %v845_v30  ;;  %1477 = vmatprep.subr.bf16.mxu0 %v1621_v12  ;;  %v1555_v42 = vld [vmem:[%s1964_s9 + $0x8] sm:$0xff]   ;;  %v1556_v44 = vld [vmem:[%s1964_s9] sm:$0xff]  }
 0x144   : > { %v844_v5 = vadd.f32 %v1827_v20, %v831_v45  ;;  %1593 = vpow2.f32 %v1347_v31 }
 0x145   : > { %1478 = vmatpush3.bf16.msra.mxu0 %v1544_v14 }
 0x146   : > { %v1346_v46 = vmul.f32 -1.442695, %v844_v5  ;;  %1479 = vmatprep.subr.bf16.mxu0 %v1621_v12 }
 0x148   : > { %1595 = vpow2.f32 %v1346_v46 }
 0x149   : > { %1480 = vmatpush3.bf16.msra.mxu0 %v1545_v15 }
 0x14a   : > { %1481 = vmatprep.subr.bf16.mxu0 %v1621_v12 }
 0x14c   : > { %v1590_v47 = vpop.eup %1589 }
 0x14d   : > { %v1592_v49 = vpop.eup %1591  ;;  %v858_v50 = vadd.f32 1.0, %v1590_v47  ;;  %1482 = vmatpush3.bf16.msra.mxu0 %v1546_v16 }
 0x14e   : > { %v859_v19 = vadd.f32 1.0, %v1592_v49  ;;  %1483 = vmatprep.subr.bf16.mxu0 %v1621_v12 }
 0x14f   : > { %1597 = vrcp.f32 %v858_v50 }
 0x150   : > { %1599 = vrcp.f32 %v859_v19 }
 0x151   : > { %v1594_v51 = vpop.eup %1593  ;;  %1484 = vmatpush3.bf16.msra.mxu0 %v1547_v17 }
 0x152   : > { %v861_v52 = vadd.f32 1.0, %v1594_v51  ;;  %1485 = vmatprep.subr.bf16.mxu0 %v1621_v12 }
 0x154   : > { %1601 = vrcp.f32 %v861_v52 }
 0x155   : > { %v1596_v53 = vpop.eup %1595  ;;  %1486 = vmatpush3.bf16.msra.mxu0 %v1548_v18 }
 0x156   : > { %v860_v54 = vadd.f32 1.0, %v1596_v53 }
 0x158   : > { %1603 = vrcp.f32 %v860_v54 }
 0x15c   : > { %v1598_v43 = vpop.eup %1597 }
 0x15d   : > { %v1600_v55 = vpop.eup %1599  ;;  %v1857_v20 = vmul.f32 %v1598_v43, %v842_v35 }
 0x15e   : > { %v1859_v37 = vmul.f32 %v1600_v55, %v843_v36  ;;  %v1549_v36 = vld [vmem:[%s1964_s9 + $0x38] sm:$0xff]  }
 0x160   : > { %v878_v61 = vcombine.low %v1857_v20, %v1859_v37 }
 0x161   : > { %v1602_v56 = vpop.eup %1601 }
 0x162   : > { %v1863_v60 = vmul.f32 %v1602_v56, %v845_v30 }
 0x165   : > { %v1604_v57 = vpop.eup %1603 }
 0x166   : > { %v1861_v59 = vmul.f32 %v1604_v57, %v844_v5 }
 0x168   : > { %v879_v62 = vcombine.low %v1861_v59, %v1863_v60 }
 0x16a   : > { %v882_v63 = vadd.f32 %v879_v62, %v878_v61  ;;  %v1366_v62 = vld [vmem:[%s1965_s10] ss:$0 sm:$0xff] }
 0x16c   : > { %v883_v0 = vrot.slane %v882_v63, 4 }
 0x16e   : > { %v884_v1 = vadd.f32 %v883_v0, %v882_v63 }
 0x170   : > { %v885_v2 = vrot.slane %v884_v1, 2 }
 0x172   : > { %v886_v4 = vadd.f32 %v885_v2, %v884_v1 }
 0x174   : > { %v887_v6 = vrot.slane %v886_v4, 1 }
 0x176   : > { %v888_v7 = vadd.f32 %v887_v6, %v886_v4 }
 0x178   : > { %v889_v8 = vmul.f32 0.0625, %v888_v7 }
 0x17a   : > { %v890_v9 = vpack.c.bf16 %v889_v8, %v889_v8 }
 0x17c   : > { %1468 = vmatmul.mubr.bf16.vlgmr.msra.gmra.mxu1 %v890_v9 }
 0x17d   : > { %1507 = vmatprep.mubr.msk.bf16.mxu1 %vm1622_vm0, %v1621_v12  ;;  %1492 = vmatpush3.bf16.msra.mxu1 %v1549_v36 }
 0x17e   : > { %1493 = vmatprep.subr.bf16.mxu1 %v1621_v12 }
 0x181   : > { %1494 = vmatpush3.bf16.msra.mxu1 %v1550_v38 }
 0x182   : > { %1495 = vmatprep.subr.bf16.mxu1 %v1621_v12 }
 0x185   : > { %1496 = vmatpush3.bf16.msra.mxu1 %v1551_v39 }
 0x186   : > { %1497 = vmatprep.subr.bf16.mxu1 %v1621_v12 }
 0x189   : > { %1498 = vmatpush3.bf16.msra.mxu1 %v1552_v40 }
 0x18a   : > { %1499 = vmatprep.subr.bf16.mxu1 %v1621_v12 }
 0x18d   : > { %1500 = vmatpush3.bf16.msra.mxu1 %v1553_v3 }
 0x18e   : > { %1501 = vmatprep.subr.bf16.mxu1 %v1621_v12 }
 0x191   : > { %1502 = vmatpush3.bf16.msra.mxu1 %v1554_v41 }
 0x192   : > { %1503 = vmatprep.subr.bf16.mxu1 %v1621_v12 }
 0x195   : > { %1504 = vmatpush3.bf16.msra.mxu1 %v1555_v42 }
 0x196   : > { %1505 = vmatprep.subr.bf16.mxu1 %v1621_v12 }
 0x199   : > { %1506 = vmatpush3.bf16.msra.mxu1 %v1556_v44 }
 0x23c   : > { %v990_v23 = vpop.f32.mrf.mxu1 }
 0x23d   : > { %v991_v25 = vadd.f32 %v990_v23, %v907_v22 }
 0x23e   : > { %v1469_v26 = vpop.f32.mrf.mxu1 }
 0x23f   : > { %v1356_v27 = vmul.f32 -1.442695, %v991_v25 }
 0x240   : > { %v993_v28 = vpop.f32.mrf.mxu1 }
 0x241   : > { %1605 = vpow2.f32 %v1356_v27 }
 0x242   : > { %v1470_v32 = vpop.f32.mrf.mxu1 }
 0x24e   : > { %v1606_v58 = vpop.eup %1605 }
 0x24f   : > { %v999_v33 = vadd.f32 1.0, %v1606_v58 }
 0x251   : > { %1607 = vrcp.f32 %v999_v33 }
 0x25e   : > { %v1608_v24 = vpop.eup %1607 }
 0x25f   : > { %v1002_v34 = vmul.f32 %v1608_v24, %v991_v25 }
 0x261   : > { %v1003_v35 = vpack.c.bf16 %v1002_v34, %v1002_v34 }
 0x263   : > { %1488 = vmatmul.mubr.bf16.vlgmr.msra.gmra.mxu0 %v1003_v35 }
 0x323   : > { %v1103_v45 = vpop.f32.mrf.mxu0 }
 0x324   : > { %v1104_v30 = vadd.f32 %v1103_v45, %v1020_v29 }
 0x325   : > { %v1489_v5 = vpop.f32.mrf.mxu0 }
 0x326   : > { %v1365_v31 = vmul.f32 -1.442695, %v1104_v30 }
 0x327   : > { %v1106_v46 = vpop.f32.mrf.mxu0 }
 0x328   : > { %1609 = vpow2.f32 %v1365_v31 }
 0x329   : > { %v1490_v47 = vpop.f32.mrf.mxu0 }
 0x335   : > { %v1610_v49 = vpop.eup %1609 }
 0x336   : > { %v1112_v50 = vadd.f32 1.0, %v1610_v49 }
 0x338   : > { %1611 = vrcp.f32 %v1112_v50 }
 0x345   : > { %v1612_v19 = vpop.eup %1611 }
 0x346   : > { %v1118_v12 = vrot.slane %v1612_v19, %v695_v21 }
 0x348   : > { %v1120_v51 = vcombine.high %v1118_v12, %v1118_v12  ;;  %v1122_v52 = vmul.f32 %v1118_v12, %v1857_v20  ;;  %v1124_v54 = vmul.f32 %v1118_v12, %v1861_v59 }
 0x34a   : > { %v1123_v53 = vmul.f32 %v1120_v51, %v1859_v37  ;;  %v1125_v43 = vmul.f32 %v1120_v51, %v1863_v60 }
 0x34c   : > { %v1130_v55 = vcombine.low %v1122_v52, %v1123_v53  ;;  %v1131_v56 = vcombine.low %v1124_v54, %v1125_v43 }
 0x34e   : > { %v1134_v57 = vpack.c.bf16 %v1131_v56, %v1130_v55 }
 0x350   : > { %1508 = vmatmul.mubr.bf16.vlgmr.msra.gmra.mxu1 %v1134_v57 }
 0x410   : > { %v1240_v61 = vpop.f32.mrf.mxu1 }
 0x411   : > { %v1241_v63 = vadd.f32 %v1366_v62, %v1240_v61 }
 0x412   : > { %v1509_v11 = vpop.f32.mrf.mxu1 }
 0x414   : > { %v1243_v21 = vpop.f32.mrf.mxu1 }
 0x415   : > { %v1244_v20 = vadd.f32 %v1366_v62, %v1243_v21 }
 0x416   : > { %v1510_v37 = vpop.f32.mrf.mxu1 }
 0x417   : > { %v1386_v59 = vpack.c.bf16 %v1244_v20, %v1241_v63 }
 0x419   : > { %1387 = vst [vmem:[%s386_s19] sm:$0xff] %v1386_v59  }
 0x41a PF: > { %s21_s17 = sadd.s32 1, %s1619_s17  }
 0x41b   : > { %p18_p4 = scmp.ge.s32.totalorder %s21_s17, 4  }
 0x41d   :  { %20 = sbr.rel (!%p18_p4) target bundleno = 1 (0x1), region = 107 }

// kernel: efficientnet_forward.11
= control target key start
LH: loop header
LB: loop body
LE: loop exit
PB: predicated region body
PF: predicated region fallthrough
CT: control target
= control target key end

     0   :  { %s1494_s17 = smov 0   ;;  %s1724_s0 = inlined_call_operand.vmem [shape: bf16[2,16,128], index: 0, kind: input, shape index: {}]   ;;  %s1725_s1 = inlined_call_operand.vmem [shape: bf16[128,128], index: 1, kind: input, shape index: {}]   ;;  %s1726_s2 = inlined_call_operand.vmem [shape: f32[1,128], index: 2, kind: input, shape index: {}]   ;;  %s1727_s3 = inlined_call_operand.vmem [shape: f32[9,128], index: 3, kind: input, shape index: {}]   ;;  %s1728_s4 = inlined_call_operand.vmem [shape: f32[1,128], index: 4, kind: input, shape index: {}]   ;;  %s1729_s5 = inlined_call_operand.vmem [shape: bf16[128,128], index: 5, kind: input, shape index: {}]   ;;  %s1730_s6 = inlined_call_operand.vmem [shape: f32[1,128], index: 6, kind: input, shape index: {}]   ;;  %s1731_s7 = inlined_call_operand.vmem [shape: bf16[128,128], index: 7, kind: input, shape index: {}]   ;;  %s1732_s8 = inlined_call_operand.vmem [shape: f32[1,128], index: 8, kind: input, shape index: {}]   ;;  %s1733_s9 = inlined_call_operand.vmem [shape: bf16[128,128], index: 9, kind: input, shape index: {}]   ;;  %s1734_s10 = inlined_call_operand.vmem [shape: f32[1,128], index: 10, kind: input, shape index: {}]   ;;  %s1735_s11 = inlined_call_operand.vmem [shape: bf16[2,16,128], index: 11, kind: output, shape index: {}]  }
   0x1 LB: > { %s1166_s18 = sadd.s32 4294967295, %s1430_s17   ;;  %p1170_p0 = scmp.ge.s32.totalorder %s1430_s17, 1  ;;  %s1430_s17 = sphi %s1494_s17, %s21_s17  }
   0x2   : > { %p337_p1 = scmp.lt.s32.totalorder %s1430_s17, 3 }
   0x4   : > { %p338_p2 = pnand %p1170_p0, %p337_p1 }
   0x5   : > { %p377_p3 = scmp.lt.s32.totalorder (!%p338_p2), %s1166_s18, 1 }
   0x6   : > { %341 = sbr.rel (%p338_p2) target bundleno = 1030 (0x406), region = 64 }
   0xb   : > { %v1359_v0 = vld [vmem:[%s1725_s1 + $0x38] sm:$0xff]   ;;  %v1432_v1 = vmov 0.0   ;;  %v1360_v2 = vld [vmem:[%s1725_s1 + $0x30] sm:$0xff]   ;;  %vm1433_vm0 = vmmov 0   ;;  %s1737_s18 = smov (!%p377_p3, %s1166_s18), 1  ;;  %v1361_v3 = vld [vmem:[%s1725_s1 + $0x28] sm:$0xff]   ;;  %v550_v29 = vlaneseq }
   0xc   : > { %1269 = vmatprep.subr.bf16.mxu0 %v1432_v1  ;;  %524 = vst [vmem:[#allocation2] sm:$0x3f] %v1432_v1  ;;  %526 = vst [vmem:[#allocation2 + $0x28] sm:$0x3f] %v1432_v1  ;;  %1289 = vmatprep.subr.bf16.mxu1 %v1432_v1  ;;  %s1224_s25 = sshll.u32 %s1737_s18, 3  ;;  %v1362_v4 = vld [vmem:[%s1725_s1 + $0x20] sm:$0xff]  }
   0xd   : > { %528 = vst [vmem:[#allocation2 + $0x8] sm:$0x1] %v1432_v1  ;;  %529 = vst [vmem:[#allocation2 + $0x10] sm:$0x1] %v1432_v1  ;;  %1270 = vmatpush3.bf16.msra.mxu0 %v1359_v0  ;;  %1285 = vmatprep.mubr.msk.bf16.mxu0 %vm1433_vm0, %v1432_v1  ;;  %s381_s28 = scalar_lea.vmem %s1724_s0, %s1224_s25  ;;  %v1363_v5 = vld [vmem:[%s1725_s1 + $0x18] sm:$0xff]   ;;  %v1364_v6 = vld [vmem:[%s1725_s1 + $0x10] sm:$0xff]   ;;  %s386_s22 = scalar_lea.vmem %s1735_s11, %s1224_s25 }
   0xe   : > { %530 = vst [vmem:[#allocation2 + $0x18] sm:$0x1] %v1432_v1  ;;  %531 = vst [vmem:[#allocation2 + $0x20] sm:$0x1] %v1432_v1  ;;  %1271 = vmatprep.subr.bf16.mxu0 %v1432_v1  ;;  %1305 = vmatprep.mubr.msk.bf16.mxu1 %vm1433_vm0, %v1432_v1  ;;  %v1365_v7 = vld [vmem:[%s1725_s1 + $0x8] sm:$0xff]   ;;  %v1366_v8 = vld [vmem:[%s1725_s1] sm:$0xff]  }
   0xf   : > { %532 = vst [vmem:[#allocation2 + $0xd] sm:$0x1] %v1432_v1  ;;  %533 = vst [vmem:[#allocation2 + $0x15] sm:$0x1] %v1432_v1  ;;  %v1367_v9 = vld [vmem:[%s381_s28] sm:$0xff]   ;;  %v1368_v10 = vld [vmem:[%s1729_s5 + $0x38] sm:$0xff]  }
  0x10   : > { %534 = vst [vmem:[#allocation2 + $0x1d] sm:$0x1] %v1432_v1  ;;  %535 = vst [vmem:[#allocation2 + $0x25] sm:$0x1] %v1432_v1  ;;  %1290 = vmatpush3.bf16.msra.mxu1 %v1368_v10  ;;  %v1369_v11 = vld [vmem:[%s1729_s5 + $0x30] sm:$0xff]   ;;  %v1370_v12 = vld [vmem:[%s1729_s5 + $0x28] sm:$0xff]  }
  0x11   : > { %1272 = vmatpush3.bf16.msra.mxu0 %v1360_v2  ;;  %1291 = vmatprep.subr.bf16.mxu1 %v1432_v1  ;;  %v1371_v13 = vld [vmem:[%s1729_s5 + $0x20] sm:$0xff]   ;;  %v1372_v14 = vld [vmem:[%s1729_s5 + $0x18] sm:$0xff]   ;;  %v1373_v15 = vld [vmem:[%s1729_s5 + $0x10] sm:$0xff]   ;;  %v1595_v32 = vshrl.u32 %v550_v29, 7 }
  0x12   : > { %1273 = vmatprep.subr.bf16.mxu0 %v1432_v1  ;;  %v1374_v16 = vld [vmem:[%s1729_s5 + $0x8] sm:$0xff]   ;;  %v1375_v17 = vld [vmem:[%s1729_s5] sm:$0xff]  }
  0x13   : > { %v1175_v18 = vld [vmem:[%s1726_s2] ss:$0 sm:$0xff]  ;;  %v552_v33 = vsub.s32 0, %v1595_v32  ;;  %v564_v34 = vsub.s32 1, %v1595_v32  ;;  %v580_v38 = vsub.s32 2, %v1595_v32  ;;  %v596_v49 = vsub.s32 3, %v1595_v32 }
  0x14   : > { %1292 = vmatpush3.bf16.msra.mxu1 %v1369_v11  ;;  %v522_v35 = vld [vmem:[%s1727_s3] sm:$0xff]  ;;  %v612_v53 = vsub.s32 4, %v1595_v32  ;;  %v628_v56 = vsub.s32 5, %v1595_v32  ;;  %v645_v57 = vsub.s32 6, %v1595_v32  ;;  %v661_v58 = vsub.s32 7, %v1595_v32 }
  0x15   : > { %1274 = vmatpush3.bf16.msra.mxu0 %v1361_v3  ;;  %1293 = vmatprep.subr.bf16.mxu1 %v1432_v1  ;;  %v553_v36 = vrot.slane %v522_v35, %v552_v33  ;;  %v565_v37 = vrot.slane %v522_v35, %v564_v34  ;;  %v546_v39 = vld [vmem:[#allocation2] sm:$0xf]  ;;  %v581_v45 = vrot.slane %v522_v35, %v580_v38  ;;  %v642_v63 = vld [vmem:[#allocation2 + $0x28] sm:$0xf] }
  0x16   : > { %1275 = vmatprep.subr.bf16.mxu0 %v1432_v1  ;;  %v558_v40 = vld [vmem:[#allocation2 + $0x1] sm:$0xf]  ;;  %v597_v55 = vrot.slane %v522_v35, %v596_v49  ;;  %v613_v62 = vrot.slane %v522_v35, %v612_v53  ;;  %v629_v10 = vrot.slane %v522_v35, %v628_v56  ;;  %v646_v11 = vrot.slane %v522_v35, %v645_v57  ;;  %v1211_v32 = vld [vmem:[%s1734_s10] ss:$0 sm:$0xff] }
  0x17   : > { %v554_v43 = vmul.f32 %v553_v36, %v546_v39  ;;  %v566_v44 = vmul.f32 %v565_v37, %v558_v40  ;;  %v574_v47 = vld [vmem:[#allocation2 + $0x2] sm:$0xf] }
  0x18   : > { %1294 = vmatpush3.bf16.msra.mxu1 %v1370_v12  ;;  %v582_v52 = vmul.f32 %v581_v45, %v574_v47 }
  0x19   : > { %1276 = vmatpush3.bf16.msra.mxu0 %v1362_v4  ;;  %1295 = vmatprep.subr.bf16.mxu1 %v1432_v1  ;;  %v570_v51 = vadd.f32 %v566_v44, %v554_v43 }
  0x1a   : > { %1277 = vmatprep.subr.bf16.mxu0 %v1432_v1 }
  0x1b   : > { %v586_v61 = vadd.f32 %v582_v52, %v570_v51 }
  0x1c   : > { %1296 = vmatpush3.bf16.msra.mxu1 %v1371_v13 }
  0x1d   : > { %1278 = vmatpush3.bf16.msra.mxu0 %v1363_v5  ;;  %1297 = vmatprep.subr.bf16.mxu1 %v1432_v1 }
  0x1e   : > { %1279 = vmatprep.subr.bf16.mxu0 %v1432_v1 }
  0x20   : > { %1298 = vmatpush3.bf16.msra.mxu1 %v1372_v14 }
  0x21   : > { %1280 = vmatpush3.bf16.msra.mxu0 %v1364_v6  ;;  %1299 = vmatprep.subr.bf16.mxu1 %v1432_v1 }
  0x22   : > { %1281 = vmatprep.subr.bf16.mxu0 %v1432_v1 }
  0x24   : > { %1300 = vmatpush3.bf16.msra.mxu1 %v1373_v15 }
  0x25   : > { %1282 = vmatpush3.bf16.msra.mxu0 %v1365_v7  ;;  %1301 = vmatprep.subr.bf16.mxu1 %v1432_v1 }
  0x26   : > { %1283 = vmatprep.subr.bf16.mxu0 %v1432_v1 }
  0x28   : > { %1302 = vmatpush3.bf16.msra.mxu1 %v1374_v16 }
  0x29   : > { %1284 = vmatpush3.bf16.msra.mxu0 %v1366_v8  ;;  %1303 = vmatprep.subr.bf16.mxu1 %v1432_v1 }
  0x2a   : > { %1309 = vmatprep.subr.bf16.mxu0 %v1432_v1 }
  0x2c   : > { %1286 = vmatmul.mubr.bf16.vlgmr.msra.gmra.mxu0 %v1367_v9  ;;  %1304 = vmatpush3.bf16.msra.mxu1 %v1375_v17  ;;  %v1610_v17 = vrot.slane %v522_v35, %v661_v58 }
  0x2d   : > { %1325 = vmatprep.mubr.msk.bf16.mxu0 %vm1433_vm0, %v1432_v1  ;;  %1329 = vmatprep.subr.bf16.mxu1 %v1432_v1 }
  0xec   : > { %v501_v19 = vpop.f32.mrf.mxu0 }
  0xed   : > { %v502_v20 = vadd.f32 %v1175_v18, %v501_v19 }
  0xee   : > { %v1287_v21 = vpop.f32.mrf.mxu0 }
  0xef   : > { %v1185_v22 = vmul.f32 -1.442695, %v502_v20 }
  0xf0   : > { %v504_v23 = vpop.f32.mrf.mxu0 }
  0xf1   : > { %1392 = vpow2.f32 %v1185_v22  ;;  %v505_v24 = vadd.f32 %v1175_v18, %v504_v23 }
  0xf2   : > { %v1288_v25 = vpop.f32.mrf.mxu0 }
  0xf3   : > { %v1186_v26 = vmul.f32 -1.442695, %v505_v24 }
  0xf5   : > { %1394 = vpow2.f32 %v1186_v26 }
  0xfe   : > { %v1393_v27 = vpop.eup %1392 }
  0xff   : > { %v514_v28 = vadd.f32 1.0, %v1393_v27 }
 0x101   : > { %1396 = vrcp.f32 %v514_v28 }
 0x102   : > { %v1395_v30 = vpop.eup %1394 }
 0x103   : > { %v515_v31 = vadd.f32 1.0, %v1395_v30 }
 0x105   : > { %1398 = vrcp.f32 %v515_v31 }
 0x10e   : > { %v1397_v41 = vpop.eup %1396 }
 0x10f   : > { %v520_v42 = vmul.f32 %v1397_v41, %v502_v20 }
 0x111   : > { %v538_v46 = vcombine.high %v520_v42, %v520_v42  ;;  %542 = vst [vmem:[#allocation2 + $0x9] sm:$0xf] %v520_v42 }
 0x112   : > { %v1399_v48 = vpop.eup %1398 }
 0x113   : > { %543 = vst [vmem:[#allocation2 + $0x11] sm:$0xf] %v538_v46  ;;  %v521_v50 = vmul.f32 %v1399_v48, %v505_v24  ;;  %v1612_v24 = vmul.f32 %v646_v11, %v642_v63 }
 0x115   : > { %v539_v54 = vcombine.high %v521_v50, %v521_v50  ;;  %544 = vst [vmem:[#allocation2 + $0x19] sm:$0xf] %v521_v50 }
 0x117   : > { %545 = vst [vmem:[#allocation2 + $0x21] sm:$0xf] %v539_v54 }
 0x118   : > { %v547_v59 = vld [vmem:[#allocation2 + $0x8] sm:$0xf] }
 0x119   : > { %v559_v60 = vld [vmem:[#allocation2 + $0x9] sm:$0xf]  ;;  %v555_v0 = vmul.f32 %v553_v36, %v547_v59 }
 0x11a   : > { %v567_v2 = vmul.f32 %v565_v37, %v559_v60  ;;  %v575_v3 = vld [vmem:[#allocation2 + $0xa] sm:$0xf]  ;;  %v548_v6 = vld [vmem:[#allocation2 + $0x10] sm:$0xf] }
 0x11b   : > { %v590_v4 = vld [vmem:[#allocation2 + $0x8] sm:$0xf]  ;;  %v560_v7 = vld [vmem:[#allocation2 + $0x11] sm:$0xf]  ;;  %v556_v12 = vmul.f32 %v553_v36, %v548_v6  ;;  %v583_v21 = vmul.f32 %v581_v45, %v575_v3 }
 0x11c   : > { %v606_v5 = vld [vmem:[#allocation2 + $0x9] sm:$0xf]  ;;  %v576_v8 = vld [vmem:[#allocation2 + $0x12] sm:$0xf]  ;;  %v598_v9 = vmul.f32 %v597_v55, %v590_v4  ;;  %v568_v13 = vmul.f32 %v565_v37, %v560_v7  ;;  %v571_v14 = vadd.f32 %v567_v2, %v555_v0  ;;  %v549_v18 = vld [vmem:[#allocation2 + $0x18] sm:$0xf] }
 0x11d   : > { %v591_v15 = vld [vmem:[#allocation2 + $0x10] sm:$0xf]  ;;  %v622_v16 = vld [vmem:[#allocation2 + $0xa] sm:$0xf]  ;;  %v561_v19 = vld [vmem:[#allocation2 + $0x19] sm:$0xf]  ;;  %v614_v23 = vmul.f32 %v613_v62, %v606_v5  ;;  %v557_v25 = vmul.f32 %v553_v36, %v549_v18  ;;  %v584_v28 = vmul.f32 %v581_v45, %v576_v8 }
 0x11e   : > { %v577_v20 = vld [vmem:[#allocation2 + $0x1a] sm:$0xf]  ;;  %v602_v22 = vadd.f32 %v598_v9, %v586_v61  ;;  %v569_v26 = vmul.f32 %v565_v37, %v561_v19  ;;  %v572_v27 = vadd.f32 %v568_v13, %v556_v12  ;;  %v607_v30 = vld [vmem:[#allocation2 + $0x11] sm:$0xf]  ;;  %v587_v34 = vadd.f32 %v583_v21, %v571_v14  ;;  %v593_v38 = vld [vmem:[#allocation2 + $0x20] sm:$0xf] }
 0x11f   : > { %v592_v29 = vld [vmem:[#allocation2 + $0x18] sm:$0xf]  ;;  %v599_v39 = vmul.f32 %v597_v55, %v591_v15  ;;  %v623_v40 = vld [vmem:[#allocation2 + $0x12] sm:$0xf]  ;;  %v630_v41 = vmul.f32 %v629_v10, %v622_v16  ;;  %v585_v43 = vmul.f32 %v581_v45, %v577_v20  ;;  %v609_v47 = vld [vmem:[#allocation2 + $0x21] sm:$0xf]  ;;  %v615_v37 = vmul.f32 %v613_v62, %v607_v30 }
 0x120   : > { %v608_v31 = vld [vmem:[#allocation2 + $0x19] sm:$0xf]  ;;  %v618_v35 = vadd.f32 %v614_v23, %v602_v22  ;;  %v573_v42 = vadd.f32 %v569_v26, %v557_v25  ;;  %v588_v44 = vadd.f32 %v584_v28, %v572_v27  ;;  %v600_v46 = vmul.f32 %v597_v55, %v592_v29  ;;  %v639_v49 = vld [vmem:[#allocation2 + $0x10] sm:$0xf]  ;;  %v625_v57 = vld [vmem:[#allocation2 + $0x22] sm:$0xf] }
 0x121   : > { %v624_v48 = vld [vmem:[#allocation2 + $0x1a] sm:$0xf]  ;;  %v603_v36 = vadd.f32 %v599_v39, %v587_v34  ;;  %v616_v50 = vmul.f32 %v613_v62, %v608_v31  ;;  %v655_v52 = vld [vmem:[#allocation2 + $0x11] sm:$0xf]  ;;  %v601_v54 = vmul.f32 %v597_v55, %v593_v38  ;;  %v641_v59 = vld [vmem:[#allocation2 + $0x20] sm:$0xf]  ;;  %v647_v60 = vmul.f32 %v646_v11, %v639_v49 }
 0x122   : > { %v634_v51 = vadd.f32 %v630_v41, %v618_v35  ;;  %v589_v53 = vadd.f32 %v585_v43, %v573_v42  ;;  %v604_v56 = vadd.f32 %v600_v46, %v588_v44  ;;  %v640_v58 = vld [vmem:[#allocation2 + $0x18] sm:$0xf]  ;;  %v1187_v45 = vld [vmem:[%s1727_s3 + $0x8] ss:$0 sm:$0xff]  ;;  %v617_v61 = vmul.f32 %v613_v62, %v609_v47  ;;  %v671_v3 = vld [vmem:[#allocation2 + $0x12] sm:$0xf] }
 0x123   : > { %v619_v63 = vadd.f32 %v615_v37, %v603_v36  ;;  %v631_v0 = vmul.f32 %v629_v10, %v623_v40  ;;  %v632_v2 = vmul.f32 %v629_v10, %v624_v48  ;;  %v656_v7 = vld [vmem:[#allocation2 + $0x19] sm:$0xf]  ;;  %v658_v8 = vld [vmem:[#allocation2 + $0x29] sm:$0xf]  ;;  %v663_v55 = vmul.f32 %v1610_v17, %v655_v52  ;;  %v657_v15 = vld [vmem:[#allocation2 + $0x21] sm:$0xf] }
 0x124   : > { %v605_v4 = vadd.f32 %v601_v54, %v589_v53  ;;  %v620_v5 = vadd.f32 %v616_v50, %v604_v56  ;;  %v651_v6 = vadd.f32 %v647_v60, %v634_v51  ;;  %v633_v9 = vmul.f32 %v629_v10, %v625_v57  ;;  %v672_v62 = vld [vmem:[#allocation2 + $0x1a] sm:$0xf]  ;;  %v674_v20 = vld [vmem:[#allocation2 + $0x2a] sm:$0xf]  ;;  %v673_v26 = vld [vmem:[#allocation2 + $0x22] sm:$0xf] }
 0x125   : > { %v635_v12 = vadd.f32 %v631_v0, %v619_v63  ;;  %v648_v13 = vmul.f32 %v646_v11, %v640_v58  ;;  %v649_v14 = vmul.f32 %v646_v11, %v641_v59  ;;  %v679_v21 = vmul.f32 %v1187_v45, %v671_v3  ;;  %v1188_v10 = vld [vmem:[%s1728_s4] ss:$0 sm:$0xff] }
 0x126   : > { %v621_v16 = vadd.f32 %v617_v61, %v605_v4  ;;  %v636_v18 = vadd.f32 %v632_v2, %v620_v5  ;;  %v667_v19 = vadd.f32 %v663_v55, %v651_v6  ;;  %v664_v23 = vmul.f32 %v1610_v17, %v656_v7 }
 0x127   : > { %v652_v22 = vadd.f32 %v648_v13, %v635_v12  ;;  %v666_v25 = vmul.f32 %v1610_v17, %v658_v8  ;;  %v665_v11 = vmul.f32 %v1610_v17, %v657_v15  ;;  %v680_v31 = vmul.f32 %v1187_v45, %v672_v62  ;;  %v1379_v62 = vld [vmem:[%s1731_s7 + $0x20] sm:$0xff]  }
 0x128   : > { %v637_v27 = vadd.f32 %v633_v9, %v621_v16  ;;  %v653_v28 = vadd.f32 %v649_v14, %v636_v18  ;;  %v683_v29 = vadd.f32 %v679_v21, %v667_v19  ;;  %v682_v34 = vmul.f32 %v1187_v45, %v674_v20  ;;  %v1376_v16 = vld [vmem:[%s1731_s7 + $0x38] sm:$0xff]   ;;  %v1377_v18 = vld [vmem:[%s1731_s7 + $0x30] sm:$0xff]   ;;  %v1378_v19 = vld [vmem:[%s1731_s7 + $0x28] sm:$0xff]  }
 0x129   : > { %v668_v30 = vadd.f32 %v664_v23, %v652_v22  ;;  %v694_v38 = vcombine.high %v1188_v10, %v1188_v10  ;;  %v681_v40 = vmul.f32 %v1187_v45, %v673_v26  ;;  %1310 = vmatpush3.bf16.msra.mxu0 %v1376_v16  ;;  %v1380_v20 = vld [vmem:[%s1731_s7 + $0x18] sm:$0xff]   ;;  %v1381_v21 = vld [vmem:[%s1731_s7 + $0x10] sm:$0xff]   ;;  %v1382_v22 = vld [vmem:[%s1731_s7 + $0x8] sm:$0xff]  }
 0x12a   : > { %v654_v39 = vadd.f32 %v1612_v24, %v637_v27  ;;  %v669_v35 = vadd.f32 %v665_v11, %v653_v28  ;;  %v696_v41 = vadd.f32 %v1188_v10, %v683_v29  ;;  %1311 = vmatprep.subr.bf16.mxu0 %v1432_v1  ;;  %v1383_v23 = vld [vmem:[%s1731_s7] sm:$0xff]  }
 0x12b   : > { %v684_v42 = vadd.f32 %v680_v31, %v668_v30 }
 0x12c   : > { %v670_v43 = vadd.f32 %v666_v25, %v654_v39  ;;  %v685_v44 = vadd.f32 %v681_v40, %v669_v35  ;;  %v1189_v46 = vmul.f32 -1.442695, %v696_v41  ;;  %v761_v25 = vld [vmem:[%s1730_s6] sm:$0x1]  ;;  %v1384_v35 = vld [vmem:[%s1733_s9 + $0x38] sm:$0xff]   ;;  %v1385_v40 = vld [vmem:[%s1733_s9 + $0x30] sm:$0xff]  }
 0x12d   : > { %v697_v47 = vadd.f32 %v694_v38, %v684_v42  ;;  %1312 = vmatpush3.bf16.msra.mxu0 %v1377_v18  ;;  %v1387_v42 = vld [vmem:[%s1733_s9 + $0x20] sm:$0xff]  }
 0x12e   : > { %v686_v48 = vadd.f32 %v682_v34, %v670_v43  ;;  %v698_v49 = vadd.f32 %v1188_v10, %v685_v44  ;;  %1400 = vpow2.f32 %v1189_v46  ;;  %1313 = vmatprep.subr.bf16.mxu0 %v1432_v1  ;;  %v1388_v43 = vld [vmem:[%s1733_s9 + $0x18] sm:$0xff]   ;;  %v1389_v44 = vld [vmem:[%s1733_s9 + $0x10] sm:$0xff]   ;;  %v1390_v46 = vld [vmem:[%s1733_s9 + $0x8] sm:$0xff]  }
 0x12f   : > { %v1190_v36 = vmul.f32 -1.442695, %v697_v47 }
 0x130   : > { %v699_v17 = vadd.f32 %v694_v38, %v686_v48  ;;  %v1191_v37 = vmul.f32 -1.442695, %v698_v49  ;;  %v874_v48 = vld [vmem:[%s1732_s8] sm:$0x1] }
 0x131   : > { %1402 = vpow2.f32 %v1190_v36  ;;  %1314 = vmatpush3.bf16.msra.mxu0 %v1378_v19 }
 0x132   : > { %1404 = vpow2.f32 %v1191_v37  ;;  %v1192_v50 = vmul.f32 -1.442695, %v699_v17  ;;  %1315 = vmatprep.subr.bf16.mxu0 %v1432_v1 }
 0x134   : > { %1406 = vpow2.f32 %v1192_v50 }
 0x135   : > { %1316 = vmatpush3.bf16.msra.mxu0 %v1379_v62 }
 0x136   : > { %1317 = vmatprep.subr.bf16.mxu0 %v1432_v1 }
 0x139   : > { %1318 = vmatpush3.bf16.msra.mxu0 %v1380_v20 }
 0x13a   : > { %1319 = vmatprep.subr.bf16.mxu0 %v1432_v1 }
 0x13b   : > { %v1401_v51 = vpop.eup %1400 }
 0x13c   : > { %v712_v24 = vadd.f32 1.0, %v1401_v51 }
 0x13d   : > { %1320 = vmatpush3.bf16.msra.mxu0 %v1381_v21 }
 0x13e   : > { %v1403_v52 = vpop.eup %1402  ;;  %1408 = vrcp.f32 %v712_v24  ;;  %1321 = vmatprep.subr.bf16.mxu0 %v1432_v1 }
 0x13f   : > { %v1405_v53 = vpop.eup %1404  ;;  %v713_v54 = vadd.f32 1.0, %v1403_v52 }
 0x140   : > { %v714_v56 = vadd.f32 1.0, %v1405_v53 }
 0x141   : > { %v1407_v57 = vpop.eup %1406  ;;  %1410 = vrcp.f32 %v713_v54  ;;  %1322 = vmatpush3.bf16.msra.mxu0 %v1382_v22 }
 0x142   : > { %v715_v58 = vadd.f32 1.0, %v1407_v57  ;;  %1412 = vrcp.f32 %v714_v56  ;;  %1323 = vmatprep.subr.bf16.mxu0 %v1432_v1 }
 0x144   : > { %1414 = vrcp.f32 %v715_v58 }
 0x145   : > { %1324 = vmatpush3.bf16.msra.mxu0 %v1383_v23 }
 0x14b   : > { %v1409_v59 = vpop.eup %1408 }
 0x14c   : > { %v1627_v0 = vmul.f32 %v1409_v59, %v696_v41  ;;  %v1386_v41 = vld [vmem:[%s1733_s9 + $0x28] sm:$0xff]  }
 0x14e   : > { %v1411_v60 = vpop.eup %1410 }
 0x14f   : > { %v1413_v45 = vpop.eup %1412  ;;  %v1625_v61 = vmul.f32 %v1411_v60, %v697_v47  ;;  %v1391_v47 = vld [vmem:[%s1733_s9] sm:$0xff]  }
 0x150   : > { %v1629_v2 = vmul.f32 %v1413_v45, %v698_v49 }
 0x151   : > { %v1415_v63 = vpop.eup %1414  ;;  %v732_v4 = vcombine.low %v1627_v0, %v1625_v61 }
 0x152   : > { %v1631_v3 = vmul.f32 %v1415_v63, %v699_v17 }
 0x154   : > { %v733_v5 = vcombine.low %v1629_v2, %v1631_v3 }
 0x156   : > { %v736_v6 = vadd.f32 %v733_v5, %v732_v4 }
 0x158   : > { %v737_v7 = vrot.slane %v736_v6, 4 }
 0x15a   : > { %v738_v8 = vadd.f32 %v737_v7, %v736_v6 }
 0x15c   : > { %v739_v55 = vrot.slane %v738_v8, 2 }
 0x15e   : > { %v740_v9 = vadd.f32 %v739_v55, %v738_v8 }
 0x160   : > { %v741_v12 = vrot.slane %v740_v9, 1 }
 0x162   : > { %v742_v13 = vadd.f32 %v741_v12, %v740_v9 }
 0x164   : > { %v743_v14 = vmul.f32 0.0625, %v742_v13 }
 0x166   : > { %v744_v15 = vpack.c.bf16 %v743_v14, %v743_v14 }
 0x168   : > { %1306 = vmatmul.mubr.bf16.vlgmr.msra.gmra.mxu1 %v744_v15 }
 0x169   : > { %1345 = vmatprep.mubr.msk.bf16.mxu1 %vm1433_vm0, %v1432_v1  ;;  %1330 = vmatpush3.bf16.msra.mxu1 %v1384_v35 }
 0x16a   : > { %1331 = vmatprep.subr.bf16.mxu1 %v1432_v1 }
 0x16d   : > { %1332 = vmatpush3.bf16.msra.mxu1 %v1385_v40 }
 0x16e   : > { %1333 = vmatprep.subr.bf16.mxu1 %v1432_v1 }
 0x171   : > { %1334 = vmatpush3.bf16.msra.mxu1 %v1386_v41 }
 0x172   : > { %1335 = vmatprep.subr.bf16.mxu1 %v1432_v1 }
 0x175   : > { %1336 = vmatpush3.bf16.msra.mxu1 %v1387_v42 }
 0x176   : > { %1337 = vmatprep.subr.bf16.mxu1 %v1432_v1 }
 0x179   : > { %1338 = vmatpush3.bf16.msra.mxu1 %v1388_v43 }
 0x17a   : > { %1339 = vmatprep.subr.bf16.mxu1 %v1432_v1 }
 0x17d   : > { %1340 = vmatpush3.bf16.msra.mxu1 %v1389_v44 }
 0x17e   : > { %1341 = vmatprep.subr.bf16.mxu1 %v1432_v1 }
 0x181   : > { %1342 = vmatpush3.bf16.msra.mxu1 %v1390_v46 }
 0x182   : > { %1343 = vmatprep.subr.bf16.mxu1 %v1432_v1 }
 0x185   : > { %1344 = vmatpush3.bf16.msra.mxu1 %v1391_v47 }
 0x228   : > { %v844_v26 = vpop.f32.mrf.mxu1 }
 0x229   : > { %v845_v10 = vadd.f32 %v844_v26, %v761_v25 }
 0x22a   : > { %v1307_v27 = vpop.f32.mrf.mxu1 }
 0x22b   : > { %v1201_v28 = vmul.f32 -1.442695, %v845_v10 }
 0x22c   : > { %v847_v11 = vpop.f32.mrf.mxu1 }
 0x22d   : > { %1416 = vpow2.f32 %v1201_v28 }
 0x22e   : > { %v1308_v29 = vpop.f32.mrf.mxu1 }
 0x23a   : > { %v1417_v30 = vpop.eup %1416 }
 0x23b   : > { %v853_v31 = vadd.f32 1.0, %v1417_v30 }
 0x23d   : > { %1418 = vrcp.f32 %v853_v31 }
 0x24a   : > { %v1419_v34 = vpop.eup %1418 }
 0x24b   : > { %v856_v38 = vmul.f32 %v1419_v34, %v845_v10 }
 0x24d   : > { %v857_v39 = vpack.c.bf16 %v856_v38, %v856_v38 }
 0x24f   : > { %1326 = vmatmul.mubr.bf16.vlgmr.msra.gmra.mxu0 %v857_v39 }
 0x30f   : > { %v957_v49 = vpop.f32.mrf.mxu0 }
 0x310   : > { %v958_v36 = vadd.f32 %v957_v49, %v874_v48 }
 0x311   : > { %v1327_v17 = vpop.f32.mrf.mxu0 }
 0x312   : > { %v1210_v37 = vmul.f32 -1.442695, %v958_v36 }
 0x313   : > { %v960_v50 = vpop.f32.mrf.mxu0 }
 0x314   : > { %1420 = vpow2.f32 %v1210_v37 }
 0x315   : > { %v1328_v51 = vpop.f32.mrf.mxu0 }
 0x321   : > { %v1421_v24 = vpop.eup %1420 }
 0x322   : > { %v966_v52 = vadd.f32 1.0, %v1421_v24 }
 0x324   : > { %1422 = vrcp.f32 %v966_v52 }
 0x331   : > { %v1423_v53 = vpop.eup %1422 }
 0x332   : > { %v972_v54 = vrot.slane %v1423_v53, %v552_v33 }
 0x334   : > { %v974_v1 = vcombine.high %v972_v54, %v972_v54  ;;  %v976_v56 = vmul.f32 %v972_v54, %v1627_v0  ;;  %v978_v58 = vmul.f32 %v972_v54, %v1629_v2 }
 0x336   : > { %v977_v57 = vmul.f32 %v974_v1, %v1625_v61  ;;  %v979_v59 = vmul.f32 %v974_v1, %v1631_v3 }
 0x338   : > { %v984_v60 = vcombine.low %v976_v56, %v977_v57  ;;  %v985_v45 = vcombine.low %v978_v58, %v979_v59 }
 0x33a   : > { %v988_v63 = vpack.c.bf16 %v985_v45, %v984_v60 }
 0x33c   : > { %1346 = vmatmul.mubr.bf16.vlgmr.msra.gmra.mxu1 %v988_v63 }
 0x3fc   : > { %v1094_v4 = vpop.f32.mrf.mxu1 }
 0x3fd   : > { %v1095_v6 = vadd.f32 %v1211_v32, %v1094_v4 }
 0x3fe   : > { %v1347_v33 = vpop.f32.mrf.mxu1 }
 0x400   : > { %v1097_v5 = vpop.f32.mrf.mxu1 }
 0x401   : > { %v1098_v7 = vadd.f32 %v1211_v32, %v1097_v5 }
 0x402   : > { %v1348_v61 = vpop.f32.mrf.mxu1 }
 0x403   : > { %v1231_v0 = vpack.c.bf16 %v1098_v7, %v1095_v6 }
 0x405   : > { %1232 = vst [vmem:[%s386_s22] sm:$0xff] %v1231_v0  }
 0x406 PF: > { %s21_s17 = sadd.s32 1, %s1430_s17  }
 0x407   : > { %p18_p4 = scmp.ge.s32.totalorder %s21_s17, 4  }
 0x409   :  { %20 = sbr.rel (!%p18_p4) target bundleno = 1 (0x1), region = 97 }

</bundles_post_ra>
